<compile_context>
chip_gen: v5e
topology: v5e:2x2
jax: 0.10.0
libtpu: 0.0.40
codegen_flags: <defaults>
</compile_context>

<pallas_src>
import jax
import jax.numpy as jnp
from jax import lax
from jax.experimental import pallas as pl
from jax.experimental.pallas import tpu as pltpu

# Model hyper-parameters (ConnectXNet defaults).
IN_CH = 3
CH = 64
N_BLOCKS = 5
BOARD_H, BOARD_W = 6, 7
N_ACTIONS = 7
S = BOARD_H * BOARD_W            # 42 board cells
LEAD = 8                         # leading zero rows per sample (>= max row shift 8)
ROWS = 56                        # per-sample rows: 8 + 42 + 6 (multiple of 8 and 7)
TRAIL = ROWS - LEAD - S          # 6
KIN = 32                         # im2col features for the input conv (27 padded to 32)
N_LAYERS = 1 + 2 * N_BLOCKS      # 11 conv+BN layers in the trunk
OUT_LANES = 128                  # lane-dense output: lanes 0..6 policy, lane 7 value
MAX_BATCH_TILE = 64              # samples per grid step (VMEM-safe on v5e/v6e/v7x)
BN_EPS = 1e-5


def _cdiv(a, b):
    return -(-a // b)


# ------------------------------ fused kernel ---------------------------------

def _connectx_kernel(x0_ref, mm_ref, mp_ref, bm_ref,
                     w_in_ref, w_trunk_ref, sh_ref,
                     wh_ref, hsh_ref,
                     pw0_ref, pw1_ref, pb_ref,
                     vw1_ref, vb1_ref, vw2_ref, vb2_ref,
                     out_ref, xcat_ref):
    f32 = jnp.float32
    slab = x0_ref.shape[0]
    bt = slab // ROWS

    def tile_rows(ref):
        # 56-row-periodic constants -> full slab (sublane concat, 56 = 7 tiles).
        v = ref[...]
        return v if bt == 1 else jnp.concatenate([v] * bt, axis=0)

    def roll_rows(x, d):
        # result[i] = x[(i + d) % n]; wrapped rows always hit zero pad rows.
        s = (-d) % x.shape[0]
        return x if s == 0 else pltpu.roll(x, shift=s, axis=0)

    maskm = tile_rows(mm_ref)      # (slab, 1) kills column underflow (kw offset -1)
    maskp = tile_rows(mp_ref)      # (slab, 1) kills column overflow  (kw offset +1)
    bmask = tile_rows(bm_ref)      # (slab, 1) 1.0 on real board cells, 0.0 on pad

    # Input conv: one im2col matmul (K = 32); BN scale folded into w_in.
    h = jnp.dot(x0_ref[...], w_in_ref[...], preferred_element_type=f32)
    h = jnp.maximum(h + sh_ref[0], 0.0) * bmask

    def conv3x3(hin, layer):
        # kw taps lane-concatenated into the reused VMEM scratch -> K = 192;
        # kh taps fused along N (192) and recovered as three 64-lane slices.
        xcat_ref[:, 0:CH] = roll_rows(hin, -1) * maskm
        xcat_ref[:, CH:2 * CH] = hin
        xcat_ref[:, 2 * CH:3 * CH] = roll_rows(hin, 1) * maskp
        res = jnp.dot(xcat_ref[...], w_trunk_ref[layer],
                      preferred_element_type=f32)                 # (slab, 192)
        return (roll_rows(res[:, 0:CH], -BOARD_W)
                + res[:, CH:2 * CH]
                + roll_rows(res[:, 2 * CH:3 * CH], BOARD_W))

    # Residual trunk (5 blocks x 2 convs); activations stay resident in VMEM.
    bn = 1
    for blk in range(N_BLOCKS):
        resid = h
        h = jnp.maximum(conv3x3(h, 2 * blk) + sh_ref[bn], 0.0) * bmask
        bn += 1
        h = jnp.maximum(conv3x3(h, 2 * blk + 1) + sh_ref[bn] + resid, 0.0) * bmask
        bn += 1

    # Heads: fused 1x1 convs (BN scale folded into wh) + ReLU, then the
    # per-sample flatten + Linear layers as positional-weight multiplies
    # followed by one segment-sum matmul per head.  The segment-sum matrix and
    # the positional weights are built in-kernel (no bt-scaled HBM inputs).
    hf = jnp.dot(h, wh_ref[...], preferred_element_type=f32)        # (slab, 8)
    hf = jnp.maximum(hf + hsh_ref[...], 0.0)
    p0 = hf[:, 0:1]                                                  # policy ch 0
    p1 = hf[:, 1:2]                                                  # policy ch 1
    vf = hf[:, 2:3]                                                  # value  ch

    r_iota = lax.broadcasted_iota(jnp.int32, (bt, slab), 1)
    b_iota = lax.broadcasted_iota(jnp.int32, (bt, slab), 0)
    sel = ((r_iota >= b_iota * ROWS)
           & (r_iota < (b_iota + 1) * ROWS)).astype(f32)             # (bt, slab)

    pw0 = tile_rows(pw0_ref)                                         # (slab, 128)
    pw1 = tile_rows(pw1_ref)
    vw1 = tile_rows(vw1_ref)                                         # (slab, 64)

    logits = jnp.dot(sel, p0 * pw0 + p1 * pw1,
                     preferred_element_type=f32) + pb_ref[...]       # (bt, 128)
    hidden = jnp.maximum(
        jnp.dot(sel, vf * vw1, preferred_element_type=f32) + vb1_ref[...],
        0.0)                                                         # (bt, 64)
    value = jnp.tanh(jnp.dot(hidden, vw2_ref[...],
                             preferred_element_type=f32) + vb2_ref[...])
    out_ref[...] = logits + value


# ------------------------------ host-side prep --------------------------------

def _fold_bn(bnp):
    scale = bnp["gamma"] / jnp.sqrt(bnp["var"] + BN_EPS)
    return scale, bnp["beta"] - bnp["mean"] * scale


def _prep_params(params):
    def conv_kn(w, scale):
        # (Cout, Cin, 3, 3) -> (3*Cin, 3*Cout): K index = kw*Cin + cin (matches
        # the [shift(-1)|x|shift(+1)] lane concat), N index = kh*Cout + cout
        # (the three 64-lane output slices row-shifted by -7 / 0 / +7).
        # BN scale is folded into the Cout axis.
        ws = w * scale[:, None, None, None]
        t = jnp.transpose(ws, (3, 1, 2, 0))                     # (kw, Cin, kh, Cout)
        return t.reshape(3 * w.shape[1], 3 * w.shape[0])

    sc_in, sh_in = _fold_bn(params["conv_in_bn"])
    w_in = jnp.transpose(params["conv_in_w"] * sc_in[:, None, None, None],
                         (2, 3, 1, 0)).reshape(9 * IN_CH, CH)
    w_in = jnp.pad(w_in, ((0, KIN - 9 * IN_CH), (0, 0)))

    w_trunk, shifts = [], [sh_in]
    for blk in params["blocks"]:
        s1, h1 = _fold_bn(blk["bn1"])
        s2, h2 = _fold_bn(blk["bn2"])
        w_trunk += [conv_kn(blk["w1"], s1), conv_kn(blk["w2"], s2)]
        shifts += [h1, h2]
    w_trunk = jnp.stack(w_trunk)                                 # (10, 192, 192)
    shifts = jnp.stack(shifts).reshape(N_LAYERS, 1, CH)

    psc, psh = _fold_bn(params["pbn"])
    vsc, vsh = _fold_bn(params["vbn"])
    wh = jnp.zeros((CH, 8), jnp.float32)
    wh = wh.at[:, 0:2].set((params["pconv_w"].reshape(2, CH) * psc[:, None]).T)
    wh = wh.at[:, 2:3].set((params["vconv_w"].reshape(1, CH) * vsc[:, None]).T)
    hsh = jnp.zeros((1, 8), jnp.float32).at[0, 0:2].set(psh).at[0, 2].set(vsh[0])

    # Per-row FC weights on the 56-row per-sample period (zero on pad rows and
    # on unused output lanes); tiled to the full slab inside the kernel.
    pfc = params["pfc_w"].reshape(N_ACTIONS, 2, S)               # [a, c, s]
    pw = jnp.zeros((2, ROWS, OUT_LANES), jnp.float32)
    pw = pw.at[:, LEAD:LEAD + S, :N_ACTIONS].set(jnp.transpose(pfc, (1, 2, 0)))
    pb = jnp.zeros((1, OUT_LANES), jnp.float32).at[0, :N_ACTIONS].set(params["pfc_b"])

    vw1 = jnp.zeros((ROWS, CH), jnp.float32).at[LEAD:LEAD + S, :].set(
        params["vfc1_w"].T)
    vb1 = params["vfc1_b"].reshape(1, CH)
    vw2 = jnp.zeros((CH, OUT_LANES), jnp.float32).at[:, N_ACTIONS].set(
        params["vfc2_w"][0])
    vb2 = jnp.zeros((1, OUT_LANES), jnp.float32).at[0, N_ACTIONS].set(
        params["vfc2_b"][0])

    return dict(w_in=w_in, w_trunk=w_trunk, shifts=shifts, wh=wh, hsh=hsh,
                pw0=pw[0], pw1=pw[1], pb=pb, vw1=vw1, vb1=vb1, vw2=vw2, vb2=vb2)


def _im2col_slab(x, batch_pad):
    """NCHW input -> (Bp*56, 32) im2col slab with zero pad rows / features."""
    xf = x.astype(jnp.float32)
    if batch_pad:
        xf = jnp.pad(xf, ((0, batch_pad), (0, 0), (0, 0), (0, 0)))
    xp = jnp.pad(xf, ((0, 0), (0, 0), (1, 1), (1, 1)))
    patches = [xp[:, :, kh:kh + BOARD_H, kw:kw + BOARD_W]
               for kh in range(3) for kw in range(3)]
    pat = jnp.concatenate(patches, axis=1)                       # (Bp, 27, 6, 7)
    pat = jnp.transpose(pat, (0, 2, 3, 1)).reshape(xf.shape[0], S, 9 * IN_CH)
    pat = jnp.pad(pat, ((0, 0), (LEAD, TRAIL), (0, KIN - 9 * IN_CH)))
    return pat.reshape(xf.shape[0] * ROWS, KIN)


def _period_masks():
    """56-row-periodic column / board masks, shape (56, 1)."""
    r = jnp.arange(ROWS, dtype=jnp.int32)
    col = (r + (ROWS - LEAD)) % BOARD_W      # == (r - LEAD) mod 7, non-negative
    maskm = (col >= 1).astype(jnp.float32)[:, None]
    maskp = (col <= BOARD_W - 2).astype(jnp.float32)[:, None]
    board = ((r >= LEAD) & (r < LEAD + S)).astype(jnp.float32)[:, None]
    return maskm, maskp, board


# ------------------------------ full forward ----------------------------------

@jax.jit
def connectx_pallas(x, params):
    batch = x.shape[0]
    if batch < 16:
        bt = batch                                   # one step, block == full array
    else:
        # >= 2 grid steps so v7x's two TensorCores both get work; keep the tile
        # a multiple of 8 so the output block stays sublane-aligned.
        steps = max(2, _cdiv(batch, MAX_BATCH_TILE))
        bt = _cdiv(_cdiv(batch, steps), 8) * 8
    grid_b = _cdiv(batch, bt)
    bpad = grid_b * bt - batch
    slab = bt * ROWS

    x0 = _im2col_slab(x, bpad)                                   # (Bp*56, 32)
    mm, mp, bm = _period_masks()
    p = _prep_params(params)

    args = (x0, mm, mp, bm, p["w_in"], p["w_trunk"], p["shifts"], p["wh"],
            p["hsh"], p["pw0"], p["pw1"], p["pb"], p["vw1"], p["vb1"],
            p["vw2"], p["vb2"])

    def full_spec(a):
        nd = a.ndim
        return pl.BlockSpec(tuple(a.shape), lambda i, nd=nd: (0,) * nd)

    in_specs = [pl.BlockSpec((slab, KIN), lambda i: (i, 0))]
    in_specs += [full_spec(a) for a in args[1:]]

    macs = slab * (KIN * CH + (N_LAYERS - 1) * (3 * CH) * (3 * CH) + CH * 8)
    macs += bt * slab * (OUT_LANES + CH) + bt * CH * OUT_LANES
    cost = pl.CostEstimate(
        flops=2 * macs * grid_b,
        transcendentals=grid_b * bt * OUT_LANES,
        bytes_accessed=4 * (int(x0.size) + sum(int(a.size) for a in args[1:])
                            + grid_b * bt * OUT_LANES))

    out = pl.pallas_call(
        _connectx_kernel,
        out_shape=jax.ShapeDtypeStruct((grid_b * bt, OUT_LANES), jnp.float32),
        grid=(grid_b,),
        in_specs=in_specs,
        out_specs=pl.BlockSpec((bt, OUT_LANES), lambda i: (i, 0)),
        scratch_shapes=[pltpu.VMEM((slab, 3 * CH), jnp.float32)],
        compiler_params=pltpu.CompilerParams(
            dimension_semantics=("parallel",),
            vmem_limit_bytes=48 * 1024 * 1024),
        cost_estimate=cost,
    )(*args)

    return out[:batch, :N_ACTIONS], out[:batch, N_ACTIONS:N_ACTIONS + 1]


# -------------------------- params (deterministic) ----------------------------

def init_params(key):
    keys = iter(jax.random.split(key, 128))

    def nrm(shape, std):
        return std * jax.random.normal(next(keys), shape, jnp.float32)

    def bn(c):
        return dict(gamma=1.0 + nrm((c,), 0.1),
                    beta=nrm((c,), 0.1),
                    mean=nrm((c,), 0.1),
                    var=1.0 + jnp.abs(nrm((c,), 0.1)))

    return dict(
        conv_in_w=nrm((CH, IN_CH, 3, 3), 0.2),
        conv_in_bn=bn(CH),
        blocks=[dict(w1=nrm((CH, CH, 3, 3), 0.04), bn1=bn(CH),
                     w2=nrm((CH, CH, 3, 3), 0.04), bn2=bn(CH))
                for _ in range(N_BLOCKS)],
        pconv_w=nrm((2, CH, 1, 1), 0.1),
        pbn=bn(2),
        pfc_w=nrm((N_ACTIONS, 2 * S), 0.1),
        pfc_b=nrm((N_ACTIONS,), 0.1),
        vconv_w=nrm((1, CH, 1, 1), 0.1),
        vbn=bn(1),
        vfc1_w=nrm((CH, S), 0.1),
        vfc1_b=nrm((CH,), 0.1),
        vfc2_w=nrm((1, CH), 0.1),
        vfc2_b=nrm((1,), 0.1),
    )


# ----------------------------- pure-JAX reference ------------------------------

def connectx_ref(x, params):
    x = x.astype(jnp.float32)

    def bn(y, p):
        shp = (1, -1, 1, 1)
        return ((y - p["mean"].reshape(shp)) / jnp.sqrt(p["var"].reshape(shp) + BN_EPS)
                * p["gamma"].reshape(shp) + p["beta"].reshape(shp))

    def conv(y, w, pad):
        return lax.conv_general_dilated(y, w, (1, 1), [(pad, pad), (pad, pad)],
                                        dimension_numbers=("NCHW", "OIHW", "NCHW"))

    h = jax.nn.relu(bn(conv(x, params["conv_in_w"], 1), params["conv_in_bn"]))
    for blk in params["blocks"]:
        r = h
        t = jax.nn.relu(bn(conv(h, blk["w1"], 1), blk["bn1"]))
        t = bn(conv(t, blk["w2"], 1), blk["bn2"])
        h = jax.nn.relu(t + r)
    p = jax.nn.relu(bn(conv(h, params["pconv_w"], 0), params["pbn"]))
    p = p.reshape(p.shape[0], -1) @ params["pfc_w"].T + params["pfc_b"]
    v = jax.nn.relu(bn(conv(h, params["vconv_w"], 0), params["vbn"]))
    v = jax.nn.relu(v.reshape(v.shape[0], -1) @ params["vfc1_w"].T + params["vfc1_b"])
    v = jnp.tanh(v @ params["vfc2_w"].T + params["vfc2_b"])
    return p, v


if __name__ == "__main__":
    key = jax.random.PRNGKey(0)
    pkey, xkey = jax.random.split(key)
    params = init_params(pkey)
    x = jax.random.normal(xkey, (2, IN_CH, BOARD_H, BOARD_W), jnp.float32)

    p_out, v_out = connectx_pallas(x, params)
    jax.block_until_ready((p_out, v_out))

    p_ref_out, v_ref_out = connectx_ref(x, params)
    assert p_out.shape == (2, N_ACTIONS) and v_out.shape == (2, 1)
    assert jnp.allclose(p_out, p_ref_out, atol=1e-2, rtol=1e-2), "policy mismatch"
    assert jnp.allclose(v_out, v_ref_out, atol=1e-2, rtol=1e-2), "value mismatch"
    print("KERNEL_OK")
</pallas_src>

<mosaic_0001>
module attributes {stable_mosaic.version = 11 : i64} {
  func.func @_connectx_kernel(%arg0: i32, %arg1: memref<112x32xf32, #tpu.memory_space<vmem>>, %arg2: memref<56x1xf32, #tpu.memory_space<vmem>>, %arg3: memref<56x1xf32, #tpu.memory_space<vmem>>, %arg4: memref<56x1xf32, #tpu.memory_space<vmem>>, %arg5: memref<32x64xf32, #tpu.memory_space<vmem>>, %arg6: memref<10x192x192xf32, #tpu.memory_space<vmem>>, %arg7: memref<11x1x64xf32, #tpu.memory_space<vmem>>, %arg8: memref<64x8xf32, #tpu.memory_space<vmem>>, %arg9: memref<1x8xf32, #tpu.memory_space<vmem>>, %arg10: memref<56x128xf32, #tpu.memory_space<vmem>>, %arg11: memref<56x128xf32, #tpu.memory_space<vmem>>, %arg12: memref<1x128xf32, #tpu.memory_space<vmem>>, %arg13: memref<56x64xf32, #tpu.memory_space<vmem>>, %arg14: memref<1x64xf32, #tpu.memory_space<vmem>>, %arg15: memref<64x128xf32, #tpu.memory_space<vmem>>, %arg16: memref<1x128xf32, #tpu.memory_space<vmem>>, %arg17: memref<2x128xf32, #tpu.memory_space<vmem>>, %arg18: memref<112x192xf32, #tpu.memory_space<vmem>>) attributes {dimension_semantics = [#tpu.dimension_semantics<parallel>], iteration_bounds = array<i64: 1>, scalar_prefetch = 0 : i64, scratch_operands = 1 : i64, tpu.core_type = #tpu.core_type<tc>, window_params = [{transform_indices = @transform_0, window_bounds = array<i64: 112, 32>}, {pipeline_mode = #tpu.pipeline_mode<synchronous>, transform_indices = @transform_1, window_bounds = array<i64: 56, 1>}, {pipeline_mode = #tpu.pipeline_mode<synchronous>, transform_indices = @transform_2, window_bounds = array<i64: 56, 1>}, {pipeline_mode = #tpu.pipeline_mode<synchronous>, transform_indices = @transform_3, window_bounds = array<i64: 56, 1>}, {pipeline_mode = #tpu.pipeline_mode<synchronous>, transform_indices = @transform_4, window_bounds = array<i64: 32, 64>}, {pipeline_mode = #tpu.pipeline_mode<synchronous>, transform_indices = @transform_5, window_bounds = array<i64: 10, 192, 192>}, {pipeline_mode = #tpu.pipeline_mode<synchronous>, transform_indices = @transform_6, window_bounds = array<i64: 11, 1, 64>}, {pipeline_mode = #tpu.pipeline_mode<synchronous>, transform_indices = @transform_7, window_bounds = array<i64: 64, 8>}, {pipeline_mode = #tpu.pipeline_mode<synchronous>, transform_indices = @transform_8, window_bounds = array<i64: 1, 8>}, {pipeline_mode = #tpu.pipeline_mode<synchronous>, transform_indices = @transform_9, window_bounds = array<i64: 56, 128>}, {pipeline_mode = #tpu.pipeline_mode<synchronous>, transform_indices = @transform_10, window_bounds = array<i64: 56, 128>}, {pipeline_mode = #tpu.pipeline_mode<synchronous>, transform_indices = @transform_11, window_bounds = array<i64: 1, 128>}, {pipeline_mode = #tpu.pipeline_mode<synchronous>, transform_indices = @transform_12, window_bounds = array<i64: 56, 64>}, {pipeline_mode = #tpu.pipeline_mode<synchronous>, transform_indices = @transform_13, window_bounds = array<i64: 1, 64>}, {pipeline_mode = #tpu.pipeline_mode<synchronous>, transform_indices = @transform_14, window_bounds = array<i64: 64, 128>}, {pipeline_mode = #tpu.pipeline_mode<synchronous>, transform_indices = @transform_15, window_bounds = array<i64: 1, 128>}, {transform_indices = @transform_16, window_bounds = array<i64: 2, 128>}]} {
    %c0 = arith.constant 0 : index
    %c0_0 = arith.constant 0 : index
    %0 = vector.load %arg2[%c0, %c0_0] : memref<56x1xf32, #tpu.memory_space<vmem>>, vector<56x1xf32>
    %1 = tpu.concatenate %0, %0 in 0 : vector<56x1xf32>, vector<56x1xf32> -> vector<112x1xf32>
    %c0_1 = arith.constant 0 : index
    %c0_2 = arith.constant 0 : index
    %2 = vector.load %arg3[%c0_1, %c0_2] : memref<56x1xf32, #tpu.memory_space<vmem>>, vector<56x1xf32>
    %3 = tpu.concatenate %2, %2 in 0 : vector<56x1xf32>, vector<56x1xf32> -> vector<112x1xf32>
    %c0_3 = arith.constant 0 : index
    %c0_4 = arith.constant 0 : index
    %4 = vector.load %arg4[%c0_3, %c0_4] : memref<56x1xf32, #tpu.memory_space<vmem>>, vector<56x1xf32>
    %5 = tpu.concatenate %4, %4 in 0 : vector<56x1xf32>, vector<56x1xf32> -> vector<112x1xf32>
    %c0_5 = arith.constant 0 : index
    %c0_6 = arith.constant 0 : index
    %6 = vector.load %arg1[%c0_5, %c0_6] : memref<112x32xf32, #tpu.memory_space<vmem>>, vector<112x32xf32>
    %c0_7 = arith.constant 0 : index
    %c0_8 = arith.constant 0 : index
    %7 = vector.load %arg5[%c0_7, %c0_8] : memref<32x64xf32, #tpu.memory_space<vmem>>, vector<32x64xf32>
    %cst = arith.constant dense<0.000000e+00> : vector<112x64xf32>
    %8 = tpu.matmul %6, %7, %cst {dimension_numbers = #tpu.dot_dimension_numbers<[1], [0], [0], [1], [0, 0, 1, 1], [], []>} : vector<112x32xf32>, vector<32x64xf32>, vector<112x64xf32> -> vector<112x64xf32>
    %c0_9 = arith.constant 0 : index
    %c0_10 = arith.constant 0 : index
    %c0_11 = arith.constant 0 : index
    %9 = vector.load %arg7[%c0_9, %c0_10, %c0_11] : memref<11x1x64xf32, #tpu.memory_space<vmem>>, vector<1x1x64xf32>
    %10 = vector.shape_cast %9 : vector<1x1x64xf32> to vector<1x64xf32>
    %11 = vector.broadcast %10 : vector<1x64xf32> to vector<112x64xf32>
    %12 = arith.addf %8, %11 : vector<112x64xf32>
    %cst_12 = arith.constant 0.000000e+00 : f32
    %13 = vector.broadcast %cst_12 : f32 to vector<112x64xf32>
    %14 = arith.maximumf %12, %13 : vector<112x64xf32>
    %15 = vector.broadcast %5 : vector<112x1xf32> to vector<112x64xf32>
    %16 = arith.mulf %14, %15 : vector<112x64xf32>
    %c1_i32 = arith.constant 1 : i32
    %17 = tpu.dynamic_rotate %16 by %c1_i32 dim 0 : vector<112x64xf32>, i32 -> vector<112x64xf32>
    %18 = vector.broadcast %1 : vector<112x1xf32> to vector<112x64xf32>
    %19 = arith.mulf %17, %18 : vector<112x64xf32>
    %c0_13 = arith.constant 0 : index
    %c0_14 = arith.constant 0 : index
    %20 = vector.load %arg18[%c0_13, %c0_14] : memref<112x192xf32, #tpu.memory_space<vmem>>, vector<112x64xf32>
    tpu.vector_store %arg18[%c0_13, %c0_14], %19 {strides = array<i32>} : memref<112x192xf32, #tpu.memory_space<vmem>>, vector<112x64xf32>,
    %c0_15 = arith.constant 0 : index
    %c64 = arith.constant 64 : index
    %21 = vector.load %arg18[%c0_15, %c64] : memref<112x192xf32, #tpu.memory_space<vmem>>, vector<112x64xf32>
    tpu.vector_store %arg18[%c0_15, %c64], %16 {strides = array<i32>} : memref<112x192xf32, #tpu.memory_space<vmem>>, vector<112x64xf32>,
    %c111_i32 = arith.constant 111 : i32
    %22 = tpu.dynamic_rotate %16 by %c111_i32 dim 0 : vector<112x64xf32>, i32 -> vector<112x64xf32>
    %23 = vector.broadcast %3 : vector<112x1xf32> to vector<112x64xf32>
    %24 = arith.mulf %22, %23 : vector<112x64xf32>
    %c0_16 = arith.constant 0 : index
    %c128 = arith.constant 128 : index
    %25 = vector.load %arg18[%c0_16, %c128] : memref<112x192xf32, #tpu.memory_space<vmem>>, vector<112x64xf32>
    tpu.vector_store %arg18[%c0_16, %c128], %24 {strides = array<i32>} : memref<112x192xf32, #tpu.memory_space<vmem>>, vector<112x64xf32>,
    %c0_17 = arith.constant 0 : index
    %c0_18 = arith.constant 0 : index
    %26 = vector.load %arg18[%c0_17, %c0_18] : memref<112x192xf32, #tpu.memory_space<vmem>>, vector<112x192xf32>
    %c0_19 = arith.constant 0 : index
    %c0_20 = arith.constant 0 : index
    %c0_21 = arith.constant 0 : index
    %27 = vector.load %arg6[%c0_19, %c0_20, %c0_21] : memref<10x192x192xf32, #tpu.memory_space<vmem>>, vector<1x192x192xf32>
    %28 = vector.shape_cast %27 : vector<1x192x192xf32> to vector<192x192xf32>
    %cst_22 = arith.constant dense<0.000000e+00> : vector<112x192xf32>
    %29 = tpu.matmul %26, %28, %cst_22 {dimension_numbers = #tpu.dot_dimension_numbers<[1], [0], [0], [1], [0, 0, 1, 1], [], []>} : vector<112x192xf32>, vector<192x192xf32>, vector<112x192xf32> -> vector<112x192xf32>
    %30 = vector.extract_strided_slice %29 {offsets = [0, 0], sizes = [112, 64], strides = [1, 1]} : vector<112x192xf32> to vector<112x64xf32>
    %c7_i32 = arith.constant 7 : i32
    %31 = tpu.dynamic_rotate %30 by %c7_i32 dim 0 : vector<112x64xf32>, i32 -> vector<112x64xf32>
    %32 = vector.extract_strided_slice %29 {offsets = [0, 64], sizes = [112, 64], strides = [1, 1]} : vector<112x192xf32> to vector<112x64xf32>
    %33 = arith.addf %31, %32 : vector<112x64xf32>
    %34 = vector.extract_strided_slice %29 {offsets = [0, 128], sizes = [112, 64], strides = [1, 1]} : vector<112x192xf32> to vector<112x64xf32>
    %c105_i32 = arith.constant 105 : i32
    %35 = tpu.dynamic_rotate %34 by %c105_i32 dim 0 : vector<112x64xf32>, i32 -> vector<112x64xf32>
    %36 = arith.addf %33, %35 : vector<112x64xf32>
    %c1 = arith.constant 1 : index
    %c0_23 = arith.constant 0 : index
    %c0_24 = arith.constant 0 : index
    %37 = vector.load %arg7[%c1, %c0_23, %c0_24] : memref<11x1x64xf32, #tpu.memory_space<vmem>>, vector<1x1x64xf32>
    %38 = vector.shape_cast %37 : vector<1x1x64xf32> to vector<1x64xf32>
    %39 = vector.broadcast %38 : vector<1x64xf32> to vector<112x64xf32>
    %40 = arith.addf %36, %39 : vector<112x64xf32>
    %cst_25 = arith.constant 0.000000e+00 : f32
    %41 = vector.broadcast %cst_25 : f32 to vector<112x64xf32>
    %42 = arith.maximumf %40, %41 : vector<112x64xf32>
    %43 = vector.broadcast %5 : vector<112x1xf32> to vector<112x64xf32>
    %44 = arith.mulf %42, %43 : vector<112x64xf32>
    %c1_i32_26 = arith.constant 1 : i32
    %45 = tpu.dynamic_rotate %44 by %c1_i32_26 dim 0 : vector<112x64xf32>, i32 -> vector<112x64xf32>
    %46 = vector.broadcast %1 : vector<112x1xf32> to vector<112x64xf32>
    %47 = arith.mulf %45, %46 : vector<112x64xf32>
    %c0_27 = arith.constant 0 : index
    %c0_28 = arith.constant 0 : index
    %48 = vector.load %arg18[%c0_27, %c0_28] : memref<112x192xf32, #tpu.memory_space<vmem>>, vector<112x64xf32>
    tpu.vector_store %arg18[%c0_27, %c0_28], %47 {strides = array<i32>} : memref<112x192xf32, #tpu.memory_space<vmem>>, vector<112x64xf32>,
    %c0_29 = arith.constant 0 : index
    %c64_30 = arith.constant 64 : index
    %49 = vector.load %arg18[%c0_29, %c64_30] : memref<112x192xf32, #tpu.memory_space<vmem>>, vector<112x64xf32>
    tpu.vector_store %arg18[%c0_29, %c64_30], %44 {strides = array<i32>} : memref<112x192xf32, #tpu.memory_space<vmem>>, vector<112x64xf32>,
    %c111_i32_31 = arith.constant 111 : i32
    %50 = tpu.dynamic_rotate %44 by %c111_i32_31 dim 0 : vector<112x64xf32>, i32 -> vector<112x64xf32>
    %51 = vector.broadcast %3 : vector<112x1xf32> to vector<112x64xf32>
    %52 = arith.mulf %50, %51 : vector<112x64xf32>
    %c0_32 = arith.constant 0 : index
    %c128_33 = arith.constant 128 : index
    %53 = vector.load %arg18[%c0_32, %c128_33] : memref<112x192xf32, #tpu.memory_space<vmem>>, vector<112x64xf32>
    tpu.vector_store %arg18[%c0_32, %c128_33], %52 {strides = array<i32>} : memref<112x192xf32, #tpu.memory_space<vmem>>, vector<112x64xf32>,
    %c0_34 = arith.constant 0 : index
    %c0_35 = arith.constant 0 : index
    %54 = vector.load %arg18[%c0_34, %c0_35] : memref<112x192xf32, #tpu.memory_space<vmem>>, vector<112x192xf32>
    %c1_36 = arith.constant 1 : index
    %c0_37 = arith.constant 0 : index
    %c0_38 = arith.constant 0 : index
    %55 = vector.load %arg6[%c1_36, %c0_37, %c0_38] : memref<10x192x192xf32, #tpu.memory_space<vmem>>, vector<1x192x192xf32>
    %56 = vector.shape_cast %55 : vector<1x192x192xf32> to vector<192x192xf32>
    %cst_39 = arith.constant dense<0.000000e+00> : vector<112x192xf32>
    %57 = tpu.matmul %54, %56, %cst_39 {dimension_numbers = #tpu.dot_dimension_numbers<[1], [0], [0], [1], [0, 0, 1, 1], [], []>} : vector<112x192xf32>, vector<192x192xf32>, vector<112x192xf32> -> vector<112x192xf32>
    %58 = vector.extract_strided_slice %57 {offsets = [0, 0], sizes = [112, 64], strides = [1, 1]} : vector<112x192xf32> to vector<112x64xf32>
    %c7_i32_40 = arith.constant 7 : i32
    %59 = tpu.dynamic_rotate %58 by %c7_i32_40 dim 0 : vector<112x64xf32>, i32 -> vector<112x64xf32>
    %60 = vector.extract_strided_slice %57 {offsets = [0, 64], sizes = [112, 64], strides = [1, 1]} : vector<112x192xf32> to vector<112x64xf32>
    %61 = arith.addf %59, %60 : vector<112x64xf32>
    %62 = vector.extract_strided_slice %57 {offsets = [0, 128], sizes = [112, 64], strides = [1, 1]} : vector<112x192xf32> to vector<112x64xf32>
    %c105_i32_41 = arith.constant 105 : i32
    %63 = tpu.dynamic_rotate %62 by %c105_i32_41 dim 0 : vector<112x64xf32>, i32 -> vector<112x64xf32>
    %64 = arith.addf %61, %63 : vector<112x64xf32>
    %c2 = arith.constant 2 : index
    %c0_42 = arith.constant 0 : index
    %c0_43 = arith.constant 0 : index
    %65 = vector.load %arg7[%c2, %c0_42, %c0_43] : memref<11x1x64xf32, #tpu.memory_space<vmem>>, vector<1x1x64xf32>
    %66 = vector.shape_cast %65 : vector<1x1x64xf32> to vector<1x64xf32>
    %67 = vector.broadcast %66 : vector<1x64xf32> to vector<112x64xf32>
    %68 = arith.addf %64, %67 : vector<112x64xf32>
    %69 = arith.addf %68, %16 : vector<112x64xf32>
    %cst_44 = arith.constant 0.000000e+00 : f32
    %70 = vector.broadcast %cst_44 : f32 to vector<112x64xf32>
    %71 = arith.maximumf %69, %70 : vector<112x64xf32>
    %72 = vector.broadcast %5 : vector<112x1xf32> to vector<112x64xf32>
    %73 = arith.mulf %71, %72 : vector<112x64xf32>
    %c1_i32_45 = arith.constant 1 : i32
    %74 = tpu.dynamic_rotate %73 by %c1_i32_45 dim 0 : vector<112x64xf32>, i32 -> vector<112x64xf32>
    %75 = vector.broadcast %1 : vector<112x1xf32> to vector<112x64xf32>
    %76 = arith.mulf %74, %75 : vector<112x64xf32>
    %c0_46 = arith.constant 0 : index
    %c0_47 = arith.constant 0 : index
    %77 = vector.load %arg18[%c0_46, %c0_47] : memref<112x192xf32, #tpu.memory_space<vmem>>, vector<112x64xf32>
    tpu.vector_store %arg18[%c0_46, %c0_47], %76 {strides = array<i32>} : memref<112x192xf32, #tpu.memory_space<vmem>>, vector<112x64xf32>,
    %c0_48 = arith.constant 0 : index
    %c64_49 = arith.constant 64 : index
    %78 = vector.load %arg18[%c0_48, %c64_49] : memref<112x192xf32, #tpu.memory_space<vmem>>, vector<112x64xf32>
    tpu.vector_store %arg18[%c0_48, %c64_49], %73 {strides = array<i32>} : memref<112x192xf32, #tpu.memory_space<vmem>>, vector<112x64xf32>,
    %c111_i32_50 = arith.constant 111 : i32
    %79 = tpu.dynamic_rotate %73 by %c111_i32_50 dim 0 : vector<112x64xf32>, i32 -> vector<112x64xf32>
    %80 = vector.broadcast %3 : vector<112x1xf32> to vector<112x64xf32>
    %81 = arith.mulf %79, %80 : vector<112x64xf32>
    %c0_51 = arith.constant 0 : index
    %c128_52 = arith.constant 128 : index
    %82 = vector.load %arg18[%c0_51, %c128_52] : memref<112x192xf32, #tpu.memory_space<vmem>>, vector<112x64xf32>
    tpu.vector_store %arg18[%c0_51, %c128_52], %81 {strides = array<i32>} : memref<112x192xf32, #tpu.memory_space<vmem>>, vector<112x64xf32>,
    %c0_53 = arith.constant 0 : index
    %c0_54 = arith.constant 0 : index
    %83 = vector.load %arg18[%c0_53, %c0_54] : memref<112x192xf32, #tpu.memory_space<vmem>>, vector<112x192xf32>
    %c2_55 = arith.constant 2 : index
    %c0_56 = arith.constant 0 : index
    %c0_57 = arith.constant 0 : index
    %84 = vector.load %arg6[%c2_55, %c0_56, %c0_57] : memref<10x192x192xf32, #tpu.memory_space<vmem>>, vector<1x192x192xf32>
    %85 = vector.shape_cast %84 : vector<1x192x192xf32> to vector<192x192xf32>
    %cst_58 = arith.constant dense<0.000000e+00> : vector<112x192xf32>
    %86 = tpu.matmul %83, %85, %cst_58 {dimension_numbers = #tpu.dot_dimension_numbers<[1], [0], [0], [1], [0, 0, 1, 1], [], []>} : vector<112x192xf32>, vector<192x192xf32>, vector<112x192xf32> -> vector<112x192xf32>
    %87 = vector.extract_strided_slice %86 {offsets = [0, 0], sizes = [112, 64], strides = [1, 1]} : vector<112x192xf32> to vector<112x64xf32>
    %c7_i32_59 = arith.constant 7 : i32
    %88 = tpu.dynamic_rotate %87 by %c7_i32_59 dim 0 : vector<112x64xf32>, i32 -> vector<112x64xf32>
    %89 = vector.extract_strided_slice %86 {offsets = [0, 64], sizes = [112, 64], strides = [1, 1]} : vector<112x192xf32> to vector<112x64xf32>
    %90 = arith.addf %88, %89 : vector<112x64xf32>
    %91 = vector.extract_strided_slice %86 {offsets = [0, 128], sizes = [112, 64], strides = [1, 1]} : vector<112x192xf32> to vector<112x64xf32>
    %c105_i32_60 = arith.constant 105 : i32
    %92 = tpu.dynamic_rotate %91 by %c105_i32_60 dim 0 : vector<112x64xf32>, i32 -> vector<112x64xf32>
    %93 = arith.addf %90, %92 : vector<112x64xf32>
    %c3 = arith.constant 3 : index
    %c0_61 = arith.constant 0 : index
    %c0_62 = arith.constant 0 : index
    %94 = vector.load %arg7[%c3, %c0_61, %c0_62] : memref<11x1x64xf32, #tpu.memory_space<vmem>>, vector<1x1x64xf32>
    %95 = vector.shape_cast %94 : vector<1x1x64xf32> to vector<1x64xf32>
    %96 = vector.broadcast %95 : vector<1x64xf32> to vector<112x64xf32>
    %97 = arith.addf %93, %96 : vector<112x64xf32>
    %cst_63 = arith.constant 0.000000e+00 : f32
    %98 = vector.broadcast %cst_63 : f32 to vector<112x64xf32>
    %99 = arith.maximumf %97, %98 : vector<112x64xf32>
    %100 = vector.broadcast %5 : vector<112x1xf32> to vector<112x64xf32>
    %101 = arith.mulf %99, %100 : vector<112x64xf32>
    %c1_i32_64 = arith.constant 1 : i32
    %102 = tpu.dynamic_rotate %101 by %c1_i32_64 dim 0 : vector<112x64xf32>, i32 -> vector<112x64xf32>
    %103 = vector.broadcast %1 : vector<112x1xf32> to vector<112x64xf32>
    %104 = arith.mulf %102, %103 : vector<112x64xf32>
    %c0_65 = arith.constant 0 : index
    %c0_66 = arith.constant 0 : index
    %105 = vector.load %arg18[%c0_65, %c0_66] : memref<112x192xf32, #tpu.memory_space<vmem>>, vector<112x64xf32>
    tpu.vector_store %arg18[%c0_65, %c0_66], %104 {strides = array<i32>} : memref<112x192xf32, #tpu.memory_space<vmem>>, vector<112x64xf32>,
    %c0_67 = arith.constant 0 : index
    %c64_68 = arith.constant 64 : index
    %106 = vector.load %arg18[%c0_67, %c64_68] : memref<112x192xf32, #tpu.memory_space<vmem>>, vector<112x64xf32>
    tpu.vector_store %arg18[%c0_67, %c64_68], %101 {strides = array<i32>} : memref<112x192xf32, #tpu.memory_space<vmem>>, vector<112x64xf32>,
    %c111_i32_69 = arith.constant 111 : i32
    %107 = tpu.dynamic_rotate %101 by %c111_i32_69 dim 0 : vector<112x64xf32>, i32 -> vector<112x64xf32>
    %108 = vector.broadcast %3 : vector<112x1xf32> to vector<112x64xf32>
    %109 = arith.mulf %107, %108 : vector<112x64xf32>
    %c0_70 = arith.constant 0 : index
    %c128_71 = arith.constant 128 : index
    %110 = vector.load %arg18[%c0_70, %c128_71] : memref<112x192xf32, #tpu.memory_space<vmem>>, vector<112x64xf32>
    tpu.vector_store %arg18[%c0_70, %c128_71], %109 {strides = array<i32>} : memref<112x192xf32, #tpu.memory_space<vmem>>, vector<112x64xf32>,
    %c0_72 = arith.constant 0 : index
    %c0_73 = arith.constant 0 : index
    %111 = vector.load %arg18[%c0_72, %c0_73] : memref<112x192xf32, #tpu.memory_space<vmem>>, vector<112x192xf32>
    %c3_74 = arith.constant 3 : index
    %c0_75 = arith.constant 0 : index
    %c0_76 = arith.constant 0 : index
    %112 = vector.load %arg6[%c3_74, %c0_75, %c0_76] : memref<10x192x192xf32, #tpu.memory_space<vmem>>, vector<1x192x192xf32>
    %113 = vector.shape_cast %112 : vector<1x192x192xf32> to vector<192x192xf32>
    %cst_77 = arith.constant dense<0.000000e+00> : vector<112x192xf32>
    %114 = tpu.matmul %111, %113, %cst_77 {dimension_numbers = #tpu.dot_dimension_numbers<[1], [0], [0], [1], [0, 0, 1, 1], [], []>} : vector<112x192xf32>, vector<192x192xf32>, vector<112x192xf32> -> vector<112x192xf32>
    %115 = vector.extract_strided_slice %114 {offsets = [0, 0], sizes = [112, 64], strides = [1, 1]} : vector<112x192xf32> to vector<112x64xf32>
    %c7_i32_78 = arith.constant 7 : i32
    %116 = tpu.dynamic_rotate %115 by %c7_i32_78 dim 0 : vector<112x64xf32>, i32 -> vector<112x64xf32>
    %117 = vector.extract_strided_slice %114 {offsets = [0, 64], sizes = [112, 64], strides = [1, 1]} : vector<112x192xf32> to vector<112x64xf32>
    %118 = arith.addf %116, %117 : vector<112x64xf32>
    %119 = vector.extract_strided_slice %114 {offsets = [0, 128], sizes = [112, 64], strides = [1, 1]} : vector<112x192xf32> to vector<112x64xf32>
    %c105_i32_79 = arith.constant 105 : i32
    %120 = tpu.dynamic_rotate %119 by %c105_i32_79 dim 0 : vector<112x64xf32>, i32 -> vector<112x64xf32>
    %121 = arith.addf %118, %120 : vector<112x64xf32>
    %c4 = arith.constant 4 : index
    %c0_80 = arith.constant 0 : index
    %c0_81 = arith.constant 0 : index
    %122 = vector.load %arg7[%c4, %c0_80, %c0_81] : memref<11x1x64xf32, #tpu.memory_space<vmem>>, vector<1x1x64xf32>
    %123 = vector.shape_cast %122 : vector<1x1x64xf32> to vector<1x64xf32>
    %124 = vector.broadcast %123 : vector<1x64xf32> to vector<112x64xf32>
    %125 = arith.addf %121, %124 : vector<112x64xf32>
    %126 = arith.addf %125, %73 : vector<112x64xf32>
    %cst_82 = arith.constant 0.000000e+00 : f32
    %127 = vector.broadcast %cst_82 : f32 to vector<112x64xf32>
    %128 = arith.maximumf %126, %127 : vector<112x64xf32>
    %129 = vector.broadcast %5 : vector<112x1xf32> to vector<112x64xf32>
    %130 = arith.mulf %128, %129 : vector<112x64xf32>
    %c1_i32_83 = arith.constant 1 : i32
    %131 = tpu.dynamic_rotate %130 by %c1_i32_83 dim 0 : vector<112x64xf32>, i32 -> vector<112x64xf32>
    %132 = vector.broadcast %1 : vector<112x1xf32> to vector<112x64xf32>
    %133 = arith.mulf %131, %132 : vector<112x64xf32>
    %c0_84 = arith.constant 0 : index
    %c0_85 = arith.constant 0 : index
    %134 = vector.load %arg18[%c0_84, %c0_85] : memref<112x192xf32, #tpu.memory_space<vmem>>, vector<112x64xf32>
    tpu.vector_store %arg18[%c0_84, %c0_85], %133 {strides = array<i32>} : memref<112x192xf32, #tpu.memory_space<vmem>>, vector<112x64xf32>,
    %c0_86 = arith.constant 0 : index
    %c64_87 = arith.constant 64 : index
    %135 = vector.load %arg18[%c0_86, %c64_87] : memref<112x192xf32, #tpu.memory_space<vmem>>, vector<112x64xf32>
    tpu.vector_store %arg18[%c0_86, %c64_87], %130 {strides = array<i32>} : memref<112x192xf32, #tpu.memory_space<vmem>>, vector<112x64xf32>,
    %c111_i32_88 = arith.constant 111 : i32
    %136 = tpu.dynamic_rotate %130 by %c111_i32_88 dim 0 : vector<112x64xf32>, i32 -> vector<112x64xf32>
    %137 = vector.broadcast %3 : vector<112x1xf32> to vector<112x64xf32>
    %138 = arith.mulf %136, %137 : vector<112x64xf32>
    %c0_89 = arith.constant 0 : index
    %c128_90 = arith.constant 128 : index
    %139 = vector.load %arg18[%c0_89, %c128_90] : memref<112x192xf32, #tpu.memory_space<vmem>>, vector<112x64xf32>
    tpu.vector_store %arg18[%c0_89, %c128_90], %138 {strides = array<i32>} : memref<112x192xf32, #tpu.memory_space<vmem>>, vector<112x64xf32>,
    %c0_91 = arith.constant 0 : index
    %c0_92 = arith.constant 0 : index
    %140 = vector.load %arg18[%c0_91, %c0_92] : memref<112x192xf32, #tpu.memory_space<vmem>>, vector<112x192xf32>
    %c4_93 = arith.constant 4 : index
    %c0_94 = arith.constant 0 : index
    %c0_95 = arith.constant 0 : index
    %141 = vector.load %arg6[%c4_93, %c0_94, %c0_95] : memref<10x192x192xf32, #tpu.memory_space<vmem>>, vector<1x192x192xf32>
    %142 = vector.shape_cast %141 : vector<1x192x192xf32> to vector<192x192xf32>
    %cst_96 = arith.constant dense<0.000000e+00> : vector<112x192xf32>
    %143 = tpu.matmul %140, %142, %cst_96 {dimension_numbers = #tpu.dot_dimension_numbers<[1], [0], [0], [1], [0, 0, 1, 1], [], []>} : vector<112x192xf32>, vector<192x192xf32>, vector<112x192xf32> -> vector<112x192xf32>
    %144 = vector.extract_strided_slice %143 {offsets = [0, 0], sizes = [112, 64], strides = [1, 1]} : vector<112x192xf32> to vector<112x64xf32>
    %c7_i32_97 = arith.constant 7 : i32
    %145 = tpu.dynamic_rotate %144 by %c7_i32_97 dim 0 : vector<112x64xf32>, i32 -> vector<112x64xf32>
    %146 = vector.extract_strided_slice %143 {offsets = [0, 64], sizes = [112, 64], strides = [1, 1]} : vector<112x192xf32> to vector<112x64xf32>
    %147 = arith.addf %145, %146 : vector<112x64xf32>
    %148 = vector.extract_strided_slice %143 {offsets = [0, 128], sizes = [112, 64], strides = [1, 1]} : vector<112x192xf32> to vector<112x64xf32>
    %c105_i32_98 = arith.constant 105 : i32
    %149 = tpu.dynamic_rotate %148 by %c105_i32_98 dim 0 : vector<112x64xf32>, i32 -> vector<112x64xf32>
    %150 = arith.addf %147, %149 : vector<112x64xf32>
    %c5 = arith.constant 5 : index
    %c0_99 = arith.constant 0 : index
    %c0_100 = arith.constant 0 : index
    %151 = vector.load %arg7[%c5, %c0_99, %c0_100] : memref<11x1x64xf32, #tpu.memory_space<vmem>>, vector<1x1x64xf32>
    %152 = vector.shape_cast %151 : vector<1x1x64xf32> to vector<1x64xf32>
    %153 = vector.broadcast %152 : vector<1x64xf32> to vector<112x64xf32>
    %154 = arith.addf %150, %153 : vector<112x64xf32>
    %cst_101 = arith.constant 0.000000e+00 : f32
    %155 = vector.broadcast %cst_101 : f32 to vector<112x64xf32>
    %156 = arith.maximumf %154, %155 : vector<112x64xf32>
    %157 = vector.broadcast %5 : vector<112x1xf32> to vector<112x64xf32>
    %158 = arith.mulf %156, %157 : vector<112x64xf32>
    %c1_i32_102 = arith.constant 1 : i32
    %159 = tpu.dynamic_rotate %158 by %c1_i32_102 dim 0 : vector<112x64xf32>, i32 -> vector<112x64xf32>
    %160 = vector.broadcast %1 : vector<112x1xf32> to vector<112x64xf32>
    %161 = arith.mulf %159, %160 : vector<112x64xf32>
    %c0_103 = arith.constant 0 : index
    %c0_104 = arith.constant 0 : index
    %162 = vector.load %arg18[%c0_103, %c0_104] : memref<112x192xf32, #tpu.memory_space<vmem>>, vector<112x64xf32>
    tpu.vector_store %arg18[%c0_103, %c0_104], %161 {strides = array<i32>} : memref<112x192xf32, #tpu.memory_space<vmem>>, vector<112x64xf32>,
    %c0_105 = arith.constant 0 : index
    %c64_106 = arith.constant 64 : index
    %163 = vector.load %arg18[%c0_105, %c64_106] : memref<112x192xf32, #tpu.memory_space<vmem>>, vector<112x64xf32>
    tpu.vector_store %arg18[%c0_105, %c64_106], %158 {strides = array<i32>} : memref<112x192xf32, #tpu.memory_space<vmem>>, vector<112x64xf32>,
    %c111_i32_107 = arith.constant 111 : i32
    %164 = tpu.dynamic_rotate %158 by %c111_i32_107 dim 0 : vector<112x64xf32>, i32 -> vector<112x64xf32>
    %165 = vector.broadcast %3 : vector<112x1xf32> to vector<112x64xf32>
    %166 = arith.mulf %164, %165 : vector<112x64xf32>
    %c0_108 = arith.constant 0 : index
    %c128_109 = arith.constant 128 : index
    %167 = vector.load %arg18[%c0_108, %c128_109] : memref<112x192xf32, #tpu.memory_space<vmem>>, vector<112x64xf32>
    tpu.vector_store %arg18[%c0_108, %c128_109], %166 {strides = array<i32>} : memref<112x192xf32, #tpu.memory_space<vmem>>, vector<112x64xf32>,
    %c0_110 = arith.constant 0 : index
    %c0_111 = arith.constant 0 : index
    %168 = vector.load %arg18[%c0_110, %c0_111] : memref<112x192xf32, #tpu.memory_space<vmem>>, vector<112x192xf32>
    %c5_112 = arith.constant 5 : index
    %c0_113 = arith.constant 0 : index
    %c0_114 = arith.constant 0 : index
    %169 = vector.load %arg6[%c5_112, %c0_113, %c0_114] : memref<10x192x192xf32, #tpu.memory_space<vmem>>, vector<1x192x192xf32>
    %170 = vector.shape_cast %169 : vector<1x192x192xf32> to vector<192x192xf32>
    %cst_115 = arith.constant dense<0.000000e+00> : vector<112x192xf32>
    %171 = tpu.matmul %168, %170, %cst_115 {dimension_numbers = #tpu.dot_dimension_numbers<[1], [0], [0], [1], [0, 0, 1, 1], [], []>} : vector<112x192xf32>, vector<192x192xf32>, vector<112x192xf32> -> vector<112x192xf32>
    %172 = vector.extract_strided_slice %171 {offsets = [0, 0], sizes = [112, 64], strides = [1, 1]} : vector<112x192xf32> to vector<112x64xf32>
    %c7_i32_116 = arith.constant 7 : i32
    %173 = tpu.dynamic_rotate %172 by %c7_i32_116 dim 0 : vector<112x64xf32>, i32 -> vector<112x64xf32>
    %174 = vector.extract_strided_slice %171 {offsets = [0, 64], sizes = [112, 64], strides = [1, 1]} : vector<112x192xf32> to vector<112x64xf32>
    %175 = arith.addf %173, %174 : vector<112x64xf32>
    %176 = vector.extract_strided_slice %171 {offsets = [0, 128], sizes = [112, 64], strides = [1, 1]} : vector<112x192xf32> to vector<112x64xf32>
    %c105_i32_117 = arith.constant 105 : i32
    %177 = tpu.dynamic_rotate %176 by %c105_i32_117 dim 0 : vector<112x64xf32>, i32 -> vector<112x64xf32>
    %178 = arith.addf %175, %177 : vector<112x64xf32>
    %c6 = arith.constant 6 : index
    %c0_118 = arith.constant 0 : index
    %c0_119 = arith.constant 0 : index
    %179 = vector.load %arg7[%c6, %c0_118, %c0_119] : memref<11x1x64xf32, #tpu.memory_space<vmem>>, vector<1x1x64xf32>
    %180 = vector.shape_cast %179 : vector<1x1x64xf32> to vector<1x64xf32>
    %181 = vector.broadcast %180 : vector<1x64xf32> to vector<112x64xf32>
    %182 = arith.addf %178, %181 : vector<112x64xf32>
    %183 = arith.addf %182, %130 : vector<112x64xf32>
    %cst_120 = arith.constant 0.000000e+00 : f32
    %184 = vector.broadcast %cst_120 : f32 to vector<112x64xf32>
    %185 = arith.maximumf %183, %184 : vector<112x64xf32>
    %186 = vector.broadcast %5 : vector<112x1xf32> to vector<112x64xf32>
    %187 = arith.mulf %185, %186 : vector<112x64xf32>
    %c1_i32_121 = arith.constant 1 : i32
    %188 = tpu.dynamic_rotate %187 by %c1_i32_121 dim 0 : vector<112x64xf32>, i32 -> vector<112x64xf32>
    %189 = vector.broadcast %1 : vector<112x1xf32> to vector<112x64xf32>
    %190 = arith.mulf %188, %189 : vector<112x64xf32>
    %c0_122 = arith.constant 0 : index
    %c0_123 = arith.constant 0 : index
    %191 = vector.load %arg18[%c0_122, %c0_123] : memref<112x192xf32, #tpu.memory_space<vmem>>, vector<112x64xf32>
    tpu.vector_store %arg18[%c0_122, %c0_123], %190 {strides = array<i32>} : memref<112x192xf32, #tpu.memory_space<vmem>>, vector<112x64xf32>,
    %c0_124 = arith.constant 0 : index
    %c64_125 = arith.constant 64 : index
    %192 = vector.load %arg18[%c0_124, %c64_125] : memref<112x192xf32, #tpu.memory_space<vmem>>, vector<112x64xf32>
    tpu.vector_store %arg18[%c0_124, %c64_125], %187 {strides = array<i32>} : memref<112x192xf32, #tpu.memory_space<vmem>>, vector<112x64xf32>,
    %c111_i32_126 = arith.constant 111 : i32
    %193 = tpu.dynamic_rotate %187 by %c111_i32_126 dim 0 : vector<112x64xf32>, i32 -> vector<112x64xf32>
    %194 = vector.broadcast %3 : vector<112x1xf32> to vector<112x64xf32>
    %195 = arith.mulf %193, %194 : vector<112x64xf32>
    %c0_127 = arith.constant 0 : index
    %c128_128 = arith.constant 128 : index
    %196 = vector.load %arg18[%c0_127, %c128_128] : memref<112x192xf32, #tpu.memory_space<vmem>>, vector<112x64xf32>
    tpu.vector_store %arg18[%c0_127, %c128_128], %195 {strides = array<i32>} : memref<112x192xf32, #tpu.memory_space<vmem>>, vector<112x64xf32>,
    %c0_129 = arith.constant 0 : index
    %c0_130 = arith.constant 0 : index
    %197 = vector.load %arg18[%c0_129, %c0_130] : memref<112x192xf32, #tpu.memory_space<vmem>>, vector<112x192xf32>
    %c6_131 = arith.constant 6 : index
    %c0_132 = arith.constant 0 : index
    %c0_133 = arith.constant 0 : index
    %198 = vector.load %arg6[%c6_131, %c0_132, %c0_133] : memref<10x192x192xf32, #tpu.memory_space<vmem>>, vector<1x192x192xf32>
    %199 = vector.shape_cast %198 : vector<1x192x192xf32> to vector<192x192xf32>
    %cst_134 = arith.constant dense<0.000000e+00> : vector<112x192xf32>
    %200 = tpu.matmul %197, %199, %cst_134 {dimension_numbers = #tpu.dot_dimension_numbers<[1], [0], [0], [1], [0, 0, 1, 1], [], []>} : vector<112x192xf32>, vector<192x192xf32>, vector<112x192xf32> -> vector<112x192xf32>
    %201 = vector.extract_strided_slice %200 {offsets = [0, 0], sizes = [112, 64], strides = [1, 1]} : vector<112x192xf32> to vector<112x64xf32>
    %c7_i32_135 = arith.constant 7 : i32
    %202 = tpu.dynamic_rotate %201 by %c7_i32_135 dim 0 : vector<112x64xf32>, i32 -> vector<112x64xf32>
    %203 = vector.extract_strided_slice %200 {offsets = [0, 64], sizes = [112, 64], strides = [1, 1]} : vector<112x192xf32> to vector<112x64xf32>
    %204 = arith.addf %202, %203 : vector<112x64xf32>
    %205 = vector.extract_strided_slice %200 {offsets = [0, 128], sizes = [112, 64], strides = [1, 1]} : vector<112x192xf32> to vector<112x64xf32>
    %c105_i32_136 = arith.constant 105 : i32
    %206 = tpu.dynamic_rotate %205 by %c105_i32_136 dim 0 : vector<112x64xf32>, i32 -> vector<112x64xf32>
    %207 = arith.addf %204, %206 : vector<112x64xf32>
    %c7 = arith.constant 7 : index
    %c0_137 = arith.constant 0 : index
    %c0_138 = arith.constant 0 : index
    %208 = vector.load %arg7[%c7, %c0_137, %c0_138] : memref<11x1x64xf32, #tpu.memory_space<vmem>>, vector<1x1x64xf32>
    %209 = vector.shape_cast %208 : vector<1x1x64xf32> to vector<1x64xf32>
    %210 = vector.broadcast %209 : vector<1x64xf32> to vector<112x64xf32>
    %211 = arith.addf %207, %210 : vector<112x64xf32>
    %cst_139 = arith.constant 0.000000e+00 : f32
    %212 = vector.broadcast %cst_139 : f32 to vector<112x64xf32>
    %213 = arith.maximumf %211, %212 : vector<112x64xf32>
    %214 = vector.broadcast %5 : vector<112x1xf32> to vector<112x64xf32>
    %215 = arith.mulf %213, %214 : vector<112x64xf32>
    %c1_i32_140 = arith.constant 1 : i32
    %216 = tpu.dynamic_rotate %215 by %c1_i32_140 dim 0 : vector<112x64xf32>, i32 -> vector<112x64xf32>
    %217 = vector.broadcast %1 : vector<112x1xf32> to vector<112x64xf32>
    %218 = arith.mulf %216, %217 : vector<112x64xf32>
    %c0_141 = arith.constant 0 : index
    %c0_142 = arith.constant 0 : index
    %219 = vector.load %arg18[%c0_141, %c0_142] : memref<112x192xf32, #tpu.memory_space<vmem>>, vector<112x64xf32>
    tpu.vector_store %arg18[%c0_141, %c0_142], %218 {strides = array<i32>} : memref<112x192xf32, #tpu.memory_space<vmem>>, vector<112x64xf32>,
    %c0_143 = arith.constant 0 : index
    %c64_144 = arith.constant 64 : index
    %220 = vector.load %arg18[%c0_143, %c64_144] : memref<112x192xf32, #tpu.memory_space<vmem>>, vector<112x64xf32>
    tpu.vector_store %arg18[%c0_143, %c64_144], %215 {strides = array<i32>} : memref<112x192xf32, #tpu.memory_space<vmem>>, vector<112x64xf32>,
    %c111_i32_145 = arith.constant 111 : i32
    %221 = tpu.dynamic_rotate %215 by %c111_i32_145 dim 0 : vector<112x64xf32>, i32 -> vector<112x64xf32>
    %222 = vector.broadcast %3 : vector<112x1xf32> to vector<112x64xf32>
    %223 = arith.mulf %221, %222 : vector<112x64xf32>
    %c0_146 = arith.constant 0 : index
    %c128_147 = arith.constant 128 : index
    %224 = vector.load %arg18[%c0_146, %c128_147] : memref<112x192xf32, #tpu.memory_space<vmem>>, vector<112x64xf32>
    tpu.vector_store %arg18[%c0_146, %c128_147], %223 {strides = array<i32>} : memref<112x192xf32, #tpu.memory_space<vmem>>, vector<112x64xf32>,
    %c0_148 = arith.constant 0 : index
    %c0_149 = arith.constant 0 : index
    %225 = vector.load %arg18[%c0_148, %c0_149] : memref<112x192xf32, #tpu.memory_space<vmem>>, vector<112x192xf32>
    %c7_150 = arith.constant 7 : index
    %c0_151 = arith.constant 0 : index
    %c0_152 = arith.constant 0 : index
    %226 = vector.load %arg6[%c7_150, %c0_151, %c0_152] : memref<10x192x192xf32, #tpu.memory_space<vmem>>, vector<1x192x192xf32>
    %227 = vector.shape_cast %226 : vector<1x192x192xf32> to vector<192x192xf32>
    %cst_153 = arith.constant dense<0.000000e+00> : vector<112x192xf32>
    %228 = tpu.matmul %225, %227, %cst_153 {dimension_numbers = #tpu.dot_dimension_numbers<[1], [0], [0], [1], [0, 0, 1, 1], [], []>} : vector<112x192xf32>, vector<192x192xf32>, vector<112x192xf32> -> vector<112x192xf32>
    %229 = vector.extract_strided_slice %228 {offsets = [0, 0], sizes = [112, 64], strides = [1, 1]} : vector<112x192xf32> to vector<112x64xf32>
    %c7_i32_154 = arith.constant 7 : i32
    %230 = tpu.dynamic_rotate %229 by %c7_i32_154 dim 0 : vector<112x64xf32>, i32 -> vector<112x64xf32>
    %231 = vector.extract_strided_slice %228 {offsets = [0, 64], sizes = [112, 64], strides = [1, 1]} : vector<112x192xf32> to vector<112x64xf32>
    %232 = arith.addf %230, %231 : vector<112x64xf32>
    %233 = vector.extract_strided_slice %228 {offsets = [0, 128], sizes = [112, 64], strides = [1, 1]} : vector<112x192xf32> to vector<112x64xf32>
    %c105_i32_155 = arith.constant 105 : i32
    %234 = tpu.dynamic_rotate %233 by %c105_i32_155 dim 0 : vector<112x64xf32>, i32 -> vector<112x64xf32>
    %235 = arith.addf %232, %234 : vector<112x64xf32>
    %c8 = arith.constant 8 : index
    %c0_156 = arith.constant 0 : index
    %c0_157 = arith.constant 0 : index
    %236 = vector.load %arg7[%c8, %c0_156, %c0_157] : memref<11x1x64xf32, #tpu.memory_space<vmem>>, vector<1x1x64xf32>
    %237 = vector.shape_cast %236 : vector<1x1x64xf32> to vector<1x64xf32>
    %238 = vector.broadcast %237 : vector<1x64xf32> to vector<112x64xf32>
    %239 = arith.addf %235, %238 : vector<112x64xf32>
    %240 = arith.addf %239, %187 : vector<112x64xf32>
    %cst_158 = arith.constant 0.000000e+00 : f32
    %241 = vector.broadcast %cst_158 : f32 to vector<112x64xf32>
    %242 = arith.maximumf %240, %241 : vector<112x64xf32>
    %243 = vector.broadcast %5 : vector<112x1xf32> to vector<112x64xf32>
    %244 = arith.mulf %242, %243 : vector<112x64xf32>
    %c1_i32_159 = arith.constant 1 : i32
    %245 = tpu.dynamic_rotate %244 by %c1_i32_159 dim 0 : vector<112x64xf32>, i32 -> vector<112x64xf32>
    %246 = vector.broadcast %1 : vector<112x1xf32> to vector<112x64xf32>
    %247 = arith.mulf %245, %246 : vector<112x64xf32>
    %c0_160 = arith.constant 0 : index
    %c0_161 = arith.constant 0 : index
    %248 = vector.load %arg18[%c0_160, %c0_161] : memref<112x192xf32, #tpu.memory_space<vmem>>, vector<112x64xf32>
    tpu.vector_store %arg18[%c0_160, %c0_161], %247 {strides = array<i32>} : memref<112x192xf32, #tpu.memory_space<vmem>>, vector<112x64xf32>,
    %c0_162 = arith.constant 0 : index
    %c64_163 = arith.constant 64 : index
    %249 = vector.load %arg18[%c0_162, %c64_163] : memref<112x192xf32, #tpu.memory_space<vmem>>, vector<112x64xf32>
    tpu.vector_store %arg18[%c0_162, %c64_163], %244 {strides = array<i32>} : memref<112x192xf32, #tpu.memory_space<vmem>>, vector<112x64xf32>,
    %c111_i32_164 = arith.constant 111 : i32
    %250 = tpu.dynamic_rotate %244 by %c111_i32_164 dim 0 : vector<112x64xf32>, i32 -> vector<112x64xf32>
    %251 = vector.broadcast %3 : vector<112x1xf32> to vector<112x64xf32>
    %252 = arith.mulf %250, %251 : vector<112x64xf32>
    %c0_165 = arith.constant 0 : index
    %c128_166 = arith.constant 128 : index
    %253 = vector.load %arg18[%c0_165, %c128_166] : memref<112x192xf32, #tpu.memory_space<vmem>>, vector<112x64xf32>
    tpu.vector_store %arg18[%c0_165, %c128_166], %252 {strides = array<i32>} : memref<112x192xf32, #tpu.memory_space<vmem>>, vector<112x64xf32>,
    %c0_167 = arith.constant 0 : index
    %c0_168 = arith.constant 0 : index
    %254 = vector.load %arg18[%c0_167, %c0_168] : memref<112x192xf32, #tpu.memory_space<vmem>>, vector<112x192xf32>
    %c8_169 = arith.constant 8 : index
    %c0_170 = arith.constant 0 : index
    %c0_171 = arith.constant 0 : index
    %255 = vector.load %arg6[%c8_169, %c0_170, %c0_171] : memref<10x192x192xf32, #tpu.memory_space<vmem>>, vector<1x192x192xf32>
    %256 = vector.shape_cast %255 : vector<1x192x192xf32> to vector<192x192xf32>
    %cst_172 = arith.constant dense<0.000000e+00> : vector<112x192xf32>
    %257 = tpu.matmul %254, %256, %cst_172 {dimension_numbers = #tpu.dot_dimension_numbers<[1], [0], [0], [1], [0, 0, 1, 1], [], []>} : vector<112x192xf32>, vector<192x192xf32>, vector<112x192xf32> -> vector<112x192xf32>
    %258 = vector.extract_strided_slice %257 {offsets = [0, 0], sizes = [112, 64], strides = [1, 1]} : vector<112x192xf32> to vector<112x64xf32>
    %c7_i32_173 = arith.constant 7 : i32
    %259 = tpu.dynamic_rotate %258 by %c7_i32_173 dim 0 : vector<112x64xf32>, i32 -> vector<112x64xf32>
    %260 = vector.extract_strided_slice %257 {offsets = [0, 64], sizes = [112, 64], strides = [1, 1]} : vector<112x192xf32> to vector<112x64xf32>
    %261 = arith.addf %259, %260 : vector<112x64xf32>
    %262 = vector.extract_strided_slice %257 {offsets = [0, 128], sizes = [112, 64], strides = [1, 1]} : vector<112x192xf32> to vector<112x64xf32>
    %c105_i32_174 = arith.constant 105 : i32
    %263 = tpu.dynamic_rotate %262 by %c105_i32_174 dim 0 : vector<112x64xf32>, i32 -> vector<112x64xf32>
    %264 = arith.addf %261, %263 : vector<112x64xf32>
    %c9 = arith.constant 9 : index
    %c0_175 = arith.constant 0 : index
    %c0_176 = arith.constant 0 : index
    %265 = vector.load %arg7[%c9, %c0_175, %c0_176] : memref<11x1x64xf32, #tpu.memory_space<vmem>>, vector<1x1x64xf32>
    %266 = vector.shape_cast %265 : vector<1x1x64xf32> to vector<1x64xf32>
    %267 = vector.broadcast %266 : vector<1x64xf32> to vector<112x64xf32>
    %268 = arith.addf %264, %267 : vector<112x64xf32>
    %cst_177 = arith.constant 0.000000e+00 : f32
    %269 = vector.broadcast %cst_177 : f32 to vector<112x64xf32>
    %270 = arith.maximumf %268, %269 : vector<112x64xf32>
    %271 = vector.broadcast %5 : vector<112x1xf32> to vector<112x64xf32>
    %272 = arith.mulf %270, %271 : vector<112x64xf32>
    %c1_i32_178 = arith.constant 1 : i32
    %273 = tpu.dynamic_rotate %272 by %c1_i32_178 dim 0 : vector<112x64xf32>, i32 -> vector<112x64xf32>
    %274 = vector.broadcast %1 : vector<112x1xf32> to vector<112x64xf32>
    %275 = arith.mulf %273, %274 : vector<112x64xf32>
    %c0_179 = arith.constant 0 : index
    %c0_180 = arith.constant 0 : index
    %276 = vector.load %arg18[%c0_179, %c0_180] : memref<112x192xf32, #tpu.memory_space<vmem>>, vector<112x64xf32>
    tpu.vector_store %arg18[%c0_179, %c0_180], %275 {strides = array<i32>} : memref<112x192xf32, #tpu.memory_space<vmem>>, vector<112x64xf32>,
    %c0_181 = arith.constant 0 : index
    %c64_182 = arith.constant 64 : index
    %277 = vector.load %arg18[%c0_181, %c64_182] : memref<112x192xf32, #tpu.memory_space<vmem>>, vector<112x64xf32>
    tpu.vector_store %arg18[%c0_181, %c64_182], %272 {strides = array<i32>} : memref<112x192xf32, #tpu.memory_space<vmem>>, vector<112x64xf32>,
    %c111_i32_183 = arith.constant 111 : i32
    %278 = tpu.dynamic_rotate %272 by %c111_i32_183 dim 0 : vector<112x64xf32>, i32 -> vector<112x64xf32>
    %279 = vector.broadcast %3 : vector<112x1xf32> to vector<112x64xf32>
    %280 = arith.mulf %278, %279 : vector<112x64xf32>
    %c0_184 = arith.constant 0 : index
    %c128_185 = arith.constant 128 : index
    %281 = vector.load %arg18[%c0_184, %c128_185] : memref<112x192xf32, #tpu.memory_space<vmem>>, vector<112x64xf32>
    tpu.vector_store %arg18[%c0_184, %c128_185], %280 {strides = array<i32>} : memref<112x192xf32, #tpu.memory_space<vmem>>, vector<112x64xf32>,
    %c0_186 = arith.constant 0 : index
    %c0_187 = arith.constant 0 : index
    %282 = vector.load %arg18[%c0_186, %c0_187] : memref<112x192xf32, #tpu.memory_space<vmem>>, vector<112x192xf32>
    %c9_188 = arith.constant 9 : index
    %c0_189 = arith.constant 0 : index
    %c0_190 = arith.constant 0 : index
    %283 = vector.load %arg6[%c9_188, %c0_189, %c0_190] : memref<10x192x192xf32, #tpu.memory_space<vmem>>, vector<1x192x192xf32>
    %284 = vector.shape_cast %283 : vector<1x192x192xf32> to vector<192x192xf32>
    %cst_191 = arith.constant dense<0.000000e+00> : vector<112x192xf32>
    %285 = tpu.matmul %282, %284, %cst_191 {dimension_numbers = #tpu.dot_dimension_numbers<[1], [0], [0], [1], [0, 0, 1, 1], [], []>} : vector<112x192xf32>, vector<192x192xf32>, vector<112x192xf32> -> vector<112x192xf32>
    %286 = vector.extract_strided_slice %285 {offsets = [0, 0], sizes = [112, 64], strides = [1, 1]} : vector<112x192xf32> to vector<112x64xf32>
    %c7_i32_192 = arith.constant 7 : i32
    %287 = tpu.dynamic_rotate %286 by %c7_i32_192 dim 0 : vector<112x64xf32>, i32 -> vector<112x64xf32>
    %288 = vector.extract_strided_slice %285 {offsets = [0, 64], sizes = [112, 64], strides = [1, 1]} : vector<112x192xf32> to vector<112x64xf32>
    %289 = arith.addf %287, %288 : vector<112x64xf32>
    %290 = vector.extract_strided_slice %285 {offsets = [0, 128], sizes = [112, 64], strides = [1, 1]} : vector<112x192xf32> to vector<112x64xf32>
    %c105_i32_193 = arith.constant 105 : i32
    %291 = tpu.dynamic_rotate %290 by %c105_i32_193 dim 0 : vector<112x64xf32>, i32 -> vector<112x64xf32>
    %292 = arith.addf %289, %291 : vector<112x64xf32>
    %c10 = arith.constant 10 : index
    %c0_194 = arith.constant 0 : index
    %c0_195 = arith.constant 0 : index
    %293 = vector.load %arg7[%c10, %c0_194, %c0_195] : memref<11x1x64xf32, #tpu.memory_space<vmem>>, vector<1x1x64xf32>
    %294 = vector.shape_cast %293 : vector<1x1x64xf32> to vector<1x64xf32>
    %295 = vector.broadcast %294 : vector<1x64xf32> to vector<112x64xf32>
    %296 = arith.addf %292, %295 : vector<112x64xf32>
    %297 = arith.addf %296, %244 : vector<112x64xf32>
    %cst_196 = arith.constant 0.000000e+00 : f32
    %298 = vector.broadcast %cst_196 : f32 to vector<112x64xf32>
    %299 = arith.maximumf %297, %298 : vector<112x64xf32>
    %300 = vector.broadcast %5 : vector<112x1xf32> to vector<112x64xf32>
    %301 = arith.mulf %299, %300 : vector<112x64xf32>
    %c0_197 = arith.constant 0 : index
    %c0_198 = arith.constant 0 : index
    %302 = vector.load %arg8[%c0_197, %c0_198] : memref<64x8xf32, #tpu.memory_space<vmem>>, vector<64x8xf32>
    %cst_199 = arith.constant dense<0.000000e+00> : vector<112x8xf32>
    %303 = tpu.matmul %301, %302, %cst_199 {dimension_numbers = #tpu.dot_dimension_numbers<[1], [0], [0], [1], [0, 0, 1, 1], [], []>} : vector<112x64xf32>, vector<64x8xf32>, vector<112x8xf32> -> vector<112x8xf32>
    %c0_200 = arith.constant 0 : index
    %c0_201 = arith.constant 0 : index
    %304 = vector.load %arg9[%c0_200, %c0_201] : memref<1x8xf32, #tpu.memory_space<vmem>>, vector<1x8xf32>
    %305 = vector.broadcast %304 : vector<1x8xf32> to vector<112x8xf32>
    %306 = arith.addf %303, %305 : vector<112x8xf32>
    %cst_202 = arith.constant 0.000000e+00 : f32
    %307 = vector.broadcast %cst_202 : f32 to vector<112x8xf32>
    %308 = arith.maximumf %306, %307 : vector<112x8xf32>
    %309 = vector.extract_strided_slice %308 {offsets = [0, 0], sizes = [112, 1], strides = [1, 1]} : vector<112x8xf32> to vector<112x1xf32>
    %310 = vector.extract_strided_slice %308 {offsets = [0, 1], sizes = [112, 1], strides = [1, 1]} : vector<112x8xf32> to vector<112x1xf32>
    %311 = vector.extract_strided_slice %308 {offsets = [0, 2], sizes = [112, 1], strides = [1, 1]} : vector<112x8xf32> to vector<112x1xf32>
    %312 = tpu.iota {dimensions = array<i32: 1>} : vector<2x112xi32>
    %313 = tpu.iota {dimensions = array<i32: 0>} : vector<2x112xi32>
    %c56_i32 = arith.constant 56 : i32
    %314 = vector.broadcast %c56_i32 : i32 to vector<2x112xi32>
    %315 = arith.muli %313, %314 : vector<2x112xi32>
    %316 = arith.cmpi sge, %312, %315 : vector<2x112xi32>
    %c1_i32_203 = arith.constant 1 : i32
    %317 = vector.broadcast %c1_i32_203 : i32 to vector<2x112xi32>
    %318 = arith.addi %313, %317 : vector<2x112xi32>
    %c56_i32_204 = arith.constant 56 : i32
    %319 = vector.broadcast %c56_i32_204 : i32 to vector<2x112xi32>
    %320 = arith.muli %318, %319 : vector<2x112xi32>
    %321 = arith.cmpi slt, %312, %320 : vector<2x112xi32>
    %322 = arith.andi %316, %321 : vector<2x112xi1>
    %323 = arith.extui %322 : vector<2x112xi1> to vector<2x112xi32>
    %324 = arith.sitofp %323 : vector<2x112xi32> to vector<2x112xf32>
    %c0_205 = arith.constant 0 : index
    %c0_206 = arith.constant 0 : index
    %325 = vector.load %arg10[%c0_205, %c0_206] : memref<56x128xf32, #tpu.memory_space<vmem>>, vector<56x128xf32>
    %326 = tpu.concatenate %325, %325 in 0 : vector<56x128xf32>, vector<56x128xf32> -> vector<112x128xf32>
    %c0_207 = arith.constant 0 : index
    %c0_208 = arith.constant 0 : index
    %327 = vector.load %arg11[%c0_207, %c0_208] : memref<56x128xf32, #tpu.memory_space<vmem>>, vector<56x128xf32>
    %328 = tpu.concatenate %327, %327 in 0 : vector<56x128xf32>, vector<56x128xf32> -> vector<112x128xf32>
    %c0_209 = arith.constant 0 : index
    %c0_210 = arith.constant 0 : index
    %329 = vector.load %arg13[%c0_209, %c0_210] : memref<56x64xf32, #tpu.memory_space<vmem>>, vector<56x64xf32>
    %330 = tpu.concatenate %329, %329 in 0 : vector<56x64xf32>, vector<56x64xf32> -> vector<112x64xf32>
    %331 = vector.broadcast %309 : vector<112x1xf32> to vector<112x128xf32>
    %332 = arith.mulf %331, %326 : vector<112x128xf32>
    %333 = vector.broadcast %310 : vector<112x1xf32> to vector<112x128xf32>
    %334 = arith.mulf %333, %328 : vector<112x128xf32>
    %335 = arith.addf %332, %334 : vector<112x128xf32>
    %cst_211 = arith.constant dense<0.000000e+00> : vector<2x128xf32>
    %336 = tpu.matmul %324, %335, %cst_211 {dimension_numbers = #tpu.dot_dimension_numbers<[1], [0], [0], [1], [0, 0, 1, 1], [], []>} : vector<2x112xf32>, vector<112x128xf32>, vector<2x128xf32> -> vector<2x128xf32>
    %c0_212 = arith.constant 0 : index
    %c0_213 = arith.constant 0 : index
    %337 = vector.load %arg12[%c0_212, %c0_213] : memref<1x128xf32, #tpu.memory_space<vmem>>, vector<1x128xf32>
    %338 = vector.broadcast %337 : vector<1x128xf32> to vector<2x128xf32>
    %339 = arith.addf %336, %338 : vector<2x128xf32>
    %340 = vector.broadcast %311 : vector<112x1xf32> to vector<112x64xf32>
    %341 = arith.mulf %340, %330 : vector<112x64xf32>
    %cst_214 = arith.constant dense<0.000000e+00> : vector<2x64xf32>
    %342 = tpu.matmul %324, %341, %cst_214 {dimension_numbers = #tpu.dot_dimension_numbers<[1], [0], [0], [1], [0, 0, 1, 1], [], []>} : vector<2x112xf32>, vector<112x64xf32>, vector<2x64xf32> -> vector<2x64xf32>
    %c0_215 = arith.constant 0 : index
    %c0_216 = arith.constant 0 : index
    %343 = vector.load %arg14[%c0_215, %c0_216] : memref<1x64xf32, #tpu.memory_space<vmem>>, vector<1x64xf32>
    %344 = vector.broadcast %343 : vector<1x64xf32> to vector<2x64xf32>
    %345 = arith.addf %342, %344 : vector<2x64xf32>
    %cst_217 = arith.constant 0.000000e+00 : f32
    %346 = vector.broadcast %cst_217 : f32 to vector<2x64xf32>
    %347 = arith.maximumf %345, %346 : vector<2x64xf32>
    %c0_218 = arith.constant 0 : index
    %c0_219 = arith.constant 0 : index
    %348 = vector.load %arg15[%c0_218, %c0_219] : memref<64x128xf32, #tpu.memory_space<vmem>>, vector<64x128xf32>
    %cst_220 = arith.constant dense<0.000000e+00> : vector<2x128xf32>
    %349 = tpu.matmul %347, %348, %cst_220 {dimension_numbers = #tpu.dot_dimension_numbers<[1], [0], [0], [1], [0, 0, 1, 1], [], []>} : vector<2x64xf32>, vector<64x128xf32>, vector<2x128xf32> -> vector<2x128xf32>
    %c0_221 = arith.constant 0 : index
    %c0_222 = arith.constant 0 : index
    %350 = vector.load %arg16[%c0_221, %c0_222] : memref<1x128xf32, #tpu.memory_space<vmem>>, vector<1x128xf32>
    %351 = vector.broadcast %350 : vector<1x128xf32> to vector<2x128xf32>
    %352 = arith.addf %349, %351 : vector<2x128xf32>
    %353 = math.tanh %352 : vector<2x128xf32>
    %354 = arith.addf %339, %353 : vector<2x128xf32>
    %c0_223 = arith.constant 0 : index
    %c0_224 = arith.constant 0 : index
    %355 = vector.load %arg17[%c0_223, %c0_224] : memref<2x128xf32, #tpu.memory_space<vmem>>, vector<2x128xf32>
    tpu.vector_store %arg17[%c0_223, %c0_224], %354 {strides = array<i32>} : memref<2x128xf32, #tpu.memory_space<vmem>>, vector<2x128xf32>,
    return
  }
  func.func @transform_0(%arg0: i32) -> (i32, i32) {
    %c0_i32 = arith.constant 0 : i32
    %c0_i32_0 = arith.constant 0 : i32
    return %arg0, %c0_i32 : i32, i32
  }
  func.func @transform_1(%arg0: i32) -> (i32, i32) {
    %c0_i32 = arith.constant 0 : i32
    %c0_i32_0 = arith.constant 0 : i32
    %c0_i32_1 = arith.constant 0 : i32
    return %c0_i32, %c0_i32_0 : i32, i32
  }
  func.func @transform_2(%arg0: i32) -> (i32, i32) {
    %c0_i32 = arith.constant 0 : i32
    %c0_i32_0 = arith.constant 0 : i32
    %c0_i32_1 = arith.constant 0 : i32
    return %c0_i32, %c0_i32_0 : i32, i32
  }
  func.func @transform_3(%arg0: i32) -> (i32, i32) {
    %c0_i32 = arith.constant 0 : i32
    %c0_i32_0 = arith.constant 0 : i32
    %c0_i32_1 = arith.constant 0 : i32
    return %c0_i32, %c0_i32_0 : i32, i32
  }
  func.func @transform_4(%arg0: i32) -> (i32, i32) {
    %c0_i32 = arith.constant 0 : i32
    %c0_i32_0 = arith.constant 0 : i32
    %c0_i32_1 = arith.constant 0 : i32
    return %c0_i32, %c0_i32_0 : i32, i32
  }
  func.func @transform_5(%arg0: i32) -> (i32, i32, i32) {
    %c0_i32 = arith.constant 0 : i32
    %c0_i32_0 = arith.constant 0 : i32
    %c0_i32_1 = arith.constant 0 : i32
    %c0_i32_2 = arith.constant 0 : i32
    return %c0_i32, %c0_i32_0, %c0_i32_1 : i32, i32, i32
  }
  func.func @transform_6(%arg0: i32) -> (i32, i32, i32) {
    %c0_i32 = arith.constant 0 : i32
    %c0_i32_0 = arith.constant 0 : i32
    %c0_i32_1 = arith.constant 0 : i32
    %c0_i32_2 = arith.constant 0 : i32
    return %c0_i32, %c0_i32_0, %c0_i32_1 : i32, i32, i32
  }
  func.func @transform_7(%arg0: i32) -> (i32, i32) {
    %c0_i32 = arith.constant 0 : i32
    %c0_i32_0 = arith.constant 0 : i32
    %c0_i32_1 = arith.constant 0 : i32
    return %c0_i32, %c0_i32_0 : i32, i32
  }
  func.func @transform_8(%arg0: i32) -> (i32, i32) {
    %c0_i32 = arith.constant 0 : i32
    %c0_i32_0 = arith.constant 0 : i32
    %c0_i32_1 = arith.constant 0 : i32
    return %c0_i32, %c0_i32_0 : i32, i32
  }
  func.func @transform_9(%arg0: i32) -> (i32, i32) {
    %c0_i32 = arith.constant 0 : i32
    %c0_i32_0 = arith.constant 0 : i32
    %c0_i32_1 = arith.constant 0 : i32
    return %c0_i32, %c0_i32_0 : i32, i32
  }
  func.func @transform_10(%arg0: i32) -> (i32, i32) {
    %c0_i32 = arith.constant 0 : i32
    %c0_i32_0 = arith.constant 0 : i32
    %c0_i32_1 = arith.constant 0 : i32
    return %c0_i32, %c0_i32_0 : i32, i32
  }
  func.func @transform_11(%arg0: i32) -> (i32, i32) {
    %c0_i32 = arith.constant 0 : i32
    %c0_i32_0 = arith.constant 0 : i32
    %c0_i32_1 = arith.constant 0 : i32
    return %c0_i32, %c0_i32_0 : i32, i32
  }
  func.func @transform_12(%arg0: i32) -> (i32, i32) {
    %c0_i32 = arith.constant 0 : i32
    %c0_i32_0 = arith.constant 0 : i32
    %c0_i32_1 = arith.constant 0 : i32
    return %c0_i32, %c0_i32_0 : i32, i32
  }
  func.func @transform_13(%arg0: i32) -> (i32, i32) {
    %c0_i32 = arith.constant 0 : i32
    %c0_i32_0 = arith.constant 0 : i32
    %c0_i32_1 = arith.constant 0 : i32
    return %c0_i32, %c0_i32_0 : i32, i32
  }
  func.func @transform_14(%arg0: i32) -> (i32, i32) {
    %c0_i32 = arith.constant 0 : i32
    %c0_i32_0 = arith.constant 0 : i32
    %c0_i32_1 = arith.constant 0 : i32
    return %c0_i32, %c0_i32_0 : i32, i32
  }
  func.func @transform_15(%arg0: i32) -> (i32, i32) {
    %c0_i32 = arith.constant 0 : i32
    %c0_i32_0 = arith.constant 0 : i32
    %c0_i32_1 = arith.constant 0 : i32
    return %c0_i32, %c0_i32_0 : i32, i32
  }
  func.func @transform_16(%arg0: i32) -> (i32, i32) {
    %c0_i32 = arith.constant 0 : i32
    %c0_i32_0 = arith.constant 0 : i32
    return %arg0, %c0_i32 : i32, i32
  }
}

</mosaic_0001>

<bundles_post_ra>
// kernel: connectx_pallas.1
= control target key start
LH: loop header
LB: loop body
LE: loop exit
PB: predicated region body
PF: predicated region fallthrough
CT: control target
= control target key end

     0   :  { %v16164_v0 = vmov 0   ;;  %vm96_vm0 = vcmask 261120   ;;  %v16163_v63 = vlaneseq  ;;  %s8946_s19 = smov 64   ;;  %vm341_vm3 = vcmask 523264   ;;  %s16145_s4 = inlined_call_operand.vmem [shape: f32[32,64], index: 4, kind: input, shape index: {}]   ;;  %s16146_s3 = inlined_call_operand.vmem [shape: f32[56,1], index: 3, kind: input, shape index: {}]   ;;  %s16147_s2 = inlined_call_operand.vmem [shape: f32[56,1], index: 2, kind: input, shape index: {}]   ;;  %s16148_s0 = inlined_call_operand.vmem [shape: f32[112,32], index: 0, kind: input, shape index: {}]   ;;  %s16149_s6 = inlined_call_operand.vmem [shape: f32[11,1,64], index: 6, kind: input, shape index: {}]   ;;  %s16150_s1 = inlined_call_operand.vmem [shape: f32[56,1], index: 1, kind: input, shape index: {}]   ;;  %s16151_s5 = inlined_call_operand.vmem [shape: f32[10,192,192], index: 5, kind: input, shape index: {}]   ;;  %s16152_s7 = inlined_call_operand.vmem [shape: f32[64,8], index: 7, kind: input, shape index: {}]   ;;  %s16153_s8 = inlined_call_operand.vmem [shape: f32[1,8], index: 8, kind: input, shape index: {}]   ;;  %s16154_s12 = inlined_call_operand.vmem [shape: f32[56,64], index: 12, kind: input, shape index: {}]   ;;  %s16155_s13 = inlined_call_operand.vmem [shape: f32[1,64], index: 13, kind: input, shape index: {}]   ;;  %s16156_s11 = inlined_call_operand.vmem [shape: f32[1,128], index: 11, kind: input, shape index: {}]   ;;  %s16157_s9 = inlined_call_operand.vmem [shape: f32[56,128], index: 9, kind: input, shape index: {}]   ;;  %s16158_s10 = inlined_call_operand.vmem [shape: f32[56,128], index: 10, kind: input, shape index: {}]   ;;  %s16159_s14 = inlined_call_operand.vmem [shape: f32[64,128], index: 14, kind: input, shape index: {}]   ;;  %s16160_s15 = inlined_call_operand.vmem [shape: f32[1,128], index: 15, kind: input, shape index: {}]   ;;  %s16161_s16 = inlined_call_operand.vmem [shape: f32[2,128], index: 16, kind: output, shape index: {}]  }
   0x1   :  { %16319 = sst [smem:[#allocation22_spill]] %s16145_s4  ;;  %8908 = vset.pattern.permute.xlu0 %v16164_v0  ;;  %v67_v2 = vld [vmem:[%s16146_s3] sm:$0xff]  ;;  %8910 = vset.pattern.permute.xlu2 %v16164_v0  ;;  %v62_v5 = vld [vmem:[%s16147_s2 + $0x10] sm:$0xff]  ;;  %v83_v9 = vld [vmem:[%s16148_s0 + $0x48] sm:$0xff]  ;;  %vm412_vm4 = vcmask 1048064   ;;  %vm7976_vm8 = vcmask 916480  }
   0x2   :  { %s16320_s23 = sld [smem:[#allocation22_spill]]  ;;  %214 = vperm.xlu0 %8908, %v67_v2   ;;  %8909 = vset.pattern.permute.xlu1 %v16164_v0  ;;  %v69_v7 = vld [vmem:[%s16146_s3 + $0x10] sm:$0xff]  ;;  %v74_v8 = vld [vmem:[%s16148_s0] sm:$0xff]  ;;  %v68_v10 = vld [vmem:[%s16146_s3 + $0x8] sm:$0xff] }
   0x3   :  { %468 = vperm.xlu2 %8910, %v62_v5   ;;  %224 = vperm.xlu1 %8909, %v69_v7   ;;  %v71_v11 = vld [vmem:[%s16146_s3 + $0x20] sm:$0xff]  ;;  %v70_v12 = vld [vmem:[%s16146_s3 + $0x18] sm:$0xff]  ;;  %v75_v13 = vld [vmem:[%s16148_s0 + $0x8] sm:$0xff] }
   0x4   :  { %v84_v14 = vld [vmem:[%s16148_s0 + $0x50] sm:$0xff]  ;;  %v63_v16 = vld [vmem:[%s16147_s2 + $0x18] sm:$0xff]  ;;  %v53_v17 = vld [vmem:[%s16150_s1] sm:$0xff] }
   0x5   :  { %v73_v15 = vld [vmem:[%s16146_s3 + $0x30] sm:$0xff]  ;;  %v85_v19 = vld [vmem:[%s16148_s0 + $0x58] sm:$0xff]  ;;  %v72_v20 = vld [vmem:[%s16146_s3 + $0x28] sm:$0xff] }
   0x6   :  { %v76_v18 = vld [vmem:[%s16148_s0 + $0x10] sm:$0xff]  ;;  %v54_v21 = vld [vmem:[%s16150_s1 + $0x8] sm:$0xff]  ;;  %v77_v22 = vld [vmem:[%s16148_s0 + $0x18] sm:$0xff] }
   0x7   :  { %v86_v23 = vld [vmem:[%s16148_s0 + $0x60] sm:$0xff]  ;;  %v55_v25 = vld [vmem:[%s16150_s1 + $0x10] sm:$0xff]  ;;  %v87_v27 = vld [vmem:[%s16148_s0 + $0x68] sm:$0xff] }
   0x8   :  { %v91_v1 = vld [vmem:[%s16320_s23 + $0x18] sm:$0xff]  ;;  %v90_v3 = vld [vmem:[%s16320_s23 + $0x10] sm:$0xff]  ;;  %v89_v4 = vld [vmem:[%s16320_s23 + $0x8] sm:$0xff] }
   0x9   :  { %151 = vmatpush.msra.mxu0 %v91_v1  ;;  %8891 = vmatpush.msra.mxu1 %v91_v1  ;;  %v88_v6 = vld [vmem:[%s16320_s23] sm:$0xff]  ;;  %v65_v28 = vld [vmem:[%s16147_s2 + $0x28] sm:$0xff]  ;;  %v56_v29 = vld [vmem:[%s16150_s1 + $0x18] sm:$0xff] }
   0xa   :  { %219 = vperm.xlu0 %8908, %v68_v10   ;;  %v64_v24 = vld [vmem:[%s16147_s2 + $0x20] sm:$0xff]  ;;  %v79_v30 = vld [vmem:[%s16148_s0 + $0x28] sm:$0xff]  ;;  %v66_v31 = vld [vmem:[%s16147_s2 + $0x30] sm:$0xff] }
   0xb   :  { %152 = vmatpush.msra.mxu0 %v90_v3  ;;  %8892 = vmatpush.msra.mxu1 %v90_v3  ;;  %v78_v26 = vld [vmem:[%s16148_s0 + $0x20] sm:$0xff]  ;;  %v80_v33 = vld [vmem:[%s16148_s0 + $0x30] sm:$0xff]  ;;  %v58_v34 = vld [vmem:[%s16150_s1 + $0x28] sm:$0xff] }
   0xc   :  { %234 = vperm.xlu2 %8910, %v71_v11   ;;  %229 = vperm.xlu1 %8909, %v70_v12   ;;  %v57_v32 = vld [vmem:[%s16150_s1 + $0x20] sm:$0xff]  ;;  %v81_v35 = vld [vmem:[%s16148_s0 + $0x38] sm:$0xff]  ;;  %v59_v36 = vld [vmem:[%s16150_s1 + $0x30] sm:$0xff] }
   0xd   :  { %153 = vmatpush.msra.mxu0 %v89_v4  ;;  %8893 = vmatpush.msra.mxu1 %v89_v4  ;;  %v82_v37 = vld [vmem:[%s16148_s0 + $0x40] sm:$0xff]  ;;  %v593_v41 = vld [vmem:[%s16151_s5 + $0x170] sm:$0xff] }
   0xe   :  { %8895 = vmatpush.msra.mxu3 %v593_v41  ;;  %704 = vmatpush.msra.mxu2 %v593_v41  ;;  %v591_v43 = vld [vmem:[%s16151_s5 + $0x160] sm:$0xff]  ;;  %v589_v44 = vld [vmem:[%s16151_s5 + $0x150] sm:$0xff] }
   0xf   :  { %154 = vmatpush.msra.mxu0 %v88_v6  ;;  %8894 = vmatpush.msra.mxu1 %v88_v6  ;;  %v587_v45 = vld [vmem:[%s16151_s5 + $0x140] sm:$0xff]  ;;  %v585_v46 = vld [vmem:[%s16151_s5 + $0x130] sm:$0xff]  ;;  %v9223_v6 = vshrl.u32 %v16163_v63, 7 }
  0x10   :  { %8137 = vmatmul.msk.f32.vlgmr.msra.gmra.mxu0 %vm96_vm0, %v74_v8  ;;  %8146 = vmatmul.msk.f32.vlgmr.msra.gmra.mxu1 %vm96_vm0, %v83_v9  ;;  %v583_v49 = vld [vmem:[%s16151_s5 + $0x120] sm:$0xff]  ;;  %v581_v50 = vld [vmem:[%s16151_s5 + $0x110] sm:$0xff] }
  0x11   :  { %8896 = vmatpush.msra.mxu3 %v591_v43  ;;  %705 = vmatpush.msra.mxu2 %v591_v43  ;;  %v579_v51 = vld [vmem:[%s16151_s5 + $0x100] sm:$0xff]  ;;  %vm441_vm1 = vcmp.lt.s32.totalorder %v9223_v6, 7  ;;  %vm277_vm2 = vcmp.lt.s32.totalorder %v9223_v6, 1 }
  0x12   :  { %244 = vperm.xlu0 %8908, %v73_v15   ;;  %v9202_v52 = vld [vmem:[%s16149_s6] ss:$0 sm:$0xff] }
  0x13   :  { %8897 = vmatpush.msra.mxu3 %v589_v44  ;;  %706 = vmatpush.msra.mxu2 %v589_v44 }
  0x14   :  { %473 = vperm.xlu2 %8910, %v63_v16   ;;  %294 = vperm.xlu1 %8909, %v53_v17  }
  0x15   :  { %8898 = vmatpush.msra.mxu3 %v587_v45  ;;  %707 = vmatpush.msra.mxu2 %v587_v45 }
  0x17   :  { %8899 = vmatpush.msra.mxu3 %v585_v46  ;;  %708 = vmatpush.msra.mxu2 %v585_v46 }
  0x18   :  { %8138 = vmatmul.msk.f32.gmra.mxu0 %vm96_vm0, %v75_v13  ;;  %8147 = vmatmul.msk.f32.gmra.mxu1 %vm96_vm0, %v84_v14 }
  0x19   :  { %8900 = vmatpush.msra.mxu3 %v583_v49  ;;  %709 = vmatpush.msra.mxu2 %v583_v49 }
  0x1a   :  { %239 = vperm.xlu0 %8908, %v72_v20  }
  0x1b   :  { %8901 = vmatpush.msra.mxu3 %v581_v50  ;;  %710 = vmatpush.msra.mxu2 %v581_v50 }
  0x1c   :  { %299 = vperm.xlu2 %8910, %v54_v21  }
  0x1d   :  { %8902 = vmatpush.msra.mxu3 %v579_v51  ;;  %711 = vmatpush.msra.mxu2 %v579_v51 }
  0x20   :  { %8139 = vmatmul.msk.f32.gmra.mxu0 %vm96_vm0, %v76_v18  ;;  %8148 = vmatmul.msk.f32.gmra.mxu1 %vm96_vm0, %v85_v19 }
  0x22   :  { %478 = vperm.xlu0 %8908, %v64_v24  }
  0x24   :  { %304 = vperm.xlu2 %8910, %v55_v25  }
  0x28   :  { %8140 = vmatmul.msk.f32.gmra.mxu0 %vm96_vm0, %v77_v22  ;;  %8149 = vmatmul.msk.f32.gmra.mxu1 %vm96_vm0, %v86_v23 }
  0x2a   :  { %483 = vperm.xlu0 %8908, %v65_v28  }
  0x2c   :  { %309 = vperm.xlu2 %8910, %v56_v29  }
  0x30   :  { %8141 = vmatmul.msk.f32.gmra.mxu0 %vm96_vm0, %v78_v26  ;;  %8150 = vmatmul.msk.f32.gmra.mxu1 %vm96_vm0, %v87_v27 }
  0x32   :  { %488 = vperm.xlu0 %8908, %v66_v31  }
  0x34   :  { %314 = vperm.xlu2 %8910, %v57_v32  }
  0x38   :  { %8142 = vmatmul.msk.f32.gmra.mxu0 %vm96_vm0, %v79_v30 }
  0x3c   :  { %319 = vperm.xlu2 %8910, %v58_v34  }
  0x40   :  { %8143 = vmatmul.msk.f32.gmra.mxu0 %vm96_vm0, %v80_v33 }
  0x44   :  { %324 = vperm.xlu2 %8910, %v59_v36  }
  0x48   :  { %8144 = vmatmul.msk.f32.gmra.mxu0 %vm96_vm0, %v81_v35 }
  0x50   :  { %8145 = vmatmul.msk.f32.gmra.mxu0 %vm96_vm0, %v82_v37 }
  0x5d   :  { %v9163_v38 = vpop.permute.xlu2 %468 }
  0x66   :  { %v9165_v39 = vpop.permute.xlu2 %234 }
  0x67   :  { %16321 = vst [vmem:[#allocation3_spill] sm:$0xff] %v9165_v39 }
  0x6e   :  { %v9167_v40 = vpop.permute.xlu2 %473 }
  0x74   :  { %v9172_v42 = vpop.permute.xlu0 %214 }
  0x75   :  { %v9204_v53 = vpop.permute.xlu1 %224 }
  0x76   :  { %v9188_v48 = vpop.permute.xlu2 %299 }
  0x7c   :  { %v9186_v47 = vpop.permute.xlu0 %219 }
  0x7e   :  { %v9210_v59 = vpop.permute.xlu2 %304  ;;  %v9225_v7 = vpop.permute.xlu1 %229 }
  0x84   :  { %v9206_v56 = vpop.permute.xlu0 %244 }
  0x86   :  { %v9229_v11 = vpop.permute.xlu2 %309 }
  0x8c   :  { %v9227_v8 = vpop.permute.xlu0 %239 }
  0x8d   :  { %v156_v54 = vpop.f32.mrf.mxu0  ;;  %v183_v55 = vpop.f32.mrf.mxu1 }
  0x8e   :  { %v157_v57 = vadd.f32 %v9202_v52, %v156_v54  ;;  %v184_v58 = vadd.f32 %v9202_v52, %v183_v55  ;;  %v9273_v35 = vpop.permute.xlu2 %314 }
  0x90   :  { %v198_v60 = vmax.f32 %v157_v57, 0.0  ;;  %v207_v62 = vmax.f32 %v184_v58, 0.0 }
  0x92   :  { %v9213_v61 = vmul.f32 %v9172_v42, %v198_v60  ;;  %v9220_v5 = vmul.f32 %v9204_v53, %v207_v62 }
  0x94   :  { %16322 = vst [vmem:[#allocation4_spill] sm:$0xff] %v9213_v61  ;;  %370 = vrot.lane.b32.xlu1 %v9213_v61, %s8946_s19  ;;  %v436_v14 = vrot.slane %v9220_v5, 1  ;;  %v270_v15 = vrot.slane %v9220_v5, 7  ;;  %v261_v21 = vrot.slane %v9213_v61, 7  ;;  %v9265_v32 = vpop.permute.xlu0 %478 }
  0x95   :  { %v159_v1 = vpop.f32.mrf.mxu0  ;;  %v186_v2 = vpop.f32.mrf.mxu1  ;;  %16323 = vst [vmem:[#allocation5_spill] sm:$0xff] %v9220_v5 }
  0x96   :  { %v160_v3 = vadd.f32 %v9202_v52, %v159_v1  ;;  %v187_v4 = vadd.f32 %v9202_v52, %v186_v2 }
  0x98   :  { %v199_v9 = vmax.f32 %v160_v3, 0.0  ;;  %v208_v10 = vmax.f32 %v187_v4, 0.0 }
  0x9a   :  { %v9232_v12 = vmul.f32 %v9186_v47, %v199_v9  ;;  %v9235_v13 = vmul.f32 %v9225_v7, %v208_v10 }
  0x9c   :  { %16324 = vst [vmem:[#allocation6_spill] sm:$0xff] %v9232_v12  ;;  %372 = vrot.lane.b32.xlu1 %v9232_v12, %s8946_s19  ;;  %v437_v16 = vrot.slane %v9235_v13, 1  ;;  %v262_v17 = vrot.slane %v9232_v12, 7  ;;  %v271_v18 = vrot.slane %v9235_v13, 7  ;;  %v9307_v4 = vpop.permute.xlu0 %483 }
  0x9d   :  { %16325 = vst [vmem:[#allocation7_spill] sm:$0xff] %v9235_v13  ;;  %v162_v19 = vpop.f32.mrf.mxu0  ;;  %v189_v20 = vpop.f32.mrf.mxu1 }
  0x9e   :  { %v163_v22 = vadd.f32 %v9202_v52, %v162_v19  ;;  %v190_v23 = vadd.f32 %v9202_v52, %v189_v20  ;;  %v445_v24 = vsel %vm441_vm1, %v436_v14, %v437_v16  ;;  %v290_v26 = vsel %vm277_vm2, %v261_v21, %v262_v17 }
  0x9f   :  { %v500_v25 = vmul.f32 %v9163_v38, %v445_v24  ;;  %v281_v27 = vsel %vm277_vm2, %v270_v15, %v271_v18  ;;  %v328_v30 = vmul.f32 %v9188_v48, %v290_v26 }
  0xa0   :  { %v200_v28 = vmax.f32 %v163_v22, 0.0  ;;  %v209_v29 = vmax.f32 %v190_v23, 0.0  ;;  %v337_v31 = vmul.f32 %v9229_v11, %v281_v27 }
  0xa1   :  { %514 = vst.msk [vmem:[#allocation2 + $0x98] sm:$0xff] %vm341_vm3, %v500_v25 }
  0xa2   :  { %v9268_v33 = vmul.f32 %v9204_v53, %v200_v28  ;;  %v9271_v34 = vmul.f32 %v9165_v39, %v209_v29  ;;  %343 = vst.msk [vmem:[#allocation2 + $0x10] sm:$0xff] %vm341_vm3, %v328_v30 }
  0xa3   :  { %352 = vst.msk [vmem:[#allocation2 + $0xa0] sm:$0xff] %vm341_vm3, %v337_v31 }
  0xa4   :  { %16326 = vst [vmem:[#allocation8_spill] sm:$0xff] %v9268_v33  ;;  %v438_v36 = vrot.slane %v9271_v34, 1  ;;  %374 = vrot.lane.b32.xlu1 %v9268_v33, %s8946_s19  ;;  %v263_v37 = vrot.slane %v9268_v33, 7  ;;  %v272_v41 = vrot.slane %v9271_v34, 7  ;;  %v429_v3 = vrot.slane %v9268_v33, 1 }
  0xa5   :  { %16327 = vst [vmem:[#allocation9_spill] sm:$0xff] %v9271_v34  ;;  %v165_v43 = vpop.f32.mrf.mxu0  ;;  %v192_v44 = vpop.f32.mrf.mxu1 }
  0xa6   :  { %v444_v45 = vsel %vm441_vm1, %v437_v16, %v438_v36  ;;  %v166_v46 = vadd.f32 %v9202_v52, %v165_v43  ;;  %v193_v49 = vadd.f32 %v9202_v52, %v192_v44  ;;  %v289_v51 = vsel %vm277_vm2, %v262_v17, %v263_v37  ;;  %v9313_v16 = vpop.permute.xlu2 %319 }
  0xa7   :  { %v501_v50 = vmul.f32 %v9167_v40, %v444_v45  ;;  %v280_v54 = vsel %vm277_vm2, %v271_v18, %v272_v41  ;;  %v329_v60 = vmul.f32 %v9210_v59, %v289_v51 }
  0xa8   :  { %v201_v55 = vmax.f32 %v166_v46, 0.0  ;;  %v210_v57 = vmax.f32 %v193_v49, 0.0  ;;  %v9291_v58 = vld [vmem:[#allocation2 + $0x98] sm:$0xff]  ;;  %v338_v62 = vmul.f32 %v9273_v35, %v280_v54  ;;  %v427_v46 = vrot.slane %v9213_v61, 1 }
  0xa9   :  { %515 = vst.msk [vmem:[#allocation2 + $0xa8] sm:$0xff] %vm341_vm3, %v501_v50  ;;  %8160 = vmatmul.msk.f32.vlgmr.msra.gmra.mxu3 %vm341_vm3, %v9291_v58 }
  0xaa   :  { %v9299_v1 = vmul.f32 %v9225_v7, %v201_v55  ;;  %v9302_v2 = vmul.f32 %v9227_v8, %v210_v57  ;;  %344 = vst.msk [vmem:[#allocation2 + $0x20] sm:$0xff] %vm341_vm3, %v329_v60  ;;  %v9357_v57 = vpop.permute.xlu0 %488 }
  0xab   :  { %353 = vst.msk [vmem:[#allocation2 + $0xb0] sm:$0xff] %vm341_vm3, %v338_v62 }
  0xac   :  { %16328 = vst [vmem:[#allocation10_spill] sm:$0xff] %v9299_v1  ;;  %v430_v9 = vrot.slane %v9299_v1, 1  ;;  %v439_v10 = vrot.slane %v9302_v2, 1  ;;  %376 = vrot.lane.b32.xlu1 %v9299_v1, %s8946_s19  ;;  %v264_v17 = vrot.slane %v9299_v1, 7  ;;  %v273_v18 = vrot.slane %v9302_v2, 7 }
  0xad   :  { %16329 = vst [vmem:[#allocation11_spill] sm:$0xff] %v9302_v2  ;;  %v168_v19 = vpop.f32.mrf.mxu0  ;;  %v195_v20 = vpop.f32.mrf.mxu1 }
  0xae   :  { %v452_v22 = vsel %vm441_vm1, %v429_v3, %v430_v9  ;;  %v443_v23 = vsel %vm441_vm1, %v438_v36, %v439_v10  ;;  %v169_v24 = vadd.f32 %v9202_v52, %v168_v19  ;;  %v196_v25 = vadd.f32 %v9202_v52, %v195_v20 }
  0xaf   :  { %v493_v26 = vmul.f32 %v9163_v38, %v452_v22  ;;  %v502_v27 = vmul.f32 %v9265_v32, %v443_v23  ;;  %v288_v28 = vsel %vm277_vm2, %v263_v37, %v264_v17  ;;  %v279_v29 = vsel %vm277_vm2, %v272_v41, %v273_v18  ;;  %v60_v37 = vld [vmem:[%s16147_s2] sm:$0xff]  ;;  %v9368_v22 = vpop.permute.xlu1 %294 }
  0xb0   :  { %v202_v30 = vmax.f32 %v169_v24, 0.0  ;;  %v211_v31 = vmax.f32 %v196_v25, 0.0  ;;  %v9331_v43 = vld [vmem:[#allocation2 + $0xa8] sm:$0xff]  ;;  %v330_v36 = vmul.f32 %v9229_v11, %v288_v28  ;;  %v339_v44 = vmul.f32 %v9313_v16, %v279_v29 }
  0xb1   :  { %507 = vst.msk [vmem:[#allocation2 + $0x28] sm:$0xff] %vm341_vm3, %v493_v26  ;;  %8161 = vmatmul.msk.f32.gmra.mxu3 %vm341_vm3, %v9331_v43  ;;  %v9373_v26 = vpop.permute.xlu2 %324 }
  0xb2   :  { %516 = vst.msk [vmem:[#allocation2 + $0xb8] sm:$0xff] %vm341_vm3, %v502_v27  ;;  %v9343_v41 = vmul.f32 %v9165_v39, %v202_v30  ;;  %v9346_v45 = vmul.f32 %v9206_v56, %v211_v31  ;;  %v61_v31 = vld [vmem:[%s16147_s2 + $0x8] sm:$0xff] }
  0xb3   :  { %345 = vst.msk [vmem:[#allocation2 + $0x30] sm:$0xff] %vm341_vm3, %v330_v36 }
  0xb4   :  { %16330 = vst [vmem:[#allocation12_spill] sm:$0xff] %v9343_v41  ;;  %v431_v49 = vrot.slane %v9343_v41, 1  ;;  %v440_v50 = vrot.slane %v9346_v45, 1  ;;  %378 = vrot.lane.b32.xlu0 %v9343_v41, %s8946_s19  ;;  %458 = vperm.xlu1 %8909, %v60_v37   ;;  %v274_v51 = vrot.slane %v9346_v45, 7  ;;  %v265_v54 = vrot.slane %v9343_v41, 7 }
  0xb5   :  { %16331 = vst [vmem:[#allocation13_spill] sm:$0xff] %v9346_v45  ;;  %v171_v55 = vpop.f32.mrf.mxu0 }
  0xb6   :  { %354 = vst.msk [vmem:[#allocation2 + $0xc0] sm:$0xff] %vm341_vm3, %v339_v44  ;;  %v451_v60 = vsel %vm441_vm1, %v430_v9, %v431_v49  ;;  %v442_v62 = vsel %vm441_vm1, %v439_v10, %v440_v50  ;;  %v455_v19 = vsel %vm441_vm1, %v440_v50, %v427_v46  ;;  %v172_v20 = vadd.f32 %v9202_v52, %v171_v55  ;;  %v577_v50 = vld [vmem:[%s16151_s5 + $0xf0] sm:$0xff]  ;;  %v575_v55 = vld [vmem:[%s16151_s5 + $0xe0] sm:$0xff] }
  0xb7   :  { %v494_v23 = vmul.f32 %v9167_v40, %v451_v60  ;;  %v503_v24 = vmul.f32 %v9307_v4, %v442_v62  ;;  %v504_v25 = vmul.f32 %v9357_v57, %v455_v19  ;;  %v291_v9 = vsel %vm277_vm2, %v274_v51, %v261_v21  ;;  %637 = vmatpush.msrb.mxu1 %v577_v50  ;;  %v576_v19 = vld [vmem:[%s16151_s5 + $0xe8] sm:$0xff]  ;;  %v567_v50 = vld [vmem:[%s16151_s5 + $0xa0] sm:$0xff] }
  0xb8   :  { %v203_v10 = vmax.f32 %v172_v20, 0.0  ;;  %v327_v27 = vmul.f32 %v9368_v22, %v291_v9  ;;  %v287_v28 = vsel %vm277_vm2, %v264_v17, %v265_v54  ;;  %v278_v29 = vsel %vm277_vm2, %v273_v18, %v274_v51  ;;  %v578_v51 = vld [vmem:[%s16151_s5 + $0xf8] sm:$0xff] }
  0xb9   :  { %508 = vst.msk [vmem:[#allocation2 + $0x38] sm:$0xff] %vm341_vm3, %v494_v23  ;;  %v9385_v30 = vld [vmem:[#allocation2 + $0xb8] sm:$0xff]  ;;  %v331_v36 = vmul.f32 %v9273_v35, %v287_v28  ;;  %v340_v17 = vmul.f32 %v9373_v26, %v278_v29  ;;  %755 = vmatpush.msrb.mxu3 %v578_v51  ;;  %638 = vmatpush.msrb.mxu1 %v575_v55  ;;  %v572_v28 = vld [vmem:[%s16151_s5 + $0xc8] sm:$0xff]  ;;  %v569_v29 = vld [vmem:[%s16151_s5 + $0xb0] sm:$0xff] }
  0xba   :  { %517 = vst.msk [vmem:[#allocation2 + $0xc8] sm:$0xff] %vm341_vm3, %v503_v24  ;;  %v9393_v21 = vmul.f32 %v9227_v8, %v203_v10  ;;  %8162 = vmatmul.msk.f32.gmra.mxu3 %vm341_vm3, %v9385_v30  ;;  %v573_v24 = vld [vmem:[%s16151_s5 + $0xd0] sm:$0xff]  ;;  %v574_v9 = vld [vmem:[%s16151_s5 + $0xd8] sm:$0xff]  ;;  %v571_v10 = vld [vmem:[%s16151_s5 + $0xc0] sm:$0xff] }
  0xbb   :  { %518 = vst.msk [vmem:[#allocation2 + $0xd8] sm:$0xff] %vm341_vm3, %v504_v25  ;;  %756 = vmatpush.msrb.mxu3 %v576_v19  ;;  %639 = vmatpush.msrb.mxu1 %v573_v24  ;;  %v566_v24 = vld [vmem:[%s16151_s5 + $0x98] sm:$0xff] }
  0xbc   :  { %16332 = vst [vmem:[#allocation14_spill] sm:$0xff] %v9393_v21  ;;  %v432_v18 = vrot.slane %v9393_v21, 1  ;;  %380 = vrot.lane.b32.xlu0 %v9393_v21, %s8946_s19  ;;  %463 = vperm.xlu1 %8909, %v61_v31   ;;  %v266_v44 = vrot.slane %v9393_v21, 7 }
  0xbd   :  { %342 = vst.msk [vmem:[#allocation2] sm:$0xff] %vm341_vm3, %v327_v27  ;;  %v174_v37 = vpop.f32.mrf.mxu0  ;;  %757 = vmatpush.msrb.mxu3 %v574_v9  ;;  %640 = vmatpush.msrb.mxu1 %v571_v10  ;;  %v564_v9 = vld [vmem:[%s16151_s5 + $0x88] sm:$0xff] }
  0xbe   :  { %346 = vst.msk [vmem:[#allocation2 + $0x40] sm:$0xff] %vm341_vm3, %v331_v36  ;;  %v450_v60 = vsel %vm441_vm1, %v431_v49, %v432_v18  ;;  %v175_v62 = vadd.f32 %v9202_v52, %v174_v37  ;;  %v286_v20 = vsel %vm277_vm2, %v265_v54, %v266_v44  ;;  %v570_v36 = vld [vmem:[%s16151_s5 + $0xb8] sm:$0xff] }
  0xbf   :  { %355 = vst.msk [vmem:[#allocation2 + $0xd0] sm:$0xff] %vm341_vm3, %v340_v17  ;;  %v495_v23 = vmul.f32 %v9265_v32, %v450_v60  ;;  %v332_v49 = vmul.f32 %v9313_v16, %v286_v20  ;;  %758 = vmatpush.msrb.mxu3 %v572_v28  ;;  %641 = vmatpush.msrb.mxu1 %v569_v29  ;;  %v568_v60 = vld [vmem:[%s16151_s5 + $0xa8] sm:$0xff]  ;;  %v565_v20 = vld [vmem:[%s16151_s5 + $0x90] sm:$0xff]  ;;  %v562_v29 = vld [vmem:[%s16151_s5 + $0x78] sm:$0xff] }
  0xc0   :  { %v204_v25 = vmax.f32 %v175_v62, 0.0  ;;  %v561_v28 = vld [vmem:[%s16151_s5 + $0x70] sm:$0xff] }
  0xc1   :  { %509 = vst.msk [vmem:[#allocation2 + $0x48] sm:$0xff] %vm341_vm3, %v495_v23  ;;  %v9432_v54 = vld [vmem:[#allocation2 + $0xc8] sm:$0xff]  ;;  %759 = vmatpush.msrb.mxu3 %v570_v36  ;;  %642 = vmatpush.msrb.mxu1 %v567_v50 }
  0xc2   :  { %v9438_v27 = vmul.f32 %v9206_v56, %v204_v25  ;;  %8163 = vmatmul.msk.f32.gmra.mxu3 %vm341_vm3, %v9432_v54  ;;  %347 = vst.msk [vmem:[#allocation2 + $0x50] sm:$0xff] %vm341_vm3, %v332_v49  ;;  %v9476_v49 = vld [vmem:[#allocation2 + $0xd8] sm:$0xff]  ;;  %v563_v25 = vld [vmem:[%s16151_s5 + $0x80] sm:$0xff] }
  0xc3   :  { %760 = vmatpush.msrb.mxu3 %v568_v60  ;;  %643 = vmatpush.msrb.mxu1 %v565_v20  ;;  %v560_v60 = vld [vmem:[%s16151_s5 + $0x68] sm:$0xff] }
  0xc4   :  { %16333 = vst [vmem:[#allocation15_spill] sm:$0xff] %v9438_v27  ;;  %v433_v31 = vrot.slane %v9438_v27, 1  ;;  %382 = vrot.lane.b32.xlu0 %v9438_v27, %s8946_s19  ;;  %v267_v17 = vrot.slane %v9438_v27, 7 }
  0xc5   :  { %v177_v37 = vpop.f32.mrf.mxu0  ;;  %761 = vmatpush.msrb.mxu3 %v566_v24  ;;  %644 = vmatpush.msrb.mxu1 %v563_v25  ;;  %v556_v24 = vld [vmem:[%s16151_s5 + $0x48] sm:$0xff] }
  0xc6   :  { %v449_v51 = vsel %vm441_vm1, %v432_v18, %v433_v31  ;;  %v178_v55 = vadd.f32 %v9202_v52, %v177_v37  ;;  %v285_v62 = vsel %vm277_vm2, %v266_v44, %v267_v17 }
  0xc7   :  { %v496_v19 = vmul.f32 %v9307_v4, %v449_v51  ;;  %v333_v23 = vmul.f32 %v9373_v26, %v285_v62  ;;  %762 = vmatpush.msrb.mxu3 %v564_v9  ;;  %645 = vmatpush.msrb.mxu1 %v561_v28 }
  0xc8   :  { %v205_v18 = vmax.f32 %v178_v55, 0.0  ;;  %v559_v55 = vld [vmem:[%s16151_s5 + $0x60] sm:$0xff] }
  0xc9   :  { %510 = vst.msk [vmem:[#allocation2 + $0x58] sm:$0xff] %vm341_vm3, %v496_v19  ;;  %763 = vmatpush.msrb.mxu3 %v562_v29  ;;  %646 = vmatpush.msrb.mxu1 %v559_v55  ;;  %v549_v55 = vld [vmem:[%s16151_s5 + $0x10] sm:$0xff] }
  0xca   :  { %v9479_v44 = vmul.f32 %v9172_v42, %v205_v18  ;;  %8164 = vmatmul.msk.f32.gmra.mxu3 %vm341_vm3, %v9476_v49  ;;  %348 = vst.msk [vmem:[#allocation2 + $0x60] sm:$0xff] %vm341_vm3, %v333_v23  ;;  %v558_v23 = vld [vmem:[%s16151_s5 + $0x58] sm:$0xff]  ;;  %v555_v18 = vld [vmem:[%s16151_s5 + $0x40] sm:$0xff] }
  0xcb   :  { %764 = vmatpush.msrb.mxu3 %v560_v60  ;;  %v550_v60 = vld [vmem:[%s16151_s5 + $0x18] sm:$0xff] }
  0xcc   :  { %16334 = vst [vmem:[#allocation16_spill] sm:$0xff] %v9479_v44  ;;  %v434_v10 = vrot.slane %v9479_v44, 1  ;;  %388 = vrot.lane.b32.xlu0 %v9220_v5, %s8946_s19  ;;  %384 = vrot.lane.b32.xlu1 %v9479_v44, %s8946_s19  ;;  %v268_v36 = vrot.slane %v9479_v44, 7 }
  0xcd   :  { %v180_v37 = vpop.f32.mrf.mxu0  ;;  %765 = vmatpush.msrb.mxu3 %v558_v23 }
  0xce   :  { %v448_v50 = vsel %vm441_vm1, %v433_v31, %v434_v10  ;;  %v181_v51 = vadd.f32 %v9202_v52, %v180_v37  ;;  %v284_v62 = vsel %vm277_vm2, %v267_v17, %v268_v36  ;;  %v557_v52 = vld [vmem:[%s16151_s5 + $0x50] sm:$0xff] }
  0xcf   :  { %v497_v19 = vmul.f32 %v9357_v57, %v448_v50  ;;  %v334_v20 = vmul.f32 %v9368_v22, %v284_v62  ;;  %647 = vmatpush.msrb.mxu1 %v557_v52  ;;  %766 = vmatpush.msrb.mxu3 %v556_v24  ;;  %v551_v50 = vld [vmem:[%s16151_s5 + $0x20] sm:$0xff]  ;;  %v590_v52 = vld [vmem:[%s16151_s5 + $0x158] sm:$0xff] }
  0xd0   :  { %v206_v31 = vmax.f32 %v181_v51, 0.0  ;;  %v552_v51 = vld [vmem:[%s16151_s5 + $0x28] sm:$0xff]  ;;  %v547_v62 = vld [vmem:[%s16151_s5] sm:$0xff]  ;;  %v586_v24 = vld [vmem:[%s16151_s5 + $0x138] sm:$0xff] }
  0xd1   :  { %511 = vst.msk [vmem:[#allocation2 + $0x68] sm:$0xff] %vm341_vm3, %v497_v19  ;;  %648 = vmatpush.msrb.mxu1 %v555_v18  ;;  %v548_v19 = vld [vmem:[%s16151_s5 + $0x8] sm:$0xff] }
  0xd2   :  { %v9525_v17 = vmul.f32 %v9186_v47, %v206_v31  ;;  %349 = vst.msk [vmem:[#allocation2 + $0x70] sm:$0xff] %vm341_vm3, %v334_v20  ;;  %v594_v20 = vld [vmem:[%s16151_s5 + $0x178] sm:$0xff]  ;;  %v592_v31 = vld [vmem:[%s16151_s5 + $0x168] sm:$0xff] }
  0xd3   :  { %822 = vmatpush.msrb.mxu0 %v594_v20  ;;  %v588_v18 = vld [vmem:[%s16151_s5 + $0x148] sm:$0xff] }
  0xd4   :  { %16335 = vst [vmem:[#allocation17_spill] sm:$0xff] %v9525_v17  ;;  %386 = vrot.lane.b32.xlu2 %v9525_v17, %s8946_s19  ;;  %394 = vrot.lane.b32.xlu0 %v9302_v2, %s8946_s19  ;;  %v269_v25 = vrot.slane %v9525_v17, 7 }
  0xd5   :  { %390 = vrot.lane.b32.xlu1 %v9235_v13, %s8946_s19  ;;  %823 = vmatpush.msrb.mxu0 %v592_v31 }
  0xd6   :  { %v283_v9 = vsel %vm277_vm2, %v268_v36, %v269_v25  ;;  %v282_v28 = vsel %vm277_vm2, %v269_v25, %v270_v15  ;;  %v553_v36 = vld [vmem:[%s16151_s5 + $0x30] sm:$0xff]  ;;  %v554_v15 = vld [vmem:[%s16151_s5 + $0x38] sm:$0xff]  ;;  %v584_v25 = vld [vmem:[%s16151_s5 + $0x128] sm:$0xff] }
  0xd7   :  { %v335_v29 = vmul.f32 %v9188_v48, %v283_v9  ;;  %v336_v37 = vmul.f32 %v9210_v59, %v282_v28  ;;  %649 = vmatpush.msrb.mxu1 %v553_v36  ;;  %767 = vmatpush.msrb.mxu3 %v554_v15  ;;  %v582_v9 = vld [vmem:[%s16151_s5 + $0x118] sm:$0xff] }
  0xd8   :  { %824 = vmatpush.msrb.mxu0 %v590_v52 }
  0xd9   :  { %350 = vst.msk [vmem:[#allocation2 + $0x80] sm:$0xff] %vm341_vm3, %v335_v29  ;;  %650 = vmatpush.msrb.mxu1 %v551_v50  ;;  %768 = vmatpush.msrb.mxu3 %v552_v51 }
  0xda   :  { %351 = vst.msk [vmem:[#allocation2 + $0x90] sm:$0xff] %vm341_vm3, %v336_v37  ;;  %825 = vmatpush.msrb.mxu0 %v588_v18  ;;  %v580_v37 = vld [vmem:[%s16151_s5 + $0x108] sm:$0xff] }
  0xdb   :  { %651 = vmatpush.msrb.mxu1 %v549_v55  ;;  %769 = vmatpush.msrb.mxu3 %v550_v60  ;;  %v428_v55 = vrot.slane %v9232_v12, 1  ;;  %v435_v60 = vrot.slane %v9525_v17, 1 }
  0xdc   :  { %392 = vrot.lane.b32.xlu2 %v9271_v34, %s8946_s19  ;;  %826 = vmatpush.msrb.mxu0 %v586_v24 }
  0xdd   :  { %396 = vrot.lane.b32.xlu1 %v9346_v45, %s8946_s19  ;;  %652 = vmatpush.msrb.mxu1 %v547_v62  ;;  %v454_v62 = vsel %vm441_vm1, %v427_v46, %v428_v55 }
  0xde   :  { %770 = vmatpush.msrb.mxu3 %v548_v19  ;;  %827 = vmatpush.msrb.mxu0 %v584_v25  ;;  %v447_v19 = vsel %vm441_vm1, %v434_v10, %v435_v60  ;;  %v453_v10 = vsel %vm441_vm1, %v428_v55, %v429_v3 }
  0xe0   :  { %828 = vmatpush.msrb.mxu0 %v582_v9  ;;  %v446_v9 = vsel %vm441_vm1, %v435_v60, %v436_v14 }
  0xe2   :  { %829 = vmatpush.msrb.mxu0 %v580_v37 }
 0x106   :  { %v371_v23 = vpop.permute.xlu1 %370 }
 0x107   :  { %413 = vst.msk [vmem:[#allocation2] sm:$0xff] %vm412_vm4, %v371_v23 }
 0x10e   :  { %v373_v28 = vpop.permute.xlu1 %372  ;;  %v519_v29 = vld [vmem:[#allocation2] sm:$0xff] }
 0x10f   :  { %414 = vst.msk [vmem:[#allocation2 + $0x10] sm:$0xff] %vm412_vm4, %v373_v28  ;;  %653 = vmatmul.f32.vlgmr.msrb.gmra.mxu1 %v519_v29  ;;  %771 = vmatmul.f32.vlgmr.msrb.gmra.mxu3 %v519_v29 }
 0x116   :  { %v375_v36 = vpop.permute.xlu1 %374  ;;  %v521_v15 = vld [vmem:[#allocation2 + $0x10] sm:$0xff] }
 0x117   :  { %415 = vst.msk [vmem:[#allocation2 + $0x20] sm:$0xff] %vm412_vm4, %v375_v36  ;;  %656 = vmatmul.f32.gmra.mxu1 %v521_v15  ;;  %774 = vmatmul.f32.gmra.mxu3 %v521_v15 }
 0x11e   :  { %v377_v50 = vpop.permute.xlu1 %376  ;;  %v523_v51 = vld [vmem:[#allocation2 + $0x20] sm:$0xff] }
 0x11f   :  { %416 = vst.msk [vmem:[#allocation2 + $0x30] sm:$0xff] %vm412_vm4, %v377_v50  ;;  %659 = vmatmul.f32.gmra.mxu1 %v523_v51  ;;  %777 = vmatmul.f32.gmra.mxu3 %v523_v51 }
 0x126   :  { %v379_v20 = vpop.permute.xlu0 %378  ;;  %v9617_v31 = vpop.permute.xlu1 %458  ;;  %v525_v52 = vld [vmem:[#allocation2 + $0x30] sm:$0xff] }
 0x127   :  { %417 = vst.msk [vmem:[#allocation2 + $0x40] sm:$0xff] %vm412_vm4, %v379_v20  ;;  %662 = vmatmul.f32.gmra.mxu1 %v525_v52  ;;  %780 = vmatmul.f32.gmra.mxu3 %v525_v52  ;;  %v491_v23 = vmul.f32 %v9617_v31, %v454_v62  ;;  %v498_v18 = vmul.f32 %v9617_v31, %v447_v19  ;;  %v524_v62 = vld [vmem:[#allocation2 + $0x28] sm:$0xff] }
 0x129   :  { %505 = vst.msk [vmem:[#allocation2 + $0x8] sm:$0xff] %vm341_vm3, %v491_v23  ;;  %v526_v23 = vld [vmem:[#allocation2 + $0x38] sm:$0xff] }
 0x12a   :  { %512 = vst.msk [vmem:[#allocation2 + $0x78] sm:$0xff] %vm341_vm3, %v498_v18 }
 0x12e   :  { %v387_v46 = vpop.permute.xlu2 %386  ;;  %v381_v24 = vpop.permute.xlu0 %380  ;;  %v527_v25 = vld [vmem:[#allocation2 + $0x40] sm:$0xff] }
 0x12f   :  { %421 = vst.msk [vmem:[#allocation2 + $0x80] sm:$0xff] %vm412_vm4, %v387_v46  ;;  %v9633_v28 = vpop.permute.xlu1 %463  ;;  %665 = vmatmul.f32.gmra.mxu1 %v527_v25  ;;  %783 = vmatmul.f32.gmra.mxu3 %v527_v25 }
 0x130   :  { %418 = vst.msk [vmem:[#allocation2 + $0x50] sm:$0xff] %vm412_vm4, %v381_v24  ;;  %v520_v29 = vld [vmem:[#allocation2 + $0x8] sm:$0xff]  ;;  %v492_v37 = vmul.f32 %v9633_v28, %v453_v10  ;;  %v499_v36 = vmul.f32 %v9633_v28, %v446_v9  ;;  %v530_v10 = vld [vmem:[#allocation2 + $0x58] sm:$0xff] }
 0x131   :  { %8151 = vmatmul.msk.f32.vlgmr.msra.gmra.mxu2 %vm341_vm3, %v520_v29  ;;  %8165 = vmatmul.msk.f32.vlgmr.msrb.gmra.mxu0 %vm341_vm3, %v520_v29  ;;  %v528_v24 = vld [vmem:[#allocation2 + $0x48] sm:$0xff] }
 0x132   :  { %506 = vst.msk [vmem:[#allocation2 + $0x18] sm:$0xff] %vm341_vm3, %v492_v37  ;;  %v532_v29 = vld [vmem:[#allocation2 + $0x68] sm:$0xff] }
 0x133   :  { %513 = vst.msk [vmem:[#allocation2 + $0x88] sm:$0xff] %vm341_vm3, %v499_v36  ;;  %v534_v36 = vld [vmem:[#allocation2 + $0x78] sm:$0xff] }
 0x136   :  { %v393_v14 = vpop.permute.xlu2 %392  ;;  %v383_v3 = vpop.permute.xlu0 %382  ;;  %v535_v46 = vld [vmem:[#allocation2 + $0x80] sm:$0xff] }
 0x137   :  { %424 = vst.msk [vmem:[#allocation2 + $0xb0] sm:$0xff] %vm412_vm4, %v393_v14  ;;  %v529_v15 = vld [vmem:[#allocation2 + $0x50] sm:$0xff] }
 0x138   :  { %419 = vst.msk [vmem:[#allocation2 + $0x60] sm:$0xff] %vm412_vm4, %v383_v3  ;;  %668 = vmatmul.f32.gmra.mxu1 %v529_v15  ;;  %786 = vmatmul.f32.gmra.mxu3 %v529_v15 }
 0x139   :  { %v522_v50 = vld [vmem:[#allocation2 + $0x18] sm:$0xff] }
 0x13a   :  { %8152 = vmatmul.msk.f32.gmra.mxu2 %vm341_vm3, %v522_v50  ;;  %8166 = vmatmul.msk.f32.gmra.mxu0 %vm341_vm3, %v522_v50  ;;  %v536_v3 = vld [vmem:[#allocation2 + $0x88] sm:$0xff] }
 0x13e   :  { %v389_v51 = vpop.permute.xlu0 %388  ;;  %v385_v55 = vpop.permute.xlu1 %384  ;;  %v541_v37 = vld [vmem:[#allocation2 + $0xb0] sm:$0xff] }
 0x13f   :  { %422 = vst.msk [vmem:[#allocation2 + $0x90] sm:$0xff] %vm412_vm4, %v389_v51  ;;  %v531_v60 = vld [vmem:[#allocation2 + $0x60] sm:$0xff] }
 0x140   :  { %420 = vst.msk [vmem:[#allocation2 + $0x70] sm:$0xff] %vm412_vm4, %v385_v55  ;;  %671 = vmatmul.f32.gmra.mxu1 %v531_v60  ;;  %789 = vmatmul.f32.gmra.mxu3 %v531_v60 }
 0x142   :  { %8153 = vmatmul.msk.f32.gmra.mxu2 %vm341_vm3, %v524_v62  ;;  %8167 = vmatmul.msk.f32.gmra.mxu0 %vm341_vm3, %v524_v62 }
 0x146   :  { %v395_v19 = vpop.permute.xlu0 %394  ;;  %v537_v25 = vld [vmem:[#allocation2 + $0x90] sm:$0xff] }
 0x147   :  { %425 = vst.msk [vmem:[#allocation2 + $0xc0] sm:$0xff] %vm412_vm4, %v395_v19  ;;  %v391_v20 = vpop.permute.xlu1 %390  ;;  %v533_v52 = vld [vmem:[#allocation2 + $0x70] sm:$0xff]  ;;  %v9675_v19 = vpop.f32.mrf.mxu3 }
 0x148   :  { %423 = vst.msk [vmem:[#allocation2 + $0xa0] sm:$0xff] %vm412_vm4, %v391_v20  ;;  %674 = vmatmul.f32.gmra.mxu1 %v533_v52  ;;  %792 = vmatmul.f32.gmra.mxu3 %v533_v52 }
 0x14a   :  { %8154 = vmatmul.msk.f32.gmra.mxu2 %vm341_vm3, %v526_v23  ;;  %8168 = vmatmul.msk.f32.gmra.mxu0 %vm341_vm3, %v526_v23 }
 0x14e   :  { %v543_v14 = vld [vmem:[#allocation2 + $0xc0] sm:$0xff] }
 0x14f   :  { %v397_v18 = vpop.permute.xlu1 %396  ;;  %v539_v9 = vld [vmem:[#allocation2 + $0xa0] sm:$0xff] }
 0x150   :  { %426 = vst.msk [vmem:[#allocation2 + $0xd0] sm:$0xff] %vm412_vm4, %v397_v18  ;;  %677 = vmatmul.f32.gmra.mxu1 %v535_v46  ;;  %795 = vmatmul.f32.gmra.mxu3 %v535_v46 }
 0x152   :  { %8155 = vmatmul.msk.f32.gmra.mxu2 %vm341_vm3, %v528_v24  ;;  %8169 = vmatmul.msk.f32.gmra.mxu0 %vm341_vm3, %v528_v24 }
 0x157   :  { %v545_v15 = vld [vmem:[#allocation2 + $0xd0] sm:$0xff] }
 0x158   :  { %680 = vmatmul.f32.gmra.mxu1 %v537_v25  ;;  %798 = vmatmul.f32.gmra.mxu3 %v537_v25 }
 0x15a   :  { %8156 = vmatmul.msk.f32.gmra.mxu2 %vm341_vm3, %v530_v10  ;;  %8170 = vmatmul.msk.f32.gmra.mxu0 %vm341_vm3, %v530_v10 }
 0x160   :  { %683 = vmatmul.f32.gmra.mxu1 %v539_v9  ;;  %801 = vmatmul.f32.gmra.mxu3 %v539_v9 }
 0x162   :  { %8157 = vmatmul.msk.f32.gmra.mxu2 %vm341_vm3, %v532_v29  ;;  %8171 = vmatmul.msk.f32.gmra.mxu0 %vm341_vm3, %v532_v29 }
 0x168   :  { %686 = vmatmul.f32.gmra.mxu1 %v541_v37  ;;  %804 = vmatmul.f32.gmra.mxu3 %v541_v37 }
 0x16a   :  { %8158 = vmatmul.msk.f32.gmra.mxu2 %vm341_vm3, %v534_v36  ;;  %8172 = vmatmul.msk.f32.gmra.mxu0 %vm341_vm3, %v534_v36 }
 0x170   :  { %689 = vmatmul.f32.gmra.mxu1 %v543_v14  ;;  %807 = vmatmul.f32.gmra.mxu3 %v543_v14 }
 0x172   :  { %8159 = vmatmul.msk.f32.gmra.mxu2 %vm341_vm3, %v536_v3  ;;  %8173 = vmatmul.msk.f32.gmra.mxu0 %vm341_vm3, %v536_v3 }
 0x178   :  { %692 = vmatmul.f32.gmra.mxu1 %v545_v15  ;;  %810 = vmatmul.f32.gmra.mxu3 %v545_v15 }
 0x17a   :  { %8174 = vmatmul.msk.f32.gmra.mxu0 %vm341_vm3, %v9291_v58 }
 0x182   :  { %8175 = vmatmul.msk.f32.gmra.mxu0 %vm341_vm3, %v9331_v43  ;;  %v9681_v43 = vpop.f32.mrf.mxu3 }
 0x18a   :  { %8176 = vmatmul.msk.f32.gmra.mxu0 %vm341_vm3, %v9385_v30  ;;  %v9691_v24 = vpop.f32.mrf.mxu3 }
 0x18c   :  { %v654_v50 = vpop.f32.mrf.mxu1 }
 0x192   :  { %8177 = vmatmul.msk.f32.gmra.mxu0 %vm341_vm3, %v9432_v54  ;;  %v9698_v3 = vpop.f32.mrf.mxu3 }
 0x194   :  { %v657_v51 = vpop.f32.mrf.mxu1 }
 0x19a   :  { %8178 = vmatmul.msk.f32.gmra.mxu0 %vm341_vm3, %v9476_v49 }
 0x19c   :  { %v660_v55 = vpop.f32.mrf.mxu1 }
 0x1a4   :  { %v663_v60 = vpop.f32.mrf.mxu1 }
 0x1ac   :  { %v666_v62 = vpop.f32.mrf.mxu1 }
 0x1b4   :  { %v713_v58 = vpop.f32.mrf.mxu2 }
 0x1b5   :  { %v669_v20 = vpop.f32.mrf.mxu1  ;;  %v9677_v52 = vadd.f32 %v713_v58, %v654_v50 }
 0x1b7   :  { %915 = vrot.lane.b32.xlu2 %v9677_v52, %s8946_s19  ;;  %v16166_v18 = vrot.slane %v9677_v52, 1 }
 0x1bd   :  { %v672_v30 = vpop.f32.mrf.mxu1  ;;  %v716_v54 = vpop.f32.mrf.mxu2 }
 0x1be   :  { %v717_v23 = vadd.f32 %v716_v54, %v657_v51 }
 0x1c0   :  { %v874_v49 = vrot.slane %v717_v23, 1  ;;  %917 = vrot.lane.b32.xlu0 %v717_v23, %s8946_s19  ;;  %v752_v23 = vpop.f32.mrf.mxu3 }
 0x1c2   :  { %v9689_v46 = vsel %vm441_vm1, %v16166_v18, %v874_v49 }
 0x1c5   :  { %v675_v25 = vpop.f32.mrf.mxu1  ;;  %v719_v10 = vpop.f32.mrf.mxu2 }
 0x1c6   :  { %v720_v9 = vadd.f32 %v719_v10, %v660_v55 }
 0x1c8   :  { %v875_v29 = vrot.slane %v720_v9, 1  ;;  %919 = vrot.lane.b32.xlu1 %v720_v9, %s8946_s19  ;;  %v772_v63 = vpop.f32.mrf.mxu3 }
 0x1ca   :  { %v9696_v37 = vsel %vm441_vm1, %v874_v49, %v875_v29 }
 0x1cd   :  { %v678_v36 = vpop.f32.mrf.mxu1  ;;  %v722_v14 = vpop.f32.mrf.mxu2 }
 0x1ce   :  { %v723_v15 = vadd.f32 %v722_v14, %v663_v60 }
 0x1d0   :  { %v876_v50 = vrot.slane %v723_v15, 1  ;;  %921 = vrot.lane.b32.xlu2 %v723_v15, %s8946_s19  ;;  %v831_v15 = vpop.f32.mrf.mxu0  ;;  %v775_v34 = vpop.f32.mrf.mxu3 }
 0x1d2   :  { %v9703_v51 = vsel %vm441_vm1, %v875_v29, %v876_v50 }
 0x1d5   :  { %v9705_v55 = vpop.f32.mrf.mxu1  ;;  %v725_v58 = vpop.f32.mrf.mxu2 }
 0x1d6   :  { %v726_v54 = vadd.f32 %v725_v58, %v666_v62 }
 0x1d8   :  { %v877_v10 = vrot.slane %v726_v54, 1  ;;  %923 = vrot.lane.b32.xlu0 %v726_v54, %s8946_s19 }
 0x1da   :  { %v9710_v49 = vsel %vm441_vm1, %v876_v50, %v877_v10  ;;  %v834_v50 = vpop.f32.mrf.mxu0 }
 0x1db   :  { %v9750_v44 = vadd.f32 %v834_v50, %v775_v34 }
 0x1dd   :  { %v9712_v60 = vpop.f32.mrf.mxu1  ;;  %v728_v9 = vpop.f32.mrf.mxu2 }
 0x1de   :  { %v729_v14 = vadd.f32 %v728_v9, %v669_v20 }
 0x1e0   :  { %v878_v29 = vrot.slane %v729_v14, 1  ;;  %925 = vrot.lane.b32.xlu2 %v729_v14, %s8946_s19 }
 0x1e2   :  { %v9717_v62 = vsel %vm441_vm1, %v877_v10, %v878_v29 }
 0x1e5   :  { %v9719_v58 = vpop.f32.mrf.mxu1  ;;  %v731_v54 = vpop.f32.mrf.mxu2 }
 0x1e6   :  { %v732_v0 = vadd.f32 %v731_v54, %v672_v30  ;;  %v9733_v30 = vpop.f32.mrf.mxu0 }
 0x1e8   :  { %v879_v18 = vrot.slane %v732_v0, 1  ;;  %927 = vrot.lane.b32.xlu0 %v732_v0, %s8946_s19  ;;  %v9735_v0 = vpop.f32.mrf.mxu3 }
 0x1ea   :  { %v9724_v20 = vsel %vm441_vm1, %v878_v29, %v879_v18 }
 0x1ed   :  { %v9726_v9 = vpop.f32.mrf.mxu1  ;;  %v734_v14 = vpop.f32.mrf.mxu2 }
 0x1ee   :  { %v735_v17 = vadd.f32 %v734_v14, %v675_v25 }
 0x1f0   :  { %v880_v2 = vrot.slane %v735_v17, 1  ;;  %929 = vrot.lane.b32.xlu2 %v735_v17, %s8946_s19  ;;  %v781_v25 = vpop.f32.mrf.mxu3 }
 0x1f2   :  { %v9731_v10 = vsel %vm441_vm1, %v879_v18, %v880_v2  ;;  %v840_v18 = vpop.f32.mrf.mxu0 }
 0x1f5   :  { %v693_v54 = vpop.f32.mrf.mxu1  ;;  %v737_v45 = vpop.f32.mrf.mxu2 }
 0x1f6   :  { %v9737_v13 = vadd.f32 %v752_v23, %v693_v54  ;;  %v9739_v29 = vadd.f32 %v737_v45, %v678_v36  ;;  %v9752_v23 = vadd.f32 %v831_v15, %v772_v63  ;;  %v16182_v36 = vrot.slane %v9750_v44, 7  ;;  %v9768_v63 = vld [vmem:[%s16149_s6 + $0x1] ss:$0 sm:$0xff] }
 0x1f8   :  { %16336 = vst [vmem:[#allocation18_spill] sm:$0xff] %v9737_v13  ;;  %v16177_v5 = vrot.slane %v9739_v29, 1  ;;  %941 = vrot.lane.b32.xlu1 %v9737_v13, %s8946_s19  ;;  %v784_v61 = vpop.f32.mrf.mxu3  ;;  %v16180_v45 = vrot.slane %v9737_v13, 1  ;;  %v16181_v54 = vrot.slane %v9752_v23, 7 }
 0x1f9   :  { %16337 = vst [vmem:[#allocation19_spill] sm:$0xff] %v9739_v29 }
 0x1fa   :  { %v9748_v17 = vsel %vm441_vm1, %v880_v2, %v16177_v5  ;;  %v843_v14 = vpop.f32.mrf.mxu0  ;;  %16339 = vst [vmem:[#allocation21_spill] sm:$0xff] %v9752_v23  ;;  %v16340_v2 = vrot.slane %v9677_v52, 1  ;;  %v997_v52 = vsel %vm277_vm2, %v16181_v54, %v16182_v36  ;;  %v8219_v54 = vld [vmem:[%s16151_s5 + $0x2b8] sm:$0xff] }
 0x1fb   :  { %16338 = vst [vmem:[#allocation20_spill] sm:$0xff] %v9748_v17 }
 0x1fc   :  { %v900_v5 = vsel %vm441_vm1, %v16180_v45, %v16340_v2 }
 0x200   :  { %v9770_v15 = vpop.f32.mrf.mxu3 }
 0x202   :  { %v9757_v27 = vpop.f32.mrf.mxu0 }
 0x20a   :  { %v9782_v45 = vpop.f32.mrf.mxu0 }
 0x211   :  { %v916_v21 = vpop.permute.xlu2 %915 }
 0x212   :  { %v957_v34 = vadd.f32 %v916_v21, %v900_v5  ;;  %v9786_v5 = vpop.f32.mrf.mxu3  ;;  %v8226_v21 = vld [vmem:[%s16151_s5 + $0x2f0] sm:$0xff]  ;;  %v9822_v36 = vpop.f32.mrf.mxu0 }
 0x213   :  { %1428 = vmatpush.msra.mxu1 %v8226_v21  ;;  %v8220_v21 = vld [vmem:[%s16151_s5 + $0x2c0] sm:$0xff] }
 0x214   :  { %v999_v50 = vadd.f32 %v997_v52, %v957_v34  ;;  %v8227_v34 = vld [vmem:[%s16151_s5 + $0x2f8] sm:$0xff]  ;;  %v8222_v52 = vld [vmem:[%s16151_s5 + $0x2d0] sm:$0xff] }
 0x215   :  { %1546 = vmatpush.msra.mxu0 %v8227_v34  ;;  %v8221_v34 = vld [vmem:[%s16151_s5 + $0x2c8] sm:$0xff] }
 0x216   :  { %v1018_v41 = vadd.f32 %v9768_v63, %v999_v50  ;;  %v8223_v50 = vld [vmem:[%s16151_s5 + $0x2d8] sm:$0xff] }
 0x218   :  { %v1032_v1 = vmax.f32 %v1018_v41, 0.0  ;;  %v8225_v41 = vld [vmem:[%s16151_s5 + $0x2e8] sm:$0xff] }
 0x219   :  { %1547 = vmatpush.msra.mxu0 %v8225_v41  ;;  %v8218_v41 = vld [vmem:[%s16151_s5 + $0x2b0] sm:$0xff] }
 0x21a   :  { %v9780_v2 = vmul.f32 %v1032_v1, %v9172_v42  ;;  %v8224_v1 = vld [vmem:[%s16151_s5 + $0x2e0] sm:$0xff] }
 0x21b   :  { %1429 = vmatpush.msra.mxu1 %v8224_v1  ;;  %1548 = vmatpush.msra.mxu0 %v8223_v50  ;;  %v9812_v1 = vadd.f32 %v843_v14, %v784_v61  ;;  %v8216_v61 = vld [vmem:[%s16151_s5 + $0x2a0] sm:$0xff]  ;;  %v8217_v14 = vld [vmem:[%s16151_s5 + $0x2a8] sm:$0xff]  ;;  %v9830_v50 = vpop.f32.mrf.mxu3 }
 0x21c   :  { %1130 = vrot.lane.b32.xlu1 %v9780_v2, %s8946_s19 }
 0x21d   :  { %1430 = vmatpush.msra.mxu1 %v8222_v52  ;;  %1549 = vmatpush.msra.mxu0 %v8221_v34  ;;  %v841_v52 = vadd.f32 %v840_v18, %v781_v25  ;;  %v975_v12 = vrot.slane %v9812_v1, 7  ;;  %v8214_v18 = vld [vmem:[%s16151_s5 + $0x290] sm:$0xff]  ;;  %v8215_v25 = vld [vmem:[%s16151_s5 + $0x298] sm:$0xff] }
 0x21f   :  { %1431 = vmatpush.msra.mxu1 %v8220_v21  ;;  %1550 = vmatpush.msra.mxu0 %v8219_v54  ;;  %v974_v33 = vrot.slane %v841_v52, 7  ;;  %v8212_v54 = vld [vmem:[%s16151_s5 + $0x280] sm:$0xff]  ;;  %v838_v52 = vadd.f32 %v9733_v30, %v9735_v0  ;;  %v16341_v30 = vrot.slane %v9750_v44, 7 }
 0x221   :  { %1432 = vmatpush.msra.mxu1 %v8218_v41  ;;  %1551 = vmatpush.msra.mxu0 %v8217_v14  ;;  %v8213_v41 = vld [vmem:[%s16151_s5 + $0x288] sm:$0xff] }
 0x223   :  { %1433 = vmatpush.msra.mxu1 %v8216_v61  ;;  %1552 = vmatpush.msra.mxu0 %v8215_v25  ;;  %v994_v61 = vsel %vm277_vm2, %v974_v33, %v975_v12  ;;  %v796_v25 = vpop.f32.mrf.mxu3 }
 0x224   :  { %931 = vrot.lane.b32.xlu1 %v9739_v29, %s8946_s19 }
 0x225   :  { %1434 = vmatpush.msra.mxu1 %v8214_v18  ;;  %1553 = vmatpush.msra.mxu0 %v8213_v41  ;;  %v973_v18 = vrot.slane %v838_v52, 7 }
 0x227   :  { %1435 = vmatpush.msra.mxu1 %v8212_v54  ;;  %v996_v0 = vsel %vm277_vm2, %v16341_v30, %v973_v18  ;;  %v1186_v30 = vrot.slane %v9780_v2, 1 }
 0x22a   :  { %v922_v21 = vpop.permute.xlu2 %921 }
 0x22b   :  { %v960_v34 = vadd.f32 %v922_v21, %v9703_v51  ;;  %v855_v51 = vpop.f32.mrf.mxu0 }
 0x22d   :  { %v1002_v14 = vadd.f32 %v994_v61, %v960_v34 }
 0x22f   :  { %v1021_v21 = vadd.f32 %v9768_v63, %v1002_v14  ;;  %v9866_v14 = vpop.f32.mrf.mxu3 }
 0x231   :  { %v1035_v29 = vmax.f32 %v1021_v21, 0.0  ;;  %v995_v21 = vsel %vm277_vm2, %v973_v18, %v974_v33 }
 0x232   :  { %v918_v17 = vpop.permute.xlu0 %917 }
 0x233   :  { %v958_v23 = vadd.f32 %v918_v17, %v9689_v46  ;;  %v9855_v13 = vmul.f32 %v1035_v29, %v9225_v7  ;;  %v9864_v41 = vpop.f32.mrf.mxu0  ;;  %v9870_v46 = vadd.f32 %v9691_v24, %v9719_v58  ;;  %v9876_v17 = vadd.f32 %v9782_v45, %v9786_v5 }
 0x234   :  { %v847_v24 = vadd.f32 %v9757_v27, %v9770_v15 }
 0x235   :  { %v1000_v34 = vadd.f32 %v996_v0, %v958_v23  ;;  %1136 = vrot.lane.b32.xlu1 %v9855_v13, %s8946_s19  ;;  %v1060_v23 = vrot.slane %v9780_v2, 7  ;;  %v977_v5 = vrot.slane %v9876_v17, 7  ;;  %v8207_v17 = vld [vmem:[%s16151_s5 + $0x258] sm:$0xff] }
 0x237   :  { %v1019_v54 = vadd.f32 %v9768_v63, %v1000_v34 }
 0x239   :  { %v1033_v52 = vmax.f32 %v1019_v54, 0.0 }
 0x23a   :  { %v920_v61 = vpop.permute.xlu1 %919 }
 0x23b   :  { %v959_v44 = vadd.f32 %v920_v61, %v9696_v37  ;;  %v1047_v29 = vmul.f32 %v1033_v52, %v9186_v47  ;;  %v926_v37 = vpop.permute.xlu2 %925  ;;  %v976_v61 = vrot.slane %v847_v24, 7  ;;  %v9916_v24 = vpop.f32.mrf.mxu3 }
 0x23c   :  { %v962_v27 = vadd.f32 %v926_v37, %v9717_v62 }
 0x23d   :  { %v1001_v0 = vadd.f32 %v995_v21, %v959_v44  ;;  %v1061_v34 = vrot.slane %v1047_v29, 7  ;;  %v1187_v54 = vrot.slane %v1047_v29, 1  ;;  %1132 = vrot.lane.b32.xlu0 %v1047_v29, %s8946_s19  ;;  %937 = vrot.lane.b32.xlu1 %v9870_v46, %s8946_s19  ;;  %v9903_v44 = vadd.f32 %v9675_v19, %v9705_v55  ;;  %v9905_v29 = vpop.f32.mrf.mxu0 }
 0x23e   :  { %v992_v62 = vsel %vm277_vm2, %v976_v61, %v977_v5  ;;  %v1189_v19 = vrot.slane %v9855_v13, 1 }
 0x23f   :  { %v1020_v58 = vadd.f32 %v9768_v63, %v1001_v0  ;;  %v1212_v33 = vsel %vm441_vm1, %v1186_v30, %v1187_v54  ;;  %v1086_v45 = vsel %vm277_vm2, %v1060_v23, %v1061_v34  ;;  %v9909_v0 = vadd.f32 %v855_v51, %v796_v25 }
 0x240   :  { %v1214_v18 = vmul.f32 %v1212_v33, %v9617_v31  ;;  %v1089_v52 = vmul.f32 %v1086_v45, %v9188_v48  ;;  %v1063_v33 = vrot.slane %v9855_v13, 7  ;;  %v1004_v55 = vadd.f32 %v992_v62, %v962_v27 }
 0x241   :  { %v1034_v15 = vmax.f32 %v1020_v58, 0.0  ;;  %v9924_v51 = vadd.f32 %v9822_v36, %v9830_v50  ;;  %v979_v36 = vrot.slane %v9909_v0, 7 }
 0x242   :  { %1228 = vst.msk [vmem:[#allocation2 + $0x8] sm:$0xff] %vm341_vm3, %v1214_v18  ;;  %v1023_v50 = vadd.f32 %v9768_v63, %v1004_v55 }
 0x243   :  { %v1048_v21 = vmul.f32 %v1034_v15, %v9204_v53  ;;  %1103 = vst.msk [vmem:[#allocation2 + $0x10] sm:$0xff] %vm341_vm3, %v1089_v52 }
 0x245   :  { %v1062_v37 = vrot.slane %v1048_v21, 7  ;;  %v1188_v58 = vrot.slane %v1048_v21, 1  ;;  %1134 = vrot.lane.b32.xlu2 %v1048_v21, %s8946_s19  ;;  %933 = vrot.lane.b32.xlu0 %v9903_v44, %s8946_s19 }
 0x247   :  { %v1210_v25 = vsel %vm441_vm1, %v1188_v58, %v1189_v19  ;;  %v1211_v45 = vsel %vm441_vm1, %v1187_v54, %v1188_v58  ;;  %v1085_v13 = vsel %vm277_vm2, %v1061_v34, %v1062_v37  ;;  %v1084_v18 = vsel %vm277_vm2, %v1062_v37, %v1063_v33 }
 0x248   :  { %v1215_v52 = vmul.f32 %v1211_v45, %v9633_v28  ;;  %v1216_v27 = vmul.f32 %v1210_v25, %v9163_v38  ;;  %v1090_v15 = vmul.f32 %v1085_v13, %v9210_v59  ;;  %v1091_v62 = vmul.f32 %v1084_v18, %v9229_v11  ;;  %v9956_v13 = vpop.f32.mrf.mxu0 }
 0x249   :  { %v1243_v21 = vld [vmem:[#allocation2 + $0x8] sm:$0xff]  ;;  %v9945_v37 = vadd.f32 %v9681_v43, %v9712_v60  ;;  %v978_v58 = vrot.slane %v9924_v51, 7  ;;  %v993_v45 = vsel %vm277_vm2, %v975_v12, %v976_v61 }
 0x24a   :  { %1229 = vst.msk [vmem:[#allocation2 + $0x18] sm:$0xff] %vm341_vm3, %v1215_v52  ;;  %v924_v54 = vpop.permute.xlu0 %923  ;;  %v930_v34 = vpop.permute.xlu2 %929  ;;  %8228 = vmatmul.msk.f32.vlgmr.msra.gmra.mxu1 %vm341_vm3, %v1243_v21  ;;  %8242 = vmatmul.msk.f32.vlgmr.msra.gmra.mxu0 %vm341_vm3, %v1243_v21 }
 0x24b   :  { %1230 = vst.msk [vmem:[#allocation2 + $0x28] sm:$0xff] %vm341_vm3, %v1216_v27  ;;  %v961_v55 = vadd.f32 %v924_v54, %v9710_v49  ;;  %v964_v25 = vadd.f32 %v930_v34, %v9731_v10  ;;  %v990_v43 = vsel %vm277_vm2, %v978_v58, %v979_v36  ;;  %v1037_v49 = vmax.f32 %v1023_v50, 0.0  ;;  %v9965_v10 = vpop.f32.mrf.mxu3 }
 0x24c   :  { %1104 = vst.msk [vmem:[#allocation2 + $0x20] sm:$0xff] %vm341_vm3, %v1090_v15 }
 0x24d   :  { %v1003_v18 = vadd.f32 %v993_v45, %v961_v55  ;;  %935 = vrot.lane.b32.xlu2 %v9945_v37, %s8946_s19  ;;  %1105 = vst.msk [vmem:[#allocation2 + $0x30] sm:$0xff] %vm341_vm3, %v1091_v62  ;;  %v1006_v60 = vadd.f32 %v990_v43, %v964_v25  ;;  %v9969_v51 = vmul.f32 %v1037_v49, %v9227_v8 }
 0x24f   :  { %v1022_v12 = vadd.f32 %v9768_v63, %v1003_v18  ;;  %v1025_v52 = vadd.f32 %v9768_v63, %v1006_v60  ;;  %v1065_v21 = vrot.slane %v9969_v51, 7  ;;  %v1191_v62 = vrot.slane %v9969_v51, 1 }
 0x250   :  { %v9980_v34 = vpop.f32.mrf.mxu0 }
 0x251   :  { %v1245_v1 = vld [vmem:[#allocation2 + $0x18] sm:$0xff]  ;;  %v1036_v61 = vmax.f32 %v1022_v12, 0.0  ;;  %v1039_v54 = vmax.f32 %v1025_v52, 0.0 }
 0x252   :  { %8229 = vmatmul.msk.f32.gmra.mxu1 %vm341_vm3, %v1245_v1  ;;  %8243 = vmatmul.msk.f32.gmra.mxu0 %vm341_vm3, %v1245_v1  ;;  %v1247_v12 = vld [vmem:[#allocation2 + $0x28] sm:$0xff]  ;;  %v8211_v52 = vld [vmem:[%s16151_s5 + $0x278] sm:$0xff] }
 0x253   :  { %v1050_v27 = vmul.f32 %v1036_v61, %v9165_v39  ;;  %1479 = vmatpush.msra.mxu3 %v8211_v52 }
 0x255   :  { %v1064_v15 = vrot.slane %v1050_v27, 7  ;;  %v1190_v50 = vrot.slane %v1050_v27, 1  ;;  %1138 = vrot.lane.b32.xlu0 %v1050_v27, %s8946_s19  ;;  %1140 = vrot.lane.b32.xlu2 %v9969_v51, %s8946_s19  ;;  %v10011_v27 = vadd.f32 %v9698_v3, %v9726_v9  ;;  %v991_v3 = vsel %vm277_vm2, %v977_v5, %v978_v58  ;;  %v8206_v9 = vld [vmem:[%s16151_s5 + $0x250] sm:$0xff]  ;;  %v8204_v58 = vld [vmem:[%s16151_s5 + $0x240] sm:$0xff] }
 0x257   :  { %v1209_v55 = vsel %vm441_vm1, %v1189_v19, %v1190_v50  ;;  %v1208_v25 = vsel %vm441_vm1, %v1190_v50, %v1191_v62  ;;  %v1082_v45 = vsel %vm277_vm2, %v1064_v15, %v1065_v21  ;;  %v1083_v18 = vsel %vm277_vm2, %v1063_v33, %v1064_v15  ;;  %v9997_v19 = vpop.f32.mrf.mxu3  ;;  %v8210_v33 = vld [vmem:[%s16151_s5 + $0x270] sm:$0xff] }
 0x258   :  { %v1217_v43 = vmul.f32 %v1209_v55, %v9167_v40  ;;  %v1218_v49 = vmul.f32 %v1208_v25, %v9265_v32  ;;  %v1093_v60 = vmul.f32 %v1082_v45, %v9313_v16  ;;  %v1092_v1 = vmul.f32 %v1083_v18, %v9273_v35  ;;  %1361 = vmatpush.msrb.mxu2 %v8210_v33  ;;  %v8208_v55 = vld [vmem:[%s16151_s5 + $0x260] sm:$0xff]  ;;  %v8209_v25 = vld [vmem:[%s16151_s5 + $0x268] sm:$0xff]  ;;  %v870_v45 = vpop.f32.mrf.mxu0 }
 0x259   :  { %v10016_v50 = vmul.f32 %v1039_v54, %v9172_v42  ;;  %1480 = vmatpush.msra.mxu3 %v8209_v25  ;;  %v8205_v54 = vld [vmem:[%s16151_s5 + $0x248] sm:$0xff]  ;;  %v8200_v33 = vld [vmem:[%s16151_s5 + $0x220] sm:$0xff] }
 0x25a   :  { %1231 = vst.msk [vmem:[#allocation2 + $0x38] sm:$0xff] %vm341_vm3, %v1217_v43  ;;  %v928_v61 = vpop.permute.xlu0 %927  ;;  %8230 = vmatmul.msk.f32.gmra.mxu1 %vm341_vm3, %v1247_v12  ;;  %8244 = vmatmul.msk.f32.gmra.mxu0 %vm341_vm3, %v1247_v12 }
 0x25b   :  { %1232 = vst.msk [vmem:[#allocation2 + $0x48] sm:$0xff] %vm341_vm3, %v1218_v49  ;;  %v963_v15 = vadd.f32 %v928_v61, %v9724_v20  ;;  %1362 = vmatpush.msrb.mxu2 %v8208_v55  ;;  %1481 = vmatpush.msra.mxu3 %v8207_v17  ;;  %v8202_v49 = vld [vmem:[%s16151_s5 + $0x230] sm:$0xff]  ;;  %v1067_v52 = vrot.slane %v10016_v50, 7 }
 0x25c   :  { %1107 = vst.msk [vmem:[#allocation2 + $0x50] sm:$0xff] %vm341_vm3, %v1093_v60 }
 0x25d   :  { %v1005_v20 = vadd.f32 %v991_v3, %v963_v15  ;;  %1144 = vrot.lane.b32.xlu2 %v10016_v50, %s8946_s19  ;;  %939 = vrot.lane.b32.xlu0 %v10011_v27, %s8946_s19  ;;  %1106 = vst.msk [vmem:[#allocation2 + $0x40] sm:$0xff] %vm341_vm3, %v1092_v1  ;;  %v8203_v1 = vld [vmem:[%s16151_s5 + $0x238] sm:$0xff]  ;;  %v1193_v15 = vrot.slane %v10016_v50, 1  ;;  %v8201_v3 = vld [vmem:[%s16151_s5 + $0x228] sm:$0xff] }
 0x25e   :  { %1363 = vmatpush.msrb.mxu2 %v8206_v9  ;;  %1482 = vmatpush.msra.mxu3 %v8205_v54  ;;  %v8198_v9 = vld [vmem:[%s16151_s5 + $0x210] sm:$0xff] }
 0x25f   :  { %v1024_v5 = vadd.f32 %v9768_v63, %v1005_v20  ;;  %v811_v60 = vpop.f32.mrf.mxu3  ;;  %v885_v20 = vrot.slane %v10011_v27, 1 }
 0x260   :  { %1364 = vmatpush.msrb.mxu2 %v8204_v58  ;;  %v10056_v61 = vadd.f32 %v870_v45, %v811_v60  ;;  %1483 = vmatpush.msra.mxu3 %v8203_v1  ;;  %v16342_v1 = vld [vmem:[#allocation18_spill] sm:$0xff] }
 0x261   :  { %v1249_v18 = vld [vmem:[#allocation2 + $0x38] sm:$0xff]  ;;  %v1038_v43 = vmax.f32 %v1024_v5, 0.0 }
 0x262   :  { %8231 = vmatmul.msk.f32.gmra.mxu1 %vm341_vm3, %v1249_v18  ;;  %8245 = vmatmul.msk.f32.gmra.mxu0 %vm341_vm3, %v1249_v18  ;;  %v984_v45 = vrot.slane %v10056_v61, 7  ;;  %v1251_v60 = vld [vmem:[#allocation2 + $0x48] sm:$0xff] }
 0x263   :  { %v1052_v12 = vmul.f32 %v1038_v43, %v9206_v56  ;;  %1365 = vmatpush.msrb.mxu2 %v8202_v49  ;;  %1484 = vmatpush.msra.mxu3 %v8201_v3  ;;  %v8196_v49 = vld [vmem:[%s16151_s5 + $0x200] sm:$0xff]  ;;  %v8194_v3 = vld [vmem:[%s16151_s5 + $0x1f0] sm:$0xff] }
 0x265   :  { %v1066_v55 = vrot.slane %v1052_v12, 7  ;;  %v1192_v25 = vrot.slane %v1052_v12, 1  ;;  %1142 = vrot.lane.b32.xlu1 %v1052_v12, %s8946_s19  ;;  %1366 = vmatpush.msrb.mxu2 %v8200_v33  ;;  %v16343_v33 = vrot.slane %v16342_v1, 1 }
 0x267   :  { %v1206_v17 = vsel %vm441_vm1, %v1192_v25, %v1193_v15  ;;  %v1207_v5 = vsel %vm441_vm1, %v1191_v62, %v1192_v25  ;;  %v1080_v58 = vsel %vm277_vm2, %v1066_v55, %v1067_v52  ;;  %v1081_v54 = vsel %vm277_vm2, %v1065_v21, %v1066_v55  ;;  %v8199_v62 = vld [vmem:[%s16151_s5 + $0x218] sm:$0xff]  ;;  %1367 = vmatpush.msrb.mxu2 %v8198_v9  ;;  %v8197_v25 = vld [vmem:[%s16151_s5 + $0x208] sm:$0xff] }
 0x268   :  { %v1219_v18 = vmul.f32 %v1207_v5, %v9307_v4  ;;  %v1220_v43 = vmul.f32 %v1206_v17, %v9357_v57  ;;  %v1095_v51 = vmul.f32 %v1080_v58, %v9368_v22  ;;  %v1094_v21 = vmul.f32 %v1081_v54, %v9373_v26  ;;  %1485 = vmatpush.msra.mxu3 %v8199_v62  ;;  %v16344_v17 = vld [vmem:[#allocation21_spill] sm:$0xff]  ;;  %v8195_v54 = vld [vmem:[%s16151_s5 + $0x1f8] sm:$0xff]  ;;  %v8193_v62 = vld [vmem:[%s16151_s5 + $0x1e8] sm:$0xff] }
 0x269   :  { %v887_v55 = vsel %vm441_vm1, %v885_v20, %v16343_v33  ;;  %1368 = vmatpush.msrb.mxu2 %v8196_v49  ;;  %v16345_v5 = vrot.slane %v16344_v17, 7  ;;  %v8190_v49 = vld [vmem:[%s16151_s5 + $0x1d0] sm:$0xff]  ;;  %v8189_v33 = vld [vmem:[%s16151_s5 + $0x1c8] sm:$0xff] }
 0x26a   :  { %1233 = vst.msk [vmem:[#allocation2 + $0x58] sm:$0xff] %vm341_vm3, %v1219_v18  ;;  %v942_v12 = vpop.permute.xlu1 %941  ;;  %8232 = vmatmul.msk.f32.gmra.mxu1 %vm341_vm3, %v1251_v60  ;;  %8246 = vmatmul.msk.f32.gmra.mxu0 %vm341_vm3, %v1251_v60  ;;  %v8192_v18 = vld [vmem:[%s16151_s5 + $0x1e0] sm:$0xff] }
 0x26b   :  { %1234 = vst.msk [vmem:[#allocation2 + $0x68] sm:$0xff] %vm341_vm3, %v1220_v43  ;;  %v970_v9 = vadd.f32 %v942_v12, %v887_v55  ;;  %v998_v58 = vsel %vm277_vm2, %v984_v45, %v16345_v5  ;;  %1486 = vmatpush.msra.mxu3 %v8197_v25  ;;  %1369 = vmatpush.msrb.mxu2 %v8194_v3  ;;  %v8186_v55 = vld [vmem:[%s16151_s5 + $0x1b0] sm:$0xff]  ;;  %v8187_v3 = vld [vmem:[%s16151_s5 + $0x1b8] sm:$0xff] }
 0x26c   :  { %1109 = vst.msk [vmem:[#allocation2 + $0x70] sm:$0xff] %vm341_vm3, %v1095_v51  ;;  %v8191_v51 = vld [vmem:[%s16151_s5 + $0x1d8] sm:$0xff] }
 0x26d   :  { %v1012_v43 = vadd.f32 %v998_v58, %v970_v9  ;;  %1108 = vst.msk [vmem:[#allocation2 + $0x60] sm:$0xff] %vm341_vm3, %v1094_v21  ;;  %1487 = vmatpush.msra.mxu3 %v8195_v54  ;;  %1370 = vmatpush.msrb.mxu2 %v8192_v18  ;;  %v8188_v21 = vld [vmem:[%s16151_s5 + $0x1c0] sm:$0xff]  ;;  %v8185_v58 = vld [vmem:[%s16151_s5 + $0x1a8] sm:$0xff]  ;;  %v8182_v54 = vld [vmem:[%s16151_s5 + $0x190] sm:$0xff] }
 0x26e   :  { %v8184_v9 = vld [vmem:[%s16151_s5 + $0x1a0] sm:$0xff] }
 0x26f   :  { %v1031_v60 = vadd.f32 %v9768_v63, %v1012_v43  ;;  %1488 = vmatpush.msra.mxu3 %v8193_v62  ;;  %1371 = vmatpush.msrb.mxu2 %v8190_v49 }
 0x271   :  { %v1045_v12 = vmax.f32 %v1031_v60, 0.0  ;;  %v1253_v1 = vld [vmem:[#allocation2 + $0x58] sm:$0xff]  ;;  %1489 = vmatpush.msra.mxu3 %v8191_v51  ;;  %1372 = vmatpush.msrb.mxu2 %v8188_v21  ;;  %v10196_v21 = vadd.f32 %v9864_v41, %v9866_v14 }
 0x272   :  { %8233 = vmatmul.msk.f32.gmra.mxu1 %vm341_vm3, %v1253_v1  ;;  %8247 = vmatmul.msk.f32.gmra.mxu0 %vm341_vm3, %v1253_v1  ;;  %v8183_v60 = vld [vmem:[%s16151_s5 + $0x198] sm:$0xff]  ;;  %v1255_v2 = vld [vmem:[#allocation2 + $0x68] sm:$0xff] }
 0x273   :  { %v10150_v25 = vmul.f32 %v1045_v12, %v9206_v56  ;;  %1490 = vmatpush.msra.mxu3 %v8189_v33  ;;  %1373 = vmatpush.msrb.mxu2 %v8186_v55  ;;  %v980_v12 = vrot.slane %v10196_v21, 7  ;;  %v16346_v55 = vld [vmem:[#allocation20_spill] sm:$0xff] }
 0x275   :  { %v1073_v17 = vrot.slane %v10150_v25, 7  ;;  %v1199_v5 = vrot.slane %v10150_v25, 1  ;;  %1491 = vmatpush.msra.mxu3 %v8187_v3  ;;  %1374 = vmatpush.msrb.mxu2 %v8184_v9  ;;  %v989_v9 = vsel %vm277_vm2, %v979_v36, %v980_v12 }
 0x277   :  { %v1213_v18 = vsel %vm441_vm1, %v1199_v5, %v1186_v30  ;;  %v1087_v43 = vsel %vm277_vm2, %v1073_v17, %v1060_v23  ;;  %v8180_v30 = vld [vmem:[%s16151_s5 + $0x180] sm:$0xff]  ;;  %1492 = vmatpush.msra.mxu3 %v8185_v58  ;;  %1375 = vmatpush.msrb.mxu2 %v8182_v54  ;;  %v8181_v23 = vld [vmem:[%s16151_s5 + $0x188] sm:$0xff] }
 0x278   :  { %v1227_v62 = vmul.f32 %v1213_v18, %v9357_v57  ;;  %v1088_v49 = vmul.f32 %v1087_v43, %v9368_v22  ;;  %v865_v43 = vadd.f32 %v9956_v13, %v9965_v10 }
 0x279   :  { %1493 = vmatpush.msra.mxu3 %v8183_v60  ;;  %1376 = vmatpush.msrb.mxu2 %v8180_v30 }
 0x27a   :  { %1241 = vst.msk [vmem:[#allocation2 + $0xd8] sm:$0xff] %vm341_vm3, %v1227_v62  ;;  %8234 = vmatmul.msk.f32.gmra.mxu1 %vm341_vm3, %v1255_v2  ;;  %8248 = vmatmul.msk.f32.gmra.mxu0 %vm341_vm3, %v1255_v2  ;;  %v883_v62 = vrot.slane %v9945_v37, 1 }
 0x27b   :  { %1102 = vst.msk [vmem:[#allocation2] sm:$0xff] %vm341_vm3, %v1088_v49  ;;  %1494 = vmatpush.msra.mxu3 %v8181_v23  ;;  %v862_v49 = vadd.f32 %v9905_v29, %v9916_v24  ;;  %v882_v29 = vrot.slane %v9903_v44, 1  ;;  %v982_v24 = vrot.slane %v865_v43, 7  ;;  %v10244_v44 = vadd.f32 %v9980_v34, %v9997_v19 }
 0x27d   :  { %v981_v30 = vrot.slane %v862_v49, 7 }
 0x28e   :  { %v1131_v51 = vpop.permute.xlu1 %1130 }
 0x28f   :  { %1172 = vst.msk [vmem:[#allocation2] sm:$0xff] %vm412_vm4, %v1131_v51 }
 0x296   :  { %v932_v1 = vpop.permute.xlu1 %931  ;;  %v1242_v33 = vld [vmem:[#allocation2] sm:$0xff] }
 0x297   :  { %v965_v3 = vadd.f32 %v932_v1, %v16346_v55  ;;  %1377 = vmatmul.f32.vlgmr.msrb.gmra.mxu2 %v1242_v33  ;;  %1495 = vmatmul.f32.vlgmr.msra.gmra.mxu3 %v1242_v33  ;;  %v884_v1 = vrot.slane %v9870_v46, 1 }
 0x299   :  { %v1007_v58 = vadd.f32 %v989_v9, %v965_v3  ;;  %v983_v3 = vrot.slane %v10244_v44, 7  ;;  %v889_v34 = vsel %vm441_vm1, %v883_v62, %v884_v1 }
 0x29b   :  { %v1026_v54 = vadd.f32 %v9768_v63, %v1007_v58  ;;  %v986_v43 = vsel %vm277_vm2, %v982_v24, %v983_v3 }
 0x29d   :  { %v1040_v41 = vmax.f32 %v1026_v54, 0.0 }
 0x29f   :  { %v1135_v14 = vpop.permute.xlu2 %1134  ;;  %v10208_v18 = vmul.f32 %v1040_v41, %v9186_v47 }
 0x2a0   :  { %1174 = vst.msk [vmem:[#allocation2 + $0x20] sm:$0xff] %vm412_vm4, %v1135_v14 }
 0x2a1   :  { %1146 = vrot.lane.b32.xlu0 %v10208_v18, %s8946_s19  ;;  %v1068_v0 = vrot.slane %v10208_v18, 7  ;;  %v1194_v36 = vrot.slane %v10208_v18, 1 }
 0x2a3   :  { %v1205_v60 = vsel %vm441_vm1, %v1193_v15, %v1194_v36  ;;  %v1079_v13 = vsel %vm277_vm2, %v1067_v52, %v1068_v0  ;;  %v890_v15 = vsel %vm441_vm1, %v882_v29, %v883_v62  ;;  %v987_v52 = vsel %vm277_vm2, %v981_v30, %v982_v24 }
 0x2a4   :  { %v1221_v10 = vmul.f32 %v1205_v60, %v9617_v31  ;;  %v1096_v37 = vmul.f32 %v1079_v13, %v9188_v48  ;;  %v988_v24 = vsel %vm277_vm2, %v980_v12, %v981_v30 }
 0x2a6   :  { %1235 = vst.msk [vmem:[#allocation2 + $0x78] sm:$0xff] %vm341_vm3, %v1221_v10  ;;  %v16347_v10 = vld [vmem:[#allocation19_spill] sm:$0xff] }
 0x2a7   :  { %v936_v2 = vpop.permute.xlu2 %935  ;;  %v1137_v23 = vpop.permute.xlu1 %1136  ;;  %1110 = vst.msk [vmem:[#allocation2 + $0x80] sm:$0xff] %vm341_vm3, %v1096_v37  ;;  %v16348_v37 = vrot.slane %v16347_v10, 1 }
 0x2a8   :  { %v967_v50 = vadd.f32 %v936_v2, %v890_v15  ;;  %1175 = vst.msk [vmem:[#allocation2 + $0x30] sm:$0xff] %vm412_vm4, %v1137_v23 }
 0x2a9   :  { %v891_v62 = vsel %vm441_vm1, %v16348_v37, %v882_v29 }
 0x2aa   :  { %v1009_v51 = vadd.f32 %v987_v52, %v967_v50 }
 0x2ac   :  { %v1028_v33 = vadd.f32 %v9768_v63, %v1009_v51 }
 0x2ad   :  { %v1257_v55 = vld [vmem:[#allocation2 + $0x78] sm:$0xff] }
 0x2ae   :  { %8235 = vmatmul.msk.f32.gmra.mxu1 %vm341_vm3, %v1257_v55  ;;  %8249 = vmatmul.msk.f32.gmra.mxu0 %vm341_vm3, %v1257_v55  ;;  %v1042_v9 = vmax.f32 %v1028_v33, 0.0 }
 0x2af   :  { %v1133_v58 = vpop.permute.xlu0 %1132  ;;  %v1141_v54 = vpop.permute.xlu2 %1140 }
 0x2b0   :  { %1173 = vst.msk [vmem:[#allocation2 + $0x10] sm:$0xff] %vm412_vm4, %v1133_v58  ;;  %v938_v19 = vpop.permute.xlu1 %937  ;;  %v1056_v41 = vmul.f32 %v1042_v9, %v9225_v7 }
 0x2b1   :  { %1177 = vst.msk [vmem:[#allocation2 + $0x50] sm:$0xff] %vm412_vm4, %v1141_v54  ;;  %v968_v14 = vadd.f32 %v938_v19, %v889_v34  ;;  %v1246_v19 = vld [vmem:[#allocation2 + $0x20] sm:$0xff] }
 0x2b2   :  { %1150 = vrot.lane.b32.xlu2 %v1056_v41, %s8946_s19  ;;  %v1070_v29 = vrot.slane %v1056_v41, 7  ;;  %v1196_v33 = vrot.slane %v1056_v41, 1 }
 0x2b3   :  { %v1010_v49 = vadd.f32 %v986_v43, %v968_v14 }
 0x2b5   :  { %v1029_v60 = vadd.f32 %v9768_v63, %v1010_v49 }
 0x2b7   :  { %v934_v13 = vpop.permute.xlu0 %933  ;;  %v1145_v2 = vpop.permute.xlu2 %1144  ;;  %v1244_v15 = vld [vmem:[#allocation2 + $0x10] sm:$0xff]  ;;  %v1043_v23 = vmax.f32 %v1029_v60, 0.0 }
 0x2b8   :  { %v966_v50 = vadd.f32 %v934_v13, %v891_v62  ;;  %1179 = vst.msk [vmem:[#allocation2 + $0x70] sm:$0xff] %vm412_vm4, %v1145_v2  ;;  %1380 = vmatmul.f32.gmra.mxu2 %v1244_v15  ;;  %1498 = vmatmul.f32.gmra.mxu3 %v1244_v15  ;;  %v1252_v61 = vld [vmem:[#allocation2 + $0x50] sm:$0xff] }
 0x2b9   :  { %v10274_v52 = vmul.f32 %v1043_v23, %v9165_v39  ;;  %v1248_v23 = vld [vmem:[#allocation2 + $0x30] sm:$0xff] }
 0x2ba   :  { %v1008_v51 = vadd.f32 %v988_v24, %v966_v50  ;;  %1156 = vrot.lane.b32.xlu2 %v10150_v25, %s8946_s19 }
 0x2bb   :  { %1152 = vrot.lane.b32.xlu0 %v10274_v52, %s8946_s19  ;;  %v1071_v55 = vrot.slane %v10274_v52, 7  ;;  %v1197_v9 = vrot.slane %v10274_v52, 1 }
 0x2bc   :  { %v1027_v21 = vadd.f32 %v9768_v63, %v1008_v51 }
 0x2bd   :  { %v1202_v12 = vsel %vm441_vm1, %v1196_v33, %v1197_v9  ;;  %v1076_v30 = vsel %vm277_vm2, %v1070_v29, %v1071_v55 }
 0x2be   :  { %v1224_v58 = vmul.f32 %v1202_v12, %v9167_v40  ;;  %v1041_v54 = vmax.f32 %v1027_v21, 0.0  ;;  %v1099_v34 = vmul.f32 %v1076_v30, %v9273_v35 }
 0x2bf   :  { %v1256_v52 = vld [vmem:[#allocation2 + $0x70] sm:$0xff] }
 0x2c0   :  { %1238 = vst.msk [vmem:[#allocation2 + $0xa8] sm:$0xff] %vm341_vm3, %v1224_v58  ;;  %1383 = vmatmul.f32.gmra.mxu2 %v1246_v19  ;;  %1501 = vmatmul.f32.gmra.mxu3 %v1246_v19  ;;  %v1055_v41 = vmul.f32 %v1041_v54, %v9204_v53  ;;  %v1269_v19 = vld [vmem:[#allocation2 + $0xd8] sm:$0xff] }
 0x2c1   :  { %1113 = vst.msk [vmem:[#allocation2 + $0xb0] sm:$0xff] %vm341_vm3, %v1099_v34 }
 0x2c2   :  { %v1069_v14 = vrot.slane %v1055_v41, 7  ;;  %v1195_v43 = vrot.slane %v1055_v41, 1  ;;  %1148 = vrot.lane.b32.xlu1 %v1055_v41, %s8946_s19 }
 0x2c4   :  { %v1203_v49 = vsel %vm441_vm1, %v1195_v43, %v1196_v33  ;;  %v1204_v60 = vsel %vm441_vm1, %v1194_v36, %v1195_v43  ;;  %v1077_v13 = vsel %vm277_vm2, %v1069_v14, %v1070_v29  ;;  %v1078_v10 = vsel %vm277_vm2, %v1068_v0, %v1069_v14 }
 0x2c5   :  { %v1223_v37 = vmul.f32 %v1203_v49, %v9163_v38  ;;  %v1222_v62 = vmul.f32 %v1204_v60, %v9633_v28  ;;  %v1098_v2 = vmul.f32 %v1077_v13, %v9229_v11  ;;  %v1097_v36 = vmul.f32 %v1078_v10, %v9210_v59 }
 0x2c6   :  { %v888_v0 = vsel %vm441_vm1, %v884_v1, %v885_v20  ;;  %v985_v29 = vsel %vm277_vm2, %v983_v3, %v984_v45 }
 0x2c7   :  { %1237 = vst.msk [vmem:[#allocation2 + $0x98] sm:$0xff] %vm341_vm3, %v1223_v37  ;;  %v1139_v15 = vpop.permute.xlu0 %1138  ;;  %v1437_v49 = vpop.f32.mrf.mxu1 }
 0x2c8   :  { %1236 = vst.msk [vmem:[#allocation2 + $0x88] sm:$0xff] %vm341_vm3, %v1222_v62  ;;  %1386 = vmatmul.f32.gmra.mxu2 %v1248_v23  ;;  %1504 = vmatmul.f32.gmra.mxu3 %v1248_v23 }
 0x2c9   :  { %1176 = vst.msk [vmem:[#allocation2 + $0x40] sm:$0xff] %vm412_vm4, %v1139_v15 }
 0x2ca   :  { %1112 = vst.msk [vmem:[#allocation2 + $0xa0] sm:$0xff] %vm341_vm3, %v1098_v2 }
 0x2cb   :  { %1111 = vst.msk [vmem:[#allocation2 + $0x90] sm:$0xff] %vm341_vm3, %v1097_v36 }
 0x2ce   :  { %v1261_v33 = vld [vmem:[#allocation2 + $0x98] sm:$0xff] }
 0x2cf   :  { %v940_v18 = vpop.permute.xlu0 %939  ;;  %v1259_v50 = vld [vmem:[#allocation2 + $0x88] sm:$0xff]  ;;  %v1440_v62 = vpop.f32.mrf.mxu1 }
 0x2d0   :  { %v969_v24 = vadd.f32 %v940_v18, %v888_v0  ;;  %8236 = vmatmul.msk.f32.gmra.mxu1 %vm341_vm3, %v1259_v50  ;;  %8250 = vmatmul.msk.f32.gmra.mxu0 %vm341_vm3, %v1259_v50  ;;  %v1250_v51 = vld [vmem:[#allocation2 + $0x40] sm:$0xff] }
 0x2d1   :  { %1389 = vmatmul.f32.gmra.mxu2 %v1250_v51  ;;  %1507 = vmatmul.f32.gmra.mxu3 %v1250_v51 }
 0x2d2   :  { %v1011_v46 = vadd.f32 %v985_v29, %v969_v24 }
 0x2d4   :  { %v1030_v27 = vadd.f32 %v9768_v63, %v1011_v46 }
 0x2d6   :  { %v1044_v20 = vmax.f32 %v1030_v27, 0.0 }
 0x2d7   :  { %v1143_v1 = vpop.permute.xlu1 %1142  ;;  %v1443_v23 = vpop.f32.mrf.mxu1 }
 0x2d8   :  { %1178 = vst.msk [vmem:[#allocation2 + $0x60] sm:$0xff] %vm412_vm4, %v1143_v1  ;;  %8237 = vmatmul.msk.f32.gmra.mxu1 %vm341_vm3, %v1261_v33  ;;  %8251 = vmatmul.msk.f32.gmra.mxu0 %vm341_vm3, %v1261_v33  ;;  %v1058_v44 = vmul.f32 %v1044_v20, %v9227_v8 }
 0x2d9   :  { %1392 = vmatmul.f32.gmra.mxu2 %v1252_v61  ;;  %1510 = vmatmul.f32.gmra.mxu3 %v1252_v61 }
 0x2da   :  { %v1072_v45 = vrot.slane %v1058_v44, 7  ;;  %v1198_v3 = vrot.slane %v1058_v44, 1  ;;  %1154 = vrot.lane.b32.xlu1 %v1058_v44, %s8946_s19 }
 0x2dc   :  { %v1200_v63 = vsel %vm441_vm1, %v1198_v3, %v1199_v5  ;;  %v1201_v21 = vsel %vm441_vm1, %v1197_v9, %v1198_v3  ;;  %v1074_v12 = vsel %vm277_vm2, %v1072_v45, %v1073_v17  ;;  %v1075_v30 = vsel %vm277_vm2, %v1071_v55, %v1072_v45  ;;  %v1263_v9 = vld [vmem:[#allocation2 + $0xa8] sm:$0xff] }
 0x2dd   :  { %v1225_v58 = vmul.f32 %v1201_v21, %v9265_v32  ;;  %v1226_v54 = vmul.f32 %v1200_v63, %v9307_v4  ;;  %v1101_v34 = vmul.f32 %v1074_v12, %v9373_v26  ;;  %v1100_v5 = vmul.f32 %v1075_v30, %v9313_v16 }
 0x2df   :  { %1239 = vst.msk [vmem:[#allocation2 + $0xb8] sm:$0xff] %vm341_vm3, %v1225_v58  ;;  %v1254_v25 = vld [vmem:[#allocation2 + $0x60] sm:$0xff]  ;;  %v1446_v27 = vpop.f32.mrf.mxu1 }
 0x2e0   :  { %1240 = vst.msk [vmem:[#allocation2 + $0xc8] sm:$0xff] %vm341_vm3, %v1226_v54  ;;  %8238 = vmatmul.msk.f32.gmra.mxu1 %vm341_vm3, %v1263_v9  ;;  %8252 = vmatmul.msk.f32.gmra.mxu0 %vm341_vm3, %v1263_v9 }
 0x2e1   :  { %1395 = vmatmul.f32.gmra.mxu2 %v1254_v25  ;;  %1513 = vmatmul.f32.gmra.mxu3 %v1254_v25  ;;  %1115 = vst.msk [vmem:[#allocation2 + $0xd0] sm:$0xff] %vm341_vm3, %v1101_v34 }
 0x2e2   :  { %1114 = vst.msk [vmem:[#allocation2 + $0xc0] sm:$0xff] %vm341_vm3, %v1100_v5 }
 0x2e6   :  { %v1265_v17 = vld [vmem:[#allocation2 + $0xb8] sm:$0xff] }
 0x2e7   :  { %v1267_v55 = vld [vmem:[#allocation2 + $0xc8] sm:$0xff]  ;;  %v1449_v63 = vpop.f32.mrf.mxu1 }
 0x2e8   :  { %8239 = vmatmul.msk.f32.gmra.mxu1 %vm341_vm3, %v1265_v17  ;;  %8253 = vmatmul.msk.f32.gmra.mxu0 %vm341_vm3, %v1265_v17 }
 0x2e9   :  { %1398 = vmatmul.f32.gmra.mxu2 %v1256_v52  ;;  %1516 = vmatmul.f32.gmra.mxu3 %v1256_v52 }
 0x2ef   :  { %v1452_v5 = vpop.f32.mrf.mxu1 }
 0x2f0   :  { %8240 = vmatmul.msk.f32.gmra.mxu1 %vm341_vm3, %v1267_v55  ;;  %8254 = vmatmul.msk.f32.gmra.mxu0 %vm341_vm3, %v1267_v55 }
 0x2f8   :  { %8241 = vmatmul.msk.f32.gmra.mxu1 %vm341_vm3, %v1269_v19  ;;  %8255 = vmatmul.msk.f32.gmra.mxu0 %vm341_vm3, %v1269_v19  ;;  %v1455_v19 = vpop.f32.mrf.mxu1 }
 0x30c   :  { %v1151_v41 = vpop.permute.xlu2 %1150 }
 0x30d   :  { %1182 = vst.msk [vmem:[#allocation2 + $0xa0] sm:$0xff] %vm412_vm4, %v1151_v41 }
 0x313   :  { %v1147_v14 = vpop.permute.xlu0 %1146 }
 0x314   :  { %1180 = vst.msk [vmem:[#allocation2 + $0x80] sm:$0xff] %vm412_vm4, %v1147_v14  ;;  %v1157_v43 = vpop.permute.xlu2 %1156  ;;  %v1262_v46 = vld [vmem:[#allocation2 + $0xa0] sm:$0xff] }
 0x315   :  { %1185 = vst.msk [vmem:[#allocation2 + $0xd0] sm:$0xff] %vm412_vm4, %v1157_v43 }
 0x31a   :  { %v1378_v60 = vpop.f32.mrf.mxu2 }
 0x31b   :  { %v10369_v13 = vadd.f32 %v1437_v49, %v1378_v60  ;;  %v1258_v10 = vld [vmem:[#allocation2 + $0x80] sm:$0xff] }
 0x31c   :  { %1401 = vmatmul.f32.gmra.mxu2 %v1258_v10  ;;  %1519 = vmatmul.f32.gmra.mxu3 %v1258_v10  ;;  %v1268_v25 = vld [vmem:[#allocation2 + $0xd0] sm:$0xff] }
 0x31d   :  { %1639 = vrot.lane.b32.xlu0 %v10369_v13, %s8946_s19  ;;  %v16193_v0 = vrot.slane %v10369_v13, 1 }
 0x32b   :  { %v1458_v60 = vpop.f32.mrf.mxu1 }
 0x32d   :  { %v1153_v37 = vpop.permute.xlu0 %1152 }
 0x32e   :  { %1183 = vst.msk [vmem:[#allocation2 + $0xb0] sm:$0xff] %vm412_vm4, %v1153_v37 }
 0x334   :  { %v1149_v2 = vpop.permute.xlu1 %1148 }
 0x335   :  { %1181 = vst.msk [vmem:[#allocation2 + $0x90] sm:$0xff] %vm412_vm4, %v1149_v2  ;;  %v1264_v45 = vld [vmem:[#allocation2 + $0xb0] sm:$0xff] }
 0x33b   :  { %v1381_v15 = vpop.f32.mrf.mxu2 }
 0x33c   :  { %v1441_v36 = vadd.f32 %v1440_v62, %v1381_v15  ;;  %v1260_v18 = vld [vmem:[#allocation2 + $0x90] sm:$0xff]  ;;  %v10418_v15 = vpop.f32.mrf.mxu0 }
 0x33d   :  { %1404 = vmatmul.f32.gmra.mxu2 %v1260_v18  ;;  %1522 = vmatmul.f32.gmra.mxu3 %v1260_v18 }
 0x33e   :  { %v1598_v50 = vrot.slane %v1441_v36, 1  ;;  %1641 = vrot.lane.b32.xlu1 %v1441_v36, %s8946_s19 }
 0x340   :  { %v10381_v24 = vsel %vm441_vm1, %v16193_v0, %v1598_v50 }
 0x343   :  { %v1384_v51 = vpop.f32.mrf.mxu2 }
 0x344   :  { %v1444_v29 = vadd.f32 %v1443_v23, %v1384_v51  ;;  %v10420_v23 = vpop.f32.mrf.mxu3  ;;  %v1558_v18 = vpop.f32.mrf.mxu0 }
 0x345   :  { %1407 = vmatmul.f32.gmra.mxu2 %v1262_v46  ;;  %1525 = vmatmul.f32.gmra.mxu3 %v1262_v46 }
 0x346   :  { %v1599_v20 = vrot.slane %v1444_v29, 1  ;;  %1643 = vrot.lane.b32.xlu2 %v1444_v29, %s8946_s19 }
 0x348   :  { %v1622_v1 = vsel %vm441_vm1, %v1598_v50, %v1599_v20 }
 0x34b   :  { %v1387_v33 = vpop.f32.mrf.mxu2 }
 0x34c   :  { %v1447_v61 = vadd.f32 %v1446_v27, %v1387_v33  ;;  %v1155_v44 = vpop.permute.xlu1 %1154  ;;  %v1499_v36 = vpop.f32.mrf.mxu3 }
 0x34d   :  { %1184 = vst.msk [vmem:[#allocation2 + $0xc0] sm:$0xff] %vm412_vm4, %v1155_v44  ;;  %1410 = vmatmul.f32.gmra.mxu2 %v1264_v45  ;;  %1528 = vmatmul.f32.gmra.mxu3 %v1264_v45  ;;  %v1561_v51 = vpop.f32.mrf.mxu0  ;;  %v10425_v45 = vld [vmem:[%s16149_s6 + $0x2] ss:$0 sm:$0xff] }
 0x34e   :  { %v1600_v3 = vrot.slane %v1447_v61, 1  ;;  %1645 = vrot.lane.b32.xlu0 %v1447_v61, %s8946_s19 }
 0x350   :  { %v10390_v21 = vsel %vm441_vm1, %v1599_v20, %v1600_v3 }
 0x354   :  { %v1390_v12 = vpop.f32.mrf.mxu2  ;;  %v1266_v30 = vld [vmem:[#allocation2 + $0xc0] sm:$0xff]  ;;  %v1502_v50 = vpop.f32.mrf.mxu3 }
 0x355   :  { %v1450_v58 = vadd.f32 %v1449_v63, %v1390_v12  ;;  %1413 = vmatmul.f32.gmra.mxu2 %v1266_v30  ;;  %1531 = vmatmul.f32.gmra.mxu3 %v1266_v30  ;;  %v1564_v46 = vpop.f32.mrf.mxu0  ;;  %v1562_v20 = vadd.f32 %v1561_v51, %v1502_v50 }
 0x357   :  { %v1601_v54 = vrot.slane %v1450_v58, 1  ;;  %1647 = vrot.lane.b32.xlu1 %v1450_v58, %s8946_s19  ;;  %v1697_v61 = vrot.slane %v1562_v20, 7  ;;  %v16349_v58 = vld [vmem:[#allocation8_spill] sm:$0xff] }
 0x359   :  { %v10395_v34 = vsel %vm441_vm1, %v1600_v3, %v1601_v54 }
 0x35c   :  { %v1393_v9 = vpop.f32.mrf.mxu2  ;;  %v1505_v29 = vpop.f32.mrf.mxu3 }
 0x35d   :  { %v1453_v17 = vadd.f32 %v1452_v5, %v1393_v9  ;;  %1416 = vmatmul.f32.gmra.mxu2 %v1268_v25  ;;  %1534 = vmatmul.f32.gmra.mxu3 %v1268_v25  ;;  %v1565_v27 = vadd.f32 %v1564_v46, %v1505_v29  ;;  %v10434_v25 = vadd.f32 %v1558_v18, %v1499_v36  ;;  %v16351_v36 = vld [vmem:[#allocation6_spill] sm:$0xff] }
 0x35f   :  { %v1602_v52 = vrot.slane %v1453_v17, 1  ;;  %1649 = vrot.lane.b32.xlu0 %v1453_v17, %s8946_s19  ;;  %v1698_v33 = vrot.slane %v1565_v27, 7  ;;  %v10438_v17 = vpop.f32.mrf.mxu1 }
 0x361   :  { %v10400_v55 = vsel %vm441_vm1, %v1601_v54, %v1602_v52  ;;  %v1719_v63 = vsel %vm277_vm2, %v1697_v61, %v1698_v33 }
 0x364   :  { %v1396_v41 = vpop.f32.mrf.mxu2 }
 0x365   :  { %v1456_v14 = vadd.f32 %v1455_v19, %v1396_v41  ;;  %v1508_v41 = vpop.f32.mrf.mxu3 }
 0x367   :  { %v1603_v43 = vrot.slane %v1456_v14, 1  ;;  %1651 = vrot.lane.b32.xlu1 %v1456_v14, %s8946_s19  ;;  %v1464_v50 = vpop.f32.mrf.mxu1 }
 0x369   :  { %v10405_v49 = vsel %vm441_vm1, %v1602_v52, %v1603_v43 }
 0x36c   :  { %v1399_v10 = vpop.f32.mrf.mxu2 }
 0x36d   :  { %v10407_v37 = vadd.f32 %v1458_v60, %v1399_v10  ;;  %v1567_v10 = vpop.f32.mrf.mxu0  ;;  %v1511_v20 = vpop.f32.mrf.mxu3 }
 0x36e   :  { %v1568_v27 = vadd.f32 %v1567_v10, %v1508_v41 }
 0x36f   :  { %v16188_v62 = vrot.slane %v10407_v37, 1  ;;  %1653 = vrot.lane.b32.xlu0 %v10407_v37, %s8946_s19 }
 0x371   :  { %v10416_v2 = vsel %vm441_vm1, %v1603_v43, %v16188_v62 }
 0x38f   :  { %v10448_v51 = vpop.permute.xlu0 %1639 }
 0x39f   :  { %v10450_v29 = vpop.f32.mrf.mxu2 }
 0x3a0   :  { %v1644_v44 = vpop.permute.xlu2 %1643 }
 0x3a1   :  { %v1683_v3 = vadd.f32 %v1644_v44, %v1622_v1  ;;  %v16192_v1 = vrot.slane %v10434_v25, 7 }
 0x3a3   :  { %v1725_v12 = vadd.f32 %v1719_v63, %v1683_v3  ;;  %v1720_v14 = vsel %vm277_vm2, %v16192_v1, %v1697_v61 }
 0x3a5   :  { %v1744_v30 = vadd.f32 %v10425_v45, %v1725_v12  ;;  %v1699_v12 = vrot.slane %v1568_v27, 7  ;;  %v1514_v27 = vpop.f32.mrf.mxu3 }
 0x3a7   :  { %v1758_v54 = vadd.f32 %v1744_v30, %v16349_v58 }
 0x3a9   :  { %v1772_v5 = vmax.f32 %v1758_v54, 0.0  ;;  %v1570_v54 = vpop.f32.mrf.mxu0 }
 0x3aa   :  { %v1571_v10 = vadd.f32 %v1570_v54, %v1511_v20 }
 0x3ab   :  { %v10432_v9 = vmul.f32 %v1772_v5, %v9204_v53 }
 0x3ad   :  { %16350 = vst [vmem:[#allocation18_spill] sm:$0xff] %v10432_v9  ;;  %1872 = vrot.lane.b32.xlu0 %v10432_v9, %s8946_s19  ;;  %v1800_v44 = vrot.slane %v10432_v9, 7  ;;  %v1926_v61 = vrot.slane %v10432_v9, 1 }
 0x3b0   :  { %v1642_v52 = vpop.permute.xlu1 %1641 }
 0x3b1   :  { %v1682_v19 = vadd.f32 %v1642_v52, %v10381_v24 }
 0x3b3   :  { %v1724_v43 = vadd.f32 %v1720_v14, %v1682_v19 }
 0x3b5   :  { %v1743_v60 = vadd.f32 %v10425_v45, %v1724_v43  ;;  %v1467_v43 = vpop.f32.mrf.mxu1 }
 0x3b7   :  { %v1757_v18 = vadd.f32 %v1743_v60, %v16351_v36  ;;  %v1718_v60 = vsel %vm277_vm2, %v1698_v33, %v1699_v12 }
 0x3b9   :  { %v1771_v46 = vmax.f32 %v1757_v18, 0.0 }
 0x3bb   :  { %v10453_v24 = vmul.f32 %v1771_v46, %v9186_v47 }
 0x3bd   :  { %16352 = vst [vmem:[#allocation21_spill] sm:$0xff] %v10453_v24  ;;  %v16189_v3 = vrot.slane %v10453_v24, 7  ;;  %v16191_v63 = vrot.slane %v10453_v24, 1  ;;  %1870 = vrot.lane.b32.xlu1 %v10453_v24, %s8946_s19 }
 0x3bf   :  { %v1949_v30 = vsel %vm441_vm1, %v16191_v63, %v1926_v61  ;;  %v1823_v58 = vsel %vm277_vm2, %v16189_v3, %v1800_v44  ;;  %v1573_v3 = vpop.f32.mrf.mxu0 }
 0x3c0   :  { %v1953_v5 = vmul.f32 %v1949_v30, %v9633_v28  ;;  %v1646_v52 = vpop.permute.xlu0 %1645  ;;  %v1828_v19 = vmul.f32 %v1823_v58, %v9210_v59  ;;  %v1405_v14 = vpop.f32.mrf.mxu2  ;;  %v16353_v30 = vld [vmem:[#allocation10_spill] sm:$0xff] }
 0x3c1   :  { %v1684_v41 = vadd.f32 %v1646_v52, %v10390_v21  ;;  %v10475_v18 = vadd.f32 %v1464_v50, %v1405_v14  ;;  %v1700_v21 = vrot.slane %v1571_v10, 7  ;;  %v10483_v50 = vadd.f32 %v1573_v3, %v1514_v27  ;;  %v8303_v3 = vld [vmem:[%s16151_s5 + $0x470] sm:$0xff] }
 0x3c2   :  { %1967 = vst.msk [vmem:[#allocation2 + $0x18] sm:$0xff] %vm341_vm3, %v1953_v5  ;;  %2166 = vmatpush.msrb.mxu1 %v8303_v3 }
 0x3c3   :  { %v1726_v36 = vadd.f32 %v1718_v60, %v1684_v41  ;;  %1842 = vst.msk [vmem:[#allocation2 + $0x20] sm:$0xff] %vm341_vm3, %v1828_v19  ;;  %v1717_v54 = vsel %vm277_vm2, %v1699_v12, %v1700_v21  ;;  %v1470_v41 = vpop.f32.mrf.mxu1  ;;  %v16190_v14 = vrot.slane %v10475_v18, 1  ;;  %v8304_v12 = vld [vmem:[%s16151_s5 + $0x478] sm:$0xff]  ;;  %v1701_v27 = vrot.slane %v10483_v50, 7 }
 0x3c4   :  { %2284 = vmatpush.msrb.mxu0 %v8304_v12 }
 0x3c5   :  { %v1745_v46 = vadd.f32 %v10425_v45, %v1726_v36  ;;  %1657 = vrot.lane.b32.xlu1 %v10475_v18, %s8946_s19 }
 0x3c7   :  { %v1759_v58 = vadd.f32 %v1745_v46, %v16353_v30  ;;  %v8302_v30 = vld [vmem:[%s16151_s5 + $0x468] sm:$0xff]  ;;  %v1576_v12 = vpop.f32.mrf.mxu0 }
 0x3c8   :  { %v1408_v62 = vpop.f32.mrf.mxu2  ;;  %2285 = vmatpush.msrb.mxu0 %v8302_v30 }
 0x3c9   :  { %v1773_v52 = vmax.f32 %v1759_v58, 0.0  ;;  %v1648_v5 = vpop.permute.xlu1 %1647  ;;  %v1468_v20 = vadd.f32 %v1467_v43, %v1408_v62  ;;  %v8301_v43 = vld [vmem:[%s16151_s5 + $0x460] sm:$0xff] }
 0x3ca   :  { %v1685_v33 = vadd.f32 %v1648_v5, %v10395_v34  ;;  %v1517_v5 = vpop.f32.mrf.mxu3  ;;  %2167 = vmatpush.msrb.mxu1 %v8301_v43 }
 0x3cb   :  { %v10488_v19 = vmul.f32 %v1773_v52, %v9225_v7  ;;  %v1607_v10 = vrot.slane %v1468_v20, 1  ;;  %1659 = vrot.lane.b32.xlu0 %v1468_v20, %s8946_s19  ;;  %v1473_v30 = vpop.f32.mrf.mxu1 }
 0x3cc   :  { %v1727_v60 = vadd.f32 %v1717_v54, %v1685_v33  ;;  %v16355_v33 = vld [vmem:[#allocation12_spill] sm:$0xff] }
 0x3cd   :  { %16354 = vst [vmem:[#allocation20_spill] sm:$0xff] %v10488_v19  ;;  %v1801_v36 = vrot.slane %v10488_v19, 7  ;;  %v1927_v34 = vrot.slane %v10488_v19, 1  ;;  %v10508_v46 = vsel %vm441_vm1, %v16190_v14, %v1607_v10 }
 0x3ce   :  { %v1746_v62 = vadd.f32 %v10425_v45, %v1727_v60 }
 0x3cf   :  { %v1948_v58 = vsel %vm441_vm1, %v1926_v61, %v1927_v34  ;;  %v1822_v52 = vsel %vm277_vm2, %v1800_v44, %v1801_v36  ;;  %v10525_v44 = vadd.f32 %v1576_v12, %v1517_v5  ;;  %v1716_v61 = vsel %vm277_vm2, %v1700_v21, %v1701_v27  ;;  %v8300_v5 = vld [vmem:[%s16151_s5 + $0x458] sm:$0xff] }
 0x3d0   :  { %v1760_v20 = vadd.f32 %v1746_v62, %v16355_v33  ;;  %v1954_v54 = vmul.f32 %v1948_v58, %v9163_v38  ;;  %v1829_v60 = vmul.f32 %v1822_v52, %v9229_v11  ;;  %v1411_v3 = vpop.f32.mrf.mxu2  ;;  %2286 = vmatpush.msrb.mxu0 %v8300_v5 }
 0x3d1   :  { %v1650_v50 = vpop.permute.xlu0 %1649  ;;  %v10522_v1 = vadd.f32 %v1470_v41, %v1411_v3 }
 0x3d2   :  { %v1774_v14 = vmax.f32 %v1760_v20, 0.0  ;;  %v1686_v63 = vadd.f32 %v1650_v50, %v10400_v55  ;;  %1968 = vst.msk [vmem:[#allocation2 + $0x28] sm:$0xff] %vm341_vm3, %v1954_v54  ;;  %v1520_v33 = vpop.f32.mrf.mxu3  ;;  %v16357_v20 = vld [vmem:[#allocation14_spill] sm:$0xff] }
 0x3d3   :  { %1843 = vst.msk [vmem:[#allocation2 + $0x30] sm:$0xff] %vm341_vm3, %v1829_v60  ;;  %v1608_v58 = vrot.slane %v10522_v1, 1  ;;  %v8298_v60 = vld [vmem:[%s16151_s5 + $0x448] sm:$0xff] }
 0x3d4   :  { %v1728_v62 = vadd.f32 %v1716_v61, %v1686_v63  ;;  %v10532_v43 = vmul.f32 %v1774_v14, %v9165_v39  ;;  %v8299_v14 = vld [vmem:[%s16151_s5 + $0x450] sm:$0xff]  ;;  %2287 = vmatpush.msrb.mxu0 %v8298_v60  ;;  %v16360_v60 = vld [vmem:[#allocation15_spill] sm:$0xff] }
 0x3d5   :  { %v10541_v21 = vsel %vm441_vm1, %v1607_v10, %v1608_v58  ;;  %2168 = vmatpush.msrb.mxu1 %v8299_v14  ;;  %v8297_v10 = vld [vmem:[%s16151_s5 + $0x440] sm:$0xff] }
 0x3d6   :  { %16356 = vst [vmem:[#allocation19_spill] sm:$0xff] %v10532_v43  ;;  %v1747_v55 = vadd.f32 %v10425_v45, %v1728_v62  ;;  %v1802_v41 = vrot.slane %v10532_v43, 7  ;;  %v1928_v52 = vrot.slane %v10532_v43, 1  ;;  %1876 = vrot.lane.b32.xlu1 %v10532_v43, %s8946_s19  ;;  %v8295_v62 = vld [vmem:[%s16151_s5 + $0x430] sm:$0xff]  ;;  %v16358_v43 = vrot.slane %v10525_v44, 7 }
 0x3d7   :  { %2169 = vmatpush.msrb.mxu1 %v8297_v10  ;;  %v1476_v10 = vpop.f32.mrf.mxu1 }
 0x3d8   :  { %v1761_v54 = vadd.f32 %v1747_v55, %v16357_v20  ;;  %v1947_v50 = vsel %vm441_vm1, %v1927_v34, %v1928_v52  ;;  %v1821_v3 = vsel %vm277_vm2, %v1801_v36, %v1802_v41  ;;  %v1414_v61 = vpop.f32.mrf.mxu2  ;;  %v8296_v55 = vld [vmem:[%s16151_s5 + $0x438] sm:$0xff]  ;;  %v1579_v20 = vpop.f32.mrf.mxu0  ;;  %v1715_v9 = vsel %vm277_vm2, %v1701_v27, %v16358_v43 }
 0x3d9   :  { %v1652_v12 = vpop.permute.xlu1 %1651  ;;  %v1955_v14 = vmul.f32 %v1947_v50, %v9167_v40  ;;  %v1830_v5 = vmul.f32 %v1821_v3, %v9273_v35  ;;  %v1474_v63 = vadd.f32 %v1473_v30, %v1414_v61  ;;  %v10570_v36 = vadd.f32 %v1579_v20, %v1520_v33  ;;  %2170 = vmatpush.msrb.mxu1 %v8295_v62  ;;  %v8294_v30 = vld [vmem:[%s16151_s5 + $0x428] sm:$0xff]  ;;  %v8292_v33 = vld [vmem:[%s16151_s5 + $0x418] sm:$0xff]  ;;  %v8289_v61 = vld [vmem:[%s16151_s5 + $0x400] sm:$0xff] }
 0x3da   :  { %v1775_v0 = vmax.f32 %v1761_v54, 0.0  ;;  %v1687_v34 = vadd.f32 %v1652_v12, %v10405_v49  ;;  %2288 = vmatpush.msrb.mxu0 %v8296_v55  ;;  %v8293_v49 = vld [vmem:[%s16151_s5 + $0x420] sm:$0xff]  ;;  %v8290_v62 = vld [vmem:[%s16151_s5 + $0x408] sm:$0xff]  ;;  %v10617_v55 = vadd.f32 %v10418_v15, %v10420_v23 }
 0x3db   :  { %1969 = vst.msk [vmem:[#allocation2 + $0x38] sm:$0xff] %vm341_vm3, %v1955_v14  ;;  %v1609_v50 = vrot.slane %v1474_v63, 1  ;;  %v1703_v54 = vrot.slane %v10570_v36, 7  ;;  %2171 = vmatpush.msrb.mxu1 %v8293_v49 }
 0x3dc   :  { %v1729_v39 = vadd.f32 %v1715_v9, %v1687_v34  ;;  %v10578_v3 = vmul.f32 %v1775_v0, %v9227_v8  ;;  %1844 = vst.msk [vmem:[#allocation2 + $0x40] sm:$0xff] %vm341_vm3, %v1830_v5  ;;  %v8291_v0 = vld [vmem:[%s16151_s5 + $0x410] sm:$0xff]  ;;  %2289 = vmatpush.msrb.mxu0 %v8294_v30 }
 0x3dd   :  { %2172 = vmatpush.msrb.mxu1 %v8291_v0 }
 0x3de   :  { %16359 = vst [vmem:[#allocation8_spill] sm:$0xff] %v10578_v3  ;;  %v1748_v27 = vadd.f32 %v10425_v45, %v1729_v39  ;;  %v1803_v9 = vrot.slane %v10578_v3, 7  ;;  %v1929_v43 = vrot.slane %v10578_v3, 1  ;;  %1878 = vrot.lane.b32.xlu0 %v10578_v3, %s8946_s19  ;;  %1663 = vrot.lane.b32.xlu1 %v1474_v63, %s8946_s19  ;;  %v10601_v39 = vsel %vm441_vm1, %v1608_v58, %v1609_v50 }
 0x3df   :  { %2290 = vmatpush.msrb.mxu0 %v8292_v33  ;;  %2173 = vmatpush.msrb.mxu1 %v8289_v61 }
 0x3e0   :  { %v1762_v12 = vadd.f32 %v1748_v27, %v16360_v60  ;;  %v1946_v63 = vsel %vm441_vm1, %v1928_v52, %v1929_v43  ;;  %v1820_v58 = vsel %vm277_vm2, %v1802_v41, %v1803_v9  ;;  %v1417_v20 = vpop.f32.mrf.mxu2  ;;  %v16361_v41 = vrot.slane %v10525_v44, 7 }
 0x3e1   :  { %v1956_v14 = vmul.f32 %v1946_v63, %v9265_v32  ;;  %v1654_v5 = vpop.permute.xlu0 %1653  ;;  %v1831_v52 = vmul.f32 %v1820_v58, %v9313_v16  ;;  %v1477_v30 = vadd.f32 %v1476_v10, %v1417_v20  ;;  %2291 = vmatpush.msrb.mxu0 %v8290_v62  ;;  %v16363_v44 = vrot.slane %v10369_v13, 1  ;;  %v16365_v58 = vld [vmem:[#allocation16_spill] sm:$0xff] }
 0x3e2   :  { %v1776_v34 = vmax.f32 %v1762_v12, 0.0  ;;  %v1688_v49 = vadd.f32 %v1654_v5, %v10416_v2  ;;  %v1714_v15 = vsel %vm277_vm2, %v16361_v41, %v1703_v54  ;;  %v1695_v2 = vrot.slane %v10617_v55, 7 }
 0x3e3   :  { %1970 = vst.msk [vmem:[#allocation2 + $0x48] sm:$0xff] %vm341_vm3, %v1956_v14  ;;  %v1610_v27 = vrot.slane %v1477_v30, 1  ;;  %1665 = vrot.lane.b32.xlu2 %v1477_v30, %s8946_s19  ;;  %v16364_v62 = vrot.slane %v10434_v25, 7  ;;  %v16367_v30 = vld [vmem:[#allocation4_spill] sm:$0xff] }
 0x3e4   :  { %v1730_v23 = vadd.f32 %v1714_v15, %v1688_v49  ;;  %v10631_v0 = vmul.f32 %v1776_v34, %v9206_v56  ;;  %1845 = vst.msk [vmem:[#allocation2 + $0x50] sm:$0xff] %vm341_vm3, %v1831_v52 }
 0x3e5   :  { %v1624_v10 = vsel %vm441_vm1, %v1610_v27, %v16363_v44  ;;  %v10645_v61 = vsel %vm441_vm1, %v1609_v50, %v1610_v27  ;;  %v1721_v13 = vsel %vm277_vm2, %v1695_v2, %v16364_v62 }
 0x3e6   :  { %16362 = vst [vmem:[#allocation6_spill] sm:$0xff] %v10631_v0  ;;  %v1749_v33 = vadd.f32 %v10425_v45, %v1730_v23  ;;  %v1804_v60 = vrot.slane %v10631_v0, 7  ;;  %v1930_v12 = vrot.slane %v10631_v0, 1  ;;  %v1681_v63 = vadd.f32 %v10448_v51, %v1624_v10 }
 0x3e8   :  { %v1763_v14 = vadd.f32 %v1749_v33, %v16365_v58  ;;  %v1945_v5 = vsel %vm441_vm1, %v1929_v43, %v1930_v12  ;;  %v1819_v20 = vsel %vm277_vm2, %v1803_v9, %v1804_v60  ;;  %v1723_v51 = vadd.f32 %v1721_v13, %v1681_v63 }
 0x3e9   :  { %v1957_v52 = vmul.f32 %v1945_v5, %v9307_v4  ;;  %v1832_v50 = vmul.f32 %v1819_v20, %v9373_v26  ;;  %v16370_v13 = vrot.slane %v10453_v24, 7  ;;  %v10707_v20 = vadd.f32 %v10438_v17, %v10450_v29  ;;  %v10720_v17 = vpop.f32.mrf.mxu3  ;;  %v10722_v29 = vpop.f32.mrf.mxu0 }
 0x3ea   :  { %v1777_v34 = vmax.f32 %v1763_v14, 0.0  ;;  %v1742_v25 = vadd.f32 %v10425_v45, %v1723_v51 }
 0x3eb   :  { %1971 = vst.msk [vmem:[#allocation2 + $0x58] sm:$0xff] %vm341_vm3, %v1957_v52  ;;  %v1983_v52 = vld [vmem:[#allocation2 + $0x18] sm:$0xff] }
 0x3ec   :  { %v10663_v49 = vmul.f32 %v1777_v34, %v9172_v42  ;;  %1846 = vst.msk [vmem:[#allocation2 + $0x60] sm:$0xff] %vm341_vm3, %v1832_v50  ;;  %v1756_v43 = vadd.f32 %v1742_v25, %v16367_v30  ;;  %v1985_v50 = vld [vmem:[#allocation2 + $0x28] sm:$0xff]  ;;  %v1987_v25 = vld [vmem:[#allocation2 + $0x38] sm:$0xff]  ;;  %v8287_v30 = vld [vmem:[%s16151_s5 + $0x3f0] sm:$0xff] }
 0x3ed   :  { %2099 = vmatpush.msra.mxu2 %v8287_v30  ;;  %v8275_v30 = vld [vmem:[%s16151_s5 + $0x390] sm:$0xff] }
 0x3ee   :  { %16366 = vst [vmem:[#allocation10_spill] sm:$0xff] %v10663_v49  ;;  %v1805_v41 = vrot.slane %v10663_v49, 7  ;;  %v1931_v9 = vrot.slane %v10663_v49, 1  ;;  %1882 = vrot.lane.b32.xlu0 %v10663_v49, %s8946_s19  ;;  %v1770_v15 = vmax.f32 %v1756_v43, 0.0  ;;  %v8288_v43 = vld [vmem:[%s16151_s5 + $0x3f8] sm:$0xff] }
 0x3ef   :  { %2217 = vmatpush.msrb.mxu3 %v8288_v43  ;;  %v8276_v43 = vld [vmem:[%s16151_s5 + $0x398] sm:$0xff] }
 0x3f0   :  { %v1944_v23 = vsel %vm441_vm1, %v1930_v12, %v1931_v9  ;;  %v1818_v27 = vsel %vm277_vm2, %v1804_v60, %v1805_v41  ;;  %v10680_v33 = vmul.f32 %v1770_v15, %v9172_v42  ;;  %v16369_v60 = vrot.slane %v10453_v24, 1  ;;  %v8285_v15 = vld [vmem:[%s16151_s5 + $0x3e0] sm:$0xff] }
 0x3f1   :  { %v1958_v44 = vmul.f32 %v1944_v23, %v9357_v57  ;;  %v1833_v10 = vmul.f32 %v1818_v27, %v9368_v22  ;;  %v10728_v34 = vpop.f32.mrf.mxu3  ;;  %v8286_v23 = vld [vmem:[%s16151_s5 + $0x3e8] sm:$0xff]  ;;  %2100 = vmatpush.msra.mxu2 %v8285_v15  ;;  %v8273_v15 = vld [vmem:[%s16151_s5 + $0x380] sm:$0xff] }
 0x3f2   :  { %16368 = vst [vmem:[#allocation12_spill] sm:$0xff] %v10680_v33  ;;  %1868 = vrot.lane.b32.xlu2 %v10680_v33, %s8946_s19  ;;  %v1798_v63 = vrot.slane %v10680_v33, 7  ;;  %v1924_v62 = vrot.slane %v10680_v33, 1  ;;  %2218 = vmatpush.msrb.mxu3 %v8286_v23  ;;  %v8274_v23 = vld [vmem:[%s16151_s5 + $0x388] sm:$0xff] }
 0x3f3   :  { %1972 = vst.msk [vmem:[#allocation2 + $0x68] sm:$0xff] %vm341_vm3, %v1958_v44  ;;  %v1989_v44 = vld [vmem:[#allocation2 + $0x48] sm:$0xff] }
 0x3f4   :  { %1847 = vst.msk [vmem:[#allocation2 + $0x70] sm:$0xff] %vm341_vm3, %v1833_v10  ;;  %v1950_v12 = vsel %vm441_vm1, %v1924_v62, %v16369_v60  ;;  %v1824_v58 = vsel %vm277_vm2, %v1798_v63, %v16370_v13  ;;  %v8283_v10 = vld [vmem:[%s16151_s5 + $0x3d0] sm:$0xff]  ;;  %v8284_v60 = vld [vmem:[%s16151_s5 + $0x3d8] sm:$0xff]  ;;  %v8281_v13 = vld [vmem:[%s16151_s5 + $0x3c0] sm:$0xff] }
 0x3f5   :  { %v1952_v14 = vmul.f32 %v1950_v12, %v9617_v31  ;;  %v1827_v5 = vmul.f32 %v1824_v58, %v9188_v48  ;;  %2101 = vmatpush.msra.mxu2 %v8283_v10  ;;  %2219 = vmatpush.msrb.mxu3 %v8284_v60  ;;  %v8282_v58 = vld [vmem:[%s16151_s5 + $0x3c8] sm:$0xff]  ;;  %v8272_v10 = vld [vmem:[%s16151_s5 + $0x378] sm:$0xff] }
 0x3f7   :  { %1966 = vst.msk [vmem:[#allocation2 + $0x8] sm:$0xff] %vm341_vm3, %v1952_v14  ;;  %2102 = vmatpush.msra.mxu2 %v8281_v13  ;;  %2220 = vmatpush.msrb.mxu3 %v8282_v58  ;;  %v8269_v13 = vld [vmem:[%s16151_s5 + $0x360] sm:$0xff]  ;;  %v8270_v58 = vld [vmem:[%s16151_s5 + $0x368] sm:$0xff] }
 0x3f8   :  { %1841 = vst.msk [vmem:[#allocation2 + $0x10] sm:$0xff] %vm341_vm3, %v1827_v5  ;;  %v8279_v5 = vld [vmem:[%s16151_s5 + $0x3b0] sm:$0xff] }
 0x3f9   :  { %v10753_v12 = vpop.f32.mrf.mxu3  ;;  %2103 = vmatpush.msra.mxu2 %v8279_v5 }
 0x3fa   :  { %1655 = vrot.lane.b32.xlu2 %v10707_v20, %s8946_s19 }
 0x3fe   :  { %v1981_v51 = vld [vmem:[#allocation2 + $0x8] sm:$0xff] }
 0x3ff   :  { %8305 = vmatmul.msk.f32.vlgmr.msrb.gmra.mxu1 %vm341_vm3, %v1981_v51  ;;  %8319 = vmatmul.msk.f32.vlgmr.msrb.gmra.mxu0 %vm341_vm3, %v1981_v51  ;;  %v8280_v51 = vld [vmem:[%s16151_s5 + $0x3b8] sm:$0xff] }
 0x400   :  { %2221 = vmatpush.msrb.mxu3 %v8280_v51  ;;  %v1993_v51 = vld [vmem:[#allocation2 + $0x68] sm:$0xff] }
 0x402   :  { %1874 = vrot.lane.b32.xlu2 %v10488_v19, %s8946_s19 }
 0x407   :  { %8306 = vmatmul.msk.f32.gmra.mxu1 %vm341_vm3, %v1983_v52  ;;  %8320 = vmatmul.msk.f32.gmra.mxu0 %vm341_vm3, %v1983_v52  ;;  %v8277_v52 = vld [vmem:[%s16151_s5 + $0x3a0] sm:$0xff] }
 0x408   :  { %2104 = vmatpush.msra.mxu2 %v8277_v52  ;;  %v8267_v52 = vld [vmem:[%s16151_s5 + $0x350] sm:$0xff] }
 0x40a   :  { %1661 = vrot.lane.b32.xlu2 %v10522_v1, %s8946_s19  ;;  %v1585_v1 = vpop.f32.mrf.mxu0  ;;  %2105 = vmatpush.msra.mxu2 %v8275_v30  ;;  %v8265_v30 = vld [vmem:[%s16151_s5 + $0x340] sm:$0xff] }
 0x40c   :  { %2106 = vmatpush.msra.mxu2 %v8273_v15  ;;  %v10821_v15 = vadd.f32 %v10722_v29, %v10720_v17  ;;  %v8261_v17 = vld [vmem:[%s16151_s5 + $0x320] sm:$0xff]  ;;  %v8262_v29 = vld [vmem:[%s16151_s5 + $0x328] sm:$0xff] }
 0x40f   :  { %8307 = vmatmul.msk.f32.gmra.mxu1 %vm341_vm3, %v1985_v50  ;;  %8321 = vmatmul.msk.f32.gmra.mxu0 %vm341_vm3, %v1985_v50  ;;  %v8278_v50 = vld [vmem:[%s16151_s5 + $0x3a8] sm:$0xff] }
 0x410   :  { %2222 = vmatpush.msrb.mxu3 %v8278_v50  ;;  %v8268_v50 = vld [vmem:[%s16151_s5 + $0x358] sm:$0xff] }
 0x412   :  { %1880 = vrot.lane.b32.xlu2 %v10631_v0, %s8946_s19  ;;  %v1588_v14 = vpop.f32.mrf.mxu0  ;;  %2223 = vmatpush.msrb.mxu3 %v8276_v43  ;;  %v8266_v43 = vld [vmem:[%s16151_s5 + $0x348] sm:$0xff] }
 0x414   :  { %2224 = vmatpush.msrb.mxu3 %v8274_v23  ;;  %v1605_v23 = vrot.slane %v10707_v20, 1 }
 0x416   :  { %2225 = vmatpush.msrb.mxu3 %v8272_v10 }
 0x417   :  { %8308 = vmatmul.msk.f32.gmra.mxu1 %vm341_vm3, %v1987_v25  ;;  %8322 = vmatmul.msk.f32.gmra.mxu0 %vm341_vm3, %v1987_v25  ;;  %v1991_v25 = vld [vmem:[#allocation2 + $0x58] sm:$0xff] }
 0x418   :  { %2226 = vmatpush.msrb.mxu3 %v8270_v58  ;;  %v1704_v58 = vrot.slane %v10821_v15, 7 }
 0x41a   :  { %v10795_v60 = vpop.f32.mrf.mxu0  ;;  %2227 = vmatpush.msrb.mxu3 %v8268_v50  ;;  %v10844_v50 = vadd.f32 %v1588_v14, %v10753_v12  ;;  %v8257_v14 = vld [vmem:[%s16151_s5 + $0x300] sm:$0xff] }
 0x41c   :  { %2228 = vmatpush.msrb.mxu3 %v8266_v43  ;;  %v8259_v43 = vld [vmem:[%s16151_s5 + $0x310] sm:$0xff] }
 0x41f   :  { %v1873_v27 = vpop.permute.xlu0 %1872  ;;  %8309 = vmatmul.msk.f32.gmra.mxu1 %vm341_vm3, %v1989_v44  ;;  %8323 = vmatmul.msk.f32.gmra.mxu0 %vm341_vm3, %v1989_v44  ;;  %v8271_v44 = vld [vmem:[%s16151_s5 + $0x370] sm:$0xff] }
 0x420   :  { %1912 = vst.msk [vmem:[#allocation2 + $0x20] sm:$0xff] %vm412_vm4, %v1873_v27  ;;  %v10787_v27 = vpop.f32.mrf.mxu3  ;;  %2107 = vmatpush.msra.mxu2 %v8271_v44 }
 0x422   :  { %2108 = vmatpush.msra.mxu2 %v8269_v13  ;;  %v1594_v13 = vpop.f32.mrf.mxu0 }
 0x424   :  { %2109 = vmatpush.msra.mxu2 %v8267_v52 }
 0x426   :  { %2110 = vmatpush.msra.mxu2 %v8265_v30 }
 0x427   :  { %8310 = vmatmul.msk.f32.gmra.mxu1 %vm341_vm3, %v1991_v25  ;;  %8324 = vmatmul.msk.f32.gmra.mxu0 %vm341_vm3, %v1991_v25  ;;  %v1586_v25 = vadd.f32 %v1585_v1, %v10728_v34  ;;  %v8263_v34 = vld [vmem:[%s16151_s5 + $0x330] sm:$0xff]  ;;  %v8264_v1 = vld [vmem:[%s16151_s5 + $0x338] sm:$0xff] }
 0x428   :  { %v1535_v10 = vpop.f32.mrf.mxu3  ;;  %2111 = vmatpush.msra.mxu2 %v8263_v34  ;;  %2229 = vmatpush.msrb.mxu3 %v8264_v1  ;;  %v8258_v1 = vld [vmem:[%s16151_s5 + $0x308] sm:$0xff] }
 0x429   :  { %v1705_v44 = vrot.slane %v1586_v25, 7  ;;  %v10846_v25 = vadd.f32 %v1594_v13, %v1535_v10  ;;  %v1706_v10 = vrot.slane %v10844_v50, 7  ;;  %v16372_v13 = vld [vmem:[#allocation5_spill] sm:$0xff] }
 0x42a   :  { %2112 = vmatpush.msra.mxu2 %v8261_v17  ;;  %2230 = vmatpush.msrb.mxu3 %v8262_v29 }
 0x42b   :  { %v1712_v34 = vsel %vm277_vm2, %v1704_v58, %v1705_v44  ;;  %v1708_v17 = vrot.slane %v10846_v25, 7 }
 0x42c   :  { %2113 = vmatpush.msra.mxu2 %v8259_v43 }
 0x42d   :  { %v1722_v25 = vsel %vm277_vm2, %v1708_v17, %v1695_v2 }
 0x42e   :  { %2114 = vmatpush.msra.mxu2 %v8257_v14 }
 0x42f   :  { %v1871_v5 = vpop.permute.xlu1 %1870  ;;  %8311 = vmatmul.msk.f32.gmra.mxu1 %vm341_vm3, %v1993_v51  ;;  %8325 = vmatmul.msk.f32.gmra.mxu0 %vm341_vm3, %v1993_v51  ;;  %v16371_v51 = vrot.slane %v10475_v18, 1  ;;  %v8260_v18 = vld [vmem:[%s16151_s5 + $0x318] sm:$0xff] }
 0x430   :  { %1911 = vst.msk [vmem:[#allocation2 + $0x10] sm:$0xff] %vm412_vm4, %v1871_v5  ;;  %2231 = vmatpush.msrb.mxu3 %v8260_v18 }
 0x431   :  { %v1615_v52 = vsel %vm441_vm1, %v1605_v23, %v16371_v51 }
 0x432   :  { %2232 = vmatpush.msrb.mxu3 %v8258_v1 }
 0x437   :  { %v1658_v5 = vpop.permute.xlu1 %1657 }
 0x438   :  { %v1690_v30 = vadd.f32 %v1658_v5, %v1615_v52 }
 0x43a   :  { %v1732_v12 = vadd.f32 %v1712_v34, %v1690_v30  ;;  %v1711_v34 = vsel %vm277_vm2, %v1705_v44, %v1706_v10  ;;  %v16375_v44 = vld [vmem:[#allocation13_spill] sm:$0xff] }
 0x43c   :  { %v1751_v29 = vadd.f32 %v10425_v45, %v1732_v12 }
 0x43d   :  { %v1660_v51 = vpop.permute.xlu0 %1659  ;;  %v1666_v52 = vpop.permute.xlu2 %1665 }
 0x43e   :  { %v1765_v5 = vadd.f32 %v1751_v29, %v16372_v13  ;;  %v1691_v30 = vadd.f32 %v1660_v51, %v10508_v46  ;;  %v1694_v43 = vadd.f32 %v1666_v52, %v10645_v61  ;;  %v16374_v29 = vld [vmem:[#allocation7_spill] sm:$0xff] }
 0x440   :  { %v1779_v18 = vmax.f32 %v1765_v5, 0.0  ;;  %v1733_v12 = vadd.f32 %v1711_v34, %v1691_v30  ;;  %v1736_v14 = vadd.f32 %v1722_v25, %v1694_v43 }
 0x442   :  { %v10879_v1 = vmul.f32 %v1779_v18, %v9204_v53  ;;  %v1752_v46 = vadd.f32 %v10425_v45, %v1733_v12  ;;  %v1755_v61 = vadd.f32 %v10425_v45, %v1736_v14  ;;  %v10903_v14 = vadd.f32 %v10795_v60, %v10787_v27 }
 0x444   :  { %16373 = vst [vmem:[#allocation14_spill] sm:$0xff] %v10879_v1  ;;  %1886 = vrot.lane.b32.xlu2 %v10879_v1, %s8946_s19  ;;  %v1766_v13 = vadd.f32 %v1752_v46, %v16374_v29  ;;  %v1769_v5 = vadd.f32 %v1755_v61, %v16375_v44  ;;  %v1933_v43 = vrot.slane %v10879_v1, 1  ;;  %v1807_v46 = vrot.slane %v10879_v1, 7 }
 0x446   :  { %v1780_v55 = vmax.f32 %v1766_v13, 0.0  ;;  %v1783_v51 = vmax.f32 %v1769_v5, 0.0 }
 0x448   :  { %v1877_v52 = vpop.permute.xlu1 %1876  ;;  %v10888_v2 = vmul.f32 %v1783_v51, %v9206_v56  ;;  %v10892_v30 = vmul.f32 %v1780_v55, %v9225_v7  ;;  %v1707_v55 = vrot.slane %v10903_v14, 7 }
 0x449   :  { %1914 = vst.msk [vmem:[#allocation2 + $0x40] sm:$0xff] %vm412_vm4, %v1877_v52 }
 0x44a   :  { %16376 = vst [vmem:[#allocation15_spill] sm:$0xff] %v10888_v2  ;;  %v1937_v18 = vrot.slane %v10888_v2, 1  ;;  %1888 = vrot.lane.b32.xlu0 %v10892_v30, %s8946_s19  ;;  %v1808_v34 = vrot.slane %v10892_v30, 7  ;;  %v1934_v25 = vrot.slane %v10892_v30, 1  ;;  %v1811_v12 = vrot.slane %v10888_v2, 7 }
 0x44b   :  { %16377 = vst [vmem:[#allocation16_spill] sm:$0xff] %v10892_v30 }
 0x44c   :  { %v1951_v61 = vsel %vm441_vm1, %v1937_v18, %v1924_v62  ;;  %v1941_v29 = vsel %vm441_vm1, %v1933_v43, %v1934_v25  ;;  %v1869_v13 = vpop.permute.xlu2 %1868  ;;  %v1825_v27 = vsel %vm277_vm2, %v1811_v12, %v1798_v63  ;;  %v1815_v62 = vsel %vm277_vm2, %v1807_v46, %v1808_v34 }
 0x44d   :  { %v1965_v60 = vmul.f32 %v1951_v61, %v9357_v57  ;;  %v1961_v44 = vmul.f32 %v1941_v29, %v9163_v38  ;;  %v1826_v5 = vmul.f32 %v1825_v27, %v9368_v22  ;;  %v1836_v61 = vmul.f32 %v1815_v62, %v9229_v11 }
 0x44e   :  { %v1709_v29 = vsel %vm277_vm2, %v1707_v55, %v1708_v17  ;;  %v1713_v62 = vsel %vm277_vm2, %v1703_v54, %v1704_v58 }
 0x44f   :  { %1979 = vst.msk [vmem:[#allocation2 + $0xd8] sm:$0xff] %vm341_vm3, %v1965_v60 }
 0x450   :  { %v1664_v51 = vpop.permute.xlu1 %1663  ;;  %1975 = vst.msk [vmem:[#allocation2 + $0x98] sm:$0xff] %vm341_vm3, %v1961_v44  ;;  %v1879_v52 = vpop.permute.xlu0 %1878 }
 0x451   :  { %v1693_v63 = vadd.f32 %v1664_v51, %v10601_v39  ;;  %1840 = vst.msk [vmem:[#allocation2] sm:$0xff] %vm341_vm3, %v1826_v5  ;;  %v16378_v39 = vrot.slane %v10407_v37, 1 }
 0x452   :  { %1910 = vst.msk [vmem:[#allocation2] sm:$0xff] %vm412_vm4, %v1869_v13  ;;  %1894 = vrot.lane.b32.xlu0 %v10888_v2, %s8946_s19  ;;  %v16379_v13 = vld [vmem:[#allocation11_spill] sm:$0xff] }
 0x453   :  { %v1735_v27 = vadd.f32 %v1709_v29, %v1693_v63  ;;  %1915 = vst.msk [vmem:[#allocation2 + $0x50] sm:$0xff] %vm412_vm4, %v1879_v52  ;;  %v1616_v60 = vsel %vm441_vm1, %v16378_v39, %v1605_v23  ;;  %v16381_v63 = vld [vmem:[#allocation17_spill] sm:$0xff] }
 0x454   :  { %v1656_v44 = vpop.permute.xlu2 %1655  ;;  %1850 = vst.msk [vmem:[#allocation2 + $0xa0] sm:$0xff] %vm341_vm3, %v1836_v61 }
 0x455   :  { %v1754_v14 = vadd.f32 %v10425_v45, %v1735_v27  ;;  %v1689_v17 = vadd.f32 %v1656_v44, %v1616_v60 }
 0x457   :  { %v1768_v5 = vadd.f32 %v1754_v14, %v16379_v13  ;;  %v1731_v51 = vadd.f32 %v1713_v62, %v1689_v17  ;;  %v1982_v17 = vld [vmem:[#allocation2 + $0x10] sm:$0xff] }
 0x459   :  { %v1782_v20 = vmax.f32 %v1768_v5, 0.0  ;;  %v1750_v37 = vadd.f32 %v10425_v45, %v1731_v51  ;;  %v1980_v52 = vld [vmem:[#allocation2] sm:$0xff] }
 0x45a   :  { %2115 = vmatmul.f32.vlgmr.msra.gmra.mxu2 %v1980_v52  ;;  %2233 = vmatmul.f32.vlgmr.msrb.gmra.mxu3 %v1980_v52 }
 0x45b   :  { %v10956_v23 = vmul.f32 %v1782_v20, %v9227_v8  ;;  %v1764_v61 = vadd.f32 %v1750_v37, %v16381_v63 }
 0x45c   :  { %v1875_v36 = vpop.permute.xlu2 %1874 }
 0x45d   :  { %16380 = vst [vmem:[#allocation4_spill] sm:$0xff] %v10956_v23  ;;  %v1810_v29 = vrot.slane %v10956_v23, 7  ;;  %v1936_v15 = vrot.slane %v10956_v23, 1  ;;  %1892 = vrot.lane.b32.xlu2 %v10956_v23, %s8946_s19  ;;  %v1778_v54 = vmax.f32 %v1764_v61, 0.0 }
 0x45e   :  { %1913 = vst.msk [vmem:[#allocation2 + $0x30] sm:$0xff] %vm412_vm4, %v1875_v36  ;;  %v1984_v36 = vld [vmem:[#allocation2 + $0x20] sm:$0xff] }
 0x45f   :  { %v1938_v58 = vsel %vm441_vm1, %v1936_v15, %v1937_v18  ;;  %v1812_v27 = vsel %vm277_vm2, %v1810_v29, %v1811_v12  ;;  %v10970_v60 = vmul.f32 %v1778_v54, %v9186_v47 }
 0x460   :  { %v1964_v14 = vmul.f32 %v1938_v58, %v9307_v4  ;;  %v1883_v39 = vpop.permute.xlu0 %1882  ;;  %v1839_v44 = vmul.f32 %v1812_v27, %v9373_v26 }
 0x461   :  { %16382 = vst [vmem:[#allocation5_spill] sm:$0xff] %v10970_v60  ;;  %1884 = vrot.lane.b32.xlu1 %v10970_v60, %s8946_s19  ;;  %v1806_v18 = vrot.slane %v10970_v60, 7  ;;  %v1932_v12 = vrot.slane %v10970_v60, 1 }
 0x462   :  { %1917 = vst.msk [vmem:[#allocation2 + $0x70] sm:$0xff] %vm412_vm4, %v1883_v39  ;;  %2118 = vmatmul.f32.gmra.mxu2 %v1982_v17  ;;  %2236 = vmatmul.f32.gmra.mxu3 %v1982_v17 }
 0x463   :  { %1978 = vst.msk [vmem:[#allocation2 + $0xc8] sm:$0xff] %vm341_vm3, %v1964_v14  ;;  %v1942_v13 = vsel %vm441_vm1, %v1932_v12, %v1933_v43  ;;  %v1943_v5 = vsel %vm441_vm1, %v1931_v9, %v1932_v12  ;;  %v1816_v62 = vsel %vm277_vm2, %v1806_v18, %v1807_v46  ;;  %v1817_v51 = vsel %vm277_vm2, %v1805_v41, %v1806_v18 }
 0x464   :  { %1853 = vst.msk [vmem:[#allocation2 + $0xd0] sm:$0xff] %vm341_vm3, %v1839_v44  ;;  %v1959_v20 = vmul.f32 %v1943_v5, %v9617_v31  ;;  %v1960_v37 = vmul.f32 %v1942_v13, %v9633_v28  ;;  %v1662_v52 = vpop.permute.xlu2 %1661  ;;  %v1835_v43 = vmul.f32 %v1816_v62, %v9210_v59  ;;  %v1834_v61 = vmul.f32 %v1817_v51, %v9188_v48 }
 0x465   :  { %v1692_v63 = vadd.f32 %v1662_v52, %v10541_v21  ;;  %v1710_v9 = vsel %vm277_vm2, %v1706_v10, %v1707_v55  ;;  %v16383_v21 = vld [vmem:[#allocation9_spill] sm:$0xff]  ;;  %v16384_v10 = vld [vmem:[#allocation3_spill] sm:$0xff] }
 0x466   :  { %1973 = vst.msk [vmem:[#allocation2 + $0x78] sm:$0xff] %vm341_vm3, %v1959_v20 }
 0x467   :  { %1974 = vst.msk [vmem:[#allocation2 + $0x88] sm:$0xff] %vm341_vm3, %v1960_v37  ;;  %v1734_v41 = vadd.f32 %v1710_v9, %v1692_v63  ;;  %v2007_v9 = vld [vmem:[#allocation2 + $0xd8] sm:$0xff] }
 0x468   :  { %1849 = vst.msk [vmem:[#allocation2 + $0x90] sm:$0xff] %vm341_vm3, %v1835_v43 }
 0x469   :  { %v1753_v46 = vadd.f32 %v10425_v45, %v1734_v41  ;;  %1848 = vst.msk [vmem:[#allocation2 + $0x80] sm:$0xff] %vm341_vm3, %v1834_v61  ;;  %v1986_v45 = vld [vmem:[#allocation2 + $0x30] sm:$0xff] }
 0x46a   :  { %2121 = vmatmul.f32.gmra.mxu2 %v1984_v36  ;;  %2239 = vmatmul.f32.gmra.mxu3 %v1984_v36  ;;  %v1994_v43 = vld [vmem:[#allocation2 + $0x70] sm:$0xff]  ;;  %v2005_v63 = vld [vmem:[#allocation2 + $0xc8] sm:$0xff] }
 0x46b   :  { %v1767_v54 = vadd.f32 %v1753_v46, %v16383_v21 }
 0x46c   :  { %v1881_v58 = vpop.permute.xlu2 %1880 }
 0x46d   :  { %v1781_v27 = vmax.f32 %v1767_v54, 0.0  ;;  %1916 = vst.msk [vmem:[#allocation2 + $0x60] sm:$0xff] %vm412_vm4, %v1881_v58  ;;  %v1995_v50 = vld [vmem:[#allocation2 + $0x78] sm:$0xff] }
 0x46e   :  { %8312 = vmatmul.msk.f32.gmra.mxu1 %vm341_vm3, %v1995_v50  ;;  %8326 = vmatmul.msk.f32.gmra.mxu0 %vm341_vm3, %v1995_v50 }
 0x46f   :  { %v11013_v55 = vmul.f32 %v1781_v27, %v16384_v10 }
 0x471   :  { %16385 = vst [vmem:[#allocation7_spill] sm:$0xff] %v11013_v55  ;;  %1890 = vrot.lane.b32.xlu1 %v11013_v55, %s8946_s19  ;;  %v1809_v14 = vrot.slane %v11013_v55, 7  ;;  %v1935_v39 = vrot.slane %v11013_v55, 1 }
 0x472   :  { %2124 = vmatmul.f32.gmra.mxu2 %v1986_v45  ;;  %2242 = vmatmul.f32.gmra.mxu3 %v1986_v45 }
 0x473   :  { %v1939_v44 = vsel %vm441_vm1, %v1935_v39, %v1936_v15  ;;  %v1940_v17 = vsel %vm441_vm1, %v1934_v25, %v1935_v39  ;;  %v1813_v18 = vsel %vm277_vm2, %v1809_v14, %v1810_v29  ;;  %v1814_v12 = vsel %vm277_vm2, %v1808_v34, %v1809_v14  ;;  %v1997_v15 = vld [vmem:[#allocation2 + $0x88] sm:$0xff]  ;;  %v1988_v34 = vld [vmem:[#allocation2 + $0x40] sm:$0xff]  ;;  %v1999_v25 = vld [vmem:[#allocation2 + $0x98] sm:$0xff] }
 0x474   :  { %v1962_v13 = vmul.f32 %v1940_v17, %v9167_v40  ;;  %v1963_v5 = vmul.f32 %v1939_v44, %v9265_v32  ;;  %v1838_v62 = vmul.f32 %v1813_v18, %v9313_v16  ;;  %v1837_v51 = vmul.f32 %v1814_v12, %v9273_v35  ;;  %v1990_v29 = vld [vmem:[#allocation2 + $0x50] sm:$0xff]  ;;  %v1992_v37 = vld [vmem:[#allocation2 + $0x60] sm:$0xff] }
 0x476   :  { %1976 = vst.msk [vmem:[#allocation2 + $0xa8] sm:$0xff] %vm341_vm3, %v1962_v13  ;;  %8313 = vmatmul.msk.f32.gmra.mxu1 %vm341_vm3, %v1997_v15  ;;  %8327 = vmatmul.msk.f32.gmra.mxu0 %vm341_vm3, %v1997_v15 }
 0x477   :  { %1977 = vst.msk [vmem:[#allocation2 + $0xb8] sm:$0xff] %vm341_vm3, %v1963_v5 }
 0x478   :  { %1852 = vst.msk [vmem:[#allocation2 + $0xc0] sm:$0xff] %vm341_vm3, %v1838_v62 }
 0x479   :  { %1851 = vst.msk [vmem:[#allocation2 + $0xb0] sm:$0xff] %vm341_vm3, %v1837_v51 }
 0x47a   :  { %2127 = vmatmul.f32.gmra.mxu2 %v1988_v34  ;;  %2245 = vmatmul.f32.gmra.mxu3 %v1988_v34 }
 0x47c   :  { %v2175_v21 = vpop.f32.mrf.mxu1 }
 0x47d   :  { %v2001_v20 = vld [vmem:[#allocation2 + $0xa8] sm:$0xff] }
 0x47e   :  { %8314 = vmatmul.msk.f32.gmra.mxu1 %vm341_vm3, %v1999_v25  ;;  %8328 = vmatmul.msk.f32.gmra.mxu0 %vm341_vm3, %v1999_v25  ;;  %v2003_v52 = vld [vmem:[#allocation2 + $0xb8] sm:$0xff] }
 0x482   :  { %2130 = vmatmul.f32.gmra.mxu2 %v1990_v29  ;;  %2248 = vmatmul.f32.gmra.mxu3 %v1990_v29 }
 0x484   :  { %v2178_v58 = vpop.f32.mrf.mxu1 }
 0x486   :  { %8315 = vmatmul.msk.f32.gmra.mxu1 %vm341_vm3, %v2001_v20  ;;  %8329 = vmatmul.msk.f32.gmra.mxu0 %vm341_vm3, %v2001_v20 }
 0x48a   :  { %2133 = vmatmul.f32.gmra.mxu2 %v1992_v37  ;;  %2251 = vmatmul.f32.gmra.mxu3 %v1992_v37 }
 0x48c   :  { %v2181_v44 = vpop.f32.mrf.mxu1 }
 0x48e   :  { %8316 = vmatmul.msk.f32.gmra.mxu1 %vm341_vm3, %v2003_v52  ;;  %8330 = vmatmul.msk.f32.gmra.mxu0 %vm341_vm3, %v2003_v52 }
 0x492   :  { %2136 = vmatmul.f32.gmra.mxu2 %v1994_v43  ;;  %2254 = vmatmul.f32.gmra.mxu3 %v1994_v43 }
 0x494   :  { %v2184_v62 = vpop.f32.mrf.mxu1 }
 0x496   :  { %8317 = vmatmul.msk.f32.gmra.mxu1 %vm341_vm3, %v2005_v63  ;;  %8331 = vmatmul.msk.f32.gmra.mxu0 %vm341_vm3, %v2005_v63 }
 0x49c   :  { %v2187_v52 = vpop.f32.mrf.mxu1 }
 0x49e   :  { %v1887_v61 = vpop.permute.xlu2 %1886  ;;  %8318 = vmatmul.msk.f32.gmra.mxu1 %vm341_vm3, %v2007_v9  ;;  %8332 = vmatmul.msk.f32.gmra.mxu0 %vm341_vm3, %v2007_v9 }
 0x49f   :  { %1919 = vst.msk [vmem:[#allocation2 + $0x90] sm:$0xff] %vm412_vm4, %v1887_v61 }
 0x4a6   :  { %v1998_v39 = vld [vmem:[#allocation2 + $0x90] sm:$0xff] }
 0x4b7   :  { %v1893_v41 = vpop.permute.xlu2 %1892 }
 0x4b8   :  { %1922 = vst.msk [vmem:[#allocation2 + $0xc0] sm:$0xff] %vm412_vm4, %v1893_v41 }
 0x4bc   :  { %v1889_v46 = vpop.permute.xlu0 %1888 }
 0x4bd   :  { %1920 = vst.msk [vmem:[#allocation2 + $0xa0] sm:$0xff] %vm412_vm4, %v1889_v46 }
 0x4bf   :  { %v2004_v63 = vld [vmem:[#allocation2 + $0xc0] sm:$0xff] }
 0x4c4   :  { %v1895_v36 = vpop.permute.xlu0 %1894  ;;  %v2000_v12 = vld [vmem:[#allocation2 + $0xa0] sm:$0xff] }
 0x4c5   :  { %1923 = vst.msk [vmem:[#allocation2 + $0xd0] sm:$0xff] %vm412_vm4, %v1895_v36  ;;  %v2190_v36 = vpop.f32.mrf.mxu1 }
 0x4d3   :  { %v1885_v54 = vpop.permute.xlu1 %1884 }
 0x4d4   :  { %1918 = vst.msk [vmem:[#allocation2 + $0x80] sm:$0xff] %vm412_vm4, %v1885_v54 }
 0x4db   :  { %v1996_v27 = vld [vmem:[#allocation2 + $0x80] sm:$0xff] }
 0x4dc   :  { %2139 = vmatmul.f32.gmra.mxu2 %v1996_v27  ;;  %2257 = vmatmul.f32.gmra.mxu3 %v1996_v27 }
 0x4dd   :  { %v2116_v50 = vpop.f32.mrf.mxu2 }
 0x4de   :  { %v11056_v45 = vadd.f32 %v2175_v21, %v2116_v50  ;;  %v2006_v21 = vld [vmem:[#allocation2 + $0xd0] sm:$0xff] }
 0x4e0   :  { %2377 = vrot.lane.b32.xlu1 %v11056_v45, %s8946_s19 }
 0x4e3   :  { %v1891_v14 = vpop.permute.xlu1 %1890 }
 0x4e4   :  { %1921 = vst.msk [vmem:[#allocation2 + $0xb0] sm:$0xff] %vm412_vm4, %v1891_v14  ;;  %2142 = vmatmul.f32.gmra.mxu2 %v1998_v39  ;;  %2260 = vmatmul.f32.gmra.mxu3 %v1998_v39  ;;  %v2193_v14 = vpop.f32.mrf.mxu1 }
 0x4e5   :  { %v2119_v17 = vpop.f32.mrf.mxu2 }
 0x4e6   :  { %v11061_v18 = vadd.f32 %v2178_v58, %v2119_v17 }
 0x4e8   :  { %2379 = vrot.lane.b32.xlu2 %v11061_v18, %s8946_s19  ;;  %v2336_v15 = vrot.slane %v11061_v18, 1 }
 0x4eb   :  { %v2002_v25 = vld [vmem:[#allocation2 + $0xb0] sm:$0xff] }
 0x4ec   :  { %2145 = vmatmul.f32.gmra.mxu2 %v2000_v12  ;;  %2263 = vmatmul.f32.gmra.mxu3 %v2000_v12  ;;  %v11091_v12 = vpop.f32.mrf.mxu3 }
 0x4ed   :  { %v2122_v13 = vpop.f32.mrf.mxu2 }
 0x4ee   :  { %v2182_v5 = vadd.f32 %v2181_v44, %v2122_v13  ;;  %v11084_v44 = vpop.f32.mrf.mxu0 }
 0x4f0   :  { %v2337_v51 = vrot.slane %v2182_v5, 1  ;;  %2381 = vrot.lane.b32.xlu0 %v2182_v5, %s8946_s19  ;;  %v2196_v5 = vpop.f32.mrf.mxu1 }
 0x4f2   :  { %v11069_v34 = vsel %vm441_vm1, %v2336_v15, %v2337_v51 }
 0x4f4   :  { %2148 = vmatmul.f32.gmra.mxu2 %v2002_v25  ;;  %2266 = vmatmul.f32.gmra.mxu3 %v2002_v25 }
 0x4f5   :  { %v2125_v29 = vpop.f32.mrf.mxu2 }
 0x4f6   :  { %v2185_v20 = vadd.f32 %v2184_v62, %v2125_v29  ;;  %v2296_v25 = vpop.f32.mrf.mxu0  ;;  %v2237_v29 = vpop.f32.mrf.mxu3 }
 0x4f8   :  { %v2338_v37 = vrot.slane %v2185_v20, 1  ;;  %2383 = vrot.lane.b32.xlu1 %v2185_v20, %s8946_s19  ;;  %v11126_v60 = vpop.f32.mrf.mxu1 }
 0x4fa   :  { %v11074_v43 = vsel %vm441_vm1, %v2337_v51, %v2338_v37 }
 0x4fc   :  { %2151 = vmatmul.f32.gmra.mxu2 %v2004_v63  ;;  %2269 = vmatmul.f32.gmra.mxu3 %v2004_v63 }
 0x4fd   :  { %v2128_v61 = vpop.f32.mrf.mxu2 }
 0x4fe   :  { %v2188_v9 = vadd.f32 %v2187_v52, %v2128_v61  ;;  %v2299_v20 = vpop.f32.mrf.mxu0 }
 0x500   :  { %v2339_v41 = vrot.slane %v2188_v9, 1  ;;  %2385 = vrot.lane.b32.xlu2 %v2188_v9, %s8946_s19 }
 0x502   :  { %v2358_v46 = vsel %vm441_vm1, %v2338_v37, %v2339_v41  ;;  %v2240_v37 = vpop.f32.mrf.mxu3 }
 0x504   :  { %2154 = vmatmul.f32.gmra.mxu2 %v2006_v21  ;;  %2272 = vmatmul.f32.gmra.mxu3 %v2006_v21 }
 0x505   :  { %v2131_v54 = vpop.f32.mrf.mxu2 }
 0x506   :  { %v2191_v58 = vadd.f32 %v2190_v36, %v2131_v54  ;;  %v2302_v52 = vpop.f32.mrf.mxu0  ;;  %v11103_v36 = vadd.f32 %v2296_v25, %v2237_v29  ;;  %v16200_v54 = vrot.slane %v11056_v45, 1 }
 0x508   :  { %v2340_v27 = vrot.slane %v2191_v58, 1  ;;  %2387 = vrot.lane.b32.xlu1 %v2191_v58, %s8946_s19 }
 0x50a   :  { %v11082_v50 = vsel %vm441_vm1, %v2339_v41, %v2340_v27  ;;  %v2243_v63 = vpop.f32.mrf.mxu3  ;;  %v2300_v41 = vadd.f32 %v2299_v20, %v2240_v37 }
 0x50b   :  { %v2303_v23 = vadd.f32 %v2302_v52, %v2243_v63 }
 0x50c   :  { %v2435_v58 = vrot.slane %v2300_v41, 7 }
 0x50d   :  { %v2134_v39 = vpop.f32.mrf.mxu2  ;;  %v2436_v1 = vrot.slane %v2303_v23, 7 }
 0x50e   :  { %v11086_v17 = vadd.f32 %v2193_v14, %v2134_v39  ;;  %v2305_v61 = vpop.f32.mrf.mxu0  ;;  %v2361_v39 = vsel %vm441_vm1, %v16200_v54, %v2336_v15 }
 0x510   :  { %v16198_v18 = vrot.slane %v11086_v17, 1  ;;  %2389 = vrot.lane.b32.xlu2 %v11086_v17, %s8946_s19 }
 0x512   :  { %v11097_v13 = vsel %vm441_vm1, %v2340_v27, %v16198_v18  ;;  %v2246_v9 = vpop.f32.mrf.mxu3  ;;  %v16203_v27 = vrot.slane %v11103_v36, 7 }
 0x514   :  { %v2458_v29 = vsel %vm277_vm2, %v16203_v27, %v2435_v58 }
 0x515   :  { %v2137_v62 = vpop.f32.mrf.mxu2 }
 0x516   :  { %v11099_v51 = vadd.f32 %v2196_v5, %v2137_v62  ;;  %v2308_v21 = vpop.f32.mrf.mxu0  ;;  %v11114_v62 = vld [vmem:[%s16149_s6 + $0x3] ss:$0 sm:$0xff] }
 0x518   :  { %2391 = vrot.lane.b32.xlu1 %v11099_v51, %s8946_s19 }
 0x51a   :  { %v2249_v5 = vpop.f32.mrf.mxu3 }
 0x51e   :  { %v2311_v18 = vpop.f32.mrf.mxu0 }
 0x522   :  { %v2252_v15 = vpop.f32.mrf.mxu3 }
 0x526   :  { %v2314_v54 = vpop.f32.mrf.mxu0 }
 0x52e   :  { %v2317_v27 = vpop.f32.mrf.mxu0 }
 0x542   :  { %v2380_v14 = vpop.permute.xlu2 %2379 }
 0x543   :  { %v2420_v25 = vadd.f32 %v2380_v14, %v2361_v39  ;;  %v2255_v14 = vpop.f32.mrf.mxu3  ;;  %v11128_v39 = vadd.f32 %v2308_v21, %v2249_v5  ;;  %v2320_v5 = vpop.f32.mrf.mxu0 }
 0x545   :  { %v2462_v20 = vadd.f32 %v2458_v29, %v2420_v25  ;;  %v2306_v25 = vadd.f32 %v2305_v61, %v2246_v9  ;;  %v2457_v9 = vsel %vm277_vm2, %v2435_v58, %v2436_v1 }
 0x547   :  { %v2481_v37 = vadd.f32 %v11114_v62, %v2462_v20  ;;  %v2202_v20 = vpop.f32.mrf.mxu1  ;;  %v2437_v0 = vrot.slane %v2306_v25, 7 }
 0x549   :  { %v2495_v41 = vmax.f32 %v2481_v37, 0.0  ;;  %v16213_v37 = vrot.slane %v11128_v39, 7 }
 0x54b   :  { %v11122_v55 = vmul.f32 %v2495_v41, %v9186_v47  ;;  %v2455_v52 = vsel %vm277_vm2, %v2437_v0, %v16213_v37 }
 0x54d   :  { %2594 = vrot.lane.b32.xlu2 %v11122_v55, %s8946_s19 }
 0x54f   :  { %v2205_v37 = vpop.f32.mrf.mxu1 }
 0x552   :  { %v11133_v49 = vpop.permute.xlu1 %2377 }
 0x55a   :  { %v2386_v29 = vpop.permute.xlu2 %2385 }
 0x55b   :  { %v2423_v30 = vadd.f32 %v2386_v29, %v2358_v46 }
 0x55d   :  { %v2465_v61 = vadd.f32 %v2455_v52, %v2423_v30 }
 0x55f   :  { %v11131_v2 = vpop.f32.mrf.mxu2  ;;  %v2258_v41 = vpop.f32.mrf.mxu3  ;;  %v2484_v29 = vadd.f32 %v11114_v62, %v2465_v61 }
 0x560   :  { %v11142_v3 = vadd.f32 %v2317_v27, %v2258_v41  ;;  %v11154_v27 = vadd.f32 %v2314_v54, %v2255_v14  ;;  %v16217_v54 = vrot.slane %v11122_v55, 1 }
 0x561   :  { %v2498_v61 = vmax.f32 %v2484_v29, 0.0 }
 0x562   :  { %v2382_v33 = vpop.permute.xlu0 %2381  ;;  %v16219_v30 = vrot.slane %v11142_v3, 7 }
 0x563   :  { %v2421_v63 = vadd.f32 %v2382_v33, %v11069_v34 }
 0x565   :  { %v2463_v21 = vadd.f32 %v2457_v9, %v2421_v63  ;;  %v2456_v63 = vsel %vm277_vm2, %v2436_v1, %v2437_v0  ;;  %v16218_v0 = vrot.slane %v11154_v27, 7 }
 0x567   :  { %v2482_v23 = vadd.f32 %v11114_v62, %v2463_v21  ;;  %v2143_v46 = vpop.f32.mrf.mxu2  ;;  %v2261_v25 = vpop.f32.mrf.mxu3 }
 0x568   :  { %v11146_v19 = vadd.f32 %v2202_v20, %v2143_v46  ;;  %v11148_v24 = vadd.f32 %v2320_v5, %v2261_v25  ;;  %v16215_v20 = vrot.slane %v11122_v55, 7  ;;  %v2312_v5 = vadd.f32 %v2311_v18, %v2252_v15 }
 0x569   :  { %v2496_v33 = vmax.f32 %v2482_v23, 0.0  ;;  %v11183_v18 = vmul.f32 %v2498_v61, %v16384_v10 }
 0x56a   :  { %v16214_v34 = vrot.slane %v11148_v24, 7  ;;  %v2384_v58 = vpop.permute.xlu1 %2383  ;;  %2395 = vrot.lane.b32.xlu2 %v11146_v19, %s8946_s19  ;;  %v2390_v23 = vpop.permute.xlu2 %2389 }
 0x56b   :  { %v2422_v41 = vadd.f32 %v2384_v58, %v11074_v43  ;;  %v2510_v52 = vmul.f32 %v2496_v33, %v9204_v53  ;;  %v16221_v61 = vrot.slane %v11183_v18, 7 }
 0x56c   :  { %v11167_v9 = vsel %vm277_vm2, %v16219_v30, %v16214_v34 }
 0x56d   :  { %v2464_v14 = vadd.f32 %v2456_v63, %v2422_v41  ;;  %v2524_v43 = vrot.slane %v2510_v52, 7  ;;  %v2650_v21 = vrot.slane %v2510_v52, 1  ;;  %2596 = vrot.lane.b32.xlu1 %v2510_v52, %s8946_s19  ;;  %v2425_v41 = vadd.f32 %v2390_v23, %v11097_v13 }
 0x56e   :  { %v2439_v63 = vrot.slane %v2312_v5, 7 }
 0x56f   :  { %v2483_v1 = vadd.f32 %v11114_v62, %v2464_v14  ;;  %v2673_v46 = vsel %vm441_vm1, %v16217_v54, %v2650_v21  ;;  %v2146_v25 = vpop.f32.mrf.mxu2  ;;  %v2547_v29 = vsel %vm277_vm2, %v16215_v20, %v2524_v43  ;;  %v16216_v14 = vrot.slane %v11146_v19, 1  ;;  %v2208_v20 = vpop.f32.mrf.mxu1 }
 0x570   :  { %v2677_v33 = vmul.f32 %v2673_v46, %v9633_v28  ;;  %v2206_v58 = vadd.f32 %v2205_v37, %v2146_v25  ;;  %v2552_v15 = vmul.f32 %v2547_v29, %v9210_v59  ;;  %v2453_v13 = vsel %vm277_vm2, %v2439_v63, %v16218_v0  ;;  %v8380_v46 = vld [vmem:[%s16151_s5 + $0x5f0] sm:$0xff]  ;;  %v8381_v25 = vld [vmem:[%s16151_s5 + $0x5f8] sm:$0xff]  ;;  %v8378_v29 = vld [vmem:[%s16151_s5 + $0x5e0] sm:$0xff] }
 0x571   :  { %v2497_v52 = vmax.f32 %v2483_v1, 0.0  ;;  %v2467_v23 = vadd.f32 %v2453_v13, %v2425_v41  ;;  %v16220_v1 = vrot.slane %v11183_v18, 1  ;;  %2890 = vmatpush.msra.mxu1 %v8380_v46  ;;  %3008 = vmatpush.msra.mxu0 %v8381_v25 }
 0x572   :  { %2691 = vst.msk [vmem:[#allocation2 + $0x18] sm:$0xff] %vm341_vm3, %v2677_v33  ;;  %v2345_v34 = vrot.slane %v2206_v58, 1  ;;  %2600 = vrot.lane.b32.xlu2 %v11183_v18, %s8946_s19 }
 0x573   :  { %v11192_v37 = vmul.f32 %v2497_v52, %v9225_v7  ;;  %2566 = vst.msk [vmem:[#allocation2 + $0x20] sm:$0xff] %vm341_vm3, %v2552_v15  ;;  %2891 = vmatpush.msra.mxu1 %v8378_v29  ;;  %v2486_v0 = vadd.f32 %v11114_v62, %v2467_v23  ;;  %v8377_v29 = vld [vmem:[%s16151_s5 + $0x5d8] sm:$0xff] }
 0x574   :  { %v11204_v5 = vsel %vm441_vm1, %v16216_v14, %v2345_v34 }
 0x575   :  { %2397 = vrot.lane.b32.xlu1 %v2206_v58, %s8946_s19  ;;  %v2525_v33 = vrot.slane %v11192_v37, 7  ;;  %v2651_v15 = vrot.slane %v11192_v37, 1  ;;  %v8379_v58 = vld [vmem:[%s16151_s5 + $0x5e8] sm:$0xff] }
 0x576   :  { %3009 = vmatpush.msra.mxu0 %v8379_v58 }
 0x577   :  { %v2149_v41 = vpop.f32.mrf.mxu2  ;;  %v2671_v52 = vsel %vm441_vm1, %v2651_v15, %v16220_v1  ;;  %v2672_v13 = vsel %vm441_vm1, %v2650_v21, %v2651_v15  ;;  %v2545_v14 = vsel %vm277_vm2, %v2525_v33, %v16221_v61  ;;  %v2546_v46 = vsel %vm277_vm2, %v2524_v43, %v2525_v33  ;;  %v8372_v33 = vld [vmem:[%s16151_s5 + $0x5b0] sm:$0xff] }
 0x578   :  { %v11234_v25 = vadd.f32 %v2208_v20, %v2149_v41  ;;  %v2678_v54 = vmul.f32 %v2672_v13, %v9163_v38  ;;  %v2679_v30 = vmul.f32 %v2671_v52, %v9167_v40  ;;  %v2554_v21 = vmul.f32 %v2545_v14, %v9273_v35  ;;  %v8376_v14 = vld [vmem:[%s16151_s5 + $0x5d0] sm:$0xff]  ;;  %3010 = vmatpush.msra.mxu0 %v8377_v29  ;;  %v8371_v13 = vld [vmem:[%s16151_s5 + $0x5a8] sm:$0xff] }
 0x579   :  { %v2553_v15 = vmul.f32 %v2546_v46, %v9229_v11  ;;  %v16386_v43 = vrot.slane %v11128_v39, 7  ;;  %v2211_v39 = vpop.f32.mrf.mxu1  ;;  %2892 = vmatpush.msra.mxu1 %v8376_v14 }
 0x57a   :  { %v2346_v1 = vrot.slane %v11234_v25, 1  ;;  %v2388_v61 = vpop.permute.xlu1 %2387  ;;  %2692 = vst.msk [vmem:[#allocation2 + $0x28] sm:$0xff] %vm341_vm3, %v2678_v54  ;;  %v8374_v54 = vld [vmem:[%s16151_s5 + $0x5c0] sm:$0xff] }
 0x57b   :  { %v2424_v20 = vadd.f32 %v2388_v61, %v11082_v50  ;;  %2693 = vst.msk [vmem:[#allocation2 + $0x38] sm:$0xff] %vm341_vm3, %v2679_v30  ;;  %v2454_v23 = vsel %vm277_vm2, %v16386_v43, %v2439_v63  ;;  %v8375_v63 = vld [vmem:[%s16151_s5 + $0x5c8] sm:$0xff]  ;;  %v2500_v61 = vmax.f32 %v2486_v0, 0.0  ;;  %2893 = vmatpush.msra.mxu1 %v8374_v54  ;;  %v8370_v0 = vld [vmem:[%s16151_s5 + $0x5a0] sm:$0xff]  ;;  %v8369_v43 = vld [vmem:[%s16151_s5 + $0x598] sm:$0xff] }
 0x57c   :  { %2568 = vst.msk [vmem:[#allocation2 + $0x40] sm:$0xff] %vm341_vm3, %v2554_v21  ;;  %v11263_v50 = vsel %vm441_vm1, %v2345_v34, %v2346_v1  ;;  %v8373_v34 = vld [vmem:[%s16151_s5 + $0x5b8] sm:$0xff]  ;;  %3011 = vmatpush.msra.mxu0 %v8375_v63  ;;  %v8367_v54 = vld [vmem:[%s16151_s5 + $0x588] sm:$0xff]  ;;  %v2342_v63 = vrot.slane %v11099_v51, 1 }
 0x57d   :  { %v2466_v30 = vadd.f32 %v2454_v23, %v2424_v20  ;;  %2567 = vst.msk [vmem:[#allocation2 + $0x30] sm:$0xff] %vm341_vm3, %v2553_v15  ;;  %2894 = vmatpush.msra.mxu1 %v8372_v33  ;;  %v11285_v21 = vmul.f32 %v2500_v61, %v9206_v56  ;;  %v8368_v15 = vld [vmem:[%s16151_s5 + $0x590] sm:$0xff]  ;;  %v8366_v23 = vld [vmem:[%s16151_s5 + $0x580] sm:$0xff]  ;;  %v16387_v33 = vrot.slane %v11183_v18, 1 }
 0x57e   :  { %3012 = vmatpush.msra.mxu0 %v8373_v34 }
 0x57f   :  { %v2485_v58 = vadd.f32 %v11114_v62, %v2466_v30  ;;  %v2152_v41 = vpop.f32.mrf.mxu2  ;;  %2895 = vmatpush.msra.mxu1 %v8370_v0  ;;  %v2654_v30 = vrot.slane %v11285_v21, 1  ;;  %v16388_v0 = vrot.slane %v11183_v18, 7 }
 0x580   :  { %v11276_v52 = vadd.f32 %v2211_v39, %v2152_v41  ;;  %3013 = vmatpush.msra.mxu0 %v8371_v13  ;;  %v2528_v39 = vrot.slane %v11285_v21, 7 }
 0x581   :  { %v2499_v46 = vmax.f32 %v2485_v58, 0.0  ;;  %2896 = vmatpush.msra.mxu1 %v8368_v15  ;;  %v2214_v61 = vpop.f32.mrf.mxu1  ;;  %v11320_v15 = vadd.f32 %v11084_v44, %v11091_v12  ;;  %v16389_v44 = vrot.slane %v11086_v17, 1 }
 0x582   :  { %2401 = vrot.lane.b32.xlu2 %v11276_v52, %s8946_s19  ;;  %3014 = vmatpush.msra.mxu0 %v8369_v43 }
 0x583   :  { %v2513_v20 = vmul.f32 %v2499_v46, %v9227_v8  ;;  %2897 = vmatpush.msra.mxu1 %v8366_v23  ;;  %v2355_v12 = vsel %vm441_vm1, %v16389_v44, %v2342_v63 }
 0x584   :  { %3015 = vmatpush.msra.mxu0 %v8367_v54 }
 0x585   :  { %v2527_v14 = vrot.slane %v2513_v20, 7  ;;  %v2653_v29 = vrot.slane %v2513_v20, 1  ;;  %2602 = vrot.lane.b32.xlu1 %v2513_v20, %s8946_s19 }
 0x587   :  { %v2670_v34 = vsel %vm441_vm1, %v16387_v33, %v2653_v29  ;;  %v2155_v58 = vpop.f32.mrf.mxu2  ;;  %v2669_v41 = vsel %vm441_vm1, %v2653_v29, %v2654_v30  ;;  %v2544_v13 = vsel %vm277_vm2, %v16388_v0, %v2527_v14  ;;  %v2543_v46 = vsel %vm277_vm2, %v2527_v14, %v2528_v39 }
 0x588   :  { %v2680_v20 = vmul.f32 %v2670_v34, %v9265_v32  ;;  %v2215_v43 = vadd.f32 %v2214_v61, %v2155_v58  ;;  %v2681_v23 = vmul.f32 %v2669_v41, %v9307_v4  ;;  %v2555_v29 = vmul.f32 %v2544_v13, %v9313_v16 }
 0x589   :  { %v2556_v18 = vmul.f32 %v2543_v46, %v9373_v26  ;;  %v2347_v33 = vrot.slane %v11276_v52, 1  ;;  %v2433_v61 = vrot.slane %v11320_v15, 7  ;;  %v16390_v34 = vrot.slane %v11056_v45, 1 }
 0x58a   :  { %2694 = vst.msk [vmem:[#allocation2 + $0x48] sm:$0xff] %vm341_vm3, %v2680_v20  ;;  %v2348_v0 = vrot.slane %v2215_v43, 1  ;;  %v2392_v14 = vpop.permute.xlu1 %2391  ;;  %2403 = vrot.lane.b32.xlu0 %v2215_v43, %s8946_s19  ;;  %v16391_v41 = vrot.slane %v11142_v3, 7  ;;  %v16392_v13 = vrot.slane %v11154_v27, 7  ;;  %v16393_v3 = vrot.slane %v11103_v36, 7 }
 0x58b   :  { %v2426_v54 = vadd.f32 %v2392_v14, %v2355_v12  ;;  %2695 = vst.msk [vmem:[#allocation2 + $0x58] sm:$0xff] %vm341_vm3, %v2681_v23 }
 0x58c   :  { %v2362_v58 = vsel %vm441_vm1, %v2348_v0, %v16390_v34  ;;  %v2452_v17 = vsel %vm277_vm2, %v16392_v13, %v16391_v41  ;;  %2569 = vst.msk [vmem:[#allocation2 + $0x50] sm:$0xff] %vm341_vm3, %v2555_v29  ;;  %v11352_v46 = vsel %vm441_vm1, %v2347_v33, %v2348_v0  ;;  %v2459_v27 = vsel %vm277_vm2, %v2433_v61, %v16393_v3 }
 0x58d   :  { %v2419_v45 = vadd.f32 %v11133_v49, %v2362_v58  ;;  %v2468_v20 = vadd.f32 %v2452_v17, %v2426_v54  ;;  %2570 = vst.msk [vmem:[#allocation2 + $0x60] sm:$0xff] %vm341_vm3, %v2556_v18  ;;  %v16394_v17 = vrot.slane %v11122_v55, 1 }
 0x58f   :  { %v2487_v43 = vadd.f32 %v11114_v62, %v2468_v20  ;;  %v2461_v23 = vadd.f32 %v2459_v27, %v2419_v45  ;;  %v16395_v20 = vrot.slane %v11122_v55, 7  ;;  %v11407_v27 = vadd.f32 %v11126_v60, %v11131_v2  ;;  %v2709_v2 = vld [vmem:[#allocation2 + $0x28] sm:$0xff]  ;;  %v2264_v60 = vpop.f32.mrf.mxu3 }
 0x591   :  { %v2501_v29 = vmax.f32 %v2487_v43, 0.0  ;;  %v2480_v14 = vadd.f32 %v11114_v62, %v2461_v23  ;;  %v2707_v23 = vld [vmem:[#allocation2 + $0x18] sm:$0xff] }
 0x593   :  { %v11365_v0 = vmul.f32 %v2501_v29, %v9172_v42  ;;  %v2494_v49 = vmax.f32 %v2480_v14, 0.0  ;;  %v2323_v29 = vpop.f32.mrf.mxu0 }
 0x594   :  { %v11427_v14 = vadd.f32 %v2323_v29, %v2264_v60 }
 0x595   :  { %v2529_v44 = vrot.slane %v11365_v0, 7  ;;  %v2655_v18 = vrot.slane %v11365_v0, 1  ;;  %2606 = vrot.lane.b32.xlu1 %v11365_v0, %s8946_s19  ;;  %v11372_v36 = vmul.f32 %v2494_v49, %v9172_v42 }
 0x597   :  { %2592 = vrot.lane.b32.xlu0 %v11372_v36, %s8946_s19  ;;  %v2522_v12 = vrot.slane %v11372_v36, 7  ;;  %v2648_v54 = vrot.slane %v11372_v36, 1  ;;  %v2668_v34 = vsel %vm441_vm1, %v2654_v30, %v2655_v18  ;;  %v2542_v58 = vsel %vm277_vm2, %v2528_v39, %v2529_v44  ;;  %v2267_v49 = vpop.f32.mrf.mxu3 }
 0x598   :  { %v2682_v41 = vmul.f32 %v2668_v34, %v9357_v57  ;;  %v2557_v13 = vmul.f32 %v2542_v58, %v9368_v22  ;;  %v2343_v58 = vrot.slane %v11407_v27, 1 }
 0x599   :  { %v2674_v45 = vsel %vm441_vm1, %v2648_v54, %v16394_v17  ;;  %v2548_v30 = vsel %vm277_vm2, %v2522_v12, %v16395_v20 }
 0x59a   :  { %v2676_v39 = vmul.f32 %v2674_v45, %v9617_v31  ;;  %v2551_v3 = vmul.f32 %v2548_v30, %v9188_v48  ;;  %2696 = vst.msk [vmem:[#allocation2 + $0x68] sm:$0xff] %vm341_vm3, %v2682_v41  ;;  %v2443_v41 = vrot.slane %v11427_v14, 7  ;;  %v16396_v45 = vrot.slane %v11146_v19, 1  ;;  %v8344_v14 = vld [vmem:[%s16151_s5 + $0x4d0] sm:$0xff] }
 0x59b   :  { %2571 = vst.msk [vmem:[#allocation2 + $0x70] sm:$0xff] %vm341_vm3, %v2557_v13  ;;  %v2326_v34 = vpop.f32.mrf.mxu0  ;;  %v2713_v13 = vld [vmem:[#allocation2 + $0x48] sm:$0xff]  ;;  %v16397_v30 = vrot.slane %v11148_v24, 7  ;;  %v2354_v36 = vsel %vm441_vm1, %v2342_v63, %v2343_v58 }
 0x59c   :  { %2690 = vst.msk [vmem:[#allocation2 + $0x8] sm:$0xff] %vm341_vm3, %v2676_v39 }
 0x59d   :  { %2565 = vst.msk [vmem:[#allocation2 + $0x10] sm:$0xff] %vm341_vm3, %v2551_v3  ;;  %v2450_v39 = vsel %vm277_vm2, %v16397_v30, %v2443_v41  ;;  %v8362_v30 = vld [vmem:[%s16151_s5 + $0x560] sm:$0xff] }
 0x59f   :  { %2393 = vrot.lane.b32.xlu0 %v11407_v27, %s8946_s19 }
 0x5a3   :  { %v2705_v55 = vld [vmem:[#allocation2 + $0x8] sm:$0xff] }
 0x5a4   :  { %8382 = vmatmul.msk.f32.vlgmr.msra.gmra.mxu1 %vm341_vm3, %v2705_v55  ;;  %8396 = vmatmul.msk.f32.vlgmr.msra.gmra.mxu0 %vm341_vm3, %v2705_v55  ;;  %v2270_v55 = vpop.f32.mrf.mxu3 }
 0x5a7   :  { %v2595_v43 = vpop.permute.xlu2 %2594  ;;  %2598 = vrot.lane.b32.xlu0 %v11192_v37, %s8946_s19  ;;  %v2711_v37 = vld [vmem:[#allocation2 + $0x38] sm:$0xff] }
 0x5a8   :  { %2635 = vst.msk [vmem:[#allocation2 + $0x10] sm:$0xff] %vm412_vm4, %v2595_v43  ;;  %v2329_v43 = vpop.f32.mrf.mxu0 }
 0x5ac   :  { %8383 = vmatmul.msk.f32.gmra.mxu1 %vm341_vm3, %v2707_v23  ;;  %8397 = vmatmul.msk.f32.gmra.mxu0 %vm341_vm3, %v2707_v23  ;;  %v2715_v23 = vld [vmem:[#allocation2 + $0x58] sm:$0xff]  ;;  %v2273_v24 = vpop.f32.mrf.mxu3 }
 0x5af   :  { %2399 = vrot.lane.b32.xlu0 %v11234_v25, %s8946_s19 }
 0x5b4   :  { %8384 = vmatmul.msk.f32.gmra.mxu1 %vm341_vm3, %v2709_v2  ;;  %8398 = vmatmul.msk.f32.gmra.mxu0 %vm341_vm3, %v2709_v2 }
 0x5b7   :  { %2604 = vrot.lane.b32.xlu0 %v11285_v21, %s8946_s19  ;;  %v2353_v21 = vsel %vm441_vm1, %v2343_v58, %v16396_v45  ;;  %v11458_v45 = vadd.f32 %v2329_v43, %v2270_v55  ;;  %v8360_v55 = vld [vmem:[%s16151_s5 + $0x550] sm:$0xff] }
 0x5b8   :  { %v2706_v58 = vld [vmem:[#allocation2 + $0x10] sm:$0xff] }
 0x5b9   :  { %v2445_v43 = vrot.slane %v11458_v45, 7 }
 0x5bc   :  { %8385 = vmatmul.msk.f32.gmra.mxu1 %vm341_vm3, %v2711_v37  ;;  %8399 = vmatmul.msk.f32.gmra.mxu0 %vm341_vm3, %v2711_v37  ;;  %v2717_v37 = vld [vmem:[#allocation2 + $0x68] sm:$0xff] }
 0x5c4   :  { %v2396_v17 = vpop.permute.xlu2 %2395  ;;  %8386 = vmatmul.msk.f32.gmra.mxu1 %vm341_vm3, %v2713_v13  ;;  %8400 = vmatmul.msk.f32.gmra.mxu0 %vm341_vm3, %v2713_v13  ;;  %v2332_v13 = vpop.f32.mrf.mxu0 }
 0x5c5   :  { %v2428_v20 = vadd.f32 %v2396_v17, %v2353_v21  ;;  %v11456_v17 = vadd.f32 %v2332_v13, %v2273_v24  ;;  %v8364_v21 = vld [vmem:[%s16151_s5 + $0x570] sm:$0xff]  ;;  %v8359_v24 = vld [vmem:[%s16151_s5 + $0x548] sm:$0xff] }
 0x5c6   :  { %2823 = vmatpush.msrb.mxu2 %v8364_v21  ;;  %v8356_v21 = vld [vmem:[%s16151_s5 + $0x530] sm:$0xff] }
 0x5c7   :  { %v2470_v3 = vadd.f32 %v2450_v39, %v2428_v20  ;;  %v8365_v20 = vld [vmem:[%s16151_s5 + $0x578] sm:$0xff]  ;;  %v8363_v39 = vld [vmem:[%s16151_s5 + $0x568] sm:$0xff] }
 0x5c8   :  { %2941 = vmatpush.msra.mxu3 %v8365_v20  ;;  %2824 = vmatpush.msrb.mxu2 %v8362_v30  ;;  %v8357_v20 = vld [vmem:[%s16151_s5 + $0x538] sm:$0xff]  ;;  %v8354_v30 = vld [vmem:[%s16151_s5 + $0x520] sm:$0xff] }
 0x5c9   :  { %v2489_v19 = vadd.f32 %v11114_v62, %v2470_v3  ;;  %v2446_v3 = vrot.slane %v11456_v17, 7 }
 0x5ca   :  { %2942 = vmatpush.msra.mxu3 %v8363_v39  ;;  %2825 = vmatpush.msrb.mxu2 %v8360_v55  ;;  %v8352_v39 = vld [vmem:[%s16151_s5 + $0x510] sm:$0xff]  ;;  %v8353_v55 = vld [vmem:[%s16151_s5 + $0x518] sm:$0xff] }
 0x5cb   :  { %v2503_v2 = vmax.f32 %v2489_v19, 0.0  ;;  %v8361_v19 = vld [vmem:[%s16151_s5 + $0x558] sm:$0xff]  ;;  %v2447_v25 = vsel %vm277_vm2, %v2445_v43, %v2446_v3 }
 0x5cc   :  { %v2601_v60 = vpop.permute.xlu2 %2600  ;;  %8387 = vmatmul.msk.f32.gmra.mxu1 %vm341_vm3, %v2715_v23  ;;  %8401 = vmatmul.msk.f32.gmra.mxu0 %vm341_vm3, %v2715_v23 }
 0x5cd   :  { %2638 = vst.msk [vmem:[#allocation2 + $0x40] sm:$0xff] %vm412_vm4, %v2601_v60  ;;  %v11450_v29 = vmul.f32 %v2503_v2, %v9204_v53  ;;  %v2350_v2 = vsel %vm441_vm1, %v2346_v1, %v2347_v33  ;;  %v8358_v60 = vld [vmem:[%s16151_s5 + $0x540] sm:$0xff]  ;;  %2943 = vmatpush.msra.mxu3 %v8361_v19  ;;  %v11499_v33 = vadd.f32 %v2326_v34, %v2267_v49  ;;  %v8355_v49 = vld [vmem:[%s16151_s5 + $0x528] sm:$0xff] }
 0x5ce   :  { %2826 = vmatpush.msrb.mxu2 %v8358_v60  ;;  %v8351_v60 = vld [vmem:[%s16151_s5 + $0x508] sm:$0xff] }
 0x5cf   :  { %2610 = vrot.lane.b32.xlu0 %v11450_v29, %s8946_s19  ;;  %2944 = vmatpush.msra.mxu3 %v8359_v24  ;;  %v2444_v19 = vrot.slane %v11499_v33, 7 }
 0x5d0   :  { %2827 = vmatpush.msrb.mxu2 %v8356_v21  ;;  %v8346_v21 = vld [vmem:[%s16151_s5 + $0x4e0] sm:$0xff] }
 0x5d1   :  { %2945 = vmatpush.msra.mxu3 %v8357_v20  ;;  %v8347_v20 = vld [vmem:[%s16151_s5 + $0x4e8] sm:$0xff] }
 0x5d2   :  { %2828 = vmatpush.msrb.mxu2 %v8354_v30 }
 0x5d3   :  { %2946 = vmatpush.msra.mxu3 %v8355_v49  ;;  %v8342_v49 = vld [vmem:[%s16151_s5 + $0x4c0] sm:$0xff] }
 0x5d4   :  { %8388 = vmatmul.msk.f32.gmra.mxu1 %vm341_vm3, %v2717_v37  ;;  %8402 = vmatmul.msk.f32.gmra.mxu0 %vm341_vm3, %v2717_v37 }
 0x5d5   :  { %2829 = vmatpush.msrb.mxu2 %v8352_v39  ;;  %2947 = vmatpush.msra.mxu3 %v8353_v55  ;;  %v8340_v55 = vld [vmem:[%s16151_s5 + $0x4b0] sm:$0xff] }
 0x5d7   :  { %2948 = vmatpush.msra.mxu3 %v8351_v60  ;;  %v2531_v60 = vrot.slane %v11450_v29, 7 }
 0x5dc   :  { %v2402_v23 = vpop.permute.xlu2 %2401 }
 0x5dd   :  { %v2431_v37 = vadd.f32 %v2402_v23, %v2350_v2  ;;  %v8350_v2 = vld [vmem:[%s16151_s5 + $0x500] sm:$0xff] }
 0x5de   :  { %2830 = vmatpush.msrb.mxu2 %v8350_v2  ;;  %v8341_v2 = vld [vmem:[%s16151_s5 + $0x4b8] sm:$0xff] }
 0x5df   :  { %v2473_v52 = vadd.f32 %v2447_v25, %v2431_v37  ;;  %v2597_v1 = vpop.permute.xlu1 %2596  ;;  %v8348_v25 = vld [vmem:[%s16151_s5 + $0x4f0] sm:$0xff] }
 0x5e0   :  { %2636 = vst.msk [vmem:[#allocation2 + $0x20] sm:$0xff] %vm412_vm4, %v2597_v1  ;;  %v2449_v1 = vsel %vm277_vm2, %v2443_v41, %v2444_v19  ;;  %2831 = vmatpush.msrb.mxu2 %v8348_v25  ;;  %v8345_v41 = vld [vmem:[%s16151_s5 + $0x4d8] sm:$0xff] }
 0x5e1   :  { %v2492_v13 = vadd.f32 %v11114_v62, %v2473_v52  ;;  %v8349_v52 = vld [vmem:[%s16151_s5 + $0x4f8] sm:$0xff] }
 0x5e2   :  { %2949 = vmatpush.msra.mxu3 %v8349_v52  ;;  %2832 = vmatpush.msrb.mxu2 %v8346_v21  ;;  %v8338_v52 = vld [vmem:[%s16151_s5 + $0x4a0] sm:$0xff] }
 0x5e3   :  { %v2506_v34 = vmax.f32 %v2492_v13, 0.0 }
 0x5e4   :  { %2950 = vmatpush.msra.mxu3 %v8347_v20  ;;  %2833 = vmatpush.msrb.mxu2 %v8344_v14  ;;  %v8337_v14 = vld [vmem:[%s16151_s5 + $0x498] sm:$0xff] }
 0x5e5   :  { %v11522_v23 = vmul.f32 %v2506_v34, %v9227_v8  ;;  %v8343_v34 = vld [vmem:[%s16151_s5 + $0x4c8] sm:$0xff] }
 0x5e6   :  { %2951 = vmatpush.msra.mxu3 %v8345_v41  ;;  %2834 = vmatpush.msrb.mxu2 %v8342_v49  ;;  %v8334_v41 = vld [vmem:[%s16151_s5 + $0x480] sm:$0xff] }
 0x5e7   :  { %v2398_v24 = vpop.permute.xlu1 %2397  ;;  %2616 = vrot.lane.b32.xlu0 %v11522_v23, %s8946_s19 }
 0x5e8   :  { %v2429_v37 = vadd.f32 %v2398_v24, %v11204_v5  ;;  %2952 = vmatpush.msra.mxu3 %v8343_v34  ;;  %v2657_v24 = vrot.slane %v11450_v29, 1  ;;  %2835 = vmatpush.msrb.mxu2 %v8340_v55  ;;  %v8335_v34 = vld [vmem:[%s16151_s5 + $0x488] sm:$0xff] }
 0x5ea   :  { %v2471_v13 = vadd.f32 %v2449_v1, %v2429_v37  ;;  %v8339_v1 = vld [vmem:[%s16151_s5 + $0x4a8] sm:$0xff]  ;;  %2953 = vmatpush.msra.mxu3 %v8341_v2  ;;  %2836 = vmatpush.msrb.mxu2 %v8338_v52  ;;  %v2460_v52 = vsel %vm277_vm2, %v2446_v3, %v2433_v61 }
 0x5ec   :  { %v2490_v5 = vadd.f32 %v11114_v62, %v2471_v13  ;;  %2954 = vmatpush.msra.mxu3 %v8339_v1 }
 0x5ee   :  { %v2504_v30 = vmax.f32 %v2490_v5, 0.0  ;;  %2955 = vmatpush.msra.mxu3 %v8337_v14 }
 0x5f0   :  { %v11565_v39 = vmul.f32 %v2504_v30, %v9225_v7  ;;  %v8336_v30 = vld [vmem:[%s16151_s5 + $0x490] sm:$0xff]  ;;  %2956 = vmatpush.msra.mxu3 %v8335_v34 }
 0x5f1   :  { %2837 = vmatpush.msrb.mxu2 %v8336_v30  ;;  %v2534_v30 = vrot.slane %v11522_v23, 7 }
 0x5f2   :  { %2612 = vrot.lane.b32.xlu1 %v11565_v39, %s8946_s19  ;;  %v2532_v37 = vrot.slane %v11565_v39, 7  ;;  %v2658_v25 = vrot.slane %v11565_v39, 1 }
 0x5f3   :  { %2838 = vmatpush.msrb.mxu2 %v8334_v41 }
 0x5f4   :  { %v2665_v13 = vsel %vm441_vm1, %v2657_v24, %v2658_v25  ;;  %v2539_v5 = vsel %vm277_vm2, %v2531_v60, %v2532_v37 }
 0x5f5   :  { %v2685_v21 = vmul.f32 %v2665_v13, %v9163_v38  ;;  %v2560_v20 = vmul.f32 %v2539_v5, %v9229_v11 }
 0x5f7   :  { %2699 = vst.msk [vmem:[#allocation2 + $0x98] sm:$0xff] %vm341_vm3, %v2685_v21  ;;  %v2603_v49 = vpop.permute.xlu1 %2602 }
 0x5f8   :  { %2639 = vst.msk [vmem:[#allocation2 + $0x50] sm:$0xff] %vm412_vm4, %v2603_v49 }
 0x5f9   :  { %2574 = vst.msk [vmem:[#allocation2 + $0xa0] sm:$0xff] %vm341_vm3, %v2560_v20  ;;  %v2660_v20 = vrot.slane %v11522_v23, 1  ;;  %v2712_v23 = vld [vmem:[#allocation2 + $0x40] sm:$0xff] }
 0x5fc   :  { %v2404_v55 = vpop.permute.xlu0 %2403 }
 0x5fd   :  { %v2432_v2 = vadd.f32 %v2404_v55, %v11352_v46 }
 0x5fe   :  { %v2723_v39 = vld [vmem:[#allocation2 + $0x98] sm:$0xff] }
 0x5ff   :  { %v2474_v1 = vadd.f32 %v2460_v52, %v2432_v2 }
 0x601   :  { %v2493_v13 = vadd.f32 %v11114_v62, %v2474_v1 }
 0x603   :  { %v2507_v5 = vmax.f32 %v2493_v13, 0.0 }
 0x605   :  { %v2521_v21 = vmul.f32 %v2507_v5, %v9206_v56 }
 0x607   :  { %v2607_v14 = vpop.permute.xlu1 %2606  ;;  %2618 = vrot.lane.b32.xlu1 %v2521_v21, %s8946_s19  ;;  %v2535_v46 = vrot.slane %v2521_v21, 7  ;;  %v2661_v15 = vrot.slane %v2521_v21, 1 }
 0x608   :  { %2641 = vst.msk [vmem:[#allocation2 + $0x70] sm:$0xff] %vm412_vm4, %v2607_v14 }
 0x609   :  { %v2662_v61 = vsel %vm441_vm1, %v2660_v20, %v2661_v15  ;;  %v2675_v17 = vsel %vm441_vm1, %v2661_v15, %v2648_v54  ;;  %v2593_v3 = vpop.permute.xlu0 %2592  ;;  %v2549_v41 = vsel %vm277_vm2, %v2535_v46, %v2522_v12  ;;  %v2536_v49 = vsel %vm277_vm2, %v2534_v30, %v2535_v46 }
 0x60a   :  { %v2688_v34 = vmul.f32 %v2662_v61, %v9307_v4  ;;  %v2689_v55 = vmul.f32 %v2675_v17, %v9357_v57  ;;  %v2550_v2 = vmul.f32 %v2549_v41, %v9368_v22  ;;  %v2563_v54 = vmul.f32 %v2536_v49, %v9373_v26  ;;  %v2708_v49 = vld [vmem:[#allocation2 + $0x20] sm:$0xff] }
 0x60c   :  { %2702 = vst.msk [vmem:[#allocation2 + $0xc8] sm:$0xff] %vm341_vm3, %v2688_v34 }
 0x60d   :  { %2703 = vst.msk [vmem:[#allocation2 + $0xd8] sm:$0xff] %vm341_vm3, %v2689_v55 }
 0x60e   :  { %2564 = vst.msk [vmem:[#allocation2] sm:$0xff] %vm341_vm3, %v2550_v2 }
 0x60f   :  { %2634 = vst.msk [vmem:[#allocation2] sm:$0xff] %vm412_vm4, %v2593_v3 }
 0x610   :  { %2577 = vst.msk [vmem:[#allocation2 + $0xd0] sm:$0xff] %vm341_vm3, %v2563_v54 }
 0x611   :  { %v2394_v12 = vpop.permute.xlu0 %2393 }
 0x612   :  { %v2427_v52 = vadd.f32 %v2394_v12, %v2354_v36 }
 0x614   :  { %v2469_v1 = vadd.f32 %v11167_v9, %v2427_v52 }
 0x616   :  { %v2488_v13 = vadd.f32 %v11114_v62, %v2469_v1  ;;  %v2704_v5 = vld [vmem:[#allocation2] sm:$0xff] }
 0x617   :  { %2839 = vmatmul.f32.vlgmr.msrb.gmra.mxu2 %v2704_v5  ;;  %2957 = vmatmul.f32.vlgmr.msra.gmra.mxu3 %v2704_v5 }
 0x618   :  { %v2502_v21 = vmax.f32 %v2488_v13, 0.0 }
 0x619   :  { %v2599_v14 = vpop.permute.xlu0 %2598 }
 0x61a   :  { %2637 = vst.msk [vmem:[#allocation2 + $0x30] sm:$0xff] %vm412_vm4, %v2599_v14  ;;  %v2516_v27 = vmul.f32 %v2502_v21, %v9186_v47  ;;  %v2718_v14 = vld [vmem:[#allocation2 + $0x70] sm:$0xff] }
 0x61c   :  { %2608 = vrot.lane.b32.xlu2 %v2516_v27, %s8946_s19  ;;  %v2530_v51 = vrot.slane %v2516_v27, 7  ;;  %v2656_v46 = vrot.slane %v2516_v27, 1  ;;  %v2729_v27 = vld [vmem:[#allocation2 + $0xc8] sm:$0xff] }
 0x61e   :  { %v2666_v9 = vsel %vm441_vm1, %v2656_v46, %v2657_v24  ;;  %v2667_v63 = vsel %vm441_vm1, %v2655_v18, %v2656_v46  ;;  %v2540_v15 = vsel %vm277_vm2, %v2530_v51, %v2531_v60  ;;  %v2541_v61 = vsel %vm277_vm2, %v2529_v44, %v2530_v51  ;;  %v2731_v51 = vld [vmem:[#allocation2 + $0xd8] sm:$0xff] }
 0x61f   :  { %v2683_v17 = vmul.f32 %v2667_v63, %v9617_v31  ;;  %v2684_v24 = vmul.f32 %v2666_v9, %v9633_v28  ;;  %2842 = vmatmul.f32.gmra.mxu2 %v2706_v58  ;;  %2960 = vmatmul.f32.gmra.mxu3 %v2706_v58  ;;  %v2559_v3 = vmul.f32 %v2540_v15, %v9210_v59 }
 0x620   :  { %v2558_v18 = vmul.f32 %v2541_v61, %v9188_v48  ;;  %v2448_v44 = vsel %vm277_vm2, %v2444_v19, %v2445_v43 }
 0x621   :  { %2697 = vst.msk [vmem:[#allocation2 + $0x78] sm:$0xff] %vm341_vm3, %v2683_v17  ;;  %v2400_v29 = vpop.permute.xlu0 %2399  ;;  %v2710_v2 = vld [vmem:[#allocation2 + $0x30] sm:$0xff] }
 0x622   :  { %2698 = vst.msk [vmem:[#allocation2 + $0x88] sm:$0xff] %vm341_vm3, %v2684_v24  ;;  %v2430_v0 = vadd.f32 %v2400_v29, %v11263_v50  ;;  %v2899_v24 = vpop.f32.mrf.mxu1 }
 0x623   :  { %2573 = vst.msk [vmem:[#allocation2 + $0x90] sm:$0xff] %vm341_vm3, %v2559_v3 }
 0x624   :  { %v2472_v60 = vadd.f32 %v2448_v44, %v2430_v0  ;;  %2572 = vst.msk [vmem:[#allocation2 + $0x80] sm:$0xff] %vm341_vm3, %v2558_v18 }
 0x626   :  { %v2491_v41 = vadd.f32 %v11114_v62, %v2472_v60 }
 0x627   :  { %2845 = vmatmul.f32.gmra.mxu2 %v2708_v49  ;;  %2963 = vmatmul.f32.gmra.mxu3 %v2708_v49 }
 0x628   :  { %v2719_v34 = vld [vmem:[#allocation2 + $0x78] sm:$0xff]  ;;  %v2505_v55 = vmax.f32 %v2491_v41, 0.0 }
 0x629   :  { %v2605_v50 = vpop.permute.xlu0 %2604  ;;  %8389 = vmatmul.msk.f32.gmra.mxu1 %vm341_vm3, %v2719_v34  ;;  %8403 = vmatmul.msk.f32.gmra.mxu0 %vm341_vm3, %v2719_v34 }
 0x62a   :  { %2640 = vst.msk [vmem:[#allocation2 + $0x60] sm:$0xff] %vm412_vm4, %v2605_v50  ;;  %v2519_v45 = vmul.f32 %v2505_v55, %v16384_v10  ;;  %v2902_v29 = vpop.f32.mrf.mxu1 }
 0x62c   :  { %2614 = vrot.lane.b32.xlu2 %v2519_v45, %s8946_s19  ;;  %v2533_v43 = vrot.slane %v2519_v45, 7  ;;  %v2659_v33 = vrot.slane %v2519_v45, 1 }
 0x62e   :  { %v2663_v62 = vsel %vm441_vm1, %v2659_v33, %v2660_v20  ;;  %v2664_v19 = vsel %vm441_vm1, %v2658_v25, %v2659_v33  ;;  %v2537_v54 = vsel %vm277_vm2, %v2533_v43, %v2534_v30  ;;  %v2538_v36 = vsel %vm277_vm2, %v2532_v37, %v2533_v43  ;;  %v2721_v25 = vld [vmem:[#allocation2 + $0x88] sm:$0xff]  ;;  %v2714_v37 = vld [vmem:[#allocation2 + $0x50] sm:$0xff] }
 0x62f   :  { %v2686_v12 = vmul.f32 %v2664_v19, %v9167_v40  ;;  %v2687_v20 = vmul.f32 %v2663_v62, %v9265_v32  ;;  %2848 = vmatmul.f32.gmra.mxu2 %v2710_v2  ;;  %2966 = vmatmul.f32.gmra.mxu3 %v2710_v2  ;;  %v2562_v52 = vmul.f32 %v2537_v54, %v9313_v16 }
 0x630   :  { %v2561_v1 = vmul.f32 %v2538_v36, %v9273_v35 }
 0x631   :  { %2700 = vst.msk [vmem:[#allocation2 + $0xa8] sm:$0xff] %vm341_vm3, %v2686_v12  ;;  %8390 = vmatmul.msk.f32.gmra.mxu1 %vm341_vm3, %v2721_v25  ;;  %8404 = vmatmul.msk.f32.gmra.mxu0 %vm341_vm3, %v2721_v25  ;;  %v2716_v5 = vld [vmem:[#allocation2 + $0x60] sm:$0xff] }
 0x632   :  { %2701 = vst.msk [vmem:[#allocation2 + $0xb8] sm:$0xff] %vm341_vm3, %v2687_v20  ;;  %v2905_v41 = vpop.f32.mrf.mxu1 }
 0x633   :  { %2576 = vst.msk [vmem:[#allocation2 + $0xc0] sm:$0xff] %vm341_vm3, %v2562_v52 }
 0x634   :  { %2575 = vst.msk [vmem:[#allocation2 + $0xb0] sm:$0xff] %vm341_vm3, %v2561_v1 }
 0x637   :  { %2851 = vmatmul.f32.gmra.mxu2 %v2712_v23  ;;  %2969 = vmatmul.f32.gmra.mxu3 %v2712_v23 }
 0x638   :  { %v2725_v30 = vld [vmem:[#allocation2 + $0xa8] sm:$0xff] }
 0x639   :  { %8391 = vmatmul.msk.f32.gmra.mxu1 %vm341_vm3, %v2723_v39  ;;  %8405 = vmatmul.msk.f32.gmra.mxu0 %vm341_vm3, %v2723_v39  ;;  %v2727_v21 = vld [vmem:[#allocation2 + $0xb8] sm:$0xff] }
 0x63a   :  { %v2908_v19 = vpop.f32.mrf.mxu1 }
 0x63f   :  { %2854 = vmatmul.f32.gmra.mxu2 %v2714_v37  ;;  %2972 = vmatmul.f32.gmra.mxu3 %v2714_v37 }
 0x641   :  { %v2611_v13 = vpop.permute.xlu0 %2610  ;;  %8392 = vmatmul.msk.f32.gmra.mxu1 %vm341_vm3, %v2725_v30  ;;  %8406 = vmatmul.msk.f32.gmra.mxu0 %vm341_vm3, %v2725_v30 }
 0x642   :  { %2643 = vst.msk [vmem:[#allocation2 + $0x90] sm:$0xff] %vm412_vm4, %v2611_v13  ;;  %v2911_v52 = vpop.f32.mrf.mxu1 }
 0x647   :  { %2857 = vmatmul.f32.gmra.mxu2 %v2716_v5  ;;  %2975 = vmatmul.f32.gmra.mxu3 %v2716_v5 }
 0x649   :  { %8393 = vmatmul.msk.f32.gmra.mxu1 %vm341_vm3, %v2727_v21  ;;  %8407 = vmatmul.msk.f32.gmra.mxu0 %vm341_vm3, %v2727_v21  ;;  %v2722_v17 = vld [vmem:[#allocation2 + $0x90] sm:$0xff] }
 0x64a   :  { %v2914_v30 = vpop.f32.mrf.mxu1 }
 0x64f   :  { %2860 = vmatmul.f32.gmra.mxu2 %v2718_v14  ;;  %2978 = vmatmul.f32.gmra.mxu3 %v2718_v14 }
 0x651   :  { %8394 = vmatmul.msk.f32.gmra.mxu1 %vm341_vm3, %v2729_v27  ;;  %8408 = vmatmul.msk.f32.gmra.mxu0 %vm341_vm3, %v2729_v27 }
 0x652   :  { %v2917_v27 = vpop.f32.mrf.mxu1 }
 0x659   :  { %v2617_v46 = vpop.permute.xlu0 %2616  ;;  %8395 = vmatmul.msk.f32.gmra.mxu1 %vm341_vm3, %v2731_v51  ;;  %8409 = vmatmul.msk.f32.gmra.mxu0 %vm341_vm3, %v2731_v51 }
 0x65a   :  { %2646 = vst.msk [vmem:[#allocation2 + $0xc0] sm:$0xff] %vm412_vm4, %v2617_v46 }
 0x661   :  { %v2728_v60 = vld [vmem:[#allocation2 + $0xc0] sm:$0xff] }
 0x664   :  { %v2613_v9 = vpop.permute.xlu1 %2612 }
 0x665   :  { %2644 = vst.msk [vmem:[#allocation2 + $0xa0] sm:$0xff] %vm412_vm4, %v2613_v9 }
 0x66c   :  { %v2724_v3 = vld [vmem:[#allocation2 + $0xa0] sm:$0xff] }
 0x676   :  { %v2609_v63 = vpop.permute.xlu2 %2608 }
 0x677   :  { %2642 = vst.msk [vmem:[#allocation2 + $0x80] sm:$0xff] %vm412_vm4, %v2609_v63 }
 0x679   :  { %v2619_v58 = vpop.permute.xlu1 %2618 }
 0x67a   :  { %2647 = vst.msk [vmem:[#allocation2 + $0xd0] sm:$0xff] %vm412_vm4, %v2619_v58 }
 0x67e   :  { %v2720_v15 = vld [vmem:[#allocation2 + $0x80] sm:$0xff] }
 0x67f   :  { %2863 = vmatmul.f32.gmra.mxu2 %v2720_v15  ;;  %2981 = vmatmul.f32.gmra.mxu3 %v2720_v15 }
 0x681   :  { %v2730_v45 = vld [vmem:[#allocation2 + $0xd0] sm:$0xff] }
 0x686   :  { %v2615_v61 = vpop.permute.xlu2 %2614 }
 0x687   :  { %2645 = vst.msk [vmem:[#allocation2 + $0xb0] sm:$0xff] %vm412_vm4, %v2615_v61  ;;  %2866 = vmatmul.f32.gmra.mxu2 %v2722_v17  ;;  %2984 = vmatmul.f32.gmra.mxu3 %v2722_v17 }
 0x68e   :  { %v2726_v18 = vld [vmem:[#allocation2 + $0xb0] sm:$0xff] }
 0x68f   :  { %2869 = vmatmul.f32.gmra.mxu2 %v2724_v3  ;;  %2987 = vmatmul.f32.gmra.mxu3 %v2724_v3 }
 0x697   :  { %2872 = vmatmul.f32.gmra.mxu2 %v2726_v18  ;;  %2990 = vmatmul.f32.gmra.mxu3 %v2726_v18  ;;  %v11784_v18 = vpop.f32.mrf.mxu0 }
 0x69a   :  { %v2840_v0 = vpop.f32.mrf.mxu2  ;;  %v11782_v3 = vpop.f32.mrf.mxu3 }
 0x69b   :  { %v11742_v44 = vadd.f32 %v2899_v24, %v2840_v0 }
 0x69d   :  { %3101 = vrot.lane.b32.xlu2 %v11742_v44, %s8946_s19  ;;  %v16223_v55 = vrot.slane %v11742_v44, 1 }
 0x69f   :  { %2875 = vmatmul.f32.gmra.mxu2 %v2728_v60  ;;  %2993 = vmatmul.f32.gmra.mxu3 %v2728_v60  ;;  %v3020_v0 = vpop.f32.mrf.mxu0 }
 0x6a2   :  { %v2843_v49 = vpop.f32.mrf.mxu2 }
 0x6a3   :  { %v2903_v34 = vadd.f32 %v2902_v29, %v2843_v49  ;;  %v2961_v29 = vpop.f32.mrf.mxu3 }
 0x6a5   :  { %v3060_v50 = vrot.slane %v2903_v34, 1  ;;  %3103 = vrot.lane.b32.xlu0 %v2903_v34, %s8946_s19 }
 0x6a6   :  { %v2920_v58 = vpop.f32.mrf.mxu1 }
 0x6a7   :  { %2878 = vmatmul.f32.gmra.mxu2 %v2730_v45  ;;  %2996 = vmatmul.f32.gmra.mxu3 %v2730_v45  ;;  %v11752_v43 = vsel %vm441_vm1, %v16223_v55, %v3060_v50 }
 0x6aa   :  { %v2846_v33 = vpop.f32.mrf.mxu2 }
 0x6ab   :  { %v2906_v62 = vadd.f32 %v2905_v41, %v2846_v33  ;;  %v2964_v60 = vpop.f32.mrf.mxu3  ;;  %v3023_v41 = vpop.f32.mrf.mxu0 }
 0x6ad   :  { %v3061_v2 = vrot.slane %v2906_v62, 1  ;;  %3105 = vrot.lane.b32.xlu1 %v2906_v62, %s8946_s19 }
 0x6af   :  { %v11757_v54 = vsel %vm441_vm1, %v3060_v50, %v3061_v2  ;;  %v2923_v50 = vpop.f32.mrf.mxu1 }
 0x6b2   :  { %v2849_v36 = vpop.f32.mrf.mxu2 }
 0x6b3   :  { %v2909_v12 = vadd.f32 %v2908_v19, %v2849_v36  ;;  %v2967_v49 = vpop.f32.mrf.mxu3  ;;  %v3026_v34 = vpop.f32.mrf.mxu0 }
 0x6b5   :  { %v3062_v20 = vrot.slane %v2909_v12, 1  ;;  %3107 = vrot.lane.b32.xlu2 %v2909_v12, %s8946_s19 }
 0x6b7   :  { %v3083_v25 = vsel %vm441_vm1, %v3061_v2, %v3062_v20  ;;  %v2926_v62 = vpop.f32.mrf.mxu1 }
 0x6ba   :  { %v2852_v1 = vpop.f32.mrf.mxu2 }
 0x6bb   :  { %v2912_v23 = vadd.f32 %v2911_v52, %v2852_v1  ;;  %v2970_v45 = vpop.f32.mrf.mxu3  ;;  %v3029_v33 = vpop.f32.mrf.mxu0 }
 0x6bd   :  { %v3063_v39 = vrot.slane %v2912_v23, 1  ;;  %3109 = vrot.lane.b32.xlu0 %v2912_v23, %s8946_s19 }
 0x6bf   :  { %v11765_v37 = vsel %vm441_vm1, %v3062_v20, %v3063_v39 }
 0x6c2   :  { %v2855_v13 = vpop.f32.mrf.mxu2 }
 0x6c3   :  { %v2915_v5 = vadd.f32 %v2914_v30, %v2855_v13  ;;  %v2973_v52 = vpop.f32.mrf.mxu3  ;;  %v2929_v30 = vpop.f32.mrf.mxu1 }
 0x6c5   :  { %v3064_v21 = vrot.slane %v2915_v5, 1  ;;  %3111 = vrot.lane.b32.xlu2 %v2915_v5, %s8946_s19  ;;  %v11798_v5 = vadd.f32 %v3029_v33, %v2970_v45 }
 0x6c7   :  { %v11770_v14 = vsel %vm441_vm1, %v3063_v39, %v3064_v21  ;;  %v3032_v39 = vpop.f32.mrf.mxu0 }
 0x6ca   :  { %v2858_v51 = vpop.f32.mrf.mxu2 }
 0x6cb   :  { %v2918_v46 = vadd.f32 %v2917_v27, %v2858_v51  ;;  %v3027_v27 = vadd.f32 %v3026_v34, %v2967_v49 }
 0x6cd   :  { %v3065_v9 = vrot.slane %v2918_v46, 1  ;;  %3113 = vrot.lane.b32.xlu0 %v2918_v46, %s8946_s19  ;;  %v3024_v46 = vadd.f32 %v3023_v41, %v2964_v60 }
 0x6cf   :  { %v11775_v63 = vsel %vm441_vm1, %v3064_v21, %v3065_v9  ;;  %v3035_v33 = vpop.f32.mrf.mxu0 }
 0x6d2   :  { %v2861_v15 = vpop.f32.mrf.mxu2 }
 0x6d3   :  { %v2921_v61 = vadd.f32 %v2920_v58, %v2861_v15  ;;  %v11805_v15 = vadd.f32 %v3020_v0, %v2961_v29 }
 0x6d5   :  { %v3066_v17 = vrot.slane %v2921_v61, 1  ;;  %3115 = vrot.lane.b32.xlu2 %v2921_v61, %s8946_s19  ;;  %v16224_v41 = vrot.slane %v11805_v15, 7 }
 0x6d7   :  { %v11780_v24 = vsel %vm441_vm1, %v3065_v9, %v3066_v17  ;;  %v16222_v9 = vrot.slane %v11798_v5, 7 }
 0x6f7   :  { %v11793_v20 = vpop.permute.xlu2 %3101 }
 0x702   :  { %v2864_v19 = vpop.f32.mrf.mxu2 }
 0x703   :  { %v11786_v2 = vadd.f32 %v2923_v50, %v2864_v19  ;;  %v3160_v50 = vrot.slane %v3027_v27, 7  ;;  %v3159_v19 = vrot.slane %v3024_v46, 7 }
 0x705   :  { %v3067_v36 = vrot.slane %v11786_v2, 1  ;;  %v3180_v60 = vsel %vm277_vm2, %v3160_v50, %v16222_v9  ;;  %v3182_v27 = vsel %vm277_vm2, %v16224_v41, %v3159_v19  ;;  %v11842_v9 = vadd.f32 %v3032_v39, %v2973_v52  ;;  %v8455_v52 = vld [vmem:[%s16151_s5 + $0x760] sm:$0xff] }
 0x706   :  { %v3181_v39 = vsel %vm277_vm2, %v3159_v19, %v3160_v50 }
 0x707   :  { %v11791_v12 = vsel %vm441_vm1, %v3066_v17, %v3067_v36 }
 0x708   :  { %16398 = vst [vmem:[#allocation13_spill] sm:$0xff] %v11791_v12  ;;  %v16399_v12 = vld [vmem:[#allocation21_spill] sm:$0xff] }
 0x70a   :  { %v2867_v1 = vpop.f32.mrf.mxu2 }
 0x70b   :  { %v11795_v23 = vadd.f32 %v2926_v62, %v2867_v1  ;;  %v2976_v62 = vpop.f32.mrf.mxu3  ;;  %v2932_v1 = vpop.f32.mrf.mxu1 }
 0x70d   :  { %v3068_v13 = vrot.slane %v11795_v23, 1 }
 0x70f   :  { %v11802_v21 = vsel %vm441_vm1, %v3067_v36, %v3068_v13  ;;  %v3108_v51 = vpop.permute.xlu2 %3107  ;;  %v8457_v36 = vld [vmem:[%s16151_s5 + $0x770] sm:$0xff] }
 0x710   :  { %v3146_v61 = vadd.f32 %v3108_v51, %v3083_v25  ;;  %v11818_v25 = vld [vmem:[%s16149_s6 + $0x4] ss:$0 sm:$0xff]  ;;  %3628 = vmatpush.msrb.mxu1 %v8457_v36  ;;  %v16400_v36 = vld [vmem:[#allocation20_spill] sm:$0xff] }
 0x712   :  { %v2870_v58 = vpop.f32.mrf.mxu2  ;;  %v3188_v29 = vadd.f32 %v3180_v60, %v3146_v61  ;;  %3629 = vmatpush.msrb.mxu1 %v8455_v52  ;;  %v16401_v52 = vld [vmem:[#allocation18_spill] sm:$0xff] }
 0x713   :  { %v11807_v17 = vadd.f32 %v2929_v30, %v2870_v58  ;;  %v8458_v30 = vld [vmem:[%s16151_s5 + $0x778] sm:$0xff]  ;;  %v11838_v58 = vadd.f32 %v3035_v33, %v2976_v62  ;;  %v2979_v55 = vpop.f32.mrf.mxu3  ;;  %v2935_v33 = vpop.f32.mrf.mxu1 }
 0x714   :  { %3746 = vmatpush.msrb.mxu0 %v8458_v30  ;;  %v3207_v46 = vadd.f32 %v11818_v25, %v3188_v29 }
 0x715   :  { %v3069_v45 = vrot.slane %v11807_v17, 1  ;;  %v16225_v62 = vrot.slane %v11838_v58, 7 }
 0x716   :  { %v3221_v30 = vadd.f32 %v3207_v46, %v16400_v36  ;;  %v8454_v36 = vld [vmem:[%s16151_s5 + $0x758] sm:$0xff] }
 0x717   :  { %v3104_v0 = vpop.permute.xlu0 %3103  ;;  %v11822_v49 = vsel %vm441_vm1, %v3068_v13, %v3069_v45 }
 0x718   :  { %v3144_v34 = vadd.f32 %v3104_v0, %v11752_v43  ;;  %v3038_v0 = vpop.f32.mrf.mxu0  ;;  %v3235_v50 = vmax.f32 %v3221_v30, 0.0  ;;  %v8451_v30 = vld [vmem:[%s16151_s5 + $0x740] sm:$0xff] }
 0x71a   :  { %v3186_v51 = vadd.f32 %v3182_v27, %v3144_v34  ;;  %v2873_v13 = vpop.f32.mrf.mxu2 }
 0x71b   :  { %v11836_v43 = vadd.f32 %v2932_v1, %v2873_v13  ;;  %v16227_v13 = vrot.slane %v11842_v9, 7 }
 0x71c   :  { %v3205_v61 = vadd.f32 %v11818_v25, %v3186_v51 }
 0x71d   :  { %v3070_v60 = vrot.slane %v11836_v43, 1 }
 0x71e   :  { %v3219_v41 = vadd.f32 %v3205_v61, %v16399_v12  ;;  %v8456_v12 = vld [vmem:[%s16151_s5 + $0x768] sm:$0xff]  ;;  %v8453_v61 = vld [vmem:[%s16151_s5 + $0x750] sm:$0xff] }
 0x71f   :  { %v3106_v34 = vpop.permute.xlu1 %3105  ;;  %v3112_v27 = vpop.permute.xlu2 %3111  ;;  %v11848_v1 = vsel %vm441_vm1, %v3069_v45, %v3070_v60  ;;  %3747 = vmatpush.msrb.mxu0 %v8456_v12  ;;  %3630 = vmatpush.msrb.mxu1 %v8453_v61 }
 0x720   :  { %v3233_v29 = vmax.f32 %v3219_v41, 0.0  ;;  %v3145_v51 = vadd.f32 %v3106_v34, %v11757_v54  ;;  %v3148_v45 = vadd.f32 %v3112_v27, %v11770_v14  ;;  %v3178_v34 = vsel %vm277_vm2, %v16227_v13, %v16225_v62  ;;  %v8452_v27 = vld [vmem:[%s16151_s5 + $0x748] sm:$0xff] }
 0x721   :  { %3748 = vmatpush.msrb.mxu0 %v8454_v36  ;;  %3631 = vmatpush.msrb.mxu1 %v8451_v30  ;;  %v3041_v36 = vpop.f32.mrf.mxu0 }
 0x722   :  { %v3187_v41 = vadd.f32 %v3181_v39, %v3145_v51  ;;  %v11863_v54 = vmul.f32 %v3233_v29, %v9186_v47  ;;  %v2876_v46 = vpop.f32.mrf.mxu2  ;;  %v2982_v51 = vpop.f32.mrf.mxu3  ;;  %v8449_v39 = vld [vmem:[%s16151_s5 + $0x730] sm:$0xff] }
 0x723   :  { %v11871_v19 = vadd.f32 %v2935_v33, %v2876_v46  ;;  %v3190_v33 = vadd.f32 %v3178_v34, %v3148_v45  ;;  %3749 = vmatpush.msrb.mxu0 %v8452_v27  ;;  %v11898_v46 = vadd.f32 %v11784_v18, %v11782_v3  ;;  %3632 = vmatpush.msrb.mxu1 %v8449_v39  ;;  %v8447_v34 = vld [vmem:[%s16151_s5 + $0x720] sm:$0xff]  ;;  %v8448_v3 = vld [vmem:[%s16151_s5 + $0x728] sm:$0xff]  ;;  %v8445_v18 = vld [vmem:[%s16151_s5 + $0x710] sm:$0xff] }
 0x724   :  { %v3206_v14 = vadd.f32 %v11818_v25, %v3187_v41  ;;  %3332 = vrot.lane.b32.xlu0 %v11863_v54, %s8946_s19  ;;  %v8450_v41 = vld [vmem:[%s16151_s5 + $0x738] sm:$0xff]  ;;  %v11901_v45 = vmul.f32 %v3235_v50, %v9225_v7  ;;  %v11918_v50 = vadd.f32 %v3038_v0, %v2979_v55  ;;  %v11920_v30 = vadd.f32 %v3041_v36, %v2982_v51  ;;  %v8443_v55 = vld [vmem:[%s16151_s5 + $0x700] sm:$0xff] }
 0x725   :  { %v16226_v29 = vrot.slane %v11871_v19, 1  ;;  %3750 = vmatpush.msrb.mxu0 %v8450_v41  ;;  %3633 = vmatpush.msrb.mxu1 %v8447_v34  ;;  %v8446_v27 = vld [vmem:[%s16151_s5 + $0x718] sm:$0xff]  ;;  %v3387_v34 = vrot.slane %v11863_v54, 1 }
 0x726   :  { %v3220_v12 = vadd.f32 %v3206_v14, %v16401_v52  ;;  %16402 = vst [vmem:[#allocation11_spill] sm:$0xff] %v11901_v45  ;;  %v2938_v52 = vpop.f32.mrf.mxu1  ;;  %v16230_v41 = vrot.slane %v11901_v45, 7  ;;  %v16228_v36 = vrot.slane %v11901_v45, 1 }
 0x727   :  { %v11907_v61 = vsel %vm441_vm1, %v3070_v60, %v16226_v29  ;;  %v3209_v60 = vadd.f32 %v11818_v25, %v3190_v33  ;;  %3751 = vmatpush.msrb.mxu0 %v8448_v3  ;;  %3634 = vmatpush.msrb.mxu1 %v8445_v18  ;;  %v8444_v33 = vld [vmem:[%s16151_s5 + $0x708] sm:$0xff] }
 0x728   :  { %v3234_v14 = vmax.f32 %v3220_v12, 0.0 }
 0x729   :  { %3752 = vmatpush.msrb.mxu0 %v8446_v27  ;;  %3635 = vmatpush.msrb.mxu1 %v8443_v55  ;;  %v16407_v27 = vrot.slane %v11898_v46, 7 }
 0x72a   :  { %v11927_v12 = vmul.f32 %v3234_v14, %v9204_v53  ;;  %v2879_v39 = vpop.f32.mrf.mxu2  ;;  %v16229_v14 = vrot.slane %v11863_v54, 7 }
 0x72b   :  { %v2939_v51 = vadd.f32 %v2938_v52, %v2879_v39  ;;  %v16404_v52 = vld [vmem:[#allocation8_spill] sm:$0xff]  ;;  %3753 = vmatpush.msrb.mxu0 %v8444_v33 }
 0x72c   :  { %16403 = vst [vmem:[#allocation17_spill] sm:$0xff] %v11927_v12  ;;  %v3262_v3 = vrot.slane %v11927_v12, 7  ;;  %v3388_v62 = vrot.slane %v11927_v12, 1  ;;  %3334 = vrot.lane.b32.xlu2 %v11927_v12, %s8946_s19  ;;  %3119 = vrot.lane.b32.xlu0 %v11795_v23, %s8946_s19  ;;  %v3223_v39 = vadd.f32 %v3209_v60, %v16404_v52  ;;  %v16411_v12 = vrot.slane %v11918_v50, 7 }
 0x72d   :  { %v3072_v29 = vrot.slane %v2939_v51, 1  ;;  %3127 = vrot.lane.b32.xlu1 %v2939_v51, %s8946_s19  ;;  %v16405_v51 = vrot.slane %v11742_v44, 1 }
 0x72e   :  { %v3411_v13 = vsel %vm441_vm1, %v3387_v34, %v3388_v62  ;;  %v3410_v0 = vsel %vm441_vm1, %v3388_v62, %v16228_v36  ;;  %v3285_v23 = vsel %vm277_vm2, %v16229_v14, %v3262_v3  ;;  %v3284_v60 = vsel %vm277_vm2, %v3262_v3, %v16230_v41 }
 0x72f   :  { %v3415_v55 = vmul.f32 %v3411_v13, %v9633_v28  ;;  %v3086_v33 = vsel %vm441_vm1, %v3072_v29, %v16405_v51  ;;  %v3110_v52 = vpop.permute.xlu0 %3109  ;;  %v3116_v18 = vpop.permute.xlu2 %3115  ;;  %v3416_v62 = vmul.f32 %v3410_v0, %v9163_v38  ;;  %v3290_v36 = vmul.f32 %v3285_v23, %v9210_v59 }
 0x730   :  { %v16406_v14 = vrot.slane %v11805_v15, 7  ;;  %v3143_v13 = vadd.f32 %v11793_v20, %v3086_v33  ;;  %v3147_v44 = vadd.f32 %v3110_v52, %v11765_v37  ;;  %v3150_v41 = vadd.f32 %v3116_v18, %v11780_v24  ;;  %v16414_v52 = vld [vmem:[#allocation12_spill] sm:$0xff] }
 0x731   :  { %3429 = vst.msk [vmem:[#allocation2 + $0x18] sm:$0xff] %vm341_vm3, %v3415_v55  ;;  %v16408_v51 = vrot.slane %v11842_v9, 7  ;;  %v16409_v0 = vrot.slane %v11798_v5, 7  ;;  %v16410_v23 = vrot.slane %v11920_v30, 7  ;;  %v16412_v37 = vrot.slane %v11871_v19, 1 }
 0x732   :  { %v3183_v3 = vsel %vm277_vm2, %v16407_v27, %v16406_v14  ;;  %v3291_v9 = vmul.f32 %v3284_v60, %v9229_v11  ;;  %3430 = vst.msk [vmem:[#allocation2 + $0x28] sm:$0xff] %vm341_vm3, %v3416_v62  ;;  %v3237_v27 = vmax.f32 %v3223_v39, 0.0  ;;  %v16413_v60 = vld [vmem:[#allocation19_spill] sm:$0xff] }
 0x733   :  { %v3179_v15 = vsel %vm277_vm2, %v16409_v0, %v16408_v51  ;;  %v3176_v20 = vsel %vm277_vm2, %v16411_v12, %v16410_v23  ;;  %v11997_v24 = vsel %vm441_vm1, %v16412_v37, %v3072_v29  ;;  %v3185_v14 = vadd.f32 %v3183_v3, %v3143_v13  ;;  %3304 = vst.msk [vmem:[#allocation2 + $0x20] sm:$0xff] %vm341_vm3, %v3290_v36  ;;  %v16416_v3 = vld [vmem:[#allocation10_spill] sm:$0xff] }
 0x734   :  { %v3189_v5 = vadd.f32 %v3179_v15, %v3147_v44  ;;  %v3192_v18 = vadd.f32 %v3176_v20, %v3150_v41  ;;  %3121 = vrot.lane.b32.xlu2 %v11807_v17, %s8946_s19  ;;  %3305 = vst.msk [vmem:[#allocation2 + $0x30] sm:$0xff] %vm341_vm3, %v3291_v9  ;;  %v12011_v62 = vmul.f32 %v3237_v27, %v9227_v8 }
 0x735   :  { %v3204_v12 = vadd.f32 %v11818_v25, %v3185_v14 }
 0x736   :  { %v3208_v55 = vadd.f32 %v11818_v25, %v3189_v5  ;;  %v3211_v29 = vadd.f32 %v11818_v25, %v3192_v18  ;;  %16415 = vst [vmem:[#allocation9_spill] sm:$0xff] %v12011_v62  ;;  %v3391_v51 = vrot.slane %v12011_v62, 1  ;;  %v3265_v9 = vrot.slane %v12011_v62, 7 }
 0x737   :  { %v3218_v41 = vadd.f32 %v3204_v12, %v16414_v52  ;;  %v16418_v18 = vrot.slane %v11901_v45, 1 }
 0x738   :  { %v3222_v33 = vadd.f32 %v3208_v55, %v16413_v60  ;;  %v3225_v13 = vadd.f32 %v3211_v29, %v16416_v3  ;;  %v16419_v55 = vrot.slane %v11863_v54, 7 }
 0x739   :  { %v3232_v36 = vmax.f32 %v3218_v41, 0.0 }
 0x73a   :  { %v3236_v39 = vmax.f32 %v3222_v33, 0.0  ;;  %v3239_v37 = vmax.f32 %v3225_v13, 0.0  ;;  %v16421_v13 = vrot.slane %v11918_v50, 7 }
 0x73b   :  { %v12018_v17 = vmul.f32 %v3232_v36, %v9172_v42  ;;  %v16420_v36 = vrot.slane %v11901_v45, 7 }
 0x73c   :  { %v12015_v44 = vmul.f32 %v3236_v39, %v16384_v10  ;;  %3340 = vrot.lane.b32.xlu2 %v12011_v62, %s8946_s19 }
 0x73d   :  { %16417 = vst [vmem:[#allocation3_spill] sm:$0xff] %v12018_v17  ;;  %v3260_v23 = vrot.slane %v12018_v17, 7  ;;  %v3386_v20 = vrot.slane %v12018_v17, 1  ;;  %3330 = vrot.lane.b32.xlu1 %v12018_v17, %s8946_s19 }
 0x73e   :  { %v3264_v0 = vrot.slane %v12015_v44, 7  ;;  %v3390_v15 = vrot.slane %v12015_v44, 1  ;;  %3338 = vrot.lane.b32.xlu0 %v12015_v44, %s8946_s19 }
 0x73f   :  { %v3412_v5 = vsel %vm441_vm1, %v3386_v20, %v3387_v34  ;;  %v3286_v12 = vsel %vm277_vm2, %v3260_v23, %v16419_v55  ;;  %v3114_v33 = vpop.permute.xlu0 %3113 }
 0x740   :  { %v3408_v14 = vsel %vm441_vm1, %v3390_v15, %v3391_v51  ;;  %v3409_v27 = vsel %vm441_vm1, %v16418_v18, %v3390_v15  ;;  %v3414_v60 = vmul.f32 %v3412_v5, %v9617_v31  ;;  %v3149_v34 = vadd.f32 %v3114_v33, %v11775_v63 }
 0x741   :  { %v3418_v29 = vmul.f32 %v3408_v14, %v9265_v32  ;;  %v3417_v52 = vmul.f32 %v3409_v27, %v9167_v40  ;;  %v3289_v41 = vmul.f32 %v3286_v12, %v9188_v48  ;;  %v3282_v39 = vsel %vm277_vm2, %v3264_v0, %v3265_v9 }
 0x742   :  { %v3283_v3 = vsel %vm277_vm2, %v16420_v36, %v3264_v0  ;;  %v16422_v15 = vrot.slane %v11838_v58, 7  ;;  %v3293_v63 = vmul.f32 %v3282_v39, %v9313_v16  ;;  %3428 = vst.msk [vmem:[#allocation2 + $0x8] sm:$0xff] %vm341_vm3, %v3414_v60  ;;  %v12069_v18 = vmul.f32 %v3239_v37, %v9172_v42  ;;  %v16424_v58 = vld [vmem:[#allocation6_spill] sm:$0xff] }
 0x743   :  { %3432 = vst.msk [vmem:[#allocation2 + $0x48] sm:$0xff] %vm341_vm3, %v3418_v29  ;;  %v3292_v27 = vmul.f32 %v3283_v3, %v9273_v35 }
 0x744   :  { %v3177_v14 = vsel %vm277_vm2, %v16422_v15, %v16421_v13  ;;  %16423 = vst [vmem:[#allocation21_spill] sm:$0xff] %v12069_v18  ;;  %3344 = vrot.lane.b32.xlu2 %v12069_v18, %s8946_s19  ;;  %v3393_v29 = vrot.slane %v12069_v18, 1  ;;  %v3445_v15 = vld [vmem:[#allocation2 + $0x18] sm:$0xff] }
 0x745   :  { %v3191_v5 = vadd.f32 %v3177_v14, %v3149_v34  ;;  %3431 = vst.msk [vmem:[#allocation2 + $0x38] sm:$0xff] %vm341_vm3, %v3417_v52  ;;  %3117 = vrot.lane.b32.xlu1 %v11786_v2, %s8946_s19 }
 0x746   :  { %3125 = vrot.lane.b32.xlu0 %v11871_v19, %s8946_s19  ;;  %3303 = vst.msk [vmem:[#allocation2 + $0x10] sm:$0xff] %vm341_vm3, %v3289_v41  ;;  %v3267_v19 = vrot.slane %v12069_v18, 7 }
 0x747   :  { %v3210_v0 = vadd.f32 %v11818_v25, %v3191_v5  ;;  %3307 = vst.msk [vmem:[#allocation2 + $0x50] sm:$0xff] %vm341_vm3, %v3293_v63  ;;  %v12127_v63 = vpop.f32.mrf.mxu3 }
 0x748   :  { %3306 = vst.msk [vmem:[#allocation2 + $0x40] sm:$0xff] %vm341_vm3, %v3292_v27 }
 0x749   :  { %v3224_v50 = vadd.f32 %v3210_v0, %v16424_v58  ;;  %v3443_v55 = vld [vmem:[#allocation2 + $0x8] sm:$0xff] }
 0x74a   :  { %8459 = vmatmul.msk.f32.vlgmr.msrb.gmra.mxu1 %vm341_vm3, %v3443_v55  ;;  %8473 = vmatmul.msk.f32.vlgmr.msrb.gmra.mxu0 %vm341_vm3, %v3443_v55  ;;  %v3451_v14 = vld [vmem:[#allocation2 + $0x48] sm:$0xff] }
 0x74b   :  { %v3238_v37 = vmax.f32 %v3224_v50, 0.0  ;;  %v8441_v50 = vld [vmem:[%s16151_s5 + $0x6f0] sm:$0xff] }
 0x74c   :  { %3561 = vmatpush.msra.mxu2 %v8441_v50 }
 0x74d   :  { %v12087_v12 = vmul.f32 %v3238_v37, %v9206_v56  ;;  %3336 = vrot.lane.b32.xlu1 %v11901_v45, %s8946_s19  ;;  %v8442_v37 = vld [vmem:[%s16151_s5 + $0x6f8] sm:$0xff] }
 0x74e   :  { %3679 = vmatpush.msrb.mxu3 %v8442_v37 }
 0x74f   :  { %16425 = vst [vmem:[#allocation20_spill] sm:$0xff] %v12087_v12  ;;  %v3266_v2 = vrot.slane %v12087_v12, 7  ;;  %v3392_v60 = vrot.slane %v12087_v12, 1  ;;  %v2988_v27 = vpop.f32.mrf.mxu3 }
 0x751   :  { %v3406_v33 = vsel %vm441_vm1, %v3392_v60, %v3393_v29  ;;  %v3407_v52 = vsel %vm441_vm1, %v3391_v51, %v3392_v60  ;;  %v3280_v34 = vsel %vm277_vm2, %v3266_v2, %v3267_v19  ;;  %v3281_v41 = vsel %vm277_vm2, %v3265_v9, %v3266_v2  ;;  %v3447_v51 = vld [vmem:[#allocation2 + $0x28] sm:$0xff]  ;;  %v3449_v9 = vld [vmem:[#allocation2 + $0x38] sm:$0xff]  ;;  %v8439_v2 = vld [vmem:[%s16151_s5 + $0x6e0] sm:$0xff] }
 0x752   :  { %v3419_v39 = vmul.f32 %v3407_v52, %v9307_v4  ;;  %v3420_v36 = vmul.f32 %v3406_v33, %v9357_v57  ;;  %v3295_v3 = vmul.f32 %v3280_v34, %v9368_v22  ;;  %v3294_v13 = vmul.f32 %v3281_v41, %v9373_v26  ;;  %8460 = vmatmul.msk.f32.gmra.mxu1 %vm341_vm3, %v3445_v15  ;;  %v8440_v60 = vld [vmem:[%s16151_s5 + $0x6e8] sm:$0xff]  ;;  %v8437_v52 = vld [vmem:[%s16151_s5 + $0x6d0] sm:$0xff]  ;;  %v8438_v34 = vld [vmem:[%s16151_s5 + $0x6d8] sm:$0xff] }
 0x753   :  { %8474 = vmatmul.msk.f32.gmra.mxu0 %vm341_vm3, %v3445_v15  ;;  %3562 = vmatpush.msra.mxu2 %v8439_v2  ;;  %v8434_v15 = vld [vmem:[%s16151_s5 + $0x6b8] sm:$0xff] }
 0x754   :  { %3433 = vst.msk [vmem:[#allocation2 + $0x58] sm:$0xff] %vm341_vm3, %v3419_v39  ;;  %3680 = vmatpush.msrb.mxu3 %v8440_v60  ;;  %v8435_v39 = vld [vmem:[%s16151_s5 + $0x6c0] sm:$0xff] }
 0x755   :  { %3434 = vst.msk [vmem:[#allocation2 + $0x68] sm:$0xff] %vm341_vm3, %v3420_v36  ;;  %3123 = vrot.lane.b32.xlu1 %v11836_v43, %s8946_s19  ;;  %v12129_v43 = vpop.f32.mrf.mxu0  ;;  %3563 = vmatpush.msra.mxu2 %v8437_v52  ;;  %v8436_v36 = vld [vmem:[%s16151_s5 + $0x6c8] sm:$0xff] }
 0x756   :  { %3309 = vst.msk [vmem:[#allocation2 + $0x70] sm:$0xff] %vm341_vm3, %v3295_v3  ;;  %3681 = vmatpush.msrb.mxu3 %v8438_v34  ;;  %v8425_v34 = vld [vmem:[%s16151_s5 + $0x670] sm:$0xff] }
 0x757   :  { %3308 = vst.msk [vmem:[#allocation2 + $0x60] sm:$0xff] %vm341_vm3, %v3294_v13  ;;  %v2991_v55 = vpop.f32.mrf.mxu3  ;;  %3564 = vmatpush.msra.mxu2 %v8435_v39  ;;  %v8433_v13 = vld [vmem:[%s16151_s5 + $0x6b0] sm:$0xff] }
 0x758   :  { %3682 = vmatpush.msrb.mxu3 %v8436_v36  ;;  %v8424_v36 = vld [vmem:[%s16151_s5 + $0x668] sm:$0xff] }
 0x759   :  { %3565 = vmatpush.msra.mxu2 %v8433_v13 }
 0x75a   :  { %8461 = vmatmul.msk.f32.gmra.mxu1 %vm341_vm3, %v3447_v51  ;;  %3683 = vmatpush.msrb.mxu3 %v8434_v15  ;;  %v8421_v15 = vld [vmem:[%s16151_s5 + $0x650] sm:$0xff] }
 0x75b   :  { %8475 = vmatmul.msk.f32.gmra.mxu0 %vm341_vm3, %v3447_v51  ;;  %v3453_v5 = vld [vmem:[#allocation2 + $0x58] sm:$0xff]  ;;  %v8431_v51 = vld [vmem:[%s16151_s5 + $0x6a0] sm:$0xff] }
 0x75c   :  { %v3455_v0 = vld [vmem:[#allocation2 + $0x68] sm:$0xff]  ;;  %3566 = vmatpush.msra.mxu2 %v8431_v51  ;;  %v8422_v51 = vld [vmem:[%s16151_s5 + $0x658] sm:$0xff] }
 0x75d   :  { %3342 = vrot.lane.b32.xlu1 %v12087_v12, %s8946_s19  ;;  %v3047_v58 = vpop.f32.mrf.mxu0 }
 0x75f   :  { %v12182_v50 = vpop.f32.mrf.mxu3 }
 0x762   :  { %8462 = vmatmul.msk.f32.gmra.mxu1 %vm341_vm3, %v3449_v9 }
 0x763   :  { %8476 = vmatmul.msk.f32.gmra.mxu0 %vm341_vm3, %v3449_v9  ;;  %v8432_v9 = vld [vmem:[%s16151_s5 + $0x6a8] sm:$0xff] }
 0x764   :  { %3684 = vmatpush.msrb.mxu3 %v8432_v9  ;;  %v8419_v9 = vld [vmem:[%s16151_s5 + $0x640] sm:$0xff] }
 0x765   :  { %v3050_v33 = vpop.f32.mrf.mxu0 }
 0x766   :  { %v12160_v3 = vadd.f32 %v3050_v33, %v2991_v55  ;;  %v8427_v55 = vld [vmem:[%s16151_s5 + $0x680] sm:$0xff] }
 0x768   :  { %v3168_v37 = vrot.slane %v12160_v3, 7 }
 0x76a   :  { %8463 = vmatmul.msk.f32.gmra.mxu1 %vm341_vm3, %v3451_v14 }
 0x76b   :  { %8477 = vmatmul.msk.f32.gmra.mxu0 %vm341_vm3, %v3451_v14  ;;  %v12174_v14 = vadd.f32 %v3047_v58, %v2988_v27  ;;  %v8428_v27 = vld [vmem:[%s16151_s5 + $0x688] sm:$0xff] }
 0x76d   :  { %v12191_v58 = vpop.f32.mrf.mxu0  ;;  %v3167_v2 = vrot.slane %v12174_v14, 7  ;;  %v8420_v14 = vld [vmem:[%s16151_s5 + $0x648] sm:$0xff] }
 0x76f   :  { %v3173_v52 = vsel %vm277_vm2, %v3167_v2, %v3168_v37 }
 0x772   :  { %8464 = vmatmul.msk.f32.gmra.mxu1 %vm341_vm3, %v3453_v5 }
 0x773   :  { %8478 = vmatmul.msk.f32.gmra.mxu0 %vm341_vm3, %v3453_v5  ;;  %v8429_v5 = vld [vmem:[%s16151_s5 + $0x690] sm:$0xff] }
 0x774   :  { %3567 = vmatpush.msra.mxu2 %v8429_v5  ;;  %v2997_v5 = vpop.f32.mrf.mxu3 }
 0x776   :  { %3568 = vmatpush.msra.mxu2 %v8427_v55 }
 0x778   :  { %3569 = vmatpush.msra.mxu2 %v8425_v34 }
 0x77a   :  { %8465 = vmatmul.msk.f32.gmra.mxu1 %vm341_vm3, %v3455_v0 }
 0x77b   :  { %8479 = vmatmul.msk.f32.gmra.mxu0 %vm341_vm3, %v3455_v0  ;;  %v8430_v0 = vld [vmem:[%s16151_s5 + $0x698] sm:$0xff] }
 0x77c   :  { %3685 = vmatpush.msrb.mxu3 %v8430_v0  ;;  %v16426_v0 = vld [vmem:[#allocation16_spill] sm:$0xff] }
 0x77e   :  { %3686 = vmatpush.msrb.mxu3 %v8428_v27 }
 0x786   :  { %v3335_v41 = vpop.permute.xlu2 %3334 }
 0x787   :  { %3374 = vst.msk [vmem:[#allocation2 + $0x20] sm:$0xff] %vm412_vm4, %v3335_v41  ;;  %v8426_v41 = vld [vmem:[%s16151_s5 + $0x678] sm:$0xff] }
 0x788   :  { %3687 = vmatpush.msrb.mxu3 %v8426_v41  ;;  %v3056_v41 = vpop.f32.mrf.mxu0 }
 0x78a   :  { %3688 = vmatpush.msrb.mxu3 %v8424_v36  ;;  %v12240_v36 = vadd.f32 %v12129_v43, %v12127_v63  ;;  %v8413_v63 = vld [vmem:[%s16151_s5 + $0x610] sm:$0xff]  ;;  %v8414_v43 = vld [vmem:[%s16151_s5 + $0x618] sm:$0xff] }
 0x78c   :  { %3689 = vmatpush.msrb.mxu3 %v8422_v51 }
 0x78e   :  { %v3122_v60 = vpop.permute.xlu2 %3121  ;;  %3690 = vmatpush.msrb.mxu3 %v8420_v14 }
 0x78f   :  { %v3153_v33 = vadd.f32 %v3122_v60, %v11822_v49  ;;  %v8423_v49 = vld [vmem:[%s16151_s5 + $0x660] sm:$0xff] }
 0x790   :  { %3570 = vmatpush.msra.mxu2 %v8423_v49 }
 0x791   :  { %v3195_v39 = vadd.f32 %v3173_v52, %v3153_v33  ;;  %v8417_v33 = vld [vmem:[%s16151_s5 + $0x630] sm:$0xff]  ;;  %v8418_v52 = vld [vmem:[%s16151_s5 + $0x638] sm:$0xff] }
 0x792   :  { %3571 = vmatpush.msra.mxu2 %v8421_v15  ;;  %3691 = vmatpush.msrb.mxu3 %v8418_v52  ;;  %v8416_v15 = vld [vmem:[%s16151_s5 + $0x628] sm:$0xff] }
 0x793   :  { %v3214_v13 = vadd.f32 %v11818_v25, %v3195_v39  ;;  %v12233_v39 = vadd.f32 %v3056_v41, %v2997_v5 }
 0x794   :  { %3572 = vmatpush.msra.mxu2 %v8419_v9  ;;  %3692 = vmatpush.msrb.mxu3 %v8416_v15  ;;  %v3166_v9 = vrot.slane %v12240_v36, 7  ;;  %v16429_v15 = vld [vmem:[#allocation14_spill] sm:$0xff] }
 0x795   :  { %v3228_v55 = vadd.f32 %v3214_v13, %v16426_v0  ;;  %v8415_v13 = vld [vmem:[%s16151_s5 + $0x620] sm:$0xff]  ;;  %v3170_v51 = vrot.slane %v12233_v39, 7 }
 0x796   :  { %v3333_v27 = vpop.permute.xlu0 %3332  ;;  %v3341_v60 = vpop.permute.xlu2 %3340  ;;  %3573 = vmatpush.msra.mxu2 %v8417_v33  ;;  %3693 = vmatpush.msrb.mxu3 %v8414_v43  ;;  %v3174_v33 = vsel %vm277_vm2, %v3166_v9, %v3167_v2  ;;  %v16430_v43 = vld [vmem:[#allocation15_spill] sm:$0xff] }
 0x797   :  { %v3242_v34 = vmax.f32 %v3228_v55, 0.0  ;;  %3373 = vst.msk [vmem:[#allocation2 + $0x10] sm:$0xff] %vm412_vm4, %v3333_v27  ;;  %v8411_v27 = vld [vmem:[%s16151_s5 + $0x600] sm:$0xff] }
 0x798   :  { %3377 = vst.msk [vmem:[#allocation2 + $0x50] sm:$0xff] %vm412_vm4, %v3341_v60  ;;  %3574 = vmatpush.msra.mxu2 %v8415_v13  ;;  %v8412_v60 = vld [vmem:[%s16151_s5 + $0x608] sm:$0xff] }
 0x799   :  { %v12236_v49 = vmul.f32 %v3242_v34, %v9225_v7  ;;  %3694 = vmatpush.msrb.mxu3 %v8412_v60 }
 0x79a   :  { %3575 = vmatpush.msra.mxu2 %v8413_v63 }
 0x79b   :  { %16427 = vst [vmem:[#allocation18_spill] sm:$0xff] %v12236_v49  ;;  %3350 = vrot.lane.b32.xlu2 %v12236_v49, %s8946_s19 }
 0x79c   :  { %3576 = vmatpush.msra.mxu2 %v8411_v27 }
 0x79e   :  { %v3120_v14 = vpop.permute.xlu0 %3119  ;;  %v3345_v5 = vpop.permute.xlu2 %3344 }
 0x79f   :  { %v3152_v0 = vadd.f32 %v3120_v14, %v11802_v21  ;;  %3379 = vst.msk [vmem:[#allocation2 + $0x70] sm:$0xff] %vm412_vm4, %v3345_v5  ;;  %v3128_v55 = vpop.permute.xlu1 %3127  ;;  %v16428_v21 = vrot.slane %v11898_v46, 7  ;;  %v3270_v46 = vrot.slane %v12236_v49, 7 }
 0x7a0   :  { %v3156_v52 = vadd.f32 %v3128_v55, %v11997_v24  ;;  %v3396_v55 = vrot.slane %v12236_v49, 1 }
 0x7a1   :  { %v3194_v34 = vadd.f32 %v3174_v33, %v3152_v0  ;;  %v3184_v41 = vsel %vm277_vm2, %v3170_v51, %v16428_v21 }
 0x7a2   :  { %v3198_v39 = vadd.f32 %v3184_v41, %v3156_v52 }
 0x7a3   :  { %v3213_v36 = vadd.f32 %v11818_v25, %v3194_v34 }
 0x7a4   :  { %v3217_v13 = vadd.f32 %v11818_v25, %v3198_v39 }
 0x7a5   :  { %v3227_v63 = vadd.f32 %v3213_v36, %v16429_v15 }
 0x7a6   :  { %v3231_v14 = vadd.f32 %v3217_v13, %v16430_v43 }
 0x7a7   :  { %v3241_v2 = vmax.f32 %v3227_v63, 0.0 }
 0x7a8   :  { %v3245_v5 = vmax.f32 %v3231_v14, 0.0 }
 0x7a9   :  { %v12278_v24 = vmul.f32 %v3241_v2, %v9204_v53 }
 0x7aa   :  { %v12281_v0 = vmul.f32 %v3245_v5, %v9206_v56 }
 0x7ab   :  { %16431 = vst [vmem:[#allocation8_spill] sm:$0xff] %v12278_v24  ;;  %v3269_v27 = vrot.slane %v12278_v24, 7  ;;  %v3395_v60 = vrot.slane %v12278_v24, 1  ;;  %3348 = vrot.lane.b32.xlu1 %v12278_v24, %s8946_s19 }
 0x7ac   :  { %16432 = vst [vmem:[#allocation19_spill] sm:$0xff] %v12281_v0  ;;  %3356 = vrot.lane.b32.xlu2 %v12281_v0, %s8946_s19  ;;  %v3273_v33 = vrot.slane %v12281_v0, 7  ;;  %v3399_v52 = vrot.slane %v12281_v0, 1 }
 0x7ad   :  { %v3403_v34 = vsel %vm441_vm1, %v3395_v60, %v3396_v55  ;;  %v3277_v21 = vsel %vm277_vm2, %v3269_v27, %v3270_v46 }
 0x7ae   :  { %v3423_v41 = vmul.f32 %v3403_v34, %v9163_v38  ;;  %v3413_v36 = vsel %vm441_vm1, %v3399_v52, %v3386_v20  ;;  %v3287_v13 = vsel %vm277_vm2, %v3273_v33, %v3260_v23  ;;  %v3298_v14 = vmul.f32 %v3277_v21, %v9229_v11  ;;  %v16433_v21 = vld [vmem:[#allocation13_spill] sm:$0xff] }
 0x7af   :  { %v3427_v15 = vmul.f32 %v3413_v36, %v9357_v57  ;;  %v3331_v63 = vpop.permute.xlu1 %3330  ;;  %v3288_v43 = vmul.f32 %v3287_v13, %v9368_v22  ;;  %v3054_v20 = vadd.f32 %v12191_v58, %v12182_v50  ;;  %v16434_v13 = vrot.slane %v11920_v30, 7 }
 0x7b0   :  { %v3339_v39 = vpop.permute.xlu0 %3338  ;;  %3437 = vst.msk [vmem:[#allocation2 + $0x98] sm:$0xff] %vm341_vm3, %v3423_v41 }
 0x7b1   :  { %3376 = vst.msk [vmem:[#allocation2 + $0x40] sm:$0xff] %vm412_vm4, %v3339_v39  ;;  %v3169_v23 = vrot.slane %v3054_v20, 7  ;;  %v3175_v50 = vsel %vm277_vm2, %v16434_v13, %v3166_v9  ;;  %v16436_v20 = vld [vmem:[#allocation5_spill] sm:$0xff] }
 0x7b2   :  { %3441 = vst.msk [vmem:[#allocation2 + $0xd8] sm:$0xff] %vm341_vm3, %v3427_v15  ;;  %v3444_v9 = vld [vmem:[#allocation2 + $0x10] sm:$0xff] }
 0x7b3   :  { %3302 = vst.msk [vmem:[#allocation2] sm:$0xff] %vm341_vm3, %v3288_v43  ;;  %v3171_v41 = vsel %vm277_vm2, %v3169_v23, %v3170_v51  ;;  %v16435_v43 = vld [vmem:[#allocation4_spill] sm:$0xff] }
 0x7b4   :  { %3372 = vst.msk [vmem:[#allocation2] sm:$0xff] %vm412_vm4, %v3331_v63 }
 0x7b5   :  { %3312 = vst.msk [vmem:[#allocation2 + $0xa0] sm:$0xff] %vm341_vm3, %v3298_v14 }
 0x7b7   :  { %v3118_v34 = vpop.permute.xlu1 %3117 }
 0x7b8   :  { %v3126_v2 = vpop.permute.xlu0 %3125  ;;  %v3151_v39 = vadd.f32 %v3118_v34, %v16433_v21 }
 0x7b9   :  { %v3155_v5 = vadd.f32 %v3126_v2, %v11907_v61 }
 0x7ba   :  { %v3193_v58 = vadd.f32 %v3175_v50, %v3151_v39 }
 0x7bb   :  { %v3197_v36 = vadd.f32 %v3171_v41, %v3155_v5  ;;  %v3442_v15 = vld [vmem:[#allocation2] sm:$0xff] }
 0x7bc   :  { %3577 = vmatmul.f32.vlgmr.msra.gmra.mxu2 %v3442_v15  ;;  %3695 = vmatmul.f32.vlgmr.msrb.gmra.mxu3 %v3442_v15  ;;  %v3212_v61 = vadd.f32 %v11818_v25, %v3193_v58 }
 0x7bd   :  { %v3216_v63 = vadd.f32 %v11818_v25, %v3197_v36 }
 0x7be   :  { %v3226_v51 = vadd.f32 %v3212_v61, %v16436_v20 }
 0x7bf   :  { %v3230_v14 = vadd.f32 %v3216_v63, %v16435_v43  ;;  %v3337_v34 = vpop.permute.xlu1 %3336 }
 0x7c0   :  { %v3240_v5 = vmax.f32 %v3226_v51, 0.0  ;;  %3375 = vst.msk [vmem:[#allocation2 + $0x30] sm:$0xff] %vm412_vm4, %v3337_v34 }
 0x7c1   :  { %v3244_v2 = vmax.f32 %v3230_v14, 0.0 }
 0x7c2   :  { %v12340_v41 = vmul.f32 %v3240_v5, %v9186_v47  ;;  %v3446_v5 = vld [vmem:[#allocation2 + $0x20] sm:$0xff] }
 0x7c3   :  { %v12337_v30 = vmul.f32 %v3244_v2, %v9227_v8  ;;  %v3172_v2 = vsel %vm277_vm2, %v3168_v37, %v3169_v23 }
 0x7c4   :  { %16438 = vst [vmem:[#allocation10_spill] sm:$0xff] %v12340_v41  ;;  %3580 = vmatmul.f32.gmra.mxu2 %v3444_v9  ;;  %3698 = vmatmul.f32.gmra.mxu3 %v3444_v9  ;;  %v3268_v36 = vrot.slane %v12340_v41, 7  ;;  %v3394_v13 = vrot.slane %v12340_v41, 1 }
 0x7c5   :  { %16437 = vst [vmem:[#allocation12_spill] sm:$0xff] %v12337_v30  ;;  %v3272_v21 = vrot.slane %v12337_v30, 7  ;;  %v3398_v39 = vrot.slane %v12337_v30, 1  ;;  %3354 = vrot.lane.b32.xlu1 %v12337_v30, %s8946_s19  ;;  %3346 = vrot.lane.b32.xlu0 %v12340_v41, %s8946_s19 }
 0x7c6   :  { %v3404_v63 = vsel %vm441_vm1, %v3394_v13, %v3395_v60  ;;  %v3405_v61 = vsel %vm441_vm1, %v3393_v29, %v3394_v13  ;;  %v3279_v60 = vsel %vm277_vm2, %v3267_v19, %v3268_v36  ;;  %v16439_v19 = vld [vmem:[#allocation7_spill] sm:$0xff] }
 0x7c7   :  { %v3400_v50 = vsel %vm441_vm1, %v3398_v39, %v3399_v52  ;;  %v3274_v58 = vsel %vm277_vm2, %v3272_v21, %v3273_v33  ;;  %v3421_v14 = vmul.f32 %v3405_v61, %v9617_v31  ;;  %v3422_v20 = vmul.f32 %v3404_v63, %v9633_v28  ;;  %v3124_v52 = vpop.permute.xlu1 %3123 }
 0x7c8   :  { %v3426_v15 = vmul.f32 %v3400_v50, %v9307_v4  ;;  %v3301_v43 = vmul.f32 %v3274_v58, %v9373_v26  ;;  %v3278_v33 = vsel %vm277_vm2, %v3268_v36, %v3269_v27  ;;  %v3154_v29 = vadd.f32 %v3124_v52, %v11848_v1  ;;  %v3448_v36 = vld [vmem:[#allocation2 + $0x30] sm:$0xff] }
 0x7c9   :  { %v3297_v51 = vmul.f32 %v3278_v33, %v9210_v59  ;;  %3435 = vst.msk [vmem:[#allocation2 + $0x78] sm:$0xff] %vm341_vm3, %v3421_v14  ;;  %v3296_v27 = vmul.f32 %v3279_v60, %v9188_v48 }
 0x7ca   :  { %3440 = vst.msk [vmem:[#allocation2 + $0xc8] sm:$0xff] %vm341_vm3, %v3426_v15  ;;  %v3196_v34 = vadd.f32 %v3172_v2, %v3154_v29 }
 0x7cb   :  { %3436 = vst.msk [vmem:[#allocation2 + $0x88] sm:$0xff] %vm341_vm3, %v3422_v20 }
 0x7cc   :  { %3583 = vmatmul.f32.gmra.mxu2 %v3446_v5  ;;  %3315 = vst.msk [vmem:[#allocation2 + $0xd0] sm:$0xff] %vm341_vm3, %v3301_v43  ;;  %v3215_v1 = vadd.f32 %v11818_v25, %v3196_v34  ;;  %3701 = vmatmul.f32.gmra.mxu3 %v3446_v5  ;;  %v3469_v34 = vld [vmem:[#allocation2 + $0xd8] sm:$0xff] }
 0x7cd   :  { %3311 = vst.msk [vmem:[#allocation2 + $0x90] sm:$0xff] %vm341_vm3, %v3297_v51  ;;  %v3456_v51 = vld [vmem:[#allocation2 + $0x70] sm:$0xff] }
 0x7ce   :  { %3310 = vst.msk [vmem:[#allocation2 + $0x80] sm:$0xff] %vm341_vm3, %v3296_v27  ;;  %v3229_v3 = vadd.f32 %v3215_v1, %v16439_v19  ;;  %v3637_v19 = vpop.f32.mrf.mxu1 }
 0x7cf   :  { %v3343_v9 = vpop.permute.xlu1 %3342 }
 0x7d0   :  { %v3243_v37 = vmax.f32 %v3229_v3, 0.0  ;;  %3378 = vst.msk [vmem:[#allocation2 + $0x60] sm:$0xff] %vm412_vm4, %v3343_v9  ;;  %v3457_v23 = vld [vmem:[#allocation2 + $0x78] sm:$0xff] }
 0x7d1   :  { %8466 = vmatmul.msk.f32.gmra.mxu1 %vm341_vm3, %v3457_v23  ;;  %8480 = vmatmul.msk.f32.gmra.mxu0 %vm341_vm3, %v3457_v23  ;;  %v3467_v27 = vld [vmem:[#allocation2 + $0xc8] sm:$0xff] }
 0x7d2   :  { %v12391_v13 = vmul.f32 %v3243_v37, %v16384_v10 }
 0x7d4   :  { %16440 = vst [vmem:[#allocation6_spill] sm:$0xff] %v12391_v13  ;;  %3586 = vmatmul.f32.gmra.mxu2 %v3448_v36  ;;  %3704 = vmatmul.f32.gmra.mxu3 %v3448_v36  ;;  %v3271_v25 = vrot.slane %v12391_v13, 7  ;;  %v3397_v50 = vrot.slane %v12391_v13, 1 }
 0x7d5   :  { %3352 = vrot.lane.b32.xlu0 %v12391_v13, %s8946_s19 }
 0x7d6   :  { %v3401_v58 = vsel %vm441_vm1, %v3397_v50, %v3398_v39  ;;  %v3402_v15 = vsel %vm441_vm1, %v3396_v55, %v3397_v50  ;;  %v3275_v63 = vsel %vm277_vm2, %v3271_v25, %v3272_v21  ;;  %v3276_v61 = vsel %vm277_vm2, %v3270_v46, %v3271_v25  ;;  %v3459_v39 = vld [vmem:[#allocation2 + $0x88] sm:$0xff]  ;;  %v3450_v55 = vld [vmem:[#allocation2 + $0x40] sm:$0xff]  ;;  %v3461_v46 = vld [vmem:[#allocation2 + $0x98] sm:$0xff]  ;;  %v3640_v37 = vpop.f32.mrf.mxu1 }
 0x7d7   :  { %v3424_v43 = vmul.f32 %v3402_v15, %v9167_v40  ;;  %v3425_v14 = vmul.f32 %v3401_v58, %v9265_v32  ;;  %v3300_v20 = vmul.f32 %v3275_v63, %v9313_v16  ;;  %v3299_v52 = vmul.f32 %v3276_v61, %v9273_v35  ;;  %v3452_v21 = vld [vmem:[#allocation2 + $0x50] sm:$0xff]  ;;  %v3454_v60 = vld [vmem:[#allocation2 + $0x60] sm:$0xff] }
 0x7d9   :  { %3438 = vst.msk [vmem:[#allocation2 + $0xa8] sm:$0xff] %vm341_vm3, %v3424_v43  ;;  %8467 = vmatmul.msk.f32.gmra.mxu1 %vm341_vm3, %v3459_v39  ;;  %8481 = vmatmul.msk.f32.gmra.mxu0 %vm341_vm3, %v3459_v39 }
 0x7da   :  { %3439 = vst.msk [vmem:[#allocation2 + $0xb8] sm:$0xff] %vm341_vm3, %v3425_v14 }
 0x7db   :  { %3314 = vst.msk [vmem:[#allocation2 + $0xc0] sm:$0xff] %vm341_vm3, %v3300_v20 }
 0x7dc   :  { %3589 = vmatmul.f32.gmra.mxu2 %v3450_v55  ;;  %3707 = vmatmul.f32.gmra.mxu3 %v3450_v55  ;;  %3313 = vst.msk [vmem:[#allocation2 + $0xb0] sm:$0xff] %vm341_vm3, %v3299_v52 }
 0x7de   :  { %v3643_v50 = vpop.f32.mrf.mxu1 }
 0x7e0   :  { %v3463_v33 = vld [vmem:[#allocation2 + $0xa8] sm:$0xff] }
 0x7e1   :  { %8468 = vmatmul.msk.f32.gmra.mxu1 %vm341_vm3, %v3461_v46  ;;  %8482 = vmatmul.msk.f32.gmra.mxu0 %vm341_vm3, %v3461_v46  ;;  %v3465_v29 = vld [vmem:[#allocation2 + $0xb8] sm:$0xff] }
 0x7e4   :  { %3592 = vmatmul.f32.gmra.mxu2 %v3452_v21  ;;  %3710 = vmatmul.f32.gmra.mxu3 %v3452_v21 }
 0x7e6   :  { %v3646_v46 = vpop.f32.mrf.mxu1 }
 0x7e9   :  { %8469 = vmatmul.msk.f32.gmra.mxu1 %vm341_vm3, %v3463_v33  ;;  %8483 = vmatmul.msk.f32.gmra.mxu0 %vm341_vm3, %v3463_v33 }
 0x7ec   :  { %3595 = vmatmul.f32.gmra.mxu2 %v3454_v60  ;;  %3713 = vmatmul.f32.gmra.mxu3 %v3454_v60 }
 0x7f1   :  { %8470 = vmatmul.msk.f32.gmra.mxu1 %vm341_vm3, %v3465_v29  ;;  %8484 = vmatmul.msk.f32.gmra.mxu0 %vm341_vm3, %v3465_v29 }
 0x7f4   :  { %3598 = vmatmul.f32.gmra.mxu2 %v3456_v51  ;;  %3716 = vmatmul.f32.gmra.mxu3 %v3456_v51 }
 0x7f5   :  { %v3351_v2 = vpop.permute.xlu2 %3350 }
 0x7f6   :  { %3382 = vst.msk [vmem:[#allocation2 + $0xa0] sm:$0xff] %vm412_vm4, %v3351_v2 }
 0x7f9   :  { %8471 = vmatmul.msk.f32.gmra.mxu1 %vm341_vm3, %v3467_v27  ;;  %8485 = vmatmul.msk.f32.gmra.mxu0 %vm341_vm3, %v3467_v27  ;;  %v3649_v27 = vpop.f32.mrf.mxu1 }
 0x7fd   :  { %v3462_v52 = vld [vmem:[#allocation2 + $0xa0] sm:$0xff] }
 0x801   :  { %8472 = vmatmul.msk.f32.gmra.mxu1 %vm341_vm3, %v3469_v34  ;;  %8486 = vmatmul.msk.f32.gmra.mxu0 %vm341_vm3, %v3469_v34 }
 0x806   :  { %v3357_v5 = vpop.permute.xlu2 %3356 }
 0x807   :  { %3385 = vst.msk [vmem:[#allocation2 + $0xd0] sm:$0xff] %vm412_vm4, %v3357_v5 }
 0x81d   :  { %v3349_v1 = vpop.permute.xlu1 %3348 }
 0x81e   :  { %3381 = vst.msk [vmem:[#allocation2 + $0x90] sm:$0xff] %vm412_vm4, %v3349_v1 }
 0x825   :  { %v3460_v63 = vld [vmem:[#allocation2 + $0x90] sm:$0xff] }
 0x837   :  { %v3355_v3 = vpop.permute.xlu1 %3354  ;;  %v3347_v9 = vpop.permute.xlu0 %3346 }
 0x838   :  { %3384 = vst.msk [vmem:[#allocation2 + $0xc0] sm:$0xff] %vm412_vm4, %v3355_v3 }
 0x839   :  { %3380 = vst.msk [vmem:[#allocation2 + $0x80] sm:$0xff] %vm412_vm4, %v3347_v9 }
 0x83f   :  { %v3578_v23 = vpop.f32.mrf.mxu2  ;;  %v3466_v1 = vld [vmem:[#allocation2 + $0xc0] sm:$0xff] }
 0x840   :  { %v3458_v36 = vld [vmem:[#allocation2 + $0x80] sm:$0xff]  ;;  %v12434_v25 = vadd.f32 %v3637_v19, %v3578_v23 }
 0x841   :  { %3601 = vmatmul.f32.gmra.mxu2 %v3458_v36  ;;  %3719 = vmatmul.f32.gmra.mxu3 %v3458_v36  ;;  %v3468_v36 = vld [vmem:[#allocation2 + $0xd0] sm:$0xff] }
 0x842   :  { %3839 = vrot.lane.b32.xlu0 %v12434_v25, %s8946_s19  ;;  %v16232_v43 = vrot.slane %v12434_v25, 1 }
 0x847   :  { %v3353_v58 = vpop.permute.xlu0 %3352  ;;  %v3581_v15 = vpop.f32.mrf.mxu2 }
 0x848   :  { %3383 = vst.msk [vmem:[#allocation2 + $0xb0] sm:$0xff] %vm412_vm4, %v3353_v58  ;;  %v3641_v61 = vadd.f32 %v3640_v37, %v3581_v15  ;;  %v3652_v37 = vpop.f32.mrf.mxu1 }
 0x849   :  { %3604 = vmatmul.f32.gmra.mxu2 %v3460_v63  ;;  %3722 = vmatmul.f32.gmra.mxu3 %v3460_v63 }
 0x84a   :  { %v3798_v14 = vrot.slane %v3641_v61, 1  ;;  %3841 = vrot.lane.b32.xlu1 %v3641_v61, %s8946_s19 }
 0x84c   :  { %v12445_v20 = vsel %vm441_vm1, %v16232_v43, %v3798_v14 }
 0x84f   :  { %v3584_v39 = vpop.f32.mrf.mxu2  ;;  %v3464_v29 = vld [vmem:[#allocation2 + $0xb0] sm:$0xff] }
 0x850   :  { %v3644_v55 = vadd.f32 %v3643_v50, %v3584_v39  ;;  %v3655_v63 = vpop.f32.mrf.mxu1 }
 0x851   :  { %3607 = vmatmul.f32.gmra.mxu2 %v3462_v52  ;;  %3725 = vmatmul.f32.gmra.mxu3 %v3462_v52 }
 0x852   :  { %v3799_v21 = vrot.slane %v3644_v55, 1  ;;  %3843 = vrot.lane.b32.xlu2 %v3644_v55, %s8946_s19 }
 0x854   :  { %v3822_v33 = vsel %vm441_vm1, %v3798_v14, %v3799_v21 }
 0x857   :  { %v3587_v60 = vpop.f32.mrf.mxu2 }
 0x858   :  { %v3647_v51 = vadd.f32 %v3646_v46, %v3587_v60  ;;  %v3658_v55 = vpop.f32.mrf.mxu1  ;;  %v12480_v60 = vpop.f32.mrf.mxu3 }
 0x859   :  { %3610 = vmatmul.f32.gmra.mxu2 %v3464_v29  ;;  %3728 = vmatmul.f32.gmra.mxu3 %v3464_v29  ;;  %v12482_v29 = vpop.f32.mrf.mxu0 }
 0x85a   :  { %v3800_v2 = vrot.slane %v3647_v51, 1  ;;  %3845 = vrot.lane.b32.xlu0 %v3647_v51, %s8946_s19 }
 0x85c   :  { %v12453_v34 = vsel %vm441_vm1, %v3799_v21, %v3800_v2 }
 0x85f   :  { %v3590_v5 = vpop.f32.mrf.mxu2 }
 0x860   :  { %v3650_v19 = vadd.f32 %v3649_v27, %v3590_v5  ;;  %v3699_v51 = vpop.f32.mrf.mxu3 }
 0x861   :  { %3613 = vmatmul.f32.gmra.mxu2 %v3466_v1  ;;  %3731 = vmatmul.f32.gmra.mxu3 %v3466_v1 }
 0x862   :  { %v3801_v3 = vrot.slane %v3650_v19, 1  ;;  %3847 = vrot.lane.b32.xlu1 %v3650_v19, %s8946_s19 }
 0x864   :  { %v12458_v9 = vsel %vm441_vm1, %v3800_v2, %v3801_v3  ;;  %v3758_v2 = vpop.f32.mrf.mxu0 }
 0x867   :  { %v3593_v23 = vpop.f32.mrf.mxu2 }
 0x868   :  { %v3653_v50 = vadd.f32 %v3652_v37, %v3593_v23  ;;  %v3702_v27 = vpop.f32.mrf.mxu3 }
 0x869   :  { %3616 = vmatmul.f32.gmra.mxu2 %v3468_v36  ;;  %3734 = vmatmul.f32.gmra.mxu3 %v3468_v36 }
 0x86a   :  { %v3802_v58 = vrot.slane %v3653_v50, 1  ;;  %3849 = vrot.lane.b32.xlu0 %v3653_v50, %s8946_s19 }
 0x86c   :  { %v12463_v15 = vsel %vm441_vm1, %v3801_v3, %v3802_v58  ;;  %v3761_v5 = vpop.f32.mrf.mxu0 }
 0x86d   :  { %v3762_v37 = vadd.f32 %v3761_v5, %v3702_v27  ;;  %v12497_v27 = vadd.f32 %v3758_v2, %v3699_v51  ;;  %v12499_v5 = vpop.f32.mrf.mxu1 }
 0x86f   :  { %v3596_v61 = vpop.f32.mrf.mxu2  ;;  %v3897_v36 = vrot.slane %v3762_v37, 7 }
 0x870   :  { %v12465_v14 = vadd.f32 %v3655_v63, %v3596_v61  ;;  %v3705_v1 = vpop.f32.mrf.mxu3 }
 0x872   :  { %v16233_v39 = vrot.slane %v12465_v14, 1  ;;  %3851 = vrot.lane.b32.xlu1 %v12465_v14, %s8946_s19 }
 0x874   :  { %v12474_v52 = vsel %vm441_vm1, %v3802_v58, %v16233_v39  ;;  %v3764_v19 = vpop.f32.mrf.mxu0  ;;  %v12487_v58 = vld [vmem:[%s16149_s6 + $0x5] ss:$0 sm:$0xff] }
 0x875   :  { %v3765_v3 = vadd.f32 %v3764_v19, %v3705_v1  ;;  %v16236_v1 = vrot.slane %v12497_v27, 7 }
 0x877   :  { %v3599_v46 = vpop.f32.mrf.mxu2  ;;  %v3898_v23 = vrot.slane %v3765_v3, 7 }
 0x878   :  { %v12476_v21 = vadd.f32 %v3658_v55, %v3599_v46  ;;  %v3708_v19 = vpop.f32.mrf.mxu3 }
 0x879   :  { %v3919_v61 = vsel %vm277_vm2, %v3897_v36, %v3898_v23 }
 0x87a   :  { %3853 = vrot.lane.b32.xlu0 %v12476_v21, %s8946_s19 }
 0x87c   :  { %v3767_v37 = vpop.f32.mrf.mxu0 }
 0x87d   :  { %v3768_v13 = vadd.f32 %v3767_v37, %v3708_v19 }
 0x87f   :  { %v3899_v37 = vrot.slane %v3768_v13, 7 }
 0x8ac   :  { %v3844_v50 = vpop.permute.xlu2 %3843 }
 0x8ad   :  { %v3883_v63 = vadd.f32 %v3844_v50, %v3822_v33 }
 0x8af   :  { %v3925_v55 = vadd.f32 %v3919_v61, %v3883_v63  ;;  %v3664_v61 = vpop.f32.mrf.mxu1 }
 0x8b1   :  { %v3944_v46 = vadd.f32 %v12487_v58, %v3925_v55 }
 0x8b3   :  { %v3958_v43 = vmax.f32 %v3944_v46, 0.0 }
 0x8b4   :  { %v12510_v55 = vpop.permute.xlu0 %3839 }
 0x8b5   :  { %v12493_v39 = vmul.f32 %v3958_v43, %v9204_v53  ;;  %v3920_v43 = vsel %vm277_vm2, %v16236_v1, %v3897_v36 }
 0x8b7   :  { %4058 = vrot.lane.b32.xlu0 %v12493_v39, %s8946_s19  ;;  %v4112_v41 = vrot.slane %v12493_v39, 1  ;;  %v3667_v49 = vpop.f32.mrf.mxu1 }
 0x8bc   :  { %v3842_v33 = vpop.permute.xlu1 %3841 }
 0x8bd   :  { %v3882_v3 = vadd.f32 %v3842_v33, %v12445_v20  ;;  %v3711_v20 = vpop.f32.mrf.mxu3  ;;  %v3986_v33 = vrot.slane %v12493_v39, 7 }
 0x8bf   :  { %v3924_v50 = vadd.f32 %v3920_v43, %v3882_v3  ;;  %v3770_v43 = vpop.f32.mrf.mxu0 }
 0x8c1   :  { %v3943_v63 = vadd.f32 %v12487_v58, %v3924_v50 }
 0x8c3   :  { %v3957_v51 = vmax.f32 %v3943_v63, 0.0 }
 0x8c4   :  { %v12508_v2 = vpop.f32.mrf.mxu2 }
 0x8c5   :  { %v12513_v46 = vmul.f32 %v3957_v51, %v9186_v47 }
 0x8c7   :  { %v16241_v36 = vrot.slane %v12513_v46, 7  ;;  %v16240_v3 = vrot.slane %v12513_v46, 1  ;;  %4056 = vrot.lane.b32.xlu1 %v12513_v46, %s8946_s19 }
 0x8c9   :  { %v4135_v50 = vsel %vm441_vm1, %v16240_v3, %v4112_v41  ;;  %v4009_v19 = vsel %vm277_vm2, %v16241_v36, %v3986_v33  ;;  %v3771_v3 = vadd.f32 %v3770_v43, %v3711_v20  ;;  %v3918_v36 = vsel %vm277_vm2, %v3898_v23, %v3899_v37 }
 0x8ca   :  { %v4139_v39 = vmul.f32 %v4135_v50, %v9633_v28  ;;  %v4014_v63 = vmul.f32 %v4009_v19, %v9210_v59  ;;  %v3714_v50 = vpop.f32.mrf.mxu3 }
 0x8cc   :  { %v3605_v51 = vpop.f32.mrf.mxu2  ;;  %4153 = vst.msk [vmem:[#allocation2 + $0x18] sm:$0xff] %vm341_vm3, %v4139_v39  ;;  %v3846_v0 = vpop.permute.xlu0 %3845 }
 0x8cd   :  { %v12532_v1 = vadd.f32 %v3664_v61, %v3605_v51  ;;  %v3884_v30 = vadd.f32 %v3846_v0, %v12453_v34  ;;  %4028 = vst.msk [vmem:[#allocation2 + $0x20] sm:$0xff] %vm341_vm3, %v4014_v63  ;;  %v3773_v39 = vpop.f32.mrf.mxu0  ;;  %v3900_v61 = vrot.slane %v3771_v3, 7  ;;  %v3670_v3 = vpop.f32.mrf.mxu1 }
 0x8ce   :  { %v12545_v20 = vadd.f32 %v3773_v39, %v3714_v50 }
 0x8cf   :  { %v3926_v13 = vadd.f32 %v3918_v36, %v3884_v30  ;;  %3857 = vrot.lane.b32.xlu1 %v12532_v1, %s8946_s19  ;;  %v16245_v30 = vrot.slane %v12532_v1, 1  ;;  %v3917_v36 = vsel %vm277_vm2, %v3899_v37, %v3900_v61 }
 0x8d1   :  { %v3945_v19 = vadd.f32 %v12487_v58, %v3926_v13 }
 0x8d3   :  { %v3959_v51 = vmax.f32 %v3945_v19, 0.0 }
 0x8d4   :  { %v3608_v24 = vpop.f32.mrf.mxu2  ;;  %v3848_v18 = vpop.permute.xlu1 %3847 }
 0x8d5   :  { %v3668_v17 = vadd.f32 %v3667_v49, %v3608_v24  ;;  %v3885_v0 = vadd.f32 %v3848_v18, %v12458_v9  ;;  %v12543_v34 = vmul.f32 %v3959_v51, %v9225_v7  ;;  %v8534_v49 = vld [vmem:[%s16151_s5 + $0x8f0] sm:$0xff]  ;;  %v8535_v18 = vld [vmem:[%s16151_s5 + $0x8f8] sm:$0xff]  ;;  %v8532_v24 = vld [vmem:[%s16151_s5 + $0x8e0] sm:$0xff]  ;;  %v3776_v39 = vpop.f32.mrf.mxu0  ;;  %v3901_v51 = vrot.slane %v12545_v20, 7 }
 0x8d6   :  { %4352 = vmatpush.msra.mxu1 %v8534_v49  ;;  %4470 = vmatpush.msra.mxu0 %v8535_v18  ;;  %v3717_v49 = vpop.f32.mrf.mxu3 }
 0x8d7   :  { %v3807_v23 = vrot.slane %v3668_v17, 1  ;;  %3859 = vrot.lane.b32.xlu0 %v3668_v17, %s8946_s19  ;;  %v3927_v43 = vadd.f32 %v3917_v36, %v3885_v0  ;;  %v3987_v9 = vrot.slane %v12543_v34, 7  ;;  %v4113_v37 = vrot.slane %v12543_v34, 1  ;;  %v8533_v17 = vld [vmem:[%s16151_s5 + $0x8e8] sm:$0xff] }
 0x8d8   :  { %4353 = vmatpush.msra.mxu1 %v8532_v24  ;;  %4471 = vmatpush.msra.mxu0 %v8533_v17  ;;  %v12585_v20 = vadd.f32 %v3776_v39, %v3717_v49  ;;  %v3916_v17 = vsel %vm277_vm2, %v3900_v61, %v3901_v51  ;;  %v3673_v39 = vpop.f32.mrf.mxu1 }
 0x8d9   :  { %v12569_v63 = vsel %vm441_vm1, %v16245_v30, %v3807_v23  ;;  %v3946_v13 = vadd.f32 %v12487_v58, %v3927_v43  ;;  %v4134_v50 = vsel %vm441_vm1, %v4112_v41, %v4113_v37  ;;  %v4008_v19 = vsel %vm277_vm2, %v3986_v33, %v3987_v9 }
 0x8da   :  { %v4140_v0 = vmul.f32 %v4134_v50, %v9163_v38  ;;  %v4015_v36 = vmul.f32 %v4008_v19, %v9229_v11  ;;  %v8528_v19 = vld [vmem:[%s16151_s5 + $0x8c0] sm:$0xff] }
 0x8db   :  { %v3960_v18 = vmax.f32 %v3946_v13, 0.0 }
 0x8dc   :  { %v3611_v30 = vpop.f32.mrf.mxu2  ;;  %v3850_v43 = vpop.permute.xlu0 %3849  ;;  %4154 = vst.msk [vmem:[#allocation2 + $0x28] sm:$0xff] %vm341_vm3, %v4140_v0 }
 0x8dd   :  { %v12579_v62 = vadd.f32 %v3670_v3, %v3611_v30  ;;  %v3886_v41 = vadd.f32 %v3850_v43, %v12463_v15  ;;  %v3974_v33 = vmul.f32 %v3960_v18, %v16384_v10  ;;  %4029 = vst.msk [vmem:[#allocation2 + $0x30] sm:$0xff] %vm341_vm3, %v4015_v36  ;;  %v8530_v15 = vld [vmem:[%s16151_s5 + $0x8d0] sm:$0xff]  ;;  %v8531_v3 = vld [vmem:[%s16151_s5 + $0x8d8] sm:$0xff]  ;;  %v8529_v36 = vld [vmem:[%s16151_s5 + $0x8c8] sm:$0xff]  ;;  %v3902_v43 = vrot.slane %v12585_v20, 7  ;;  %v3779_v20 = vpop.f32.mrf.mxu0 }
 0x8de   :  { %4354 = vmatpush.msra.mxu1 %v8530_v15  ;;  %4472 = vmatpush.msra.mxu0 %v8531_v3 }
 0x8df   :  { %v3808_v24 = vrot.slane %v12579_v62, 1  ;;  %v3928_v13 = vadd.f32 %v3916_v17, %v3886_v41  ;;  %v3988_v50 = vrot.slane %v3974_v33, 7  ;;  %v4114_v30 = vrot.slane %v3974_v33, 1  ;;  %4062 = vrot.lane.b32.xlu1 %v3974_v33, %s8946_s19  ;;  %v8527_v41 = vld [vmem:[%s16151_s5 + $0x8b8] sm:$0xff] }
 0x8e0   :  { %4355 = vmatpush.msra.mxu1 %v8528_v19  ;;  %4473 = vmatpush.msra.mxu0 %v8529_v36  ;;  %v8525_v19 = vld [vmem:[%s16151_s5 + $0x8a8] sm:$0xff] }
 0x8e1   :  { %v12602_v61 = vsel %vm441_vm1, %v3807_v23, %v3808_v24  ;;  %v3947_v0 = vadd.f32 %v12487_v58, %v3928_v13  ;;  %v4133_v49 = vsel %vm441_vm1, %v4113_v37, %v4114_v30  ;;  %v4007_v18 = vsel %vm277_vm2, %v3987_v9, %v3988_v50  ;;  %v8526_v23 = vld [vmem:[%s16151_s5 + $0x8b0] sm:$0xff]  ;;  %v3720_v13 = vpop.f32.mrf.mxu3 }
 0x8e2   :  { %v4141_v33 = vmul.f32 %v4133_v49, %v9167_v40  ;;  %v4016_v17 = vmul.f32 %v4007_v18, %v9273_v35  ;;  %4356 = vmatpush.msra.mxu1 %v8526_v23  ;;  %4474 = vmatpush.msra.mxu0 %v8527_v41  ;;  %v8524_v49 = vld [vmem:[%s16151_s5 + $0x8a0] sm:$0xff]  ;;  %v8522_v41 = vld [vmem:[%s16151_s5 + $0x890] sm:$0xff] }
 0x8e3   :  { %v3961_v15 = vmax.f32 %v3947_v0, 0.0 }
 0x8e4   :  { %v3614_v37 = vpop.f32.mrf.mxu2  ;;  %v3852_v3 = vpop.permute.xlu1 %3851  ;;  %4155 = vst.msk [vmem:[#allocation2 + $0x38] sm:$0xff] %vm341_vm3, %v4141_v33  ;;  %v8523_v33 = vld [vmem:[%s16151_s5 + $0x898] sm:$0xff]  ;;  %4357 = vmatpush.msra.mxu1 %v8524_v49  ;;  %4475 = vmatpush.msra.mxu0 %v8525_v19  ;;  %v12664_v19 = vadd.f32 %v12482_v29, %v12480_v60 }
 0x8e5   :  { %v3674_v9 = vadd.f32 %v3673_v39, %v3614_v37  ;;  %v3887_v12 = vadd.f32 %v3852_v3, %v12474_v52  ;;  %v3975_v45 = vmul.f32 %v3961_v15, %v9227_v8  ;;  %4030 = vst.msk [vmem:[#allocation2 + $0x40] sm:$0xff] %vm341_vm3, %v4016_v17  ;;  %v12631_v39 = vadd.f32 %v3779_v20, %v3720_v13  ;;  %v8520_v13 = vld [vmem:[%s16151_s5 + $0x880] sm:$0xff]  ;;  %v8521_v15 = vld [vmem:[%s16151_s5 + $0x888] sm:$0xff] }
 0x8e6   :  { %v3915_v52 = vsel %vm277_vm2, %v3901_v51, %v3902_v43  ;;  %v3804_v17 = vrot.slane %v12476_v21, 1  ;;  %4358 = vmatpush.msra.mxu1 %v8522_v41  ;;  %4476 = vmatpush.msra.mxu0 %v8523_v33 }
 0x8e7   :  { %v3809_v0 = vrot.slane %v3674_v9, 1  ;;  %v3929_v36 = vadd.f32 %v3915_v52, %v3887_v12  ;;  %v3989_v18 = vrot.slane %v3975_v45, 7  ;;  %v4115_v23 = vrot.slane %v3975_v45, 1  ;;  %4064 = vrot.lane.b32.xlu0 %v3975_v45, %s8946_s19  ;;  %3863 = vrot.lane.b32.xlu1 %v3674_v9, %s8946_s19 }
 0x8e8   :  { %v3903_v9 = vrot.slane %v12631_v39, 7  ;;  %4359 = vmatpush.msra.mxu1 %v8520_v13  ;;  %4477 = vmatpush.msra.mxu0 %v8521_v15  ;;  %v16442_v13 = vrot.slane %v12434_v25, 1 }
 0x8e9   :  { %v12646_v12 = vsel %vm441_vm1, %v3808_v24, %v3809_v0  ;;  %v3948_v45 = vadd.f32 %v12487_v58, %v3929_v36  ;;  %v4132_v51 = vsel %vm441_vm1, %v4114_v30, %v4115_v23  ;;  %v4006_v37 = vsel %vm277_vm2, %v3988_v50, %v3989_v18  ;;  %v3676_v30 = vpop.f32.mrf.mxu1 }
 0x8ea   :  { %v4142_v24 = vmul.f32 %v4132_v51, %v9265_v32  ;;  %v4017_v3 = vmul.f32 %v4006_v37, %v9313_v16  ;;  %v16441_v50 = vrot.slane %v12465_v14, 1  ;;  %v3914_v29 = vsel %vm277_vm2, %v3902_v43, %v3903_v9 }
 0x8eb   :  { %v3962_v20 = vmax.f32 %v3948_v45, 0.0 }
 0x8ec   :  { %v3617_v49 = vpop.f32.mrf.mxu2  ;;  %4156 = vst.msk [vmem:[#allocation2 + $0x48] sm:$0xff] %vm341_vm3, %v4142_v24  ;;  %v3854_v36 = vpop.permute.xlu0 %3853  ;;  %v3817_v41 = vsel %vm441_vm1, %v16441_v50, %v3804_v17  ;;  %v3895_v24 = vrot.slane %v12664_v19, 7 }
 0x8ed   :  { %v3677_v52 = vadd.f32 %v3676_v30, %v3617_v49  ;;  %v3888_v33 = vadd.f32 %v3854_v36, %v3817_v41  ;;  %v3976_v45 = vmul.f32 %v3962_v20, %v9206_v56  ;;  %4031 = vst.msk [vmem:[#allocation2 + $0x50] sm:$0xff] %vm341_vm3, %v4017_v3 }
 0x8ef   :  { %v3810_v60 = vrot.slane %v3677_v52, 1  ;;  %3865 = vrot.lane.b32.xlu2 %v3677_v52, %s8946_s19  ;;  %v3930_v51 = vadd.f32 %v3914_v29, %v3888_v33  ;;  %v3990_v14 = vrot.slane %v3976_v45, 7  ;;  %v4116_v37 = vrot.slane %v3976_v45, 1 }
 0x8f0   :  { %v16443_v52 = vrot.slane %v12497_v27, 7 }
 0x8f1   :  { %v3824_v15 = vsel %vm441_vm1, %v3810_v60, %v16442_v13  ;;  %v12687_v3 = vsel %vm441_vm1, %v3809_v0, %v3810_v60  ;;  %v3949_v43 = vadd.f32 %v12487_v58, %v3930_v51  ;;  %v4131_v20 = vsel %vm441_vm1, %v4115_v23, %v4116_v37 }
 0x8f2   :  { %v3881_v30 = vadd.f32 %v12510_v55, %v3824_v15  ;;  %v4005_v49 = vsel %vm277_vm2, %v3989_v18, %v3990_v14  ;;  %v3921_v25 = vsel %vm277_vm2, %v3895_v24, %v16443_v52  ;;  %v4143_v0 = vmul.f32 %v4131_v20, %v9307_v4 }
 0x8f3   :  { %v4018_v36 = vmul.f32 %v4005_v49, %v9373_v26  ;;  %v3963_v50 = vmax.f32 %v3949_v43, 0.0  ;;  %v16445_v20 = vrot.slane %v12513_v46, 7 }
 0x8f4   :  { %v3923_v55 = vadd.f32 %v3921_v25, %v3881_v30  ;;  %4157 = vst.msk [vmem:[#allocation2 + $0x58] sm:$0xff] %vm341_vm3, %v4143_v0  ;;  %v12749_v0 = vadd.f32 %v12499_v5, %v12508_v2  ;;  %v12762_v5 = vpop.f32.mrf.mxu3  ;;  %v4171_v2 = vld [vmem:[#allocation2 + $0x28] sm:$0xff] }
 0x8f5   :  { %v12705_v23 = vmul.f32 %v3963_v50, %v9172_v42  ;;  %4032 = vst.msk [vmem:[#allocation2 + $0x60] sm:$0xff] %vm341_vm3, %v4018_v36  ;;  %v4169_v36 = vld [vmem:[#allocation2 + $0x18] sm:$0xff] }
 0x8f6   :  { %v3942_v18 = vadd.f32 %v12487_v58, %v3923_v55  ;;  %v12766_v55 = vpop.f32.mrf.mxu0 }
 0x8f7   :  { %v3991_v27 = vrot.slane %v12705_v23, 7  ;;  %v4117_v41 = vrot.slane %v12705_v23, 1  ;;  %4068 = vrot.lane.b32.xlu0 %v12705_v23, %s8946_s19 }
 0x8f8   :  { %v3956_v33 = vmax.f32 %v3942_v18, 0.0 }
 0x8f9   :  { %v4130_v29 = vsel %vm441_vm1, %v4116_v37, %v4117_v41  ;;  %v4004_v51 = vsel %vm277_vm2, %v3990_v14, %v3991_v27  ;;  %v16444_v37 = vrot.slane %v12513_v46, 1 }
 0x8fa   :  { %v12714_v60 = vmul.f32 %v3956_v33, %v9172_v42  ;;  %v4144_v13 = vmul.f32 %v4130_v29, %v9357_v57  ;;  %v4019_v15 = vmul.f32 %v4004_v51, %v9368_v22  ;;  %v4175_v33 = vld [vmem:[#allocation2 + $0x48] sm:$0xff]  ;;  %v8519_v29 = vld [vmem:[%s16151_s5 + $0x878] sm:$0xff] }
 0x8fb   :  { %v8517_v51 = vld [vmem:[%s16151_s5 + $0x868] sm:$0xff]  ;;  %4403 = vmatpush.msra.mxu3 %v8519_v29 }
 0x8fc   :  { %4054 = vrot.lane.b32.xlu2 %v12714_v60, %s8946_s19  ;;  %v3984_v30 = vrot.slane %v12714_v60, 7  ;;  %v4110_v43 = vrot.slane %v12714_v60, 1  ;;  %4158 = vst.msk [vmem:[#allocation2 + $0x68] sm:$0xff] %vm341_vm3, %v4144_v13  ;;  %v3726_v50 = vpop.f32.mrf.mxu3 }
 0x8fd   :  { %4033 = vst.msk [vmem:[#allocation2 + $0x70] sm:$0xff] %vm341_vm3, %v4019_v15  ;;  %v8514_v15 = vld [vmem:[%s16151_s5 + $0x850] sm:$0xff]  ;;  %4404 = vmatpush.msra.mxu3 %v8517_v51  ;;  %v8505_v51 = vld [vmem:[%s16151_s5 + $0x808] sm:$0xff] }
 0x8fe   :  { %v4136_v14 = vsel %vm441_vm1, %v4110_v43, %v16444_v37  ;;  %v4010_v49 = vsel %vm277_vm2, %v3984_v30, %v16445_v20  ;;  %v3785_v18 = vpop.f32.mrf.mxu0  ;;  %v8515_v37 = vld [vmem:[%s16151_s5 + $0x858] sm:$0xff]  ;;  %v8512_v20 = vld [vmem:[%s16151_s5 + $0x840] sm:$0xff] }
 0x8ff   :  { %v4138_v52 = vmul.f32 %v4136_v14, %v9617_v31  ;;  %v4013_v25 = vmul.f32 %v4010_v49, %v9188_v48  ;;  %v8513_v49 = vld [vmem:[%s16151_s5 + $0x848] sm:$0xff]  ;;  %4405 = vmatpush.msra.mxu3 %v8515_v37  ;;  %v8502_v37 = vld [vmem:[%s16151_s5 + $0x7f0] sm:$0xff] }
 0x901   :  { %4152 = vst.msk [vmem:[#allocation2 + $0x8] sm:$0xff] %vm341_vm3, %v4138_v52  ;;  %4406 = vmatpush.msra.mxu3 %v8513_v49 }
 0x902   :  { %4027 = vst.msk [vmem:[#allocation2 + $0x10] sm:$0xff] %vm341_vm3, %v4013_v25  ;;  %v4177_v25 = vld [vmem:[#allocation2 + $0x58] sm:$0xff] }
 0x904   :  { %3855 = vrot.lane.b32.xlu2 %v12749_v0, %s8946_s19  ;;  %v12792_v14 = vpop.f32.mrf.mxu3 }
 0x906   :  { %v3788_v52 = vpop.f32.mrf.mxu0 }
 0x908   :  { %v4167_v46 = vld [vmem:[#allocation2 + $0x8] sm:$0xff] }
 0x909   :  { %8536 = vmatmul.msk.f32.vlgmr.msra.gmra.mxu1 %vm341_vm3, %v4167_v46  ;;  %8550 = vmatmul.msk.f32.vlgmr.msra.gmra.mxu0 %vm341_vm3, %v4167_v46  ;;  %v8510_v46 = vld [vmem:[%s16151_s5 + $0x830] sm:$0xff] }
 0x90c   :  { %4060 = vrot.lane.b32.xlu2 %v12543_v34, %s8946_s19  ;;  %v4173_v34 = vld [vmem:[#allocation2 + $0x38] sm:$0xff]  ;;  %v12820_v29 = vpop.f32.mrf.mxu3 }
 0x911   :  { %8537 = vmatmul.msk.f32.gmra.mxu1 %vm341_vm3, %v4169_v36  ;;  %8551 = vmatmul.msk.f32.gmra.mxu0 %vm341_vm3, %v4169_v36  ;;  %v8511_v36 = vld [vmem:[%s16151_s5 + $0x838] sm:$0xff] }
 0x912   :  { %4407 = vmatpush.msra.mxu3 %v8511_v36  ;;  %v3786_v36 = vadd.f32 %v3785_v18, %v3726_v50  ;;  %v12859_v50 = vadd.f32 %v12766_v55, %v12762_v5  ;;  %v3805_v18 = vrot.slane %v12749_v0, 1  ;;  %v8492_v5 = vld [vmem:[%s16151_s5 + $0x7a0] sm:$0xff]  ;;  %v8493_v55 = vld [vmem:[%s16151_s5 + $0x7a8] sm:$0xff] }
 0x914   :  { %3861 = vrot.lane.b32.xlu2 %v12579_v62, %s8946_s19  ;;  %v8518_v62 = vld [vmem:[%s16151_s5 + $0x870] sm:$0xff] }
 0x915   :  { %4285 = vmatpush.msrb.mxu2 %v8518_v62  ;;  %v8507_v62 = vld [vmem:[%s16151_s5 + $0x818] sm:$0xff] }
 0x919   :  { %8538 = vmatmul.msk.f32.gmra.mxu1 %vm341_vm3, %v4171_v2  ;;  %8552 = vmatmul.msk.f32.gmra.mxu0 %vm341_vm3, %v4171_v2  ;;  %v8508_v2 = vld [vmem:[%s16151_s5 + $0x820] sm:$0xff] }
 0x91c   :  { %4066 = vrot.lane.b32.xlu2 %v3976_v45, %s8946_s19  ;;  %v8516_v45 = vld [vmem:[%s16151_s5 + $0x860] sm:$0xff] }
 0x91d   :  { %4286 = vmatpush.msrb.mxu2 %v8516_v45  ;;  %v8504_v45 = vld [vmem:[%s16151_s5 + $0x800] sm:$0xff] }
 0x91f   :  { %4287 = vmatpush.msrb.mxu2 %v8514_v15  ;;  %v4179_v15 = vld [vmem:[#allocation2 + $0x68] sm:$0xff] }
 0x921   :  { %8539 = vmatmul.msk.f32.gmra.mxu1 %vm341_vm3, %v4173_v34  ;;  %8553 = vmatmul.msk.f32.gmra.mxu0 %vm341_vm3, %v4173_v34  ;;  %v8509_v34 = vld [vmem:[%s16151_s5 + $0x828] sm:$0xff] }
 0x922   :  { %4288 = vmatpush.msrb.mxu2 %v8512_v20  ;;  %4408 = vmatpush.msra.mxu3 %v8509_v34  ;;  %v8503_v20 = vld [vmem:[%s16151_s5 + $0x7f8] sm:$0xff] }
 0x923   :  { %v8499_v34 = vld [vmem:[%s16151_s5 + $0x7d8] sm:$0xff] }
 0x924   :  { %4289 = vmatpush.msrb.mxu2 %v8510_v46  ;;  %4409 = vmatpush.msra.mxu3 %v8507_v62  ;;  %v8501_v46 = vld [vmem:[%s16151_s5 + $0x7e8] sm:$0xff] }
 0x925   :  { %v8497_v62 = vld [vmem:[%s16151_s5 + $0x7c8] sm:$0xff] }
 0x926   :  { %4290 = vmatpush.msrb.mxu2 %v8508_v2  ;;  %4410 = vmatpush.msra.mxu3 %v8505_v51  ;;  %v8498_v2 = vld [vmem:[%s16151_s5 + $0x7d0] sm:$0xff]  ;;  %v3735_v51 = vpop.f32.mrf.mxu3 }
 0x928   :  { %4411 = vmatpush.msra.mxu3 %v8503_v20 }
 0x929   :  { %8540 = vmatmul.msk.f32.gmra.mxu1 %vm341_vm3, %v4175_v33  ;;  %8554 = vmatmul.msk.f32.gmra.mxu0 %vm341_vm3, %v4175_v33  ;;  %v4059_v13 = vpop.permute.xlu0 %4058  ;;  %v8506_v33 = vld [vmem:[%s16151_s5 + $0x810] sm:$0xff] }
 0x92a   :  { %4098 = vst.msk [vmem:[#allocation2 + $0x20] sm:$0xff] %vm412_vm4, %v4059_v13  ;;  %4291 = vmatpush.msrb.mxu2 %v8506_v33  ;;  %v12828_v13 = vpop.f32.mrf.mxu0  ;;  %4412 = vmatpush.msra.mxu3 %v8501_v46  ;;  %v8496_v33 = vld [vmem:[%s16151_s5 + $0x7c0] sm:$0xff]  ;;  %v16446_v46 = vrot.slane %v12532_v1, 1  ;;  %v8490_v1 = vld [vmem:[%s16151_s5 + $0x790] sm:$0xff] }
 0x92c   :  { %4292 = vmatpush.msrb.mxu2 %v8504_v45  ;;  %4413 = vmatpush.msra.mxu3 %v8499_v34  ;;  %v3905_v45 = vrot.slane %v3786_v36, 7  ;;  %v3815_v36 = vsel %vm441_vm1, %v3805_v18, %v16446_v46 }
 0x92e   :  { %4293 = vmatpush.msrb.mxu2 %v8502_v37  ;;  %4414 = vmatpush.msra.mxu3 %v8497_v62  ;;  %v8495_v37 = vld [vmem:[%s16151_s5 + $0x7b8] sm:$0xff] }
 0x930   :  { %4415 = vmatpush.msra.mxu3 %v8495_v37 }
 0x931   :  { %8541 = vmatmul.msk.f32.gmra.mxu1 %vm341_vm3, %v4177_v25  ;;  %8555 = vmatmul.msk.f32.gmra.mxu0 %vm341_vm3, %v4177_v25  ;;  %v8500_v25 = vld [vmem:[%s16151_s5 + $0x7e0] sm:$0xff] }
 0x932   :  { %4294 = vmatpush.msrb.mxu2 %v8500_v25  ;;  %v3794_v20 = vpop.f32.mrf.mxu0  ;;  %4416 = vmatpush.msra.mxu3 %v8493_v55 }
 0x933   :  { %v12884_v34 = vadd.f32 %v3794_v20, %v3735_v51  ;;  %v8489_v51 = vld [vmem:[%s16151_s5 + $0x788] sm:$0xff] }
 0x934   :  { %4295 = vmatpush.msrb.mxu2 %v8498_v2  ;;  %v12882_v2 = vadd.f32 %v3788_v52, %v12792_v14  ;;  %v8488_v52 = vld [vmem:[%s16151_s5 + $0x780] sm:$0xff] }
 0x936   :  { %4296 = vmatpush.msrb.mxu2 %v8496_v33  ;;  %v3906_v37 = vrot.slane %v12882_v2, 7 }
 0x939   :  { %8542 = vmatmul.msk.f32.gmra.mxu1 %vm341_vm3, %v4179_v15  ;;  %8556 = vmatmul.msk.f32.gmra.mxu0 %vm341_vm3, %v4179_v15  ;;  %v4057_v49 = vpop.permute.xlu1 %4056  ;;  %v8494_v15 = vld [vmem:[%s16151_s5 + $0x7b0] sm:$0xff] }
 0x93a   :  { %4097 = vst.msk [vmem:[#allocation2 + $0x10] sm:$0xff] %vm412_vm4, %v4057_v49  ;;  %v3904_v49 = vrot.slane %v12859_v50, 7  ;;  %4297 = vmatpush.msrb.mxu2 %v8494_v15  ;;  %v8491_v15 = vld [vmem:[%s16151_s5 + $0x798] sm:$0xff] }
 0x93b   :  { %4417 = vmatpush.msra.mxu3 %v8491_v15 }
 0x93c   :  { %v3912_v62 = vsel %vm277_vm2, %v3904_v49, %v3905_v45  ;;  %4298 = vmatpush.msrb.mxu2 %v8492_v5  ;;  %v3908_v5 = vrot.slane %v12884_v34, 7 }
 0x93d   :  { %4418 = vmatpush.msra.mxu3 %v8489_v51 }
 0x93e   :  { %4299 = vmatpush.msrb.mxu2 %v8490_v1  ;;  %v3922_v34 = vsel %vm277_vm2, %v3908_v5, %v3895_v24 }
 0x940   :  { %4300 = vmatpush.msrb.mxu2 %v8488_v52 }
 0x941   :  { %v3858_v25 = vpop.permute.xlu1 %3857 }
 0x942   :  { %v3890_v33 = vadd.f32 %v3858_v25, %v3815_v36 }
 0x944   :  { %v3932_v14 = vadd.f32 %v3912_v62, %v3890_v33  ;;  %v3911_v62 = vsel %vm277_vm2, %v3905_v45, %v3906_v37 }
 0x946   :  { %v3951_v55 = vadd.f32 %v12487_v58, %v3932_v14 }
 0x948   :  { %v3965_v20 = vmax.f32 %v3951_v55, 0.0 }
 0x949   :  { %v3860_v25 = vpop.permute.xlu0 %3859  ;;  %v3866_v46 = vpop.permute.xlu2 %3865 }
 0x94a   :  { %v3891_v36 = vadd.f32 %v3860_v25, %v12569_v63  ;;  %v3894_v33 = vadd.f32 %v3866_v46, %v12687_v3  ;;  %v12916_v1 = vmul.f32 %v3965_v20, %v9204_v53 }
 0x94c   :  { %v3933_v15 = vadd.f32 %v3911_v62, %v3891_v36  ;;  %v3936_v14 = vadd.f32 %v3922_v34, %v3894_v33  ;;  %4072 = vrot.lane.b32.xlu2 %v12916_v1, %s8946_s19  ;;  %v3993_v24 = vrot.slane %v12916_v1, 7  ;;  %v4119_v20 = vrot.slane %v12916_v1, 1 }
 0x94d   :  { %v12935_v62 = vadd.f32 %v12828_v13, %v12820_v29 }
 0x94e   :  { %v3952_v63 = vadd.f32 %v12487_v58, %v3933_v15  ;;  %v3955_v3 = vadd.f32 %v12487_v58, %v3936_v14 }
 0x94f   :  { %v3907_v60 = vrot.slane %v12935_v62, 7 }
 0x950   :  { %v3966_v52 = vmax.f32 %v3952_v63, 0.0  ;;  %v3969_v51 = vmax.f32 %v3955_v3, 0.0 }
 0x951   :  { %v4063_v19 = vpop.permute.xlu1 %4062 }
 0x952   :  { %v3983_v45 = vmul.f32 %v3969_v51, %v9206_v56  ;;  %v12924_v55 = vmul.f32 %v3966_v52, %v9225_v7  ;;  %4100 = vst.msk [vmem:[#allocation2 + $0x40] sm:$0xff] %vm412_vm4, %v4063_v19 }
 0x954   :  { %v3997_v25 = vrot.slane %v3983_v45, 7  ;;  %v4123_v46 = vrot.slane %v3983_v45, 1  ;;  %4074 = vrot.lane.b32.xlu0 %v12924_v55, %s8946_s19  ;;  %v3994_v36 = vrot.slane %v12924_v55, 7  ;;  %v4120_v33 = vrot.slane %v12924_v55, 1 }
 0x956   :  { %v4137_v34 = vsel %vm441_vm1, %v4123_v46, %v4110_v43  ;;  %v4127_v15 = vsel %vm441_vm1, %v4119_v20, %v4120_v33  ;;  %v4055_v14 = vpop.permute.xlu2 %4054  ;;  %v4011_v63 = vsel %vm277_vm2, %v3997_v25, %v3984_v30  ;;  %v4001_v29 = vsel %vm277_vm2, %v3993_v24, %v3994_v36 }
 0x957   :  { %v4151_v43 = vmul.f32 %v4137_v34, %v9357_v57  ;;  %v4147_v13 = vmul.f32 %v4127_v15, %v9163_v38  ;;  %v4012_v3 = vmul.f32 %v4011_v63, %v9368_v22  ;;  %v4022_v51 = vmul.f32 %v4001_v29, %v9229_v11 }
 0x958   :  { %v3909_v34 = vsel %vm277_vm2, %v3907_v60, %v3908_v5  ;;  %v3816_v15 = vsel %vm441_vm1, %v3804_v17, %v3805_v18  ;;  %v3913_v5 = vsel %vm277_vm2, %v3903_v9, %v3904_v49 }
 0x959   :  { %4165 = vst.msk [vmem:[#allocation2 + $0xd8] sm:$0xff] %vm341_vm3, %v4151_v43  ;;  %v4065_v30 = vpop.permute.xlu0 %4064  ;;  %v3864_v52 = vpop.permute.xlu1 %3863  ;;  %v4174_v55 = vld [vmem:[#allocation2 + $0x40] sm:$0xff] }
 0x95a   :  { %4161 = vst.msk [vmem:[#allocation2 + $0x98] sm:$0xff] %vm341_vm3, %v4147_v13  ;;  %v3893_v19 = vadd.f32 %v3864_v52, %v12646_v12 }
 0x95b   :  { %4026 = vst.msk [vmem:[#allocation2] sm:$0xff] %vm341_vm3, %v4012_v3 }
 0x95c   :  { %4096 = vst.msk [vmem:[#allocation2] sm:$0xff] %vm412_vm4, %v4055_v14  ;;  %4080 = vrot.lane.b32.xlu0 %v3983_v45, %s8946_s19  ;;  %v3935_v62 = vadd.f32 %v3909_v34, %v3893_v19 }
 0x95d   :  { %4101 = vst.msk [vmem:[#allocation2 + $0x50] sm:$0xff] %vm412_vm4, %v4065_v30 }
 0x95e   :  { %v3856_v63 = vpop.permute.xlu2 %3855  ;;  %4036 = vst.msk [vmem:[#allocation2 + $0xa0] sm:$0xff] %vm341_vm3, %v4022_v51  ;;  %v3954_v12 = vadd.f32 %v12487_v58, %v3935_v62 }
 0x95f   :  { %v3889_v14 = vadd.f32 %v3856_v63, %v3816_v15 }
 0x960   :  { %v3968_v45 = vmax.f32 %v3954_v12, 0.0 }
 0x961   :  { %v3931_v0 = vadd.f32 %v3913_v5, %v3889_v14  ;;  %v4170_v5 = vld [vmem:[#allocation2 + $0x20] sm:$0xff] }
 0x962   :  { %v3982_v17 = vmul.f32 %v3968_v45, %v9227_v8 }
 0x963   :  { %v3950_v21 = vadd.f32 %v12487_v58, %v3931_v0  ;;  %v4166_v29 = vld [vmem:[#allocation2] sm:$0xff] }
 0x964   :  { %4301 = vmatmul.f32.vlgmr.msrb.gmra.mxu2 %v4166_v29  ;;  %4419 = vmatmul.f32.vlgmr.msra.gmra.mxu3 %v4166_v29  ;;  %v3996_v43 = vrot.slane %v3982_v17, 7  ;;  %v4122_v13 = vrot.slane %v3982_v17, 1 }
 0x965   :  { %v3964_v18 = vmax.f32 %v3950_v21, 0.0  ;;  %4078 = vrot.lane.b32.xlu2 %v3982_v17, %s8946_s19 }
 0x966   :  { %v4061_v50 = vpop.permute.xlu2 %4060  ;;  %v4124_v39 = vsel %vm441_vm1, %v4122_v13, %v4123_v46  ;;  %v3998_v49 = vsel %vm277_vm2, %v3996_v43, %v3997_v25  ;;  %v4168_v25 = vld [vmem:[#allocation2 + $0x10] sm:$0xff] }
 0x967   :  { %4099 = vst.msk [vmem:[#allocation2 + $0x30] sm:$0xff] %vm412_vm4, %v4061_v50  ;;  %v3978_v9 = vmul.f32 %v3964_v18, %v9186_v47  ;;  %v4150_v3 = vmul.f32 %v4124_v39, %v9307_v4  ;;  %v4025_v30 = vmul.f32 %v3998_v49, %v9373_v26 }
 0x969   :  { %4070 = vrot.lane.b32.xlu1 %v3978_v9, %s8946_s19  ;;  %v3992_v52 = vrot.slane %v3978_v9, 7  ;;  %v4118_v51 = vrot.slane %v3978_v9, 1  ;;  %4164 = vst.msk [vmem:[#allocation2 + $0xc8] sm:$0xff] %vm341_vm3, %v4150_v3  ;;  %v4069_v19 = vpop.permute.xlu0 %4068 }
 0x96a   :  { %4103 = vst.msk [vmem:[#allocation2 + $0x70] sm:$0xff] %vm412_vm4, %v4069_v19  ;;  %v4193_v19 = vld [vmem:[#allocation2 + $0xd8] sm:$0xff] }
 0x96b   :  { %v4128_v46 = vsel %vm441_vm1, %v4118_v51, %v4119_v20  ;;  %v4129_v34 = vsel %vm441_vm1, %v4117_v41, %v4118_v51  ;;  %v4002_v62 = vsel %vm277_vm2, %v3992_v52, %v3993_v24  ;;  %v4003_v15 = vsel %vm277_vm2, %v3991_v27, %v3992_v52  ;;  %4039 = vst.msk [vmem:[#allocation2 + $0xd0] sm:$0xff] %vm341_vm3, %v4025_v30 }
 0x96c   :  { %v4145_v20 = vmul.f32 %v4129_v34, %v9617_v31  ;;  %v4146_v63 = vmul.f32 %v4128_v46, %v9633_v28  ;;  %4304 = vmatmul.f32.gmra.mxu2 %v4168_v25  ;;  %4422 = vmatmul.f32.gmra.mxu3 %v4168_v25  ;;  %v4021_v41 = vmul.f32 %v4002_v62, %v9210_v59 }
 0x96d   :  { %v4020_v1 = vmul.f32 %v4003_v15, %v9188_v48  ;;  %v3910_v27 = vsel %vm277_vm2, %v3906_v37, %v3907_v60 }
 0x96e   :  { %4159 = vst.msk [vmem:[#allocation2 + $0x78] sm:$0xff] %vm341_vm3, %v4145_v20  ;;  %v3862_v24 = vpop.permute.xlu2 %3861  ;;  %v4172_v29 = vld [vmem:[#allocation2 + $0x30] sm:$0xff] }
 0x96f   :  { %4160 = vst.msk [vmem:[#allocation2 + $0x88] sm:$0xff] %vm341_vm3, %v4146_v63  ;;  %v3892_v23 = vadd.f32 %v3862_v24, %v12602_v61 }
 0x970   :  { %4035 = vst.msk [vmem:[#allocation2 + $0x90] sm:$0xff] %vm341_vm3, %v4021_v41  ;;  %v4191_v51 = vld [vmem:[#allocation2 + $0xc8] sm:$0xff] }
 0x971   :  { %v3934_v12 = vadd.f32 %v3910_v27, %v3892_v23  ;;  %4034 = vst.msk [vmem:[#allocation2 + $0x80] sm:$0xff] %vm341_vm3, %v4020_v1  ;;  %v4180_v52 = vld [vmem:[#allocation2 + $0x70] sm:$0xff] }
 0x973   :  { %v3953_v14 = vadd.f32 %v12487_v58, %v3934_v12 }
 0x974   :  { %4307 = vmatmul.f32.gmra.mxu2 %v4170_v5  ;;  %4425 = vmatmul.f32.gmra.mxu3 %v4170_v5 }
 0x975   :  { %v3967_v45 = vmax.f32 %v3953_v14, 0.0  ;;  %v4181_v0 = vld [vmem:[#allocation2 + $0x78] sm:$0xff] }
 0x976   :  { %v4067_v21 = vpop.permute.xlu2 %4066  ;;  %8543 = vmatmul.msk.f32.gmra.mxu1 %vm341_vm3, %v4181_v0  ;;  %8557 = vmatmul.msk.f32.gmra.mxu0 %vm341_vm3, %v4181_v0  ;;  %v4183_v9 = vld [vmem:[#allocation2 + $0x88] sm:$0xff] }
 0x977   :  { %4102 = vst.msk [vmem:[#allocation2 + $0x60] sm:$0xff] %vm412_vm4, %v4067_v21  ;;  %v3981_v61 = vmul.f32 %v3967_v45, %v16384_v10 }
 0x979   :  { %4076 = vrot.lane.b32.xlu1 %v3981_v61, %s8946_s19  ;;  %v3995_v2 = vrot.slane %v3981_v61, 7  ;;  %v4121_v37 = vrot.slane %v3981_v61, 1 }
 0x97b   :  { %v4125_v58 = vsel %vm441_vm1, %v4121_v37, %v4122_v13  ;;  %v4126_v60 = vsel %vm441_vm1, %v4120_v33, %v4121_v37  ;;  %v3999_v17 = vsel %vm277_vm2, %v3995_v2, %v3996_v43  ;;  %v4000_v18 = vsel %vm277_vm2, %v3994_v36, %v3995_v2  ;;  %v4185_v36 = vld [vmem:[#allocation2 + $0x98] sm:$0xff]  ;;  %v4176_v43 = vld [vmem:[#allocation2 + $0x50] sm:$0xff] }
 0x97c   :  { %v4148_v50 = vmul.f32 %v4126_v60, %v9167_v40  ;;  %v4149_v39 = vmul.f32 %v4125_v58, %v9265_v32  ;;  %4310 = vmatmul.f32.gmra.mxu2 %v4172_v29  ;;  %4428 = vmatmul.f32.gmra.mxu3 %v4172_v29  ;;  %v4024_v13 = vmul.f32 %v3999_v17, %v9313_v16 }
 0x97d   :  { %v4023_v33 = vmul.f32 %v4000_v18, %v9273_v35 }
 0x97e   :  { %4162 = vst.msk [vmem:[#allocation2 + $0xa8] sm:$0xff] %vm341_vm3, %v4148_v50  ;;  %8544 = vmatmul.msk.f32.gmra.mxu1 %vm341_vm3, %v4183_v9  ;;  %8558 = vmatmul.msk.f32.gmra.mxu0 %vm341_vm3, %v4183_v9  ;;  %v4178_v3 = vld [vmem:[#allocation2 + $0x60] sm:$0xff] }
 0x97f   :  { %4163 = vst.msk [vmem:[#allocation2 + $0xb8] sm:$0xff] %vm341_vm3, %v4149_v39 }
 0x980   :  { %4038 = vst.msk [vmem:[#allocation2 + $0xc0] sm:$0xff] %vm341_vm3, %v4024_v13 }
 0x981   :  { %4037 = vst.msk [vmem:[#allocation2 + $0xb0] sm:$0xff] %vm341_vm3, %v4023_v33 }
 0x984   :  { %4313 = vmatmul.f32.gmra.mxu2 %v4174_v55  ;;  %4431 = vmatmul.f32.gmra.mxu3 %v4174_v55 }
 0x985   :  { %v4187_v49 = vld [vmem:[#allocation2 + $0xa8] sm:$0xff] }
 0x986   :  { %8545 = vmatmul.msk.f32.gmra.mxu1 %vm341_vm3, %v4185_v36  ;;  %8559 = vmatmul.msk.f32.gmra.mxu0 %vm341_vm3, %v4185_v36  ;;  %v4189_v30 = vld [vmem:[#allocation2 + $0xb8] sm:$0xff]  ;;  %v4361_v15 = vpop.f32.mrf.mxu1 }
 0x98c   :  { %4316 = vmatmul.f32.gmra.mxu2 %v4176_v43  ;;  %4434 = vmatmul.f32.gmra.mxu3 %v4176_v43 }
 0x98e   :  { %8546 = vmatmul.msk.f32.gmra.mxu1 %vm341_vm3, %v4187_v49  ;;  %8560 = vmatmul.msk.f32.gmra.mxu0 %vm341_vm3, %v4187_v49  ;;  %v4364_v41 = vpop.f32.mrf.mxu1 }
 0x994   :  { %4319 = vmatmul.f32.gmra.mxu2 %v4178_v3  ;;  %4437 = vmatmul.f32.gmra.mxu3 %v4178_v3 }
 0x996   :  { %8547 = vmatmul.msk.f32.gmra.mxu1 %vm341_vm3, %v4189_v30  ;;  %8561 = vmatmul.msk.f32.gmra.mxu0 %vm341_vm3, %v4189_v30  ;;  %v4367_v12 = vpop.f32.mrf.mxu1 }
 0x99c   :  { %4322 = vmatmul.f32.gmra.mxu2 %v4180_v52  ;;  %4440 = vmatmul.f32.gmra.mxu3 %v4180_v52 }
 0x99e   :  { %8548 = vmatmul.msk.f32.gmra.mxu1 %vm341_vm3, %v4191_v51  ;;  %8562 = vmatmul.msk.f32.gmra.mxu0 %vm341_vm3, %v4191_v51  ;;  %v4370_v61 = vpop.f32.mrf.mxu1 }
 0x9a6   :  { %8549 = vmatmul.msk.f32.gmra.mxu1 %vm341_vm3, %v4193_v19  ;;  %8563 = vmatmul.msk.f32.gmra.mxu0 %vm341_vm3, %v4193_v19  ;;  %v4073_v46 = vpop.permute.xlu2 %4072  ;;  %v4373_v50 = vpop.f32.mrf.mxu1 }
 0x9a7   :  { %4105 = vst.msk [vmem:[#allocation2 + $0x90] sm:$0xff] %vm412_vm4, %v4073_v46  ;;  %v13096_v19 = vpop.f32.mrf.mxu0 }
 0x9ae   :  { %v4184_v27 = vld [vmem:[#allocation2 + $0x90] sm:$0xff]  ;;  %v4376_v49 = vpop.f32.mrf.mxu1 }
 0x9b6   :  { %v4379_v46 = vpop.f32.mrf.mxu1 }
 0x9bf   :  { %v4079_v34 = vpop.permute.xlu2 %4078 }
 0x9c0   :  { %4108 = vst.msk [vmem:[#allocation2 + $0xc0] sm:$0xff] %vm412_vm4, %v4079_v34 }
 0x9c6   :  { %v4075_v25 = vpop.permute.xlu0 %4074 }
 0x9c7   :  { %4106 = vst.msk [vmem:[#allocation2 + $0xa0] sm:$0xff] %vm412_vm4, %v4075_v25  ;;  %v4190_v39 = vld [vmem:[#allocation2 + $0xc0] sm:$0xff] }
 0x9ce   :  { %v4081_v62 = vpop.permute.xlu0 %4080  ;;  %v4186_v45 = vld [vmem:[#allocation2 + $0xa0] sm:$0xff] }
 0x9cf   :  { %4109 = vst.msk [vmem:[#allocation2 + $0xd0] sm:$0xff] %vm412_vm4, %v4081_v62 }
 0x9d6   :  { %v4192_v36 = vld [vmem:[#allocation2 + $0xd0] sm:$0xff] }
 0x9db   :  { %v4071_v20 = vpop.permute.xlu1 %4070 }
 0x9dc   :  { %4104 = vst.msk [vmem:[#allocation2 + $0x80] sm:$0xff] %vm412_vm4, %v4071_v20 }
 0x9e3   :  { %v4182_v63 = vld [vmem:[#allocation2 + $0x80] sm:$0xff] }
 0x9e4   :  { %4325 = vmatmul.f32.gmra.mxu2 %v4182_v63  ;;  %4443 = vmatmul.f32.gmra.mxu3 %v4182_v63 }
 0x9e7   :  { %v4302_v1 = vpop.f32.mrf.mxu2  ;;  %v13100_v62 = vpop.f32.mrf.mxu3 }
 0x9e8   :  { %v13068_v24 = vadd.f32 %v4361_v15, %v4302_v1  ;;  %v4482_v1 = vpop.f32.mrf.mxu0 }
 0x9ea   :  { %4563 = vrot.lane.b32.xlu1 %v13068_v24, %s8946_s19 }
 0x9eb   :  { %v4077_v23 = vpop.permute.xlu1 %4076 }
 0x9ec   :  { %4107 = vst.msk [vmem:[#allocation2 + $0xb0] sm:$0xff] %vm412_vm4, %v4077_v23  ;;  %4328 = vmatmul.f32.gmra.mxu2 %v4184_v27  ;;  %4446 = vmatmul.f32.gmra.mxu3 %v4184_v27 }
 0x9ef   :  { %v4305_v14 = vpop.f32.mrf.mxu2  ;;  %v4423_v27 = vpop.f32.mrf.mxu3 }
 0x9f0   :  { %v13073_v5 = vadd.f32 %v4364_v41, %v4305_v14 }
 0x9f2   :  { %4565 = vrot.lane.b32.xlu2 %v13073_v5, %s8946_s19  ;;  %v4522_v2 = vrot.slane %v13073_v5, 1 }
 0x9f3   :  { %v4188_v58 = vld [vmem:[#allocation2 + $0xb0] sm:$0xff]  ;;  %v4382_v63 = vpop.f32.mrf.mxu1 }
 0x9f4   :  { %4331 = vmatmul.f32.gmra.mxu2 %v4186_v45  ;;  %4449 = vmatmul.f32.gmra.mxu3 %v4186_v45 }
 0x9f7   :  { %v4308_v0 = vpop.f32.mrf.mxu2  ;;  %v4426_v14 = vpop.f32.mrf.mxu3 }
 0x9f8   :  { %v4368_v21 = vadd.f32 %v4367_v12, %v4308_v0  ;;  %v4485_v12 = vpop.f32.mrf.mxu0 }
 0x9fa   :  { %v4523_v37 = vrot.slane %v4368_v21, 1  ;;  %4567 = vrot.lane.b32.xlu0 %v4368_v21, %s8946_s19 }
 0x9fc   :  { %4334 = vmatmul.f32.gmra.mxu2 %v4188_v58  ;;  %4452 = vmatmul.f32.gmra.mxu3 %v4188_v58  ;;  %v13081_v60 = vsel %vm441_vm1, %v4522_v2, %v4523_v37  ;;  %v13115_v58 = vadd.f32 %v4482_v1, %v4423_v27 }
 0x9ff   :  { %v4311_v29 = vpop.f32.mrf.mxu2  ;;  %v4429_v45 = vpop.f32.mrf.mxu3 }
 0xa00   :  { %v4371_v17 = vadd.f32 %v4370_v61, %v4311_v29  ;;  %v4488_v5 = vpop.f32.mrf.mxu0  ;;  %v4486_v61 = vadd.f32 %v4485_v12, %v4426_v14  ;;  %v16250_v29 = vrot.slane %v13068_v24, 1 }
 0xa02   :  { %v4524_v18 = vrot.slane %v4371_v17, 1  ;;  %4569 = vrot.lane.b32.xlu1 %v4371_v17, %s8946_s19  ;;  %v4621_v17 = vrot.slane %v4486_v61, 7 }
 0xa04   :  { %4337 = vmatmul.f32.gmra.mxu2 %v4190_v39  ;;  %4455 = vmatmul.f32.gmra.mxu3 %v4190_v39  ;;  %v13086_v13 = vsel %vm441_vm1, %v4523_v37, %v4524_v18 }
 0xa07   :  { %v4314_v9 = vpop.f32.mrf.mxu2  ;;  %v4432_v21 = vpop.f32.mrf.mxu3 }
 0xa08   :  { %v4374_v33 = vadd.f32 %v4373_v50, %v4314_v9  ;;  %v4491_v0 = vpop.f32.mrf.mxu0  ;;  %v16249_v50 = vrot.slane %v13115_v58, 7  ;;  %v4547_v9 = vsel %vm441_vm1, %v16250_v29, %v4522_v2 }
 0xa09   :  { %v4492_v12 = vadd.f32 %v4491_v0, %v4432_v21 }
 0xa0a   :  { %v4525_v55 = vrot.slane %v4374_v33, 1  ;;  %4571 = vrot.lane.b32.xlu2 %v4374_v33, %s8946_s19  ;;  %v13126_v33 = vld [vmem:[%s16149_s6 + $0x6] ss:$0 sm:$0xff] }
 0xa0c   :  { %4340 = vmatmul.f32.gmra.mxu2 %v4192_v36  ;;  %4458 = vmatmul.f32.gmra.mxu3 %v4192_v36  ;;  %v4544_v43 = vsel %vm441_vm1, %v4524_v18, %v4525_v55  ;;  %v4644_v36 = vsel %vm277_vm2, %v16249_v50, %v4621_v17 }
 0xa0f   :  { %v4317_v3 = vpop.f32.mrf.mxu2  ;;  %v4435_v18 = vpop.f32.mrf.mxu3 }
 0xa10   :  { %v4377_v30 = vadd.f32 %v4376_v49, %v4317_v3  ;;  %v4494_v37 = vpop.f32.mrf.mxu0 }
 0xa11   :  { %v13141_v1 = vadd.f32 %v4494_v37, %v4435_v18 }
 0xa12   :  { %v4526_v52 = vrot.slane %v4377_v30, 1  ;;  %4573 = vrot.lane.b32.xlu1 %v4377_v30, %s8946_s19 }
 0xa13   :  { %v16258_v14 = vrot.slane %v13141_v1, 7 }
 0xa14   :  { %v13094_v51 = vsel %vm441_vm1, %v4525_v55, %v4526_v52 }
 0xa17   :  { %v4320_v34 = vpop.f32.mrf.mxu2 }
 0xa18   :  { %v13098_v25 = vadd.f32 %v4379_v46, %v4320_v34  ;;  %v4497_v30 = vpop.f32.mrf.mxu0  ;;  %v4438_v46 = vpop.f32.mrf.mxu3 }
 0xa1a   :  { %v16251_v15 = vrot.slane %v13098_v25, 1  ;;  %4575 = vrot.lane.b32.xlu2 %v13098_v25, %s8946_s19 }
 0xa1c   :  { %v13109_v20 = vsel %vm441_vm1, %v4526_v52, %v16251_v15 }
 0xa1f   :  { %v4323_v41 = vpop.f32.mrf.mxu2 }
 0xa20   :  { %v13111_v23 = vadd.f32 %v4382_v63, %v4323_v41  ;;  %v4500_v63 = vpop.f32.mrf.mxu0  ;;  %v13139_v41 = vpop.f32.mrf.mxu1 }
 0xa21   :  { %v4441_v27 = vpop.f32.mrf.mxu3 }
 0xa22   :  { %4577 = vrot.lane.b32.xlu1 %v13111_v23, %s8946_s19 }
 0xa28   :  { %v4503_v61 = vpop.f32.mrf.mxu0 }
 0xa4c   :  { %v4566_v39 = vpop.permute.xlu2 %4565 }
 0xa4d   :  { %v4606_v55 = vadd.f32 %v4566_v39, %v4547_v9 }
 0xa4f   :  { %v4648_v49 = vadd.f32 %v4644_v36, %v4606_v55  ;;  %v4489_v55 = vadd.f32 %v4488_v5, %v4429_v45  ;;  %v4388_v36 = vpop.f32.mrf.mxu1 }
 0xa51   :  { %v4667_v3 = vadd.f32 %v13126_v33, %v4648_v49  ;;  %v4622_v18 = vrot.slane %v4489_v55, 7 }
 0xa53   :  { %v4681_v52 = vadd.f32 %v4667_v3, %v11863_v54  ;;  %v4623_v54 = vrot.slane %v4492_v12, 7  ;;  %v4643_v45 = vsel %vm277_vm2, %v4621_v17, %v4622_v18  ;;  %v13168_v17 = vadd.f32 %v4500_v63, %v4441_v27 }
 0xa55   :  { %v4695_v34 = vmax.f32 %v4681_v52, 0.0  ;;  %v4641_v49 = vsel %vm277_vm2, %v4623_v54, %v16258_v14  ;;  %v4642_v63 = vsel %vm277_vm2, %v4622_v18, %v4623_v54 }
 0xa57   :  { %v13135_v2 = vmul.f32 %v4695_v34, %v9186_v47 }
 0xa59   :  { %16447 = vst [vmem:[#allocation16_spill] sm:$0xff] %v13135_v2  ;;  %4794 = vrot.lane.b32.xlu2 %v13135_v2, %s8946_s19 }
 0xa5c   :  { %v13150_v34 = vpop.permute.xlu1 %4563 }
 0xa64   :  { %v4572_v39 = vpop.permute.xlu2 %4571 }
 0xa65   :  { %v4609_v9 = vadd.f32 %v4572_v39, %v4544_v43  ;;  %v4506_v43 = vpop.f32.mrf.mxu0 }
 0xa67   :  { %v13148_v3 = vpop.f32.mrf.mxu2  ;;  %v4444_v52 = vpop.f32.mrf.mxu3  ;;  %v4651_v37 = vadd.f32 %v4641_v49, %v4609_v9 }
 0xa68   :  { %v13154_v5 = vadd.f32 %v4503_v61, %v4444_v52  ;;  %v4391_v49 = vpop.f32.mrf.mxu1  ;;  %v16448_v52 = vld [vmem:[#allocation17_spill] sm:$0xff] }
 0xa69   :  { %v4670_v0 = vadd.f32 %v13126_v33, %v4651_v37 }
 0xa6b   :  { %v4684_v15 = vadd.f32 %v4670_v0, %v12015_v44  ;;  %v13180_v0 = vadd.f32 %v4497_v30, %v4438_v46 }
 0xa6c   :  { %v4568_v21 = vpop.permute.xlu0 %4567 }
 0xa6d   :  { %v4607_v12 = vadd.f32 %v4568_v21, %v13081_v60  ;;  %v16257_v60 = vrot.slane %v13154_v5, 7 }
 0xa6f   :  { %v4649_v39 = vadd.f32 %v4643_v45, %v4607_v12  ;;  %v4329_v50 = vpop.f32.mrf.mxu2  ;;  %v4447_v29 = vpop.f32.mrf.mxu3  ;;  %v4698_v12 = vmax.f32 %v4684_v15, 0.0  ;;  %v16256_v15 = vrot.slane %v13168_v17, 7 }
 0xa70   :  { %v13159_v9 = vadd.f32 %v4388_v36, %v4329_v50  ;;  %v13161_v55 = vadd.f32 %v4506_v43, %v4447_v29 }
 0xa71   :  { %v4668_v37 = vadd.f32 %v13126_v33, %v4649_v39 }
 0xa72   :  { %v16252_v61 = vrot.slane %v13161_v55, 7  ;;  %4581 = vrot.lane.b32.xlu2 %v13159_v9, %s8946_s19 }
 0xa73   :  { %v4682_v21 = vadd.f32 %v4668_v37, %v16448_v52  ;;  %v16253_v37 = vrot.slane %v13135_v2, 7  ;;  %v16254_v52 = vrot.slane %v13135_v2, 1 }
 0xa74   :  { %v4570_v44 = vpop.permute.xlu1 %4569  ;;  %v13177_v29 = vsel %vm277_vm2, %v16257_v60, %v16252_v61  ;;  %v4576_v27 = vpop.permute.xlu2 %4575 }
 0xa75   :  { %v4696_v50 = vmax.f32 %v4682_v21, 0.0  ;;  %v4608_v36 = vadd.f32 %v4570_v44, %v13086_v13  ;;  %v13191_v13 = vmul.f32 %v4698_v12, %v16384_v10  ;;  %v4611_v46 = vadd.f32 %v4576_v27, %v13109_v20  ;;  %v16451_v12 = vld [vmem:[#allocation11_spill] sm:$0xff] }
 0xa76   :  { %v4625_v44 = vrot.slane %v13180_v0, 7 }
 0xa77   :  { %v4650_v43 = vadd.f32 %v4642_v63, %v4608_v36  ;;  %v13186_v45 = vmul.f32 %v4696_v50, %v9204_v53  ;;  %v4332_v39 = vpop.f32.mrf.mxu2  ;;  %16450 = vst [vmem:[#allocation15_spill] sm:$0xff] %v13191_v13  ;;  %v16255_v50 = vrot.slane %v13159_v9, 1 }
 0xa78   :  { %v4392_v21 = vadd.f32 %v4391_v49, %v4332_v39  ;;  %v4394_v49 = vpop.f32.mrf.mxu1  ;;  %v4639_v0 = vsel %vm277_vm2, %v4625_v44, %v16256_v15 }
 0xa79   :  { %16449 = vst [vmem:[#allocation14_spill] sm:$0xff] %v13186_v45  ;;  %v4669_v30 = vadd.f32 %v13126_v33, %v4650_v43  ;;  %v4724_v54 = vrot.slane %v13186_v45, 7  ;;  %v4850_v18 = vrot.slane %v13186_v45, 1  ;;  %4796 = vrot.lane.b32.xlu1 %v13186_v45, %s8946_s19  ;;  %v4653_v61 = vadd.f32 %v4639_v0, %v4611_v46 }
 0xa7a   :  { %v4531_v36 = vrot.slane %v4392_v21, 1  ;;  %4800 = vrot.lane.b32.xlu2 %v13191_v13, %s8946_s19  ;;  %v16261_v46 = vrot.slane %v13191_v13, 7 }
 0xa7b   :  { %v4683_v63 = vadd.f32 %v4669_v30, %v16451_v12  ;;  %v4873_v20 = vsel %vm441_vm1, %v16254_v52, %v4850_v18  ;;  %v4747_v27 = vsel %vm277_vm2, %v16253_v37, %v4724_v54  ;;  %v8611_v37 = vld [vmem:[%s16151_s5 + $0xa70] sm:$0xff]  ;;  %v8612_v52 = vld [vmem:[%s16151_s5 + $0xa78] sm:$0xff]  ;;  %v4672_v0 = vadd.f32 %v13126_v33, %v4653_v61 }
 0xa7c   :  { %v4877_v43 = vmul.f32 %v4873_v20, %v9633_v28  ;;  %v4752_v39 = vmul.f32 %v4747_v27, %v9210_v59  ;;  %v13222_v30 = vsel %vm441_vm1, %v16255_v50, %v4531_v36  ;;  %5090 = vmatpush.msrb.mxu1 %v8611_v37  ;;  %5208 = vmatpush.msrb.mxu0 %v8612_v52  ;;  %v16259_v50 = vrot.slane %v13191_v13, 1  ;;  %v8609_v37 = vld [vmem:[%s16151_s5 + $0xa60] sm:$0xff]  ;;  %v8610_v52 = vld [vmem:[%s16151_s5 + $0xa68] sm:$0xff] }
 0xa7d   :  { %v4697_v12 = vmax.f32 %v4683_v63, 0.0 }
 0xa7e   :  { %4891 = vst.msk [vmem:[#allocation2 + $0x18] sm:$0xff] %vm341_vm3, %v4877_v43  ;;  %5091 = vmatpush.msrb.mxu1 %v8609_v37  ;;  %5209 = vmatpush.msrb.mxu0 %v8610_v52 }
 0xa7f   :  { %v4335_v20 = vpop.f32.mrf.mxu2  ;;  %v13232_v27 = vmul.f32 %v4697_v12, %v9225_v7  ;;  %4766 = vst.msk [vmem:[#allocation2 + $0x20] sm:$0xff] %vm341_vm3, %v4752_v39 }
 0xa80   :  { %v13236_v63 = vadd.f32 %v4394_v49, %v4335_v20  ;;  %v4397_v14 = vpop.f32.mrf.mxu1 }
 0xa81   :  { %16452 = vst [vmem:[#allocation13_spill] sm:$0xff] %v13232_v27  ;;  %4583 = vrot.lane.b32.xlu1 %v4392_v21, %s8946_s19  ;;  %v4725_v43 = vrot.slane %v13232_v27, 7  ;;  %v4851_v39 = vrot.slane %v13232_v27, 1 }
 0xa82   :  { %v16454_v45 = vrot.slane %v13236_v63, 1 }
 0xa83   :  { %v4871_v61 = vsel %vm441_vm1, %v4851_v39, %v16259_v50  ;;  %v4872_v21 = vsel %vm441_vm1, %v4850_v18, %v4851_v39  ;;  %v4745_v12 = vsel %vm277_vm2, %v4725_v43, %v16261_v46  ;;  %v4746_v20 = vsel %vm277_vm2, %v4724_v54, %v4725_v43  ;;  %v16453_v50 = vld [vmem:[#allocation20_spill] sm:$0xff] }
 0xa84   :  { %v4574_v15 = vpop.permute.xlu1 %4573  ;;  %v4878_v37 = vmul.f32 %v4872_v21, %v9163_v38  ;;  %v4879_v52 = vmul.f32 %v4871_v61, %v9167_v40  ;;  %v4754_v60 = vmul.f32 %v4745_v12, %v9273_v35  ;;  %v4686_v49 = vadd.f32 %v4672_v0, %v16453_v50  ;;  %v8607_v61 = vld [vmem:[%s16151_s5 + $0xa50] sm:$0xff]  ;;  %v8604_v0 = vld [vmem:[%s16151_s5 + $0xa38] sm:$0xff] }
 0xa85   :  { %v4610_v18 = vadd.f32 %v4574_v15, %v13094_v51  ;;  %v4753_v39 = vmul.f32 %v4746_v20, %v9229_v11  ;;  %v13272_v46 = vsel %vm441_vm1, %v4531_v36, %v16454_v45  ;;  %v16455_v54 = vrot.slane %v13141_v1, 7  ;;  %v8608_v51 = vld [vmem:[%s16151_s5 + $0xa58] sm:$0xff]  ;;  %v8605_v15 = vld [vmem:[%s16151_s5 + $0xa40] sm:$0xff]  ;;  %5092 = vmatpush.msrb.mxu1 %v8607_v61  ;;  %v8606_v1 = vld [vmem:[%s16151_s5 + $0xa48] sm:$0xff] }
 0xa86   :  { %4892 = vst.msk [vmem:[#allocation2 + $0x28] sm:$0xff] %vm341_vm3, %v4878_v37  ;;  %5210 = vmatpush.msrb.mxu0 %v8608_v51  ;;  %v8603_v36 = vld [vmem:[%s16151_s5 + $0xa30] sm:$0xff]  ;;  %v4700_v21 = vmax.f32 %v4686_v49, 0.0  ;;  %v8602_v20 = vld [vmem:[%s16151_s5 + $0xa28] sm:$0xff]  ;;  %v8597_v61 = vld [vmem:[%s16151_s5 + $0xa00] sm:$0xff] }
 0xa87   :  { %v4640_v43 = vsel %vm277_vm2, %v16455_v54, %v4625_v44  ;;  %v4338_v50 = vpop.f32.mrf.mxu2  ;;  %4893 = vst.msk [vmem:[#allocation2 + $0x38] sm:$0xff] %vm341_vm3, %v4879_v52  ;;  %5093 = vmatpush.msrb.mxu1 %v8605_v15  ;;  %v16456_v37 = vld [vmem:[#allocation9_spill] sm:$0xff]  ;;  %v8600_v52 = vld [vmem:[%s16151_s5 + $0xa18] sm:$0xff]  ;;  %v13323_v54 = vadd.f32 %v13096_v19, %v13100_v62 }
 0xa88   :  { %v4652_v45 = vadd.f32 %v4640_v43, %v4610_v18  ;;  %v13292_v44 = vadd.f32 %v4397_v14, %v4338_v50  ;;  %4768 = vst.msk [vmem:[#allocation2 + $0x40] sm:$0xff] %vm341_vm3, %v4754_v60  ;;  %5211 = vmatpush.msrb.mxu0 %v8606_v1  ;;  %v8601_v14 = vld [vmem:[%s16151_s5 + $0xa20] sm:$0xff]  ;;  %v8599_v49 = vld [vmem:[%s16151_s5 + $0xa10] sm:$0xff]  ;;  %v16262_v43 = vrot.slane %v13111_v23, 1  ;;  %v4400_v51 = vpop.f32.mrf.mxu1  ;;  %v8598_v50 = vld [vmem:[%s16151_s5 + $0xa08] sm:$0xff] }
 0xa89   :  { %4767 = vst.msk [vmem:[#allocation2 + $0x30] sm:$0xff] %vm341_vm3, %v4753_v39  ;;  %5094 = vmatpush.msrb.mxu1 %v8603_v36  ;;  %v13319_v39 = vmul.f32 %v4700_v21, %v9206_v56  ;;  %v4619_v21 = vrot.slane %v13323_v54, 7 }
 0xa8a   :  { %v4671_v12 = vadd.f32 %v13126_v33, %v4652_v45  ;;  %4587 = vrot.lane.b32.xlu2 %v13292_v44, %s8946_s19  ;;  %5212 = vmatpush.msrb.mxu0 %v8604_v0 }
 0xa8b   :  { %5095 = vmatpush.msrb.mxu1 %v8601_v14  ;;  %16457 = vst [vmem:[#allocation4_spill] sm:$0xff] %v13319_v39  ;;  %v4728_v36 = vrot.slane %v13319_v39, 7  ;;  %v4854_v0 = vrot.slane %v13319_v39, 1  ;;  %v16459_v14 = vrot.slane %v13098_v25, 1 }
 0xa8c   :  { %v4685_v60 = vadd.f32 %v4671_v12, %v16456_v37  ;;  %5213 = vmatpush.msrb.mxu0 %v8602_v20  ;;  %v16460_v37 = vrot.slane %v13191_v13, 1 }
 0xa8d   :  { %5096 = vmatpush.msrb.mxu1 %v8599_v49  ;;  %v4541_v20 = vsel %vm441_vm1, %v16459_v14, %v16262_v43  ;;  %v16463_v43 = vrot.slane %v13115_v58, 7 }
 0xa8e   :  { %v4699_v18 = vmax.f32 %v4685_v60, 0.0  ;;  %5214 = vmatpush.msrb.mxu0 %v8600_v52  ;;  %v16461_v52 = vrot.slane %v13191_v13, 7 }
 0xa8f   :  { %v4341_v45 = vpop.f32.mrf.mxu2  ;;  %5097 = vmatpush.msrb.mxu1 %v8597_v61  ;;  %v4533_v61 = vrot.slane %v13292_v44, 1  ;;  %v8594_v44 = vld [vmem:[%s16151_s5 + $0x9e8] sm:$0xff] }
 0xa90   :  { %v13330_v15 = vmul.f32 %v4699_v18, %v9227_v8  ;;  %v4401_v1 = vadd.f32 %v4400_v51, %v4341_v45  ;;  %5215 = vmatpush.msrb.mxu0 %v8598_v50  ;;  %v16462_v45 = vrot.slane %v13068_v24, 1  ;;  %v16464_v24 = vrot.slane %v13154_v5, 7 }
 0xa92   :  { %16458 = vst [vmem:[#allocation5_spill] sm:$0xff] %v13330_v15  ;;  %v4727_v19 = vrot.slane %v13330_v15, 7  ;;  %v4853_v62 = vrot.slane %v13330_v15, 1  ;;  %4802 = vrot.lane.b32.xlu1 %v13330_v15, %s8946_s19  ;;  %v4534_v12 = vrot.slane %v4401_v1, 1  ;;  %4589 = vrot.lane.b32.xlu0 %v4401_v1, %s8946_s19 }
 0xa94   :  { %v4870_v60 = vsel %vm441_vm1, %v16460_v37, %v4853_v62  ;;  %v4869_v49 = vsel %vm441_vm1, %v4853_v62, %v4854_v0  ;;  %v4744_v18 = vsel %vm277_vm2, %v16461_v52, %v4727_v19  ;;  %v4743_v25 = vsel %vm277_vm2, %v4727_v19, %v4728_v36  ;;  %v4578_v1 = vpop.permute.xlu1 %4577 }
 0xa95   :  { %v4880_v51 = vmul.f32 %v4870_v60, %v9265_v32  ;;  %v4548_v50 = vsel %vm441_vm1, %v4534_v12, %v16462_v45  ;;  %v4881_v62 = vmul.f32 %v4869_v49, %v9307_v4  ;;  %v4612_v37 = vadd.f32 %v4578_v1, %v4541_v20  ;;  %v16467_v45 = vld [vmem:[#allocation3_spill] sm:$0xff] }
 0xa96   :  { %v4605_v14 = vadd.f32 %v13150_v34, %v4548_v50  ;;  %v4755_v52 = vmul.f32 %v4744_v18, %v9313_v16  ;;  %v4645_v19 = vsel %vm277_vm2, %v4619_v21, %v16463_v43  ;;  %v16465_v60 = vrot.slane %v13168_v17, 7  ;;  %v16466_v43 = vld [vmem:[#allocation21_spill] sm:$0xff] }
 0xa97   :  { %4894 = vst.msk [vmem:[#allocation2 + $0x48] sm:$0xff] %vm341_vm3, %v4880_v51  ;;  %v13387_v34 = vsel %vm441_vm1, %v4533_v61, %v4534_v12  ;;  %v4756_v58 = vmul.f32 %v4743_v25, %v9373_v26 }
 0xa98   :  { %v4638_v49 = vsel %vm277_vm2, %v16465_v60, %v16464_v24  ;;  %v4647_v20 = vadd.f32 %v4645_v19, %v4605_v14  ;;  %4895 = vst.msk [vmem:[#allocation2 + $0x58] sm:$0xff] %vm341_vm3, %v4881_v62  ;;  %v16470_v24 = vrot.slane %v13135_v2, 1 }
 0xa99   :  { %v4654_v18 = vadd.f32 %v4638_v49, %v4612_v37  ;;  %4769 = vst.msk [vmem:[#allocation2 + $0x50] sm:$0xff] %vm341_vm3, %v4755_v52  ;;  %v16471_v49 = vrot.slane %v13135_v2, 7 }
 0xa9a   :  { %v4666_v17 = vadd.f32 %v13126_v33, %v4647_v20  ;;  %4770 = vst.msk [vmem:[#allocation2 + $0x60] sm:$0xff] %vm341_vm3, %v4756_v58 }
 0xa9b   :  { %v4673_v5 = vadd.f32 %v13126_v33, %v4654_v18 }
 0xa9c   :  { %v4680_v50 = vadd.f32 %v4666_v17, %v16467_v45  ;;  %v13438_v45 = vadd.f32 %v13139_v41, %v13148_v3  ;;  %v4907_v41 = vld [vmem:[#allocation2 + $0x18] sm:$0xff]  ;;  %v4450_v3 = vpop.f32.mrf.mxu3 }
 0xa9d   :  { %v4687_v51 = vadd.f32 %v4673_v5, %v16466_v43 }
 0xa9e   :  { %v4694_v1 = vmax.f32 %v4680_v50, 0.0  ;;  %v4909_v50 = vld [vmem:[#allocation2 + $0x28] sm:$0xff] }
 0xa9f   :  { %v4701_v12 = vmax.f32 %v4687_v51, 0.0 }
 0xaa0   :  { %v13401_v14 = vmul.f32 %v4694_v1, %v9172_v42  ;;  %v4911_v1 = vld [vmem:[#allocation2 + $0x38] sm:$0xff] }
 0xaa1   :  { %v13398_v25 = vmul.f32 %v4701_v12, %v9172_v42  ;;  %v4509_v12 = vpop.f32.mrf.mxu0 }
 0xaa2   :  { %16469 = vst [vmem:[#allocation17_spill] sm:$0xff] %v13401_v14  ;;  %4792 = vrot.lane.b32.xlu0 %v13401_v14, %s8946_s19  ;;  %v4722_v52 = vrot.slane %v13401_v14, 7  ;;  %v4848_v19 = vrot.slane %v13401_v14, 1 }
 0xaa3   :  { %16468 = vst [vmem:[#allocation7_spill] sm:$0xff] %v13398_v25  ;;  %v4729_v62 = vrot.slane %v13398_v25, 7  ;;  %v4855_v37 = vrot.slane %v13398_v25, 1  ;;  %4806 = vrot.lane.b32.xlu1 %v13398_v25, %s8946_s19 }
 0xaa4   :  { %v4874_v60 = vsel %vm441_vm1, %v4848_v19, %v16470_v24  ;;  %v4748_v58 = vsel %vm277_vm2, %v4722_v52, %v16471_v49  ;;  %v13458_v24 = vadd.f32 %v4509_v12, %v4450_v3  ;;  %v16474_v12 = vld [vmem:[#allocation8_spill] sm:$0xff] }
 0xaa5   :  { %v4868_v20 = vsel %vm441_vm1, %v4854_v0, %v4855_v37  ;;  %v4742_v18 = vsel %vm277_vm2, %v4728_v36, %v4729_v62  ;;  %v4876_v5 = vmul.f32 %v4874_v60, %v9617_v31  ;;  %v4751_v17 = vmul.f32 %v4748_v58, %v9188_v48  ;;  %v4453_v60 = vpop.f32.mrf.mxu3 }
 0xaa6   :  { %v4882_v43 = vmul.f32 %v4868_v20, %v9357_v57  ;;  %v4757_v51 = vmul.f32 %v4742_v18, %v9368_v22  ;;  %v4529_v58 = vrot.slane %v13438_v45, 1  ;;  %v4629_v20 = vrot.slane %v13458_v24, 7  ;;  %v8575_v24 = vld [vmem:[%s16151_s5 + $0x950] sm:$0xff] }
 0xaa7   :  { %4890 = vst.msk [vmem:[#allocation2 + $0x8] sm:$0xff] %vm341_vm3, %v4876_v5  ;;  %v16472_v5 = vrot.slane %v13159_v9, 1 }
 0xaa8   :  { %4765 = vst.msk [vmem:[#allocation2 + $0x10] sm:$0xff] %vm341_vm3, %v4751_v17 }
 0xaa9   :  { %4896 = vst.msk [vmem:[#allocation2 + $0x68] sm:$0xff] %vm341_vm3, %v4882_v43  ;;  %v4512_v49 = vpop.f32.mrf.mxu0  ;;  %v4539_v17 = vsel %vm441_vm1, %v4529_v58, %v16472_v5 }
 0xaaa   :  { %4579 = vrot.lane.b32.xlu0 %v13438_v45, %s8946_s19  ;;  %4771 = vst.msk [vmem:[#allocation2 + $0x70] sm:$0xff] %vm341_vm3, %v4757_v51  ;;  %v4913_v51 = vld [vmem:[#allocation2 + $0x48] sm:$0xff] }
 0xaad   :  { %v4456_v9 = vpop.f32.mrf.mxu3 }
 0xaae   :  { %v4905_v36 = vld [vmem:[#allocation2 + $0x8] sm:$0xff] }
 0xaaf   :  { %8613 = vmatmul.msk.f32.vlgmr.msrb.gmra.mxu1 %vm341_vm3, %v4905_v36  ;;  %8627 = vmatmul.msk.f32.vlgmr.msrb.gmra.mxu0 %vm341_vm3, %v4905_v36  ;;  %v16473_v36 = vrot.slane %v13161_v55, 7 }
 0xab2   :  { %4798 = vrot.lane.b32.xlu0 %v13232_v27, %s8946_s19  ;;  %v8677_v27 = vld [vmem:[%s16151_s5 + $0xb98] sm:$0xff] }
 0xab3   :  { %v4795_v0 = vpop.permute.xlu2 %4794 }
 0xab4   :  { %4835 = vst.msk [vmem:[#allocation2 + $0x10] sm:$0xff] %vm412_vm4, %v4795_v0  ;;  %v4636_v0 = vsel %vm277_vm2, %v16473_v36, %v4629_v20  ;;  %v4917_v36 = vld [vmem:[#allocation2 + $0x68] sm:$0xff] }
 0xab7   :  { %8614 = vmatmul.msk.f32.gmra.mxu1 %vm341_vm3, %v4907_v41  ;;  %8628 = vmatmul.msk.f32.gmra.mxu0 %vm341_vm3, %v4907_v41 }
 0xaba   :  { %4585 = vrot.lane.b32.xlu0 %v13236_v63, %s8946_s19 }
 0xabb   :  { %v4906_v45 = vld [vmem:[#allocation2 + $0x10] sm:$0xff] }
 0xabf   :  { %8615 = vmatmul.msk.f32.gmra.mxu1 %vm341_vm3, %v4909_v50  ;;  %8629 = vmatmul.msk.f32.gmra.mxu0 %vm341_vm3, %v4909_v50  ;;  %v4515_v50 = vpop.f32.mrf.mxu0 }
 0xac2   :  { %4804 = vrot.lane.b32.xlu0 %v13319_v39, %s8946_s19 }
 0xac7   :  { %8616 = vmatmul.msk.f32.gmra.mxu1 %vm341_vm3, %v4911_v1  ;;  %8630 = vmatmul.msk.f32.gmra.mxu0 %vm341_vm3, %v4911_v1 }
 0xacc   :  { %v4582_v18 = vpop.permute.xlu2 %4581 }
 0xacd   :  { %v4614_v43 = vadd.f32 %v4582_v18, %v4539_v17  ;;  %v4915_v17 = vld [vmem:[#allocation2 + $0x58] sm:$0xff] }
 0xacf   :  { %8617 = vmatmul.msk.f32.gmra.mxu1 %vm341_vm3, %v4913_v51  ;;  %8631 = vmatmul.msk.f32.gmra.mxu0 %vm341_vm3, %v4913_v51  ;;  %v4656_v41 = vadd.f32 %v4636_v0, %v4614_v43  ;;  %v4459_v43 = vpop.f32.mrf.mxu3  ;;  %v4518_v51 = vpop.f32.mrf.mxu0 }
 0xad0   :  { %v13488_v0 = vadd.f32 %v4518_v51, %v4459_v43  ;;  %v8595_v43 = vld [vmem:[%s16151_s5 + $0x9f0] sm:$0xff] }
 0xad1   :  { %v4675_v3 = vadd.f32 %v13126_v33, %v4656_v41  ;;  %v13492_v41 = vadd.f32 %v4515_v50, %v4456_v9  ;;  %v8596_v9 = vld [vmem:[%s16151_s5 + $0x9f8] sm:$0xff]  ;;  %v8593_v50 = vld [vmem:[%s16151_s5 + $0x9e0] sm:$0xff]  ;;  %5023 = vmatpush.msra.mxu2 %v8595_v43  ;;  %v8591_v51 = vld [vmem:[%s16151_s5 + $0x9d0] sm:$0xff] }
 0xad2   :  { %5141 = vmatpush.msrb.mxu3 %v8596_v9  ;;  %v8590_v9 = vld [vmem:[%s16151_s5 + $0x9c8] sm:$0xff] }
 0xad3   :  { %v4689_v1 = vadd.f32 %v4675_v3, %v16474_v12  ;;  %v4632_v3 = vrot.slane %v13488_v0, 7  ;;  %v4631_v12 = vrot.slane %v13492_v41, 7  ;;  %5024 = vmatpush.msra.mxu2 %v8593_v50  ;;  %v13535_v50 = vadd.f32 %v4512_v49, %v4453_v60  ;;  %v8586_v60 = vld [vmem:[%s16151_s5 + $0x9a8] sm:$0xff] }
 0xad4   :  { %v4801_v18 = vpop.permute.xlu2 %4800  ;;  %5142 = vmatpush.msrb.mxu3 %v8594_v44  ;;  %v8587_v44 = vld [vmem:[%s16151_s5 + $0x9b0] sm:$0xff] }
 0xad5   :  { %v4703_v5 = vmax.f32 %v4689_v1, 0.0  ;;  %4838 = vst.msk [vmem:[#allocation2 + $0x40] sm:$0xff] %vm412_vm4, %v4801_v18  ;;  %v16476_v18 = vrot.slane %v13236_v63, 1  ;;  %v4633_v63 = vsel %vm277_vm2, %v4631_v12, %v4632_v3  ;;  %5025 = vmatpush.msra.mxu2 %v8591_v51  ;;  %v8585_v51 = vld [vmem:[%s16151_s5 + $0x9a0] sm:$0xff] }
 0xad7   :  { %8618 = vmatmul.msk.f32.gmra.mxu1 %vm341_vm3, %v4915_v17  ;;  %8632 = vmatmul.msk.f32.gmra.mxu0 %vm341_vm3, %v4915_v17  ;;  %v13484_v55 = vmul.f32 %v4703_v5, %v9204_v53  ;;  %v4536_v5 = vsel %vm441_vm1, %v16476_v18, %v4533_v61  ;;  %v16477_v18 = vld [vmem:[#allocation12_spill] sm:$0xff] }
 0xad9   :  { %16475 = vst [vmem:[#allocation11_spill] sm:$0xff] %v13484_v55  ;;  %4810 = vrot.lane.b32.xlu0 %v13484_v55, %s8946_s19 }
 0xadf   :  { %8619 = vmatmul.msk.f32.gmra.mxu1 %vm341_vm3, %v4917_v36  ;;  %8633 = vmatmul.msk.f32.gmra.mxu0 %vm341_vm3, %v4917_v36  ;;  %v8592_v36 = vld [vmem:[%s16151_s5 + $0x9d8] sm:$0xff] }
 0xae0   :  { %5143 = vmatpush.msrb.mxu3 %v8592_v36  ;;  %v8583_v36 = vld [vmem:[%s16151_s5 + $0x990] sm:$0xff] }
 0xae2   :  { %5144 = vmatpush.msrb.mxu3 %v8590_v9  ;;  %v8579_v9 = vld [vmem:[%s16151_s5 + $0x970] sm:$0xff] }
 0xae4   :  { %v4588_v1 = vpop.permute.xlu2 %4587 }
 0xae5   :  { %v4617_v17 = vadd.f32 %v4588_v1, %v4536_v5 }
 0xae7   :  { %v4659_v61 = vadd.f32 %v4633_v63, %v4617_v17  ;;  %v8589_v17 = vld [vmem:[%s16151_s5 + $0x9c0] sm:$0xff] }
 0xae8   :  { %5026 = vmatpush.msra.mxu2 %v8589_v17 }
 0xae9   :  { %v4678_v1 = vadd.f32 %v13126_v33, %v4659_v61  ;;  %v8588_v61 = vld [vmem:[%s16151_s5 + $0x9b8] sm:$0xff] }
 0xaea   :  { %5027 = vmatpush.msra.mxu2 %v8587_v44  ;;  %5145 = vmatpush.msrb.mxu3 %v8588_v61 }
 0xaeb   :  { %v4692_v5 = vadd.f32 %v4678_v1, %v16477_v18  ;;  %v4797_v43 = vpop.permute.xlu1 %4796  ;;  %v8584_v1 = vld [vmem:[%s16151_s5 + $0x998] sm:$0xff]  ;;  %v4630_v18 = vrot.slane %v13535_v50, 7 }
 0xaec   :  { %4836 = vst.msk [vmem:[#allocation2 + $0x20] sm:$0xff] %vm412_vm4, %v4797_v43  ;;  %5028 = vmatpush.msra.mxu2 %v8585_v51  ;;  %5146 = vmatpush.msrb.mxu3 %v8586_v60  ;;  %v8582_v43 = vld [vmem:[%s16151_s5 + $0x988] sm:$0xff]  ;;  %v8577_v60 = vld [vmem:[%s16151_s5 + $0x960] sm:$0xff] }
 0xaed   :  { %v4706_v63 = vmax.f32 %v4692_v5, 0.0  ;;  %v8581_v5 = vld [vmem:[%s16151_s5 + $0x980] sm:$0xff]  ;;  %v4635_v61 = vsel %vm277_vm2, %v4629_v20, %v4630_v18  ;;  %v8576_v20 = vld [vmem:[%s16151_s5 + $0x958] sm:$0xff] }
 0xaee   :  { %5029 = vmatpush.msra.mxu2 %v8583_v36  ;;  %5147 = vmatpush.msrb.mxu3 %v8584_v1  ;;  %v8573_v1 = vld [vmem:[%s16151_s5 + $0x940] sm:$0xff] }
 0xaef   :  { %v13550_v49 = vmul.f32 %v4706_v63, %v9227_v8  ;;  %v8580_v63 = vld [vmem:[%s16151_s5 + $0x978] sm:$0xff] }
 0xaf0   :  { %5030 = vmatpush.msra.mxu2 %v8581_v5  ;;  %5148 = vmatpush.msrb.mxu3 %v8582_v43  ;;  %v16479_v5 = vld [vmem:[#allocation18_spill] sm:$0xff] }
 0xaf1   :  { %16478 = vst [vmem:[#allocation20_spill] sm:$0xff] %v13550_v49  ;;  %4816 = vrot.lane.b32.xlu0 %v13550_v49, %s8946_s19  ;;  %v4860_v54 = vrot.slane %v13550_v49, 1 }
 0xaf2   :  { %5031 = vmatpush.msra.mxu2 %v8579_v9  ;;  %5149 = vmatpush.msrb.mxu3 %v8580_v63  ;;  %v8571_v9 = vld [vmem:[%s16151_s5 + $0x930] sm:$0xff]  ;;  %v8572_v63 = vld [vmem:[%s16151_s5 + $0x938] sm:$0xff] }
 0xaf3   :  { %v4584_v17 = vpop.permute.xlu1 %4583 }
 0xaf4   :  { %v4615_v44 = vadd.f32 %v4584_v17, %v13222_v30  ;;  %v8578_v30 = vld [vmem:[%s16151_s5 + $0x968] sm:$0xff]  ;;  %5032 = vmatpush.msra.mxu2 %v8577_v60 }
 0xaf5   :  { %5150 = vmatpush.msrb.mxu3 %v8578_v30  ;;  %v8574_v17 = vld [vmem:[%s16151_s5 + $0x948] sm:$0xff]  ;;  %v4731_v30 = vrot.slane %v13484_v55, 7 }
 0xaf6   :  { %v4657_v51 = vadd.f32 %v4635_v61, %v4615_v44  ;;  %5033 = vmatpush.msra.mxu2 %v8575_v24  ;;  %v8569_v61 = vld [vmem:[%s16151_s5 + $0x920] sm:$0xff]  ;;  %v8570_v60 = vld [vmem:[%s16151_s5 + $0x928] sm:$0xff] }
 0xaf7   :  { %5151 = vmatpush.msrb.mxu3 %v8576_v20 }
 0xaf8   :  { %v4676_v36 = vadd.f32 %v13126_v33, %v4657_v51  ;;  %5034 = vmatpush.msra.mxu2 %v8573_v1  ;;  %v8567_v1 = vld [vmem:[%s16151_s5 + $0x910] sm:$0xff] }
 0xaf9   :  { %5152 = vmatpush.msrb.mxu3 %v8574_v17 }
 0xafa   :  { %v4690_v43 = vadd.f32 %v4676_v36, %v16479_v5  ;;  %5035 = vmatpush.msra.mxu2 %v8571_v9  ;;  %v4857_v36 = vrot.slane %v13484_v55, 1  ;;  %v8568_v5 = vld [vmem:[%s16151_s5 + $0x918] sm:$0xff] }
 0xafb   :  { %5153 = vmatpush.msrb.mxu3 %v8572_v63 }
 0xafc   :  { %v4704_v44 = vmax.f32 %v4690_v43, 0.0  ;;  %5036 = vmatpush.msra.mxu2 %v8569_v61  ;;  %v8566_v61 = vld [vmem:[%s16151_s5 + $0x908] sm:$0xff] }
 0xafd   :  { %5154 = vmatpush.msrb.mxu3 %v8570_v60 }
 0xafe   :  { %v13610_v51 = vmul.f32 %v4704_v44, %v9225_v7  ;;  %5037 = vmatpush.msra.mxu2 %v8567_v1  ;;  %v8565_v44 = vld [vmem:[%s16151_s5 + $0x900] sm:$0xff] }
 0xaff   :  { %5155 = vmatpush.msrb.mxu3 %v8568_v5  ;;  %v4646_v5 = vsel %vm277_vm2, %v4632_v3, %v4619_v21 }
 0xb00   :  { %16480 = vst [vmem:[#allocation9_spill] sm:$0xff] %v13610_v51  ;;  %4812 = vrot.lane.b32.xlu1 %v13610_v51, %s8946_s19  ;;  %v16263_v24 = vrot.slane %v13610_v51, 7  ;;  %v16264_v20 = vrot.slane %v13610_v51, 1  ;;  %5038 = vmatpush.msra.mxu2 %v8565_v44 }
 0xb01   :  { %5156 = vmatpush.msrb.mxu3 %v8566_v61 }
 0xb02   :  { %v4865_v43 = vsel %vm441_vm1, %v4857_v36, %v16264_v20  ;;  %v4739_v17 = vsel %vm277_vm2, %v4731_v30, %v16263_v24 }
 0xb03   :  { %v4885_v9 = vmul.f32 %v4865_v43, %v9163_v38  ;;  %v4760_v60 = vmul.f32 %v4739_v17, %v9229_v11 }
 0xb04   :  { %v4803_v63 = vpop.permute.xlu1 %4802  ;;  %v4590_v1 = vpop.permute.xlu0 %4589 }
 0xb05   :  { %4839 = vst.msk [vmem:[#allocation2 + $0x50] sm:$0xff] %vm412_vm4, %v4803_v63  ;;  %v4618_v43 = vadd.f32 %v4590_v1, %v13387_v34  ;;  %v16481_v63 = vld [vmem:[#allocation19_spill] sm:$0xff]  ;;  %v4734_v34 = vrot.slane %v13550_v49, 7 }
 0xb06   :  { %4899 = vst.msk [vmem:[#allocation2 + $0x98] sm:$0xff] %vm341_vm3, %v4885_v9 }
 0xb07   :  { %4774 = vst.msk [vmem:[#allocation2 + $0xa0] sm:$0xff] %vm341_vm3, %v4760_v60  ;;  %v4660_v24 = vadd.f32 %v4646_v5, %v4618_v43 }
 0xb09   :  { %v4679_v17 = vadd.f32 %v13126_v33, %v4660_v24 }
 0xb0b   :  { %v4693_v20 = vadd.f32 %v4679_v17, %v16481_v63 }
 0xb0d   :  { %v4707_v44 = vmax.f32 %v4693_v20, 0.0 }
 0xb0f   :  { %v13660_v9 = vmul.f32 %v4707_v44, %v9206_v56 }
 0xb11   :  { %16482 = vst [vmem:[#allocation21_spill] sm:$0xff] %v13660_v9  ;;  %4818 = vrot.lane.b32.xlu1 %v13660_v9, %s8946_s19  ;;  %v4735_v21 = vrot.slane %v13660_v9, 7  ;;  %v4861_v0 = vrot.slane %v13660_v9, 1 }
 0xb13   :  { %v4862_v24 = vsel %vm441_vm1, %v4860_v54, %v4861_v0  ;;  %v4875_v20 = vsel %vm441_vm1, %v4861_v0, %v4848_v19  ;;  %v4749_v60 = vsel %vm277_vm2, %v4735_v21, %v4722_v52  ;;  %v4736_v1 = vsel %vm277_vm2, %v4734_v34, %v4735_v21 }
 0xb14   :  { %v4793_v61 = vpop.permute.xlu0 %4792  ;;  %v4888_v43 = vmul.f32 %v4862_v24, %v9307_v4  ;;  %v4889_v5 = vmul.f32 %v4875_v20, %v9357_v57  ;;  %v4750_v17 = vmul.f32 %v4749_v60, %v9368_v22  ;;  %v4763_v19 = vmul.f32 %v4736_v1, %v9373_v26  ;;  %v16484_v20 = vld [vmem:[#allocation10_spill] sm:$0xff] }
 0xb15   :  { %v4807_v3 = vpop.permute.xlu1 %4806  ;;  %v16483_v52 = vrot.slane %v13111_v23, 1 }
 0xb16   :  { %4841 = vst.msk [vmem:[#allocation2 + $0x70] sm:$0xff] %vm412_vm4, %v4807_v3 }
 0xb17   :  { %4902 = vst.msk [vmem:[#allocation2 + $0xc8] sm:$0xff] %vm341_vm3, %v4888_v43  ;;  %v4540_v63 = vsel %vm441_vm1, %v16483_v52, %v4529_v58 }
 0xb18   :  { %4903 = vst.msk [vmem:[#allocation2 + $0xd8] sm:$0xff] %vm341_vm3, %v4889_v5 }
 0xb19   :  { %4764 = vst.msk [vmem:[#allocation2] sm:$0xff] %vm341_vm3, %v4750_v17 }
 0xb1a   :  { %4834 = vst.msk [vmem:[#allocation2] sm:$0xff] %vm412_vm4, %v4793_v61 }
 0xb1b   :  { %4777 = vst.msk [vmem:[#allocation2 + $0xd0] sm:$0xff] %vm341_vm3, %v4763_v19 }
 0xb1c   :  { %v4580_v44 = vpop.permute.xlu0 %4579 }
 0xb1d   :  { %v4613_v21 = vadd.f32 %v4580_v44, %v4540_v63 }
 0xb1f   :  { %v4655_v0 = vadd.f32 %v13177_v29, %v4613_v21 }
 0xb21   :  { %v4674_v3 = vadd.f32 %v13126_v33, %v4655_v0  ;;  %v4904_v24 = vld [vmem:[#allocation2] sm:$0xff] }
 0xb22   :  { %5039 = vmatmul.f32.vlgmr.msra.gmra.mxu2 %v4904_v24  ;;  %5157 = vmatmul.f32.vlgmr.msrb.gmra.mxu3 %v4904_v24 }
 0xb23   :  { %v4688_v61 = vadd.f32 %v4674_v3, %v16484_v20  ;;  %v4908_v3 = vld [vmem:[#allocation2 + $0x20] sm:$0xff] }
 0xb24   :  { %v4799_v60 = vpop.permute.xlu0 %4798 }
 0xb25   :  { %v4702_v1 = vmax.f32 %v4688_v61, 0.0  ;;  %4837 = vst.msk [vmem:[#allocation2 + $0x30] sm:$0xff] %vm412_vm4, %v4799_v60 }
 0xb27   :  { %v13705_v23 = vmul.f32 %v4702_v1, %v9186_v47  ;;  %v16488_v1 = vrot.slane %v13610_v51, 1 }
 0xb29   :  { %16485 = vst [vmem:[#allocation3_spill] sm:$0xff] %v13705_v23  ;;  %4808 = vrot.lane.b32.xlu2 %v13705_v23, %s8946_s19  ;;  %v4730_v29 = vrot.slane %v13705_v23, 7  ;;  %v4856_v58 = vrot.slane %v13705_v23, 1 }
 0xb2a   :  { %5042 = vmatmul.f32.gmra.mxu2 %v4906_v45  ;;  %5160 = vmatmul.f32.gmra.mxu3 %v4906_v45 }
 0xb2b   :  { %v4866_v43 = vsel %vm441_vm1, %v4856_v58, %v4857_v36  ;;  %v4867_v5 = vsel %vm441_vm1, %v4855_v37, %v4856_v58  ;;  %v4740_v17 = vsel %vm277_vm2, %v4730_v29, %v4731_v30  ;;  %v4741_v19 = vsel %vm277_vm2, %v4729_v62, %v4730_v29 }
 0xb2c   :  { %v4883_v52 = vmul.f32 %v4867_v5, %v9617_v31  ;;  %v4884_v63 = vmul.f32 %v4866_v43, %v9633_v28  ;;  %v4586_v36 = vpop.permute.xlu0 %4585  ;;  %v4759_v44 = vmul.f32 %v4740_v17, %v9210_v59  ;;  %v4758_v37 = vmul.f32 %v4741_v19, %v9188_v48 }
 0xb2d   :  { %v4616_v21 = vadd.f32 %v4586_v36, %v13272_v46  ;;  %v4634_v62 = vsel %vm277_vm2, %v4630_v18, %v4631_v12  ;;  %v16486_v46 = vld [vmem:[#allocation6_spill] sm:$0xff]  ;;  %v16489_v58 = vrot.slane %v13610_v51, 7  ;;  %v4914_v36 = vld [vmem:[#allocation2 + $0x50] sm:$0xff] }
 0xb2e   :  { %4897 = vst.msk [vmem:[#allocation2 + $0x78] sm:$0xff] %vm341_vm3, %v4883_v52 }
 0xb2f   :  { %4898 = vst.msk [vmem:[#allocation2 + $0x88] sm:$0xff] %vm341_vm3, %v4884_v63  ;;  %v4658_v30 = vadd.f32 %v4634_v62, %v4616_v21  ;;  %v4923_v63 = vld [vmem:[#allocation2 + $0x98] sm:$0xff] }
 0xb30   :  { %4773 = vst.msk [vmem:[#allocation2 + $0x90] sm:$0xff] %vm341_vm3, %v4759_v44 }
 0xb31   :  { %v4677_v0 = vadd.f32 %v13126_v33, %v4658_v30  ;;  %4772 = vst.msk [vmem:[#allocation2 + $0x80] sm:$0xff] %vm341_vm3, %v4758_v37  ;;  %v4910_v33 = vld [vmem:[#allocation2 + $0x30] sm:$0xff] }
 0xb32   :  { %5045 = vmatmul.f32.gmra.mxu2 %v4908_v3  ;;  %5163 = vmatmul.f32.gmra.mxu3 %v4908_v3  ;;  %v4918_v30 = vld [vmem:[#allocation2 + $0x70] sm:$0xff] }
 0xb33   :  { %v4691_v24 = vadd.f32 %v4677_v0, %v16486_v46  ;;  %v4929_v0 = vld [vmem:[#allocation2 + $0xc8] sm:$0xff]  ;;  %v4931_v46 = vld [vmem:[#allocation2 + $0xd8] sm:$0xff] }
 0xb34   :  { %v4805_v41 = vpop.permute.xlu0 %4804 }
 0xb35   :  { %v4705_v20 = vmax.f32 %v4691_v24, 0.0  ;;  %4840 = vst.msk [vmem:[#allocation2 + $0x60] sm:$0xff] %vm412_vm4, %v4805_v41  ;;  %v4919_v50 = vld [vmem:[#allocation2 + $0x78] sm:$0xff] }
 0xb36   :  { %8620 = vmatmul.msk.f32.gmra.mxu1 %vm341_vm3, %v4919_v50  ;;  %8634 = vmatmul.msk.f32.gmra.mxu0 %vm341_vm3, %v4919_v50  ;;  %v4921_v19 = vld [vmem:[#allocation2 + $0x88] sm:$0xff] }
 0xb37   :  { %v13748_v12 = vmul.f32 %v4705_v20, %v16384_v10 }
 0xb39   :  { %16487 = vst [vmem:[#allocation8_spill] sm:$0xff] %v13748_v12  ;;  %4814 = vrot.lane.b32.xlu2 %v13748_v12, %s8946_s19  ;;  %v4733_v18 = vrot.slane %v13748_v12, 7  ;;  %v4859_v61 = vrot.slane %v13748_v12, 1 }
 0xb3a   :  { %5048 = vmatmul.f32.gmra.mxu2 %v4910_v33  ;;  %5166 = vmatmul.f32.gmra.mxu3 %v4910_v33 }
 0xb3b   :  { %v4863_v60 = vsel %vm441_vm1, %v4859_v61, %v4860_v54  ;;  %v4864_v45 = vsel %vm441_vm1, %v16488_v1, %v4859_v61  ;;  %v4737_v29 = vsel %vm277_vm2, %v4733_v18, %v4734_v34  ;;  %v4738_v43 = vsel %vm277_vm2, %v16489_v58, %v4733_v18  ;;  %v4912_v34 = vld [vmem:[#allocation2 + $0x40] sm:$0xff]  ;;  %v5099_v61 = vpop.f32.mrf.mxu1 }
 0xb3c   :  { %v4886_v5 = vmul.f32 %v4864_v45, %v9167_v40  ;;  %v4887_v17 = vmul.f32 %v4863_v60, %v9265_v32  ;;  %v4762_v54 = vmul.f32 %v4737_v29, %v9313_v16  ;;  %v4761_v52 = vmul.f32 %v4738_v43, %v9273_v35  ;;  %v4916_v37 = vld [vmem:[#allocation2 + $0x60] sm:$0xff] }
 0xb3e   :  { %4900 = vst.msk [vmem:[#allocation2 + $0xa8] sm:$0xff] %vm341_vm3, %v4886_v5  ;;  %8621 = vmatmul.msk.f32.gmra.mxu1 %vm341_vm3, %v4921_v19  ;;  %8635 = vmatmul.msk.f32.gmra.mxu0 %vm341_vm3, %v4921_v19 }
 0xb3f   :  { %4901 = vst.msk [vmem:[#allocation2 + $0xb8] sm:$0xff] %vm341_vm3, %v4887_v17 }
 0xb40   :  { %4776 = vst.msk [vmem:[#allocation2 + $0xc0] sm:$0xff] %vm341_vm3, %v4762_v54 }
 0xb41   :  { %4775 = vst.msk [vmem:[#allocation2 + $0xb0] sm:$0xff] %vm341_vm3, %v4761_v52 }
 0xb42   :  { %5051 = vmatmul.f32.gmra.mxu2 %v4912_v34  ;;  %5169 = vmatmul.f32.gmra.mxu3 %v4912_v34 }
 0xb43   :  { %v5102_v1 = vpop.f32.mrf.mxu1 }
 0xb45   :  { %v4925_v21 = vld [vmem:[#allocation2 + $0xa8] sm:$0xff] }
 0xb46   :  { %8622 = vmatmul.msk.f32.gmra.mxu1 %vm341_vm3, %v4923_v63  ;;  %8636 = vmatmul.msk.f32.gmra.mxu0 %vm341_vm3, %v4923_v63  ;;  %v4927_v62 = vld [vmem:[#allocation2 + $0xb8] sm:$0xff] }
 0xb4a   :  { %5054 = vmatmul.f32.gmra.mxu2 %v4914_v36  ;;  %5172 = vmatmul.f32.gmra.mxu3 %v4914_v36 }
 0xb4b   :  { %v4811_v44 = vpop.permute.xlu0 %4810  ;;  %v5105_v5 = vpop.f32.mrf.mxu1 }
 0xb4c   :  { %4843 = vst.msk [vmem:[#allocation2 + $0x90] sm:$0xff] %vm412_vm4, %v4811_v44 }
 0xb4e   :  { %8623 = vmatmul.msk.f32.gmra.mxu1 %vm341_vm3, %v4925_v21  ;;  %8637 = vmatmul.msk.f32.gmra.mxu0 %vm341_vm3, %v4925_v21 }
 0xb52   :  { %5057 = vmatmul.f32.gmra.mxu2 %v4916_v37  ;;  %5175 = vmatmul.f32.gmra.mxu3 %v4916_v37 }
 0xb53   :  { %v4922_v18 = vld [vmem:[#allocation2 + $0x90] sm:$0xff]  ;;  %v5108_v21 = vpop.f32.mrf.mxu1 }
 0xb56   :  { %8624 = vmatmul.msk.f32.gmra.mxu1 %vm341_vm3, %v4927_v62  ;;  %8638 = vmatmul.msk.f32.gmra.mxu0 %vm341_vm3, %v4927_v62 }
 0xb5a   :  { %5060 = vmatmul.f32.gmra.mxu2 %v4918_v30  ;;  %5178 = vmatmul.f32.gmra.mxu3 %v4918_v30 }
 0xb5e   :  { %8625 = vmatmul.msk.f32.gmra.mxu1 %vm341_vm3, %v4929_v0  ;;  %8639 = vmatmul.msk.f32.gmra.mxu0 %vm341_vm3, %v4929_v0 }
 0xb63   :  { %v4817_v3 = vpop.permute.xlu0 %4816 }
 0xb64   :  { %4846 = vst.msk [vmem:[#allocation2 + $0xc0] sm:$0xff] %vm412_vm4, %v4817_v3 }
 0xb66   :  { %8626 = vmatmul.msk.f32.gmra.mxu1 %vm341_vm3, %v4931_v46  ;;  %8640 = vmatmul.msk.f32.gmra.mxu0 %vm341_vm3, %v4931_v46  ;;  %v5111_v46 = vpop.f32.mrf.mxu1 }
 0xb6b   :  { %v4928_v43 = vld [vmem:[#allocation2 + $0xc0] sm:$0xff] }
 0xb72   :  { %v4813_v24 = vpop.permute.xlu1 %4812 }
 0xb73   :  { %4844 = vst.msk [vmem:[#allocation2 + $0xa0] sm:$0xff] %vm412_vm4, %v4813_v24 }
 0xb7a   :  { %v4924_v60 = vld [vmem:[#allocation2 + $0xa0] sm:$0xff] }
 0xb83   :  { %v4809_v41 = vpop.permute.xlu2 %4808  ;;  %v4819_v20 = vpop.permute.xlu1 %4818 }
 0xb84   :  { %4842 = vst.msk [vmem:[#allocation2 + $0x80] sm:$0xff] %vm412_vm4, %v4809_v41 }
 0xb85   :  { %4847 = vst.msk [vmem:[#allocation2 + $0xd0] sm:$0xff] %vm412_vm4, %v4819_v20 }
 0xb8b   :  { %v4920_v50 = vld [vmem:[#allocation2 + $0x80] sm:$0xff] }
 0xb8c   :  { %5063 = vmatmul.f32.gmra.mxu2 %v4920_v50  ;;  %5181 = vmatmul.f32.gmra.mxu3 %v4920_v50  ;;  %v4930_v63 = vld [vmem:[#allocation2 + $0xd0] sm:$0xff] }
 0xb93   :  { %v4815_v33 = vpop.permute.xlu2 %4814 }
 0xb94   :  { %4845 = vst.msk [vmem:[#allocation2 + $0xb0] sm:$0xff] %vm412_vm4, %v4815_v33  ;;  %5066 = vmatmul.f32.gmra.mxu2 %v4922_v18  ;;  %5184 = vmatmul.f32.gmra.mxu3 %v4922_v18  ;;  %v5114_v18 = vpop.f32.mrf.mxu1 }
 0xb9b   :  { %v4926_v45 = vld [vmem:[#allocation2 + $0xb0] sm:$0xff] }
 0xb9c   :  { %5069 = vmatmul.f32.gmra.mxu2 %v4924_v60  ;;  %5187 = vmatmul.f32.gmra.mxu3 %v4924_v60 }
 0xba4   :  { %5072 = vmatmul.f32.gmra.mxu2 %v4926_v45  ;;  %5190 = vmatmul.f32.gmra.mxu3 %v4926_v45 }
 0xba5   :  { %v5040_v29 = vpop.f32.mrf.mxu2 }
 0xba6   :  { %v13796_v58 = vadd.f32 %v5099_v61, %v5040_v29  ;;  %v5117_v29 = vpop.f32.mrf.mxu1 }
 0xba8   :  { %5301 = vrot.lane.b32.xlu2 %v13796_v58, %s8946_s19  ;;  %v16265_v19 = vrot.slane %v13796_v58, 1 }
 0xbac   :  { %5075 = vmatmul.f32.gmra.mxu2 %v4928_v43  ;;  %5193 = vmatmul.f32.gmra.mxu3 %v4928_v43 }
 0xbad   :  { %v5043_v17 = vpop.f32.mrf.mxu2 }
 0xbae   :  { %v5103_v54 = vadd.f32 %v5102_v1, %v5043_v17 }
 0xbb0   :  { %v5260_v52 = vrot.slane %v5103_v54, 1  ;;  %5303 = vrot.lane.b32.xlu0 %v5103_v54, %s8946_s19 }
 0xbb2   :  { %v13806_v34 = vsel %vm441_vm1, %v16265_v19, %v5260_v52 }
 0xbb4   :  { %5078 = vmatmul.f32.gmra.mxu2 %v4930_v63  ;;  %5196 = vmatmul.f32.gmra.mxu3 %v4930_v63 }
 0xbb5   :  { %v5046_v36 = vpop.f32.mrf.mxu2 }
 0xbb6   :  { %v5106_v44 = vadd.f32 %v5105_v5, %v5046_v36 }
 0xbb8   :  { %v5261_v37 = vrot.slane %v5106_v44, 1  ;;  %5305 = vrot.lane.b32.xlu1 %v5106_v44, %s8946_s19 }
 0xbba   :  { %v13811_v62 = vsel %vm441_vm1, %v5260_v52, %v5261_v37  ;;  %v5120_v52 = vpop.f32.mrf.mxu1 }
 0xbbd   :  { %v5049_v30 = vpop.f32.mrf.mxu2 }
 0xbbe   :  { %v5109_v0 = vadd.f32 %v5108_v21, %v5049_v30  ;;  %v13832_v21 = vpop.f32.mrf.mxu3  ;;  %v13838_v30 = vpop.f32.mrf.mxu0 }
 0xbbf   :  { %v14002_v2 = vadd.f32 %v13838_v30, %v13832_v21 }
 0xbc0   :  { %v5262_v3 = vrot.slane %v5109_v0, 1  ;;  %5307 = vrot.lane.b32.xlu2 %v5109_v0, %s8946_s19 }
 0xbc2   :  { %v5283_v24 = vsel %vm441_vm1, %v5261_v37, %v5262_v3 }
 0xbc5   :  { %v5052_v41 = vpop.f32.mrf.mxu2 }
 0xbc6   :  { %v5112_v20 = vadd.f32 %v5111_v46, %v5052_v41  ;;  %v5161_v0 = vpop.f32.mrf.mxu3 }
 0xbc8   :  { %v5263_v50 = vrot.slane %v5112_v20, 1  ;;  %5309 = vrot.lane.b32.xlu0 %v5112_v20, %s8946_s19 }
 0xbca   :  { %v13819_v33 = vsel %vm441_vm1, %v5262_v3, %v5263_v50  ;;  %v5220_v3 = vpop.f32.mrf.mxu0 }
 0xbcd   :  { %v5055_v61 = vpop.f32.mrf.mxu2 }
 0xbce   :  { %v5115_v60 = vadd.f32 %v5114_v18, %v5055_v61  ;;  %v5164_v46 = vpop.f32.mrf.mxu3  ;;  %v5123_v18 = vpop.f32.mrf.mxu1 }
 0xbd0   :  { %v5264_v1 = vrot.slane %v5115_v60, 1  ;;  %5311 = vrot.lane.b32.xlu2 %v5115_v60, %s8946_s19 }
 0xbd2   :  { %v13824_v45 = vsel %vm441_vm1, %v5263_v50, %v5264_v1  ;;  %v5223_v41 = vpop.f32.mrf.mxu0 }
 0xbd5   :  { %v5058_v43 = vpop.f32.mrf.mxu2 }
 0xbd6   :  { %v5118_v5 = vadd.f32 %v5117_v29, %v5058_v43  ;;  %v5167_v20 = vpop.f32.mrf.mxu3 }
 0xbd8   :  { %v5265_v17 = vrot.slane %v5118_v5, 1  ;;  %5313 = vrot.lane.b32.xlu0 %v5118_v5, %s8946_s19 }
 0xbda   :  { %v13829_v54 = vsel %vm441_vm1, %v5264_v1, %v5265_v17  ;;  %v5226_v50 = vpop.f32.mrf.mxu0  ;;  %v5126_v1 = vpop.f32.mrf.mxu1 }
 0xbdb   :  { %v5227_v51 = vadd.f32 %v5226_v50, %v5167_v20 }
 0xbdd   :  { %v5061_v63 = vpop.f32.mrf.mxu2 }
 0xbde   :  { %v5121_v36 = vadd.f32 %v5120_v52, %v5061_v63  ;;  %v5170_v61 = vpop.f32.mrf.mxu3 }
 0xbe0   :  { %v5266_v44 = vrot.slane %v5121_v36, 1  ;;  %5315 = vrot.lane.b32.xlu2 %v5121_v36, %s8946_s19 }
 0xbe2   :  { %v13836_v37 = vsel %vm441_vm1, %v5265_v17, %v5266_v44  ;;  %v5229_v60 = vpop.f32.mrf.mxu0  ;;  %v5129_v23 = vpop.f32.mrf.mxu1 }
 0xbe3   :  { %v13852_v9 = vadd.f32 %v5229_v60, %v5170_v61  ;;  %v5360_v61 = vrot.slane %v5227_v51, 7 }
 0xbe5   :  { %v16277_v25 = vrot.slane %v13852_v9, 7 }
 0xbe6   :  { %v5173_v52 = vpop.f32.mrf.mxu3 }
 0xbea   :  { %v5232_v36 = vpop.f32.mrf.mxu0 }
 0xbee   :  { %v5176_v14 = vpop.f32.mrf.mxu3 }
 0xc02   :  { %v13847_v63 = vpop.permute.xlu2 %5301 }
 0xc0f   :  { %v5064_v29 = vpop.f32.mrf.mxu2 }
 0xc10   :  { %v13840_v43 = vadd.f32 %v5123_v18, %v5064_v29  ;;  %v5224_v18 = vadd.f32 %v5223_v41, %v5164_v46 }
 0xc12   :  { %v5267_v5 = vrot.slane %v13840_v43, 1 }
 0xc14   :  { %v13845_v17 = vsel %vm441_vm1, %v5266_v44, %v5267_v5  ;;  %v13858_v44 = vadd.f32 %v5220_v3, %v5161_v0  ;;  %v5380_v0 = vsel %vm277_vm2, %v5360_v61, %v16277_v25 }
 0xc16   :  { %v16278_v46 = vrot.slane %v13858_v44, 7 }
 0xc17   :  { %v5067_v19 = vpop.f32.mrf.mxu2 }
 0xc18   :  { %v13849_v12 = vadd.f32 %v5126_v1, %v5067_v19  ;;  %v5235_v19 = vpop.f32.mrf.mxu0  ;;  %v5359_v1 = vrot.slane %v5224_v18, 7  ;;  %v13886_v18 = vpop.f32.mrf.mxu3 }
 0xc1a   :  { %v5268_v49 = vrot.slane %v13849_v12, 1  ;;  %v5308_v55 = vpop.permute.xlu2 %5307  ;;  %v5382_v51 = vsel %vm277_vm2, %v16278_v46, %v5359_v1 }
 0xc1b   :  { %v5346_v15 = vadd.f32 %v5308_v55, %v5283_v24  ;;  %v13873_v55 = vld [vmem:[%s16149_s6 + $0x7] ss:$0 sm:$0xff] }
 0xc1c   :  { %v13856_v29 = vsel %vm441_vm1, %v5267_v5, %v5268_v49  ;;  %v5132_v5 = vpop.f32.mrf.mxu1 }
 0xc1f   :  { %v5070_v39 = vpop.f32.mrf.mxu2 }
 0xc20   :  { %v13861_v13 = vadd.f32 %v5129_v23, %v5070_v39  ;;  %v5388_v39 = vadd.f32 %v5380_v0, %v5346_v15 }
 0xc22   :  { %v5269_v41 = vrot.slane %v13861_v13, 1  ;;  %v5304_v60 = vpop.permute.xlu0 %5303 }
 0xc23   :  { %v5344_v3 = vadd.f32 %v5304_v60, %v13806_v34  ;;  %v13884_v34 = vpop.f32.mrf.mxu0  ;;  %v5407_v60 = vadd.f32 %v13873_v55, %v5388_v39  ;;  %v8686_v39 = vld [vmem:[%s16151_s5 + $0xbe0] sm:$0xff] }
 0xc24   :  { %v13881_v23 = vsel %vm441_vm1, %v5268_v49, %v5269_v41  ;;  %v8688_v49 = vld [vmem:[%s16151_s5 + $0xbf0] sm:$0xff] }
 0xc25   :  { %v5386_v24 = vadd.f32 %v5382_v51, %v5344_v3  ;;  %v8689_v3 = vld [vmem:[%s16151_s5 + $0xbf8] sm:$0xff]  ;;  %v13898_v51 = vadd.f32 %v5235_v19, %v5176_v14  ;;  %5814 = vmatpush.msra.mxu1 %v8688_v49  ;;  %v5381_v14 = vsel %vm277_vm2, %v5359_v1, %v5360_v61 }
 0xc26   :  { %5932 = vmatpush.msra.mxu0 %v8689_v3  ;;  %v8685_v1 = vld [vmem:[%s16151_s5 + $0xbd8] sm:$0xff] }
 0xc27   :  { %v5405_v20 = vadd.f32 %v13873_v55, %v5386_v24  ;;  %v5073_v50 = vpop.f32.mrf.mxu2  ;;  %5815 = vmatpush.msra.mxu1 %v8686_v39  ;;  %v8682_v39 = vld [vmem:[%s16151_s5 + $0xbc0] sm:$0xff] }
 0xc28   :  { %v13889_v15 = vadd.f32 %v5132_v5, %v5073_v50  ;;  %v5421_v50 = vmax.f32 %v5407_v60, 0.0  ;;  %v8684_v60 = vld [vmem:[%s16151_s5 + $0xbd0] sm:$0xff] }
 0xc29   :  { %v5419_v0 = vmax.f32 %v5405_v20, 0.0  ;;  %v8687_v20 = vld [vmem:[%s16151_s5 + $0xbe8] sm:$0xff]  ;;  %5816 = vmatpush.msra.mxu1 %v8684_v60 }
 0xc2a   :  { %v5270_v25 = vrot.slane %v13889_v15, 1  ;;  %v5306_v46 = vpop.permute.xlu1 %5305  ;;  %v5312_v49 = vpop.permute.xlu2 %5311  ;;  %5933 = vmatpush.msra.mxu0 %v8687_v20  ;;  %v13929_v3 = vmul.f32 %v5421_v50, %v9225_v7  ;;  %v8683_v20 = vld [vmem:[%s16151_s5 + $0xbc8] sm:$0xff] }
 0xc2b   :  { %v13901_v24 = vmul.f32 %v5419_v0, %v9186_v47  ;;  %v5345_v5 = vadd.f32 %v5306_v46, %v13811_v62  ;;  %v13916_v0 = vadd.f32 %v5232_v36, %v5173_v52  ;;  %v5135_v62 = vpop.f32.mrf.mxu1  ;;  %v5348_v60 = vadd.f32 %v5312_v49, %v13824_v45  ;;  %5817 = vmatpush.msra.mxu1 %v8682_v39  ;;  %v5241_v61 = vpop.f32.mrf.mxu0 }
 0xc2c   :  { %v13914_v19 = vsel %vm441_vm1, %v5269_v41, %v5270_v25  ;;  %v5182_v41 = vpop.f32.mrf.mxu3  ;;  %5934 = vmatpush.msra.mxu0 %v8685_v1  ;;  %v8681_v1 = vld [vmem:[%s16151_s5 + $0xbb8] sm:$0xff] }
 0xc2d   :  { %16490 = vst [vmem:[#allocation12_spill] sm:$0xff] %v13914_v19  ;;  %v5387_v46 = vadd.f32 %v5381_v14, %v5345_v5  ;;  %5518 = vrot.lane.b32.xlu0 %v13901_v24, %s8946_s19  ;;  %v16492_v45 = vrot.slane %v13916_v0, 7 }
 0xc2e   :  { %5935 = vmatpush.msra.mxu0 %v8683_v20  ;;  %v16281_v20 = vrot.slane %v13929_v3, 1 }
 0xc2f   :  { %v5406_v52 = vadd.f32 %v13873_v55, %v5387_v46  ;;  %v5076_v36 = vpop.f32.mrf.mxu2 }
 0xc30   :  { %v13931_v5 = vadd.f32 %v5135_v62, %v5076_v36  ;;  %v8680_v62 = vld [vmem:[%s16151_s5 + $0xbb0] sm:$0xff]  ;;  %v13948_v36 = vadd.f32 %v5241_v61, %v5182_v41  ;;  %5936 = vmatpush.msra.mxu0 %v8681_v1  ;;  %v8678_v61 = vld [vmem:[%s16151_s5 + $0xba0] sm:$0xff]  ;;  %v8679_v41 = vld [vmem:[%s16151_s5 + $0xba8] sm:$0xff]  ;;  %v13976_v1 = vadd.f32 %v13884_v34, %v13886_v18 }
 0xc31   :  { %v5420_v46 = vmax.f32 %v5406_v52, 0.0  ;;  %v16491_v52 = vrot.slane %v13898_v51, 7  ;;  %5818 = vmatpush.msra.mxu1 %v8680_v62  ;;  %v16282_v62 = vrot.slane %v13901_v24, 1 }
 0xc32   :  { %v5271_v50 = vrot.slane %v13931_v5, 1  ;;  %5937 = vmatpush.msra.mxu0 %v8679_v41 }
 0xc33   :  { %v5434_v14 = vmul.f32 %v5420_v46, %v9204_v53  ;;  %v5378_v49 = vsel %vm277_vm2, %v16492_v45, %v16491_v52  ;;  %5819 = vmatpush.msra.mxu1 %v8678_v61  ;;  %v16494_v61 = vrot.slane %v13929_v3, 7 }
 0xc34   :  { %v13968_v46 = vsel %vm441_vm1, %v5270_v25, %v5271_v50  ;;  %v5390_v39 = vadd.f32 %v5378_v49, %v5348_v60  ;;  %v8676_v25 = vld [vmem:[%s16151_s5 + $0xb90] sm:$0xff]  ;;  %v5138_v60 = vpop.f32.mrf.mxu1  ;;  %5938 = vmatpush.msra.mxu0 %v8677_v27 }
 0xc35   :  { %v5448_v52 = vrot.slane %v5434_v14, 7  ;;  %v5574_v45 = vrot.slane %v5434_v14, 1  ;;  %5520 = vrot.lane.b32.xlu2 %v5434_v14, %s8946_s19  ;;  %5319 = vrot.lane.b32.xlu0 %v13849_v12, %s8946_s19  ;;  %v16493_v14 = vrot.slane %v13901_v24, 7 }
 0xc36   :  { %5820 = vmatpush.msra.mxu1 %v8676_v25 }
 0xc37   :  { %v5596_v12 = vsel %vm441_vm1, %v5574_v45, %v16281_v20  ;;  %v5597_v34 = vsel %vm441_vm1, %v16282_v62, %v5574_v45  ;;  %v5079_v18 = vpop.f32.mrf.mxu2  ;;  %v5471_v49 = vsel %vm277_vm2, %v16493_v14, %v5448_v52  ;;  %v5470_v41 = vsel %vm277_vm2, %v5448_v52, %v16494_v61  ;;  %v8674_v62 = vld [vmem:[%s16151_s5 + $0xb80] sm:$0xff]  ;;  %v8675_v14 = vld [vmem:[%s16151_s5 + $0xb88] sm:$0xff] }
 0xc38   :  { %v5601_v20 = vmul.f32 %v5597_v34, %v9633_v28  ;;  %v5602_v19 = vmul.f32 %v5596_v12, %v9163_v38  ;;  %v5139_v45 = vadd.f32 %v5138_v60, %v5079_v18  ;;  %v5365_v52 = vrot.slane %v13948_v36, 7  ;;  %5821 = vmatpush.msra.mxu1 %v8674_v62  ;;  %5939 = vmatpush.msra.mxu0 %v8675_v14 }
 0xc39   :  { %v5409_v61 = vadd.f32 %v13873_v55, %v5390_v39  ;;  %v5476_v21 = vmul.f32 %v5471_v49, %v9210_v59  ;;  %v5477_v30 = vmul.f32 %v5470_v41, %v9229_v11  ;;  %v5364_v34 = vrot.slane %v13976_v1, 7 }
 0xc3a   :  { %5615 = vst.msk [vmem:[#allocation2 + $0x18] sm:$0xff] %vm341_vm3, %v5601_v20  ;;  %v5272_v25 = vrot.slane %v5139_v45, 1  ;;  %v5310_v60 = vpop.permute.xlu0 %5309  ;;  %v5316_v12 = vpop.permute.xlu2 %5315  ;;  %5327 = vrot.lane.b32.xlu1 %v5139_v45, %s8946_s19  ;;  %v5357_v39 = vrot.slane %v14002_v2, 7  ;;  %v16495_v49 = vrot.slane %v13796_v58, 1  ;;  %v16496_v41 = vrot.slane %v13916_v0, 7 }
 0xc3b   :  { %5616 = vst.msk [vmem:[#allocation2 + $0x28] sm:$0xff] %vm341_vm3, %v5602_v19  ;;  %v5347_v18 = vadd.f32 %v5310_v60, %v13819_v33  ;;  %v5350_v27 = vadd.f32 %v5316_v12, %v13836_v37  ;;  %v16497_v62 = vrot.slane %v13852_v9, 7  ;;  %v5423_v37 = vmax.f32 %v5409_v61, 0.0 }
 0xc3c   :  { %v5286_v20 = vsel %vm441_vm1, %v5272_v25, %v16495_v49  ;;  %5490 = vst.msk [vmem:[#allocation2 + $0x20] sm:$0xff] %vm341_vm3, %v5476_v21  ;;  %v14036_v33 = vsel %vm441_vm1, %v5271_v50, %v5272_v25  ;;  %v5376_v0 = vsel %vm277_vm2, %v5364_v34, %v5365_v52  ;;  %v16498_v9 = vrot.slane %v13858_v44, 7 }
 0xc3d   :  { %v5379_v1 = vsel %vm277_vm2, %v16497_v62, %v16496_v41  ;;  %v5343_v19 = vadd.f32 %v13847_v63, %v5286_v20  ;;  %5321 = vrot.lane.b32.xlu2 %v13861_v13, %s8946_s19  ;;  %5491 = vst.msk [vmem:[#allocation2 + $0x30] sm:$0xff] %vm341_vm3, %v5477_v30  ;;  %v5392_v45 = vadd.f32 %v5376_v0, %v5350_v27  ;;  %v16499_v62 = vrot.slane %v13929_v3, 1 }
 0xc3e   :  { %v5389_v58 = vadd.f32 %v5379_v1, %v5347_v18  ;;  %v5383_v50 = vsel %vm277_vm2, %v5357_v39, %v16498_v9  ;;  %v5437_v61 = vmul.f32 %v5423_v37, %v9227_v8 }
 0xc3f   :  { %v5385_v63 = vadd.f32 %v5383_v50, %v5343_v19  ;;  %v5411_v13 = vadd.f32 %v13873_v55, %v5392_v45  ;;  %v16500_v19 = vrot.slane %v13929_v3, 7 }
 0xc40   :  { %v5408_v14 = vadd.f32 %v13873_v55, %v5389_v58  ;;  %v5451_v44 = vrot.slane %v5437_v61, 7  ;;  %v5577_v12 = vrot.slane %v5437_v61, 1 }
 0xc41   :  { %v5404_v25 = vadd.f32 %v13873_v55, %v5385_v63  ;;  %v5425_v27 = vmax.f32 %v5411_v13, 0.0  ;;  %v16502_v13 = vrot.slane %v13901_v24, 7 }
 0xc42   :  { %v5422_v21 = vmax.f32 %v5408_v14, 0.0 }
 0xc43   :  { %v5418_v60 = vmax.f32 %v5404_v25, 0.0  ;;  %v14083_v14 = vmul.f32 %v5425_v27, %v9172_v42 }
 0xc44   :  { %v5436_v30 = vmul.f32 %v5422_v21, %v16384_v10 }
 0xc45   :  { %5526 = vrot.lane.b32.xlu2 %v5437_v61, %s8946_s19  ;;  %v14060_v20 = vmul.f32 %v5418_v60, %v9172_v42  ;;  %v16501_v61 = vrot.slane %v13901_v24, 1 }
 0xc46   :  { %v5450_v18 = vrot.slane %v5436_v30, 7  ;;  %v5576_v49 = vrot.slane %v5436_v30, 1  ;;  %5524 = vrot.lane.b32.xlu0 %v5436_v30, %s8946_s19 }
 0xc47   :  { %5516 = vrot.lane.b32.xlu1 %v14060_v20, %s8946_s19  ;;  %v5446_v50 = vrot.slane %v14060_v20, 7  ;;  %v5572_v45 = vrot.slane %v14060_v20, 1 }
 0xc48   :  { %v5594_v41 = vsel %vm441_vm1, %v5576_v49, %v5577_v12  ;;  %v5595_v1 = vsel %vm441_vm1, %v16499_v62, %v5576_v49  ;;  %v5468_v37 = vsel %vm277_vm2, %v5450_v18, %v5451_v44  ;;  %v5469_v58 = vsel %vm277_vm2, %v16500_v19, %v5450_v18 }
 0xc49   :  { %v5603_v0 = vmul.f32 %v5595_v1, %v9167_v40  ;;  %v5604_v9 = vmul.f32 %v5594_v41, %v9265_v32  ;;  %v5479_v63 = vmul.f32 %v5468_v37, %v9313_v16  ;;  %v5598_v21 = vsel %vm441_vm1, %v5572_v45, %v16501_v61 }
 0xc4a   :  { %v5314_v25 = vpop.permute.xlu0 %5313  ;;  %v5472_v30 = vsel %vm277_vm2, %v5446_v50, %v16502_v13  ;;  %v5600_v60 = vmul.f32 %v5598_v21, %v9617_v31  ;;  %v5478_v27 = vmul.f32 %v5469_v58, %v9273_v35  ;;  %v16503_v41 = vrot.slane %v13898_v51, 7 }
 0xc4b   :  { %5617 = vst.msk [vmem:[#allocation2 + $0x38] sm:$0xff] %vm341_vm3, %v5603_v0  ;;  %v5349_v18 = vadd.f32 %v5314_v25, %v13829_v54  ;;  %v5475_v49 = vmul.f32 %v5472_v30, %v9188_v48  ;;  %v5453_v37 = vrot.slane %v14083_v14, 7  ;;  %v5579_v19 = vrot.slane %v14083_v14, 1 }
 0xc4c   :  { %5618 = vst.msk [vmem:[#allocation2 + $0x48] sm:$0xff] %vm341_vm3, %v5604_v9  ;;  %v5377_v24 = vsel %vm277_vm2, %v16503_v41, %v5364_v34 }
 0xc4d   :  { %5493 = vst.msk [vmem:[#allocation2 + $0x50] sm:$0xff] %vm341_vm3, %v5479_v63  ;;  %v5391_v62 = vadd.f32 %v5377_v24, %v5349_v18  ;;  %5530 = vrot.lane.b32.xlu2 %v14083_v14, %s8946_s19  ;;  %v8672_v24 = vld [vmem:[%s16151_s5 + $0xb70] sm:$0xff] }
 0xc4e   :  { %5614 = vst.msk [vmem:[#allocation2 + $0x8] sm:$0xff] %vm341_vm3, %v5600_v60  ;;  %5325 = vrot.lane.b32.xlu0 %v13931_v5, %s8946_s19  ;;  %v14155_v60 = vpop.f32.mrf.mxu3  ;;  %5747 = vmatpush.msrb.mxu2 %v8672_v24 }
 0xc4f   :  { %5489 = vst.msk [vmem:[#allocation2 + $0x10] sm:$0xff] %vm341_vm3, %v5475_v49  ;;  %v5410_v54 = vadd.f32 %v13873_v55, %v5391_v62  ;;  %5317 = vrot.lane.b32.xlu1 %v13840_v43, %s8946_s19  ;;  %v8673_v62 = vld [vmem:[%s16151_s5 + $0xb78] sm:$0xff] }
 0xc50   :  { %5492 = vst.msk [vmem:[#allocation2 + $0x40] sm:$0xff] %vm341_vm3, %v5478_v27  ;;  %5865 = vmatpush.msra.mxu3 %v8673_v62  ;;  %v8658_v62 = vld [vmem:[%s16151_s5 + $0xb00] sm:$0xff] }
 0xc51   :  { %v5424_v51 = vmax.f32 %v5410_v54, 0.0  ;;  %v8670_v54 = vld [vmem:[%s16151_s5 + $0xb60] sm:$0xff] }
 0xc52   :  { %5748 = vmatpush.msrb.mxu2 %v8670_v54  ;;  %v8659_v54 = vld [vmem:[%s16151_s5 + $0xb08] sm:$0xff] }
 0xc53   :  { %v5438_v34 = vmul.f32 %v5424_v51, %v9206_v56  ;;  %v5637_v30 = vld [vmem:[#allocation2 + $0x48] sm:$0xff] }
 0xc54   :  { %v8671_v51 = vld [vmem:[%s16151_s5 + $0xb68] sm:$0xff] }
 0xc55   :  { %v5629_v1 = vld [vmem:[#allocation2 + $0x8] sm:$0xff]  ;;  %v5452_v58 = vrot.slane %v5438_v34, 7  ;;  %v5578_v0 = vrot.slane %v5438_v34, 1  ;;  %5866 = vmatpush.msra.mxu3 %v8671_v51 }
 0xc56   :  { %8690 = vmatmul.msk.f32.vlgmr.msra.gmra.mxu1 %vm341_vm3, %v5629_v1  ;;  %8704 = vmatmul.msk.f32.vlgmr.msra.gmra.mxu0 %vm341_vm3, %v5629_v1  ;;  %v5188_v49 = vpop.f32.mrf.mxu3 }
 0xc57   :  { %v5592_v5 = vsel %vm441_vm1, %v5578_v0, %v5579_v19  ;;  %v5593_v43 = vsel %vm441_vm1, %v5577_v12, %v5578_v0  ;;  %v5466_v9 = vsel %vm277_vm2, %v5452_v58, %v5453_v37  ;;  %v5467_v63 = vsel %vm277_vm2, %v5451_v44, %v5452_v58  ;;  %5522 = vrot.lane.b32.xlu1 %v13929_v3, %s8946_s19  ;;  %v5631_v12 = vld [vmem:[#allocation2 + $0x18] sm:$0xff]  ;;  %v5633_v3 = vld [vmem:[#allocation2 + $0x28] sm:$0xff]  ;;  %v8668_v58 = vld [vmem:[%s16151_s5 + $0xb50] sm:$0xff] }
 0xc58   :  { %v5605_v61 = vmul.f32 %v5593_v43, %v9307_v4  ;;  %v5606_v21 = vmul.f32 %v5592_v5, %v9357_v57  ;;  %v5481_v25 = vmul.f32 %v5466_v9, %v9368_v22  ;;  %v5480_v13 = vmul.f32 %v5467_v63, %v9373_v26  ;;  %v5635_v44 = vld [vmem:[#allocation2 + $0x38] sm:$0xff]  ;;  %5749 = vmatpush.msrb.mxu2 %v8668_v58  ;;  %v8666_v9 = vld [vmem:[%s16151_s5 + $0xb40] sm:$0xff]  ;;  %v8667_v63 = vld [vmem:[%s16151_s5 + $0xb48] sm:$0xff] }
 0xc59   :  { %v8669_v0 = vld [vmem:[%s16151_s5 + $0xb58] sm:$0xff] }
 0xc5a   :  { %5619 = vst.msk [vmem:[#allocation2 + $0x58] sm:$0xff] %vm341_vm3, %v5605_v61  ;;  %5867 = vmatpush.msra.mxu3 %v8669_v0  ;;  %5750 = vmatpush.msrb.mxu2 %v8666_v9  ;;  %v8657_v58 = vld [vmem:[%s16151_s5 + $0xaf8] sm:$0xff]  ;;  %v8654_v0 = vld [vmem:[%s16151_s5 + $0xae0] sm:$0xff] }
 0xc5b   :  { %5620 = vst.msk [vmem:[#allocation2 + $0x68] sm:$0xff] %vm341_vm3, %v5606_v21  ;;  %v8664_v21 = vld [vmem:[%s16151_s5 + $0xb30] sm:$0xff] }
 0xc5c   :  { %5495 = vst.msk [vmem:[#allocation2 + $0x70] sm:$0xff] %vm341_vm3, %v5481_v25  ;;  %5868 = vmatpush.msra.mxu3 %v8667_v63  ;;  %v8665_v25 = vld [vmem:[%s16151_s5 + $0xb38] sm:$0xff]  ;;  %5751 = vmatpush.msrb.mxu2 %v8664_v21  ;;  %v8652_v63 = vld [vmem:[%s16151_s5 + $0xad0] sm:$0xff] }
 0xc5d   :  { %5494 = vst.msk [vmem:[#allocation2 + $0x60] sm:$0xff] %vm341_vm3, %v5480_v13 }
 0xc5e   :  { %8691 = vmatmul.msk.f32.gmra.mxu1 %vm341_vm3, %v5631_v12  ;;  %8705 = vmatmul.msk.f32.gmra.mxu0 %vm341_vm3, %v5631_v12  ;;  %v8662_v12 = vld [vmem:[%s16151_s5 + $0xb20] sm:$0xff] }
 0xc5f   :  { %5323 = vrot.lane.b32.xlu1 %v13889_v15, %s8946_s19  ;;  %v14157_v15 = vpop.f32.mrf.mxu0  ;;  %5869 = vmatpush.msra.mxu3 %v8665_v25 }
 0xc60   :  { %5752 = vmatpush.msrb.mxu2 %v8662_v12 }
 0xc61   :  { %v5639_v18 = vld [vmem:[#allocation2 + $0x58] sm:$0xff] }
 0xc62   :  { %v5641_v27 = vld [vmem:[#allocation2 + $0x68] sm:$0xff] }
 0xc66   :  { %8692 = vmatmul.msk.f32.gmra.mxu1 %vm341_vm3, %v5633_v3  ;;  %8706 = vmatmul.msk.f32.gmra.mxu0 %vm341_vm3, %v5633_v3  ;;  %v8663_v3 = vld [vmem:[%s16151_s5 + $0xb28] sm:$0xff] }
 0xc67   :  { %5528 = vrot.lane.b32.xlu1 %v5438_v34, %s8946_s19  ;;  %v5247_v41 = vpop.f32.mrf.mxu0  ;;  %v5191_v34 = vpop.f32.mrf.mxu3  ;;  %5870 = vmatpush.msra.mxu3 %v8663_v3  ;;  %v8650_v3 = vld [vmem:[%s16151_s5 + $0xac0] sm:$0xff] }
 0xc68   :  { %v14190_v61 = vadd.f32 %v5247_v41, %v5188_v49  ;;  %v8661_v49 = vld [vmem:[%s16151_s5 + $0xb18] sm:$0xff] }
 0xc69   :  { %5871 = vmatpush.msra.mxu3 %v8661_v49 }
 0xc6b   :  { %5872 = vmatpush.msra.mxu3 %v8659_v54 }
 0xc6d   :  { %5873 = vmatpush.msra.mxu3 %v8657_v58 }
 0xc6e   :  { %8693 = vmatmul.msk.f32.gmra.mxu1 %vm341_vm3, %v5635_v44  ;;  %8707 = vmatmul.msk.f32.gmra.mxu0 %vm341_vm3, %v5635_v44  ;;  %v5367_v44 = vrot.slane %v14190_v61, 7  ;;  %v8653_v61 = vld [vmem:[%s16151_s5 + $0xad8] sm:$0xff] }
 0xc6f   :  { %v5250_v5 = vpop.f32.mrf.mxu0  ;;  %v14213_v41 = vpop.f32.mrf.mxu3 }
 0xc70   :  { %v14182_v43 = vadd.f32 %v5250_v5, %v5191_v34  ;;  %v8655_v5 = vld [vmem:[%s16151_s5 + $0xae8] sm:$0xff] }
 0xc71   :  { %5874 = vmatpush.msra.mxu3 %v8655_v5  ;;  %v8645_v5 = vld [vmem:[%s16151_s5 + $0xa98] sm:$0xff] }
 0xc72   :  { %v5368_v13 = vrot.slane %v14182_v43, 7 }
 0xc73   :  { %5875 = vmatpush.msra.mxu3 %v8653_v61 }
 0xc74   :  { %v5373_v24 = vsel %vm277_vm2, %v5367_v44, %v5368_v13 }
 0xc76   :  { %8694 = vmatmul.msk.f32.gmra.mxu1 %vm341_vm3, %v5637_v30  ;;  %8708 = vmatmul.msk.f32.gmra.mxu0 %vm341_vm3, %v5637_v30 }
 0xc77   :  { %v5197_v49 = vpop.f32.mrf.mxu3 }
 0xc7e   :  { %8695 = vmatmul.msk.f32.gmra.mxu1 %vm341_vm3, %v5639_v18  ;;  %8709 = vmatmul.msk.f32.gmra.mxu0 %vm341_vm3, %v5639_v18  ;;  %v8660_v18 = vld [vmem:[%s16151_s5 + $0xb10] sm:$0xff] }
 0xc7f   :  { %5753 = vmatpush.msrb.mxu2 %v8660_v18  ;;  %v14261_v18 = vadd.f32 %v14157_v15, %v14155_v60  ;;  %v8646_v60 = vld [vmem:[%s16151_s5 + $0xaa0] sm:$0xff]  ;;  %v8647_v15 = vld [vmem:[%s16151_s5 + $0xaa8] sm:$0xff] }
 0xc81   :  { %5754 = vmatpush.msrb.mxu2 %v8658_v62 }
 0xc86   :  { %8696 = vmatmul.msk.f32.gmra.mxu1 %vm341_vm3, %v5641_v27  ;;  %8710 = vmatmul.msk.f32.gmra.mxu0 %vm341_vm3, %v5641_v27 }
 0xc8f   :  { %v5521_v1 = vpop.permute.xlu2 %5520 }
 0xc90   :  { %5560 = vst.msk [vmem:[#allocation2 + $0x20] sm:$0xff] %vm412_vm4, %v5521_v1  ;;  %v8656_v1 = vld [vmem:[%s16151_s5 + $0xaf0] sm:$0xff] }
 0xc91   :  { %5755 = vmatpush.msrb.mxu2 %v8656_v1 }
 0xc93   :  { %5756 = vmatpush.msrb.mxu2 %v8654_v0  ;;  %v8644_v0 = vld [vmem:[%s16151_s5 + $0xa90] sm:$0xff] }
 0xc95   :  { %5757 = vmatpush.msrb.mxu2 %v8652_v63 }
 0xc97   :  { %v5322_v30 = vpop.permute.xlu2 %5321  ;;  %5758 = vmatpush.msrb.mxu2 %v8650_v3 }
 0xc98   :  { %v5353_v27 = vadd.f32 %v5322_v30, %v13881_v23  ;;  %v14225_v23 = vpop.f32.mrf.mxu0  ;;  %v8651_v30 = vld [vmem:[%s16151_s5 + $0xac8] sm:$0xff] }
 0xc99   :  { %5876 = vmatpush.msra.mxu3 %v8651_v30 }
 0xc9a   :  { %v5395_v51 = vadd.f32 %v5373_v24, %v5353_v27  ;;  %v8648_v27 = vld [vmem:[%s16151_s5 + $0xab0] sm:$0xff]  ;;  %v8649_v24 = vld [vmem:[%s16151_s5 + $0xab8] sm:$0xff] }
 0xc9b   :  { %5759 = vmatpush.msrb.mxu2 %v8648_v27  ;;  %5877 = vmatpush.msra.mxu3 %v8649_v24 }
 0xc9c   :  { %v5414_v34 = vadd.f32 %v13873_v55, %v5395_v51  ;;  %v5366_v51 = vrot.slane %v14261_v18, 7 }
 0xc9d   :  { %5760 = vmatpush.msrb.mxu2 %v8646_v60  ;;  %5878 = vmatpush.msra.mxu3 %v8647_v15 }
 0xc9e   :  { %v5428_v9 = vmax.f32 %v5414_v34, 0.0 }
 0xc9f   :  { %v5519_v21 = vpop.permute.xlu0 %5518  ;;  %v5527_v25 = vpop.permute.xlu2 %5526  ;;  %5761 = vmatpush.msrb.mxu2 %v8644_v0  ;;  %5879 = vmatpush.msra.mxu3 %v8645_v5 }
 0xca0   :  { %v14247_v12 = vmul.f32 %v5428_v9, %v9225_v7  ;;  %5559 = vst.msk [vmem:[#allocation2 + $0x10] sm:$0xff] %vm412_vm4, %v5519_v21  ;;  %v5256_v62 = vpop.f32.mrf.mxu0  ;;  %v5374_v9 = vsel %vm277_vm2, %v5366_v51, %v5367_v44  ;;  %v8643_v21 = vld [vmem:[%s16151_s5 + $0xa88] sm:$0xff] }
 0xca1   :  { %5563 = vst.msk [vmem:[#allocation2 + $0x50] sm:$0xff] %vm412_vm4, %v5527_v25  ;;  %v5257_v54 = vadd.f32 %v5256_v62, %v5197_v49  ;;  %5880 = vmatpush.msra.mxu3 %v8643_v21 }
 0xca2   :  { %5536 = vrot.lane.b32.xlu2 %v14247_v12, %s8946_s19  ;;  %v5456_v62 = vrot.slane %v14247_v12, 7 }
 0xca3   :  { %v5370_v63 = vrot.slane %v5257_v54, 7  ;;  %v5582_v54 = vrot.slane %v14247_v12, 1 }
 0xca5   :  { %v5384_v18 = vsel %vm277_vm2, %v5370_v63, %v5357_v39 }
 0xca7   :  { %v5320_v34 = vpop.permute.xlu0 %5319  ;;  %v5531_v1 = vpop.permute.xlu2 %5530 }
 0xca8   :  { %v5352_v58 = vadd.f32 %v5320_v34, %v13856_v29  ;;  %5565 = vst.msk [vmem:[#allocation2 + $0x70] sm:$0xff] %vm412_vm4, %v5531_v1  ;;  %v8642_v29 = vld [vmem:[%s16151_s5 + $0xa80] sm:$0xff] }
 0xca9   :  { %5762 = vmatpush.msrb.mxu2 %v8642_v29 }
 0xcaa   :  { %v5394_v61 = vadd.f32 %v5374_v9, %v5352_v58 }
 0xcac   :  { %v5413_v25 = vadd.f32 %v13873_v55, %v5394_v61  ;;  %v5328_v3 = vpop.permute.xlu1 %5327 }
 0xcad   :  { %v5356_v30 = vadd.f32 %v5328_v3, %v14036_v33 }
 0xcae   :  { %v5427_v44 = vmax.f32 %v5413_v25, 0.0 }
 0xcaf   :  { %v5398_v49 = vadd.f32 %v5384_v18, %v5356_v30  ;;  %v5254_v30 = vadd.f32 %v14225_v23, %v14213_v41  ;;  %v5375_v41 = vsel %vm277_vm2, %v5365_v52, %v5366_v51 }
 0xcb0   :  { %v14299_v27 = vmul.f32 %v5427_v44, %v9204_v53 }
 0xcb1   :  { %v5417_v24 = vadd.f32 %v13873_v55, %v5398_v49  ;;  %v5369_v20 = vrot.slane %v5254_v30, 7 }
 0xcb2   :  { %v5455_v60 = vrot.slane %v14299_v27, 7  ;;  %v5581_v33 = vrot.slane %v14299_v27, 1  ;;  %5534 = vrot.lane.b32.xlu1 %v14299_v27, %s8946_s19 }
 0xcb3   :  { %v5431_v2 = vmax.f32 %v5417_v24, 0.0  ;;  %v5371_v44 = vsel %vm277_vm2, %v5369_v20, %v5370_v63 }
 0xcb4   :  { %v5589_v39 = vsel %vm441_vm1, %v5581_v33, %v5582_v54  ;;  %v5463_v15 = vsel %vm277_vm2, %v5455_v60, %v5456_v62 }
 0xcb5   :  { %v5609_v34 = vmul.f32 %v5589_v39, %v9163_v38  ;;  %v5445_v1 = vmul.f32 %v5431_v2, %v9206_v56  ;;  %v5484_v58 = vmul.f32 %v5463_v15, %v9229_v11 }
 0xcb7   :  { %5623 = vst.msk [vmem:[#allocation2 + $0x98] sm:$0xff] %vm341_vm3, %v5609_v34  ;;  %v5459_v0 = vrot.slane %v5445_v1, 7  ;;  %v5585_v5 = vrot.slane %v5445_v1, 1  ;;  %5542 = vrot.lane.b32.xlu2 %v5445_v1, %s8946_s19 }
 0xcb8   :  { %v5525_v9 = vpop.permute.xlu0 %5524  ;;  %5498 = vst.msk [vmem:[#allocation2 + $0xa0] sm:$0xff] %vm341_vm3, %v5484_v58 }
 0xcb9   :  { %5562 = vst.msk [vmem:[#allocation2 + $0x40] sm:$0xff] %vm412_vm4, %v5525_v9  ;;  %v5599_v61 = vsel %vm441_vm1, %v5585_v5, %v5572_v45  ;;  %v5473_v29 = vsel %vm277_vm2, %v5459_v0, %v5446_v50  ;;  %v5517_v25 = vpop.permute.xlu1 %5516 }
 0xcba   :  { %v5613_v21 = vmul.f32 %v5599_v61, %v9357_v57  ;;  %v5474_v3 = vmul.f32 %v5473_v29, %v9368_v22  ;;  %v5630_v29 = vld [vmem:[#allocation2 + $0x10] sm:$0xff] }
 0xcbc   :  { %5627 = vst.msk [vmem:[#allocation2 + $0xd8] sm:$0xff] %vm341_vm3, %v5613_v21 }
 0xcbd   :  { %5488 = vst.msk [vmem:[#allocation2] sm:$0xff] %vm341_vm3, %v5474_v3 }
 0xcbe   :  { %5558 = vst.msk [vmem:[#allocation2] sm:$0xff] %vm412_vm4, %v5517_v25 }
 0xcc0   :  { %v5326_v45 = vpop.permute.xlu0 %5325  ;;  %v5636_v12 = vld [vmem:[#allocation2 + $0x40] sm:$0xff] }
 0xcc1   :  { %v5355_v50 = vadd.f32 %v5326_v45, %v13968_v46  ;;  %v5318_v49 = vpop.permute.xlu1 %5317 }
 0xcc2   :  { %v5351_v27 = vadd.f32 %v5318_v49, %v13845_v17 }
 0xcc3   :  { %v5397_v18 = vadd.f32 %v5371_v44, %v5355_v50 }
 0xcc4   :  { %v5393_v23 = vadd.f32 %v5375_v41, %v5351_v27 }
 0xcc5   :  { %v5416_v24 = vadd.f32 %v13873_v55, %v5397_v18  ;;  %v5628_v2 = vld [vmem:[#allocation2] sm:$0xff] }
 0xcc6   :  { %5763 = vmatmul.f32.vlgmr.msrb.gmra.mxu2 %v5628_v2  ;;  %5881 = vmatmul.f32.vlgmr.msra.gmra.mxu3 %v5628_v2  ;;  %v5412_v46 = vadd.f32 %v13873_v55, %v5393_v23  ;;  %v5632_v18 = vld [vmem:[#allocation2 + $0x20] sm:$0xff] }
 0xcc7   :  { %v5430_v39 = vmax.f32 %v5416_v24, 0.0 }
 0xcc8   :  { %v5426_v15 = vmax.f32 %v5412_v46, 0.0 }
 0xcc9   :  { %v5444_v63 = vmul.f32 %v5430_v39, %v9227_v8  ;;  %v5523_v17 = vpop.permute.xlu1 %5522 }
 0xcca   :  { %v5440_v36 = vmul.f32 %v5426_v15, %v9186_v47  ;;  %5561 = vst.msk [vmem:[#allocation2 + $0x30] sm:$0xff] %vm412_vm4, %v5523_v17 }
 0xccb   :  { %v5458_v34 = vrot.slane %v5444_v63, 7  ;;  %v5584_v1 = vrot.slane %v5444_v63, 1  ;;  %5540 = vrot.lane.b32.xlu1 %v5444_v63, %s8946_s19 }
 0xccc   :  { %v5454_v9 = vrot.slane %v5440_v36, 7  ;;  %v5580_v61 = vrot.slane %v5440_v36, 1  ;;  %5532 = vrot.lane.b32.xlu0 %v5440_v36, %s8946_s19 }
 0xccd   :  { %v5586_v52 = vsel %vm441_vm1, %v5584_v1, %v5585_v5  ;;  %v5460_v51 = vsel %vm277_vm2, %v5458_v34, %v5459_v0 }
 0xcce   :  { %v5612_v58 = vmul.f32 %v5586_v52, %v9307_v4  ;;  %v5487_v21 = vmul.f32 %v5460_v51, %v9373_v26  ;;  %5766 = vmatmul.f32.gmra.mxu2 %v5630_v29  ;;  %5884 = vmatmul.f32.gmra.mxu3 %v5630_v29  ;;  %v5590_v25 = vsel %vm441_vm1, %v5580_v61, %v5581_v33  ;;  %v5655_v29 = vld [vmem:[#allocation2 + $0xd8] sm:$0xff] }
 0xccf   :  { %v5591_v0 = vsel %vm441_vm1, %v5579_v19, %v5580_v61  ;;  %v5464_v5 = vsel %vm277_vm2, %v5454_v9, %v5455_v60  ;;  %v5465_v3 = vsel %vm277_vm2, %v5453_v37, %v5454_v9  ;;  %v5608_v45 = vmul.f32 %v5590_v25, %v9633_v28  ;;  %v16504_v60 = vld [vmem:[#allocation12_spill] sm:$0xff]  ;;  %v5642_v9 = vld [vmem:[#allocation2 + $0x70] sm:$0xff] }
 0xcd0   :  { %5626 = vst.msk [vmem:[#allocation2 + $0xc8] sm:$0xff] %vm341_vm3, %v5612_v58  ;;  %v5607_v30 = vmul.f32 %v5591_v0, %v9617_v31  ;;  %v5483_v33 = vmul.f32 %v5464_v5, %v9210_v59  ;;  %v5482_v50 = vmul.f32 %v5465_v3, %v9188_v48  ;;  %v5372_v37 = vsel %vm277_vm2, %v5368_v13, %v5369_v20 }
 0xcd1   :  { %5501 = vst.msk [vmem:[#allocation2 + $0xd0] sm:$0xff] %vm341_vm3, %v5487_v21  ;;  %v5324_v19 = vpop.permute.xlu1 %5323  ;;  %v5634_v23 = vld [vmem:[#allocation2 + $0x30] sm:$0xff] }
 0xcd2   :  { %5621 = vst.msk [vmem:[#allocation2 + $0x78] sm:$0xff] %vm341_vm3, %v5607_v30  ;;  %v5354_v14 = vadd.f32 %v5324_v19, %v16504_v60 }
 0xcd3   :  { %5622 = vst.msk [vmem:[#allocation2 + $0x88] sm:$0xff] %vm341_vm3, %v5608_v45  ;;  %v5823_v5 = vpop.f32.mrf.mxu1 }
 0xcd4   :  { %5497 = vst.msk [vmem:[#allocation2 + $0x90] sm:$0xff] %vm341_vm3, %v5483_v33  ;;  %v5396_v44 = vadd.f32 %v5372_v37, %v5354_v14 }
 0xcd5   :  { %5496 = vst.msk [vmem:[#allocation2 + $0x80] sm:$0xff] %vm341_vm3, %v5482_v50 }
 0xcd6   :  { %5769 = vmatmul.f32.gmra.mxu2 %v5632_v18  ;;  %5887 = vmatmul.f32.gmra.mxu3 %v5632_v18  ;;  %v5415_v49 = vadd.f32 %v13873_v55, %v5396_v44 }
 0xcd7   :  { %v5653_v61 = vld [vmem:[#allocation2 + $0xc8] sm:$0xff] }
 0xcd8   :  { %v5429_v27 = vmax.f32 %v5415_v49, 0.0 }
 0xcd9   :  { %v5643_v24 = vld [vmem:[#allocation2 + $0x78] sm:$0xff]  ;;  %v5529_v41 = vpop.permute.xlu1 %5528 }
 0xcda   :  { %8697 = vmatmul.msk.f32.gmra.mxu1 %vm341_vm3, %v5643_v24  ;;  %8711 = vmatmul.msk.f32.gmra.mxu0 %vm341_vm3, %v5643_v24  ;;  %v5443_v43 = vmul.f32 %v5429_v27, %v16384_v10  ;;  %5564 = vst.msk [vmem:[#allocation2 + $0x60] sm:$0xff] %vm412_vm4, %v5529_v41 }
 0xcdb   :  { %v5826_v30 = vpop.f32.mrf.mxu1 }
 0xcdc   :  { %v5457_v13 = vrot.slane %v5443_v43, 7  ;;  %v5583_v20 = vrot.slane %v5443_v43, 1  ;;  %5538 = vrot.lane.b32.xlu0 %v5443_v43, %s8946_s19 }
 0xcde   :  { %5772 = vmatmul.f32.gmra.mxu2 %v5634_v23  ;;  %5890 = vmatmul.f32.gmra.mxu3 %v5634_v23  ;;  %v5587_v55 = vsel %vm441_vm1, %v5583_v20, %v5584_v1  ;;  %v5588_v2 = vsel %vm441_vm1, %v5582_v54, %v5583_v20  ;;  %v5461_v39 = vsel %vm277_vm2, %v5457_v13, %v5458_v34  ;;  %v5645_v1 = vld [vmem:[#allocation2 + $0x88] sm:$0xff]  ;;  %v5638_v54 = vld [vmem:[#allocation2 + $0x50] sm:$0xff] }
 0xcdf   :  { %v5462_v46 = vsel %vm277_vm2, %v5456_v62, %v5457_v13  ;;  %v5610_v63 = vmul.f32 %v5588_v2, %v9167_v40  ;;  %v5611_v15 = vmul.f32 %v5587_v55, %v9265_v32  ;;  %v5486_v17 = vmul.f32 %v5461_v39, %v9313_v16  ;;  %v5647_v62 = vld [vmem:[#allocation2 + $0x98] sm:$0xff] }
 0xce0   :  { %v5485_v36 = vmul.f32 %v5462_v46, %v9273_v35 }
 0xce1   :  { %5624 = vst.msk [vmem:[#allocation2 + $0xa8] sm:$0xff] %vm341_vm3, %v5610_v63  ;;  %v5640_v52 = vld [vmem:[#allocation2 + $0x60] sm:$0xff] }
 0xce2   :  { %8698 = vmatmul.msk.f32.gmra.mxu1 %vm341_vm3, %v5645_v1  ;;  %8712 = vmatmul.msk.f32.gmra.mxu0 %vm341_vm3, %v5645_v1  ;;  %5625 = vst.msk [vmem:[#allocation2 + $0xb8] sm:$0xff] %vm341_vm3, %v5611_v15 }
 0xce3   :  { %5500 = vst.msk [vmem:[#allocation2 + $0xc0] sm:$0xff] %vm341_vm3, %v5486_v17  ;;  %v5829_v14 = vpop.f32.mrf.mxu1 }
 0xce4   :  { %5499 = vst.msk [vmem:[#allocation2 + $0xb0] sm:$0xff] %vm341_vm3, %v5485_v36 }
 0xce6   :  { %5775 = vmatmul.f32.gmra.mxu2 %v5636_v12  ;;  %5893 = vmatmul.f32.gmra.mxu3 %v5636_v12 }
 0xce8   :  { %v5649_v34 = vld [vmem:[#allocation2 + $0xa8] sm:$0xff] }
 0xce9   :  { %v5651_v51 = vld [vmem:[#allocation2 + $0xb8] sm:$0xff] }
 0xcea   :  { %8699 = vmatmul.msk.f32.gmra.mxu1 %vm341_vm3, %v5647_v62  ;;  %8713 = vmatmul.msk.f32.gmra.mxu0 %vm341_vm3, %v5647_v62 }
 0xceb   :  { %v5832_v13 = vpop.f32.mrf.mxu1 }
 0xcee   :  { %5778 = vmatmul.f32.gmra.mxu2 %v5638_v54  ;;  %5896 = vmatmul.f32.gmra.mxu3 %v5638_v54 }
 0xcf2   :  { %8700 = vmatmul.msk.f32.gmra.mxu1 %vm341_vm3, %v5649_v34  ;;  %8714 = vmatmul.msk.f32.gmra.mxu0 %vm341_vm3, %v5649_v34 }
 0xcf3   :  { %v5835_v63 = vpop.f32.mrf.mxu1 }
 0xcf6   :  { %5781 = vmatmul.f32.gmra.mxu2 %v5640_v52  ;;  %5899 = vmatmul.f32.gmra.mxu3 %v5640_v52 }
 0xcfa   :  { %8701 = vmatmul.msk.f32.gmra.mxu1 %vm341_vm3, %v5651_v51  ;;  %8715 = vmatmul.msk.f32.gmra.mxu0 %vm341_vm3, %v5651_v51 }
 0xcfb   :  { %v5838_v54 = vpop.f32.mrf.mxu1 }
 0xcfc   :  { %v5537_v58 = vpop.permute.xlu2 %5536 }
 0xcfd   :  { %5568 = vst.msk [vmem:[#allocation2 + $0xa0] sm:$0xff] %vm412_vm4, %v5537_v58 }
 0xcfe   :  { %5784 = vmatmul.f32.gmra.mxu2 %v5642_v9  ;;  %5902 = vmatmul.f32.gmra.mxu3 %v5642_v9 }
 0xd02   :  { %8702 = vmatmul.msk.f32.gmra.mxu1 %vm341_vm3, %v5653_v61  ;;  %8716 = vmatmul.msk.f32.gmra.mxu0 %vm341_vm3, %v5653_v61 }
 0xd03   :  { %v5841_v61 = vpop.f32.mrf.mxu1 }
 0xd04   :  { %v5648_v24 = vld [vmem:[#allocation2 + $0xa0] sm:$0xff] }
 0xd0a   :  { %8703 = vmatmul.msk.f32.gmra.mxu1 %vm341_vm3, %v5655_v29  ;;  %8717 = vmatmul.msk.f32.gmra.mxu0 %vm341_vm3, %v5655_v29 }
 0xd11   :  { %v5543_v21 = vpop.permute.xlu2 %5542 }
 0xd12   :  { %5571 = vst.msk [vmem:[#allocation2 + $0xd0] sm:$0xff] %vm412_vm4, %v5543_v21 }
 0xd19   :  { %v5654_v34 = vld [vmem:[#allocation2 + $0xd0] sm:$0xff] }
 0xd24   :  { %v5535_v25 = vpop.permute.xlu1 %5534 }
 0xd25   :  { %5567 = vst.msk [vmem:[#allocation2 + $0x90] sm:$0xff] %vm412_vm4, %v5535_v25 }
 0xd2c   :  { %v5646_v60 = vld [vmem:[#allocation2 + $0x90] sm:$0xff] }
 0xd3d   :  { %v5541_v0 = vpop.permute.xlu1 %5540 }
 0xd3e   :  { %5570 = vst.msk [vmem:[#allocation2 + $0xc0] sm:$0xff] %vm412_vm4, %v5541_v0  ;;  %v5533_v3 = vpop.permute.xlu0 %5532 }
 0xd3f   :  { %5566 = vst.msk [vmem:[#allocation2 + $0x80] sm:$0xff] %vm412_vm4, %v5533_v3 }
 0xd45   :  { %v5652_v17 = vld [vmem:[#allocation2 + $0xc0] sm:$0xff] }
 0xd46   :  { %v5644_v45 = vld [vmem:[#allocation2 + $0x80] sm:$0xff] }
 0xd47   :  { %5787 = vmatmul.f32.gmra.mxu2 %v5644_v45  ;;  %5905 = vmatmul.f32.gmra.mxu3 %v5644_v45 }
 0xd49   :  { %v5764_v33 = vpop.f32.mrf.mxu2  ;;  %v14475_v45 = vpop.f32.mrf.mxu3 }
 0xd4a   :  { %v14429_v50 = vadd.f32 %v5823_v5, %v5764_v33  ;;  %v14477_v33 = vpop.f32.mrf.mxu0 }
 0xd4c   :  { %6025 = vrot.lane.b32.xlu0 %v14429_v50, %s8946_s19  ;;  %v16287_v18 = vrot.slane %v14429_v50, 1 }
 0xd4e   :  { %v5539_v19 = vpop.permute.xlu0 %5538 }
 0xd4f   :  { %5569 = vst.msk [vmem:[#allocation2 + $0xb0] sm:$0xff] %vm412_vm4, %v5539_v19  ;;  %5790 = vmatmul.f32.gmra.mxu2 %v5646_v60  ;;  %5908 = vmatmul.f32.gmra.mxu3 %v5646_v60 }
 0xd51   :  { %v5767_v37 = vpop.f32.mrf.mxu2  ;;  %v5885_v19 = vpop.f32.mrf.mxu3 }
 0xd52   :  { %v5827_v44 = vadd.f32 %v5826_v30, %v5767_v37  ;;  %v5944_v60 = vpop.f32.mrf.mxu0 }
 0xd54   :  { %v5984_v49 = vrot.slane %v5827_v44, 1  ;;  %6027 = vrot.lane.b32.xlu1 %v5827_v44, %s8946_s19 }
 0xd56   :  { %v14440_v27 = vsel %vm441_vm1, %v16287_v18, %v5984_v49  ;;  %v5650_v55 = vld [vmem:[#allocation2 + $0xb0] sm:$0xff]  ;;  %v8755_v18 = vld [vmem:[%s16151_s5 + $0xd20] sm:$0xff] }
 0xd57   :  { %5793 = vmatmul.f32.gmra.mxu2 %v5648_v24  ;;  %5911 = vmatmul.f32.gmra.mxu3 %v5648_v24  ;;  %v5844_v5 = vpop.f32.mrf.mxu1 }
 0xd59   :  { %v5770_v41 = vpop.f32.mrf.mxu2 }
 0xd5a   :  { %v5830_v43 = vadd.f32 %v5829_v14, %v5770_v41  ;;  %v5888_v14 = vpop.f32.mrf.mxu3  ;;  %v5947_v37 = vpop.f32.mrf.mxu0 }
 0xd5b   :  { %v5948_v41 = vadd.f32 %v5947_v37, %v5888_v14  ;;  %v16507_v14 = vld [vmem:[#allocation16_spill] sm:$0xff] }
 0xd5c   :  { %v5985_v20 = vrot.slane %v5830_v43, 1  ;;  %6029 = vrot.lane.b32.xlu2 %v5830_v43, %s8946_s19 }
 0xd5e   :  { %v6008_v23 = vsel %vm441_vm1, %v5984_v49, %v5985_v20 }
 0xd5f   :  { %5796 = vmatmul.f32.gmra.mxu2 %v5650_v55  ;;  %5914 = vmatmul.f32.gmra.mxu3 %v5650_v55  ;;  %v14482_v55 = vld [vmem:[%s16149_s6 + $0x8] ss:$0 sm:$0xff] }
 0xd61   :  { %v5773_v2 = vpop.f32.mrf.mxu2 }
 0xd62   :  { %v5833_v39 = vadd.f32 %v5832_v13, %v5773_v2  ;;  %v5891_v44 = vpop.f32.mrf.mxu3  ;;  %v5950_v49 = vpop.f32.mrf.mxu0  ;;  %v6083_v13 = vrot.slane %v5948_v41, 7 }
 0xd63   :  { %v5951_v24 = vadd.f32 %v5950_v49, %v5891_v44 }
 0xd64   :  { %v5986_v46 = vrot.slane %v5833_v39, 1  ;;  %6031 = vrot.lane.b32.xlu0 %v5833_v39, %s8946_s19 }
 0xd65   :  { %v6084_v43 = vrot.slane %v5951_v24, 7 }
 0xd66   :  { %v14448_v15 = vsel %vm441_vm1, %v5985_v20, %v5986_v46 }
 0xd67   :  { %5799 = vmatmul.f32.gmra.mxu2 %v5652_v17  ;;  %5917 = vmatmul.f32.gmra.mxu3 %v5652_v17  ;;  %v6105_v39 = vsel %vm277_vm2, %v6083_v13, %v6084_v43  ;;  %v16505_v17 = vld [vmem:[#allocation14_spill] sm:$0xff] }
 0xd69   :  { %v5776_v1 = vpop.f32.mrf.mxu2 }
 0xd6a   :  { %v5836_v36 = vadd.f32 %v5835_v63, %v5776_v1 }
 0xd6c   :  { %v5987_v12 = vrot.slane %v5836_v36, 1  ;;  %6033 = vrot.lane.b32.xlu1 %v5836_v36, %s8946_s19 }
 0xd6e   :  { %v14453_v62 = vsel %vm441_vm1, %v5986_v46, %v5987_v12 }
 0xd6f   :  { %5802 = vmatmul.f32.gmra.mxu2 %v5654_v34  ;;  %5920 = vmatmul.f32.gmra.mxu3 %v5654_v34  ;;  %v14493_v34 = vadd.f32 %v5944_v60, %v5885_v19 }
 0xd71   :  { %v5779_v52 = vpop.f32.mrf.mxu2 }
 0xd72   :  { %v5839_v51 = vadd.f32 %v5838_v54, %v5779_v52 }
 0xd74   :  { %v5988_v58 = vrot.slane %v5839_v51, 1  ;;  %6035 = vrot.lane.b32.xlu0 %v5839_v51, %s8946_s19  ;;  %v5894_v51 = vpop.f32.mrf.mxu3 }
 0xd76   :  { %v14458_v9 = vsel %vm441_vm1, %v5987_v12, %v5988_v58  ;;  %v14488_v12 = vpop.f32.mrf.mxu1 }
 0xd79   :  { %v5782_v29 = vpop.f32.mrf.mxu2 }
 0xd7a   :  { %v14460_v21 = vadd.f32 %v5841_v61, %v5782_v29  ;;  %v5953_v29 = vpop.f32.mrf.mxu0 }
 0xd7b   :  { %v5954_v24 = vadd.f32 %v5953_v29, %v5894_v51 }
 0xd7c   :  { %v16288_v25 = vrot.slane %v14460_v21, 1  ;;  %6037 = vrot.lane.b32.xlu1 %v14460_v21, %s8946_s19  ;;  %v5897_v41 = vpop.f32.mrf.mxu3 }
 0xd7e   :  { %v14469_v0 = vsel %vm441_vm1, %v5988_v58, %v16288_v25 }
 0xd81   :  { %v5785_v3 = vpop.f32.mrf.mxu2 }
 0xd82   :  { %v14471_v30 = vadd.f32 %v5844_v5, %v5785_v3  ;;  %v5850_v3 = vpop.f32.mrf.mxu1 }
 0xd84   :  { %6039 = vrot.lane.b32.xlu0 %v14471_v30, %s8946_s19 }
 0xdb6   :  { %v6030_v20 = vpop.permute.xlu2 %6029 }
 0xdb7   :  { %v6069_v2 = vadd.f32 %v6030_v20, %v6008_v23  ;;  %v16286_v23 = vrot.slane %v14493_v34, 7  ;;  %v5956_v20 = vpop.f32.mrf.mxu0 }
 0xdb9   :  { %v6111_v46 = vadd.f32 %v6105_v39, %v6069_v2  ;;  %v6106_v61 = vsel %vm277_vm2, %v16286_v23, %v6083_v13 }
 0xdbb   :  { %v6130_v63 = vadd.f32 %v14482_v55, %v6111_v46 }
 0xdbd   :  { %v6144_v1 = vadd.f32 %v6130_v63, %v16505_v17  ;;  %v6085_v17 = vrot.slane %v5954_v24, 7 }
 0xdbe   :  { %v14507_v44 = vpop.permute.xlu0 %6025 }
 0xdbf   :  { %v6158_v36 = vmax.f32 %v6144_v1, 0.0  ;;  %v5853_v1 = vpop.f32.mrf.mxu1 }
 0xdc1   :  { %v14491_v54 = vmul.f32 %v6158_v36, %v9204_v53 }
 0xdc3   :  { %16506 = vst [vmem:[#allocation18_spill] sm:$0xff] %v14491_v54  ;;  %6258 = vrot.lane.b32.xlu0 %v14491_v54, %s8946_s19  ;;  %v6186_v13 = vrot.slane %v14491_v54, 7  ;;  %v6312_v2 = vrot.slane %v14491_v54, 1 }
 0xdc6   :  { %v6028_v52 = vpop.permute.xlu1 %6027 }
 0xdc7   :  { %v6068_v58 = vadd.f32 %v6028_v52, %v14440_v27 }
 0xdc9   :  { %v6110_v5 = vadd.f32 %v6106_v61, %v6068_v58 }
 0xdca   :  { %v14504_v60 = vpop.f32.mrf.mxu2 }
 0xdcb   :  { %v6129_v19 = vadd.f32 %v14482_v55, %v6110_v5  ;;  %v5957_v5 = vadd.f32 %v5956_v20, %v5897_v41  ;;  %v5959_v41 = vpop.f32.mrf.mxu0  ;;  %v16509_v20 = vld [vmem:[#allocation13_spill] sm:$0xff] }
 0xdcd   :  { %v6143_v37 = vadd.f32 %v6129_v19, %v16507_v14  ;;  %v6104_v19 = vsel %vm277_vm2, %v6084_v43, %v6085_v17 }
 0xdcf   :  { %v6157_v49 = vmax.f32 %v6143_v37, 0.0 }
 0xdd1   :  { %v14510_v27 = vmul.f32 %v6157_v49, %v9186_v47  ;;  %v5900_v49 = vpop.f32.mrf.mxu3 }
 0xdd2   :  { %v5791_v63 = vpop.f32.mrf.mxu2 }
 0xdd3   :  { %16508 = vst [vmem:[#allocation19_spill] sm:$0xff] %v14510_v27  ;;  %v16284_v39 = vrot.slane %v14510_v27, 7  ;;  %v16285_v46 = vrot.slane %v14510_v27, 1  ;;  %6256 = vrot.lane.b32.xlu1 %v14510_v27, %s8946_s19  ;;  %v14532_v14 = vadd.f32 %v5850_v3, %v5791_v63  ;;  %v5856_v63 = vpop.f32.mrf.mxu1 }
 0xdd5   :  { %v6335_v36 = vsel %vm441_vm1, %v16285_v46, %v6312_v2  ;;  %v6209_v52 = vsel %vm277_vm2, %v16284_v39, %v6186_v13 }
 0xdd6   :  { %v6339_v51 = vmul.f32 %v6335_v36, %v9633_v28  ;;  %v6032_v58 = vpop.permute.xlu0 %6031  ;;  %v6214_v61 = vmul.f32 %v6209_v52, %v9210_v59  ;;  %v6086_v52 = vrot.slane %v5957_v5, 7  ;;  %v14548_v5 = vadd.f32 %v5959_v41, %v5900_v49  ;;  %v8763_v49 = vld [vmem:[%s16151_s5 + $0xd60] sm:$0xff] }
 0xdd7   :  { %v6070_v29 = vadd.f32 %v6032_v58, %v14448_v15  ;;  %v16283_v58 = vrot.slane %v14532_v14, 1 }
 0xdd8   :  { %6353 = vst.msk [vmem:[#allocation2 + $0x18] sm:$0xff] %vm341_vm3, %v6339_v51 }
 0xdd9   :  { %v6112_v37 = vadd.f32 %v6104_v19, %v6070_v29  ;;  %6228 = vst.msk [vmem:[#allocation2 + $0x20] sm:$0xff] %vm341_vm3, %v6214_v61  ;;  %v8765_v19 = vld [vmem:[%s16151_s5 + $0xd70] sm:$0xff] }
 0xdda   :  { %v5794_v36 = vpop.f32.mrf.mxu2  ;;  %6552 = vmatpush.msrb.mxu1 %v8765_v19  ;;  %v5903_v19 = vpop.f32.mrf.mxu3 }
 0xddb   :  { %v6131_v24 = vadd.f32 %v14482_v55, %v6112_v37  ;;  %6043 = vrot.lane.b32.xlu1 %v14532_v14, %s8946_s19  ;;  %v5854_v15 = vadd.f32 %v5853_v1, %v5794_v36  ;;  %v8766_v1 = vld [vmem:[%s16151_s5 + $0xd78] sm:$0xff]  ;;  %v6103_v37 = vsel %vm277_vm2, %v6085_v17, %v6086_v52  ;;  %v8764_v17 = vld [vmem:[%s16151_s5 + $0xd68] sm:$0xff] }
 0xddc   :  { %6670 = vmatpush.msrb.mxu0 %v8766_v1  ;;  %6553 = vmatpush.msrb.mxu1 %v8763_v49  ;;  %v16511_v1 = vld [vmem:[#allocation15_spill] sm:$0xff] }
 0xddd   :  { %v6145_v51 = vadd.f32 %v6131_v24, %v16509_v20  ;;  %v5993_v43 = vrot.slane %v5854_v15, 1  ;;  %6045 = vrot.lane.b32.xlu0 %v5854_v15, %s8946_s19 }
 0xdde   :  { %v6034_v3 = vpop.permute.xlu1 %6033  ;;  %6671 = vmatpush.msrb.mxu0 %v8764_v17 }
 0xddf   :  { %v6159_v61 = vmax.f32 %v6145_v51, 0.0  ;;  %v6071_v29 = vadd.f32 %v6034_v3, %v14453_v62  ;;  %v14556_v62 = vsel %vm441_vm1, %v16283_v58, %v5993_v43  ;;  %v6087_v3 = vrot.slane %v14548_v5, 7 }
 0xde1   :  { %v6113_v24 = vadd.f32 %v6103_v37, %v6071_v29  ;;  %v14559_v36 = vmul.f32 %v6159_v61, %v9225_v7  ;;  %v5962_v61 = vpop.f32.mrf.mxu0 }
 0xde2   :  { %v5797_v20 = vpop.f32.mrf.mxu2  ;;  %v14582_v49 = vadd.f32 %v5962_v61, %v5903_v19  ;;  %v8760_v19 = vld [vmem:[%s16151_s5 + $0xd48] sm:$0xff] }
 0xde3   :  { %16510 = vst [vmem:[#allocation10_spill] sm:$0xff] %v14559_v36  ;;  %v6132_v15 = vadd.f32 %v14482_v55, %v6113_v24  ;;  %v6187_v41 = vrot.slane %v14559_v36, 7  ;;  %v6313_v51 = vrot.slane %v14559_v36, 1  ;;  %v14571_v29 = vadd.f32 %v5856_v63, %v5797_v20 }
 0xde5   :  { %v6146_v37 = vadd.f32 %v6132_v15, %v16511_v1  ;;  %v6334_v24 = vsel %vm441_vm1, %v6312_v2, %v6313_v51  ;;  %v6208_v58 = vsel %vm277_vm2, %v6186_v13, %v6187_v41  ;;  %v5994_v39 = vrot.slane %v14571_v29, 1  ;;  %v5859_v2 = vpop.f32.mrf.mxu1 }
 0xde6   :  { %v6036_v46 = vpop.permute.xlu0 %6035  ;;  %v6340_v23 = vmul.f32 %v6334_v24, %v9163_v38  ;;  %v6215_v63 = vmul.f32 %v6208_v58, %v9229_v11  ;;  %v6102_v15 = vsel %vm277_vm2, %v6086_v52, %v6087_v3 }
 0xde7   :  { %v6160_v5 = vmax.f32 %v6146_v37, 0.0  ;;  %v6072_v20 = vadd.f32 %v6036_v46, %v14458_v9  ;;  %v14589_v13 = vsel %vm441_vm1, %v5993_v43, %v5994_v39  ;;  %v8761_v9 = vld [vmem:[%s16151_s5 + $0xd50] sm:$0xff]  ;;  %v8762_v46 = vld [vmem:[%s16151_s5 + $0xd58] sm:$0xff] }
 0xde8   :  { %6354 = vst.msk [vmem:[#allocation2 + $0x28] sm:$0xff] %vm341_vm3, %v6340_v23  ;;  %v8759_v23 = vld [vmem:[%s16151_s5 + $0xd40] sm:$0xff]  ;;  %6554 = vmatpush.msrb.mxu1 %v8761_v9  ;;  %6672 = vmatpush.msrb.mxu0 %v8762_v46 }
 0xde9   :  { %v6114_v17 = vadd.f32 %v6102_v15, %v6072_v20  ;;  %v14592_v1 = vmul.f32 %v6160_v5, %v16384_v10  ;;  %6229 = vst.msk [vmem:[#allocation2 + $0x30] sm:$0xff] %vm341_vm3, %v6215_v63  ;;  %v8757_v63 = vld [vmem:[%s16151_s5 + $0xd30] sm:$0xff]  ;;  %v5906_v5 = vpop.f32.mrf.mxu3 }
 0xdea   :  { %v5800_v61 = vpop.f32.mrf.mxu2  ;;  %v16513_v20 = vld [vmem:[#allocation5_spill] sm:$0xff]  ;;  %6555 = vmatpush.msrb.mxu1 %v8759_v23  ;;  %6673 = vmatpush.msrb.mxu0 %v8760_v19  ;;  %v16514_v19 = vrot.slane %v14582_v49, 7 }
 0xdeb   :  { %16512 = vst [vmem:[#allocation6_spill] sm:$0xff] %v14592_v1  ;;  %v6133_v52 = vadd.f32 %v14482_v55, %v6114_v17  ;;  %v6188_v58 = vrot.slane %v14592_v1, 7  ;;  %v6314_v43 = vrot.slane %v14592_v1, 1  ;;  %6262 = vrot.lane.b32.xlu1 %v14592_v1, %s8946_s19  ;;  %v14613_v24 = vadd.f32 %v5859_v2, %v5800_v61  ;;  %v8758_v17 = vld [vmem:[%s16151_s5 + $0xd38] sm:$0xff] }
 0xdec   :  { %6556 = vmatpush.msrb.mxu1 %v8757_v63  ;;  %v6101_v1 = vsel %vm277_vm2, %v6087_v3, %v16514_v19  ;;  %6674 = vmatpush.msrb.mxu0 %v8758_v17  ;;  %v8754_v3 = vld [vmem:[%s16151_s5 + $0xd18] sm:$0xff]  ;;  %v5990_v17 = vrot.slane %v14471_v30, 1 }
 0xded   :  { %v6147_v15 = vadd.f32 %v6133_v52, %v16513_v20  ;;  %v6333_v9 = vsel %vm441_vm1, %v6313_v51, %v6314_v43  ;;  %v6207_v2 = vsel %vm277_vm2, %v6187_v41, %v6188_v58  ;;  %v5995_v46 = vrot.slane %v14613_v24, 1  ;;  %v5965_v20 = vpop.f32.mrf.mxu0  ;;  %v8756_v41 = vld [vmem:[%s16151_s5 + $0xd28] sm:$0xff] }
 0xdee   :  { %v6038_v61 = vpop.permute.xlu1 %6037  ;;  %v6341_v23 = vmul.f32 %v6333_v9, %v9167_v40  ;;  %v6216_v52 = vmul.f32 %v6207_v2, %v9273_v35  ;;  %v14636_v51 = vadd.f32 %v5965_v20, %v5906_v5  ;;  %6557 = vmatpush.msrb.mxu1 %v8755_v18  ;;  %v8753_v5 = vld [vmem:[%s16151_s5 + $0xd10] sm:$0xff]  ;;  %6675 = vmatpush.msrb.mxu0 %v8756_v41  ;;  %v8751_v9 = vld [vmem:[%s16151_s5 + $0xd00] sm:$0xff]  ;;  %v16516_v20 = vld [vmem:[#allocation4_spill] sm:$0xff] }
 0xdef   :  { %v6161_v25 = vmax.f32 %v6147_v15, 0.0  ;;  %v6073_v37 = vadd.f32 %v6038_v61, %v14469_v0  ;;  %v14645_v15 = vsel %vm441_vm1, %v5994_v39, %v5995_v46  ;;  %v5862_v39 = vpop.f32.mrf.mxu1  ;;  %v14670_v2 = vadd.f32 %v14477_v33, %v14475_v45 }
 0xdf0   :  { %6355 = vst.msk [vmem:[#allocation2 + $0x38] sm:$0xff] %vm341_vm3, %v6341_v23  ;;  %v16292_v61 = vrot.slane %v14636_v51, 7  ;;  %6558 = vmatpush.msrb.mxu1 %v8753_v5  ;;  %6676 = vmatpush.msrb.mxu0 %v8754_v3  ;;  %v16517_v5 = vrot.slane %v14460_v21, 1 }
 0xdf1   :  { %v6115_v0 = vadd.f32 %v6101_v1, %v6073_v37  ;;  %v14648_v63 = vmul.f32 %v6161_v25, %v9227_v8  ;;  %6230 = vst.msk [vmem:[#allocation2 + $0x40] sm:$0xff] %vm341_vm3, %v6216_v52  ;;  %v8752_v52 = vld [vmem:[%s16151_s5 + $0xd08] sm:$0xff] }
 0xdf2   :  { %v5803_v37 = vpop.f32.mrf.mxu2  ;;  %v6003_v3 = vsel %vm441_vm1, %v16517_v5, %v5990_v17  ;;  %6559 = vmatpush.msrb.mxu1 %v8751_v9  ;;  %6677 = vmatpush.msrb.mxu0 %v8752_v52 }
 0xdf3   :  { %16515 = vst [vmem:[#allocation12_spill] sm:$0xff] %v14648_v63  ;;  %v6134_v1 = vadd.f32 %v14482_v55, %v6115_v0  ;;  %v6189_v25 = vrot.slane %v14648_v63, 7  ;;  %v6315_v18 = vrot.slane %v14648_v63, 1  ;;  %6264 = vrot.lane.b32.xlu0 %v14648_v63, %s8946_s19  ;;  %6049 = vrot.lane.b32.xlu1 %v14613_v24, %s8946_s19  ;;  %v5863_v23 = vadd.f32 %v5862_v39, %v5803_v37 }
 0xdf4   :  { %v16518_v37 = vrot.slane %v14429_v50, 1  ;;  %v16521_v50 = vrot.slane %v14493_v34, 7 }
 0xdf5   :  { %v6148_v24 = vadd.f32 %v6134_v1, %v16516_v20  ;;  %v6332_v41 = vsel %vm441_vm1, %v6314_v43, %v6315_v18  ;;  %v6206_v19 = vsel %vm277_vm2, %v6188_v58, %v6189_v25  ;;  %v5996_v33 = vrot.slane %v5863_v23, 1  ;;  %6051 = vrot.lane.b32.xlu2 %v5863_v23, %s8946_s19 }
 0xdf6   :  { %v6342_v45 = vmul.f32 %v6332_v41, %v9265_v32  ;;  %v6040_v0 = vpop.permute.xlu0 %6039  ;;  %v6217_v39 = vmul.f32 %v6206_v19, %v9313_v16  ;;  %v6081_v58 = vrot.slane %v14670_v2, 7  ;;  %v16519_v20 = vrot.slane %v14582_v49, 7 }
 0xdf7   :  { %v6162_v43 = vmax.f32 %v6148_v24, 0.0  ;;  %v6074_v1 = vadd.f32 %v6040_v0, %v6003_v3  ;;  %v6010_v21 = vsel %vm441_vm1, %v5996_v33, %v16518_v37  ;;  %v14704_v23 = vsel %vm441_vm1, %v5995_v46, %v5996_v33  ;;  %v16522_v33 = vld [vmem:[#allocation7_spill] sm:$0xff]  ;;  %v16523_v37 = vld [vmem:[#allocation17_spill] sm:$0xff] }
 0xdf8   :  { %6356 = vst.msk [vmem:[#allocation2 + $0x48] sm:$0xff] %vm341_vm3, %v6342_v45  ;;  %v6100_v9 = vsel %vm277_vm2, %v16519_v20, %v16292_v61  ;;  %v6067_v52 = vadd.f32 %v14507_v44, %v6010_v21  ;;  %v6107_v49 = vsel %vm277_vm2, %v6081_v58, %v16521_v50  ;;  %v16529_v61 = vld [vmem:[#allocation11_spill] sm:$0xff] }
 0xdf9   :  { %v6116_v24 = vadd.f32 %v6100_v9, %v6074_v1  ;;  %v14708_v41 = vmul.f32 %v6162_v43, %v9206_v56  ;;  %6231 = vst.msk [vmem:[#allocation2 + $0x50] sm:$0xff] %vm341_vm3, %v6217_v39 }
 0xdfa   :  { %v6109_v19 = vadd.f32 %v6107_v49, %v6067_v52 }
 0xdfb   :  { %16520 = vst [vmem:[#allocation14_spill] sm:$0xff] %v14708_v41  ;;  %v6135_v45 = vadd.f32 %v14482_v55, %v6116_v24  ;;  %v6190_v46 = vrot.slane %v14708_v41, 7  ;;  %v6316_v44 = vrot.slane %v14708_v41, 1 }
 0xdfc   :  { %v6128_v5 = vadd.f32 %v14482_v55, %v6109_v19 }
 0xdfd   :  { %v6149_v0 = vadd.f32 %v6135_v45, %v16522_v33  ;;  %v6331_v3 = vsel %vm441_vm1, %v6315_v18, %v6316_v44  ;;  %v6205_v34 = vsel %vm277_vm2, %v6189_v25, %v6190_v46 }
 0xdfe   :  { %v6343_v39 = vmul.f32 %v6331_v3, %v9307_v4  ;;  %v6218_v43 = vmul.f32 %v6205_v34, %v9373_v26  ;;  %v6142_v21 = vadd.f32 %v6128_v5, %v16523_v37  ;;  %v16527_v3 = vrot.slane %v14510_v27, 7  ;;  %v6371_v37 = vld [vmem:[#allocation2 + $0x28] sm:$0xff] }
 0xdff   :  { %v6163_v1 = vmax.f32 %v6149_v0, 0.0  ;;  %v16526_v0 = vrot.slane %v14510_v27, 1 }
 0xe00   :  { %6357 = vst.msk [vmem:[#allocation2 + $0x58] sm:$0xff] %vm341_vm3, %v6343_v39  ;;  %v6156_v9 = vmax.f32 %v6142_v21, 0.0  ;;  %v14774_v39 = vadd.f32 %v14488_v12, %v14504_v60  ;;  %v14787_v12 = vpop.f32.mrf.mxu3  ;;  %v14789_v60 = vpop.f32.mrf.mxu0  ;;  %v8749_v21 = vld [vmem:[%s16151_s5 + $0xcf0] sm:$0xff] }
 0xe01   :  { %v14731_v20 = vmul.f32 %v6163_v1, %v9172_v42  ;;  %6232 = vst.msk [vmem:[#allocation2 + $0x60] sm:$0xff] %vm341_vm3, %v6218_v43  ;;  %v6369_v1 = vld [vmem:[#allocation2 + $0x18] sm:$0xff]  ;;  %6485 = vmatpush.msra.mxu2 %v8749_v21  ;;  %v8741_v21 = vld [vmem:[%s16151_s5 + $0xcb0] sm:$0xff] }
 0xe02   :  { %v14739_v25 = vmul.f32 %v6156_v9, %v9172_v42 }
 0xe03   :  { %16524 = vst [vmem:[#allocation16_spill] sm:$0xff] %v14731_v20  ;;  %v16290_v18 = vrot.slane %v14731_v20, 7  ;;  %v16291_v52 = vrot.slane %v14731_v20, 1  ;;  %6268 = vrot.lane.b32.xlu0 %v14731_v20, %s8946_s19 }
 0xe04   :  { %16525 = vst [vmem:[#allocation13_spill] sm:$0xff] %v14739_v25  ;;  %6254 = vrot.lane.b32.xlu2 %v14739_v25, %s8946_s19  ;;  %v6184_v24 = vrot.slane %v14739_v25, 7  ;;  %v6310_v50 = vrot.slane %v14739_v25, 1 }
 0xe05   :  { %v6330_v49 = vsel %vm441_vm1, %v6316_v44, %v16291_v52  ;;  %v6204_v19 = vsel %vm277_vm2, %v6190_v46, %v16290_v18  ;;  %v8723_v18 = vld [vmem:[%s16151_s5 + $0xc20] sm:$0xff] }
 0xe06   :  { %v6344_v45 = vmul.f32 %v6330_v49, %v9357_v57  ;;  %v6219_v33 = vmul.f32 %v6204_v19, %v9368_v22  ;;  %v6336_v5 = vsel %vm441_vm1, %v6310_v50, %v16526_v0  ;;  %v6210_v44 = vsel %vm277_vm2, %v6184_v24, %v16527_v3  ;;  %v6373_v49 = vld [vmem:[#allocation2 + $0x38] sm:$0xff]  ;;  %v8747_v0 = vld [vmem:[%s16151_s5 + $0xce0] sm:$0xff] }
 0xe07   :  { %v6338_v46 = vmul.f32 %v6336_v5, %v9617_v31  ;;  %v6213_v34 = vmul.f32 %v6210_v44, %v9188_v48  ;;  %v8748_v5 = vld [vmem:[%s16151_s5 + $0xce8] sm:$0xff]  ;;  %6486 = vmatpush.msra.mxu2 %v8747_v0 }
 0xe08   :  { %6358 = vst.msk [vmem:[#allocation2 + $0x68] sm:$0xff] %vm341_vm3, %v6344_v45  ;;  %v5912_v9 = vpop.f32.mrf.mxu3  ;;  %v5971_v19 = vpop.f32.mrf.mxu0  ;;  %v6375_v45 = vld [vmem:[#allocation2 + $0x48] sm:$0xff] }
 0xe09   :  { %6233 = vst.msk [vmem:[#allocation2 + $0x70] sm:$0xff] %vm341_vm3, %v6219_v33 }
 0xe0a   :  { %6352 = vst.msk [vmem:[#allocation2 + $0x8] sm:$0xff] %vm341_vm3, %v6338_v46  ;;  %v8745_v46 = vld [vmem:[%s16151_s5 + $0xcd0] sm:$0xff] }
 0xe0b   :  { %6227 = vst.msk [vmem:[#allocation2 + $0x10] sm:$0xff] %vm341_vm3, %v6213_v34  ;;  %v8746_v34 = vld [vmem:[%s16151_s5 + $0xcd8] sm:$0xff]  ;;  %6487 = vmatpush.msra.mxu2 %v8745_v46 }
 0xe0c   :  { %6041 = vrot.lane.b32.xlu2 %v14774_v39, %s8946_s19 }
 0xe10   :  { %v14805_v33 = vpop.f32.mrf.mxu3  ;;  %v5974_v3 = vpop.f32.mrf.mxu0 }
 0xe11   :  { %v6367_v43 = vld [vmem:[#allocation2 + $0x8] sm:$0xff] }
 0xe12   :  { %8767 = vmatmul.msk.f32.vlgmr.msrb.gmra.mxu1 %vm341_vm3, %v6367_v43  ;;  %8781 = vmatmul.msk.f32.vlgmr.msrb.gmra.mxu0 %vm341_vm3, %v6367_v43  ;;  %v8743_v43 = vld [vmem:[%s16151_s5 + $0xcc0] sm:$0xff] }
 0xe13   :  { %6488 = vmatpush.msra.mxu2 %v8743_v43  ;;  %v8736_v43 = vld [vmem:[%s16151_s5 + $0xc88] sm:$0xff] }
 0xe14   :  { %6260 = vrot.lane.b32.xlu2 %v14559_v36, %s8946_s19 }
 0xe15   :  { %6489 = vmatpush.msra.mxu2 %v8741_v21  ;;  %v8734_v21 = vld [vmem:[%s16151_s5 + $0xc78] sm:$0xff] }
 0xe18   :  { %v14840_v0 = vpop.f32.mrf.mxu3  ;;  %v14848_v46 = vpop.f32.mrf.mxu0 }
 0xe1a   :  { %8768 = vmatmul.msk.f32.gmra.mxu1 %vm341_vm3, %v6369_v1  ;;  %8782 = vmatmul.msk.f32.gmra.mxu0 %vm341_vm3, %v6369_v1  ;;  %v8744_v1 = vld [vmem:[%s16151_s5 + $0xcc8] sm:$0xff] }
 0xe1c   :  { %6047 = vrot.lane.b32.xlu2 %v14571_v29, %s8946_s19  ;;  %v8750_v29 = vld [vmem:[%s16151_s5 + $0xcf8] sm:$0xff] }
 0xe1d   :  { %6603 = vmatpush.msrb.mxu3 %v8750_v29  ;;  %v8742_v29 = vld [vmem:[%s16151_s5 + $0xcb8] sm:$0xff] }
 0xe1f   :  { %6604 = vmatpush.msrb.mxu3 %v8748_v5  ;;  %v8737_v5 = vld [vmem:[%s16151_s5 + $0xc90] sm:$0xff] }
 0xe21   :  { %6605 = vmatpush.msrb.mxu3 %v8746_v34  ;;  %v8735_v34 = vld [vmem:[%s16151_s5 + $0xc80] sm:$0xff] }
 0xe22   :  { %8769 = vmatmul.msk.f32.gmra.mxu1 %vm341_vm3, %v6371_v37  ;;  %8783 = vmatmul.msk.f32.gmra.mxu0 %vm341_vm3, %v6371_v37  ;;  %v6377_v37 = vld [vmem:[#allocation2 + $0x58] sm:$0xff] }
 0xe23   :  { %6606 = vmatpush.msrb.mxu3 %v8744_v1  ;;  %v6379_v1 = vld [vmem:[#allocation2 + $0x68] sm:$0xff] }
 0xe24   :  { %6266 = vrot.lane.b32.xlu2 %v14708_v41, %s8946_s19 }
 0xe25   :  { %6607 = vmatpush.msrb.mxu3 %v8742_v29  ;;  %v8731_v29 = vld [vmem:[%s16151_s5 + $0xc60] sm:$0xff] }
 0xe2a   :  { %8770 = vmatmul.msk.f32.gmra.mxu1 %vm341_vm3, %v6373_v49  ;;  %8784 = vmatmul.msk.f32.gmra.mxu0 %vm341_vm3, %v6373_v49  ;;  %v8739_v49 = vld [vmem:[%s16151_s5 + $0xca0] sm:$0xff] }
 0xe2b   :  { %6490 = vmatpush.msra.mxu2 %v8739_v49  ;;  %v8732_v49 = vld [vmem:[%s16151_s5 + $0xc68] sm:$0xff] }
 0xe2d   :  { %6491 = vmatpush.msra.mxu2 %v8737_v5  ;;  %v8729_v5 = vld [vmem:[%s16151_s5 + $0xc50] sm:$0xff] }
 0xe2f   :  { %6492 = vmatpush.msra.mxu2 %v8735_v34  ;;  %v8727_v34 = vld [vmem:[%s16151_s5 + $0xc40] sm:$0xff] }
 0xe32   :  { %8771 = vmatmul.msk.f32.gmra.mxu1 %vm341_vm3, %v6375_v45  ;;  %8785 = vmatmul.msk.f32.gmra.mxu0 %vm341_vm3, %v6375_v45  ;;  %v8740_v45 = vld [vmem:[%s16151_s5 + $0xca8] sm:$0xff] }
 0xe33   :  { %6608 = vmatpush.msrb.mxu3 %v8740_v45 }
 0xe35   :  { %v6259_v44 = vpop.permute.xlu0 %6258 }
 0xe36   :  { %6298 = vst.msk [vmem:[#allocation2 + $0x20] sm:$0xff] %vm412_vm4, %v6259_v44  ;;  %v8738_v44 = vld [vmem:[%s16151_s5 + $0xc98] sm:$0xff] }
 0xe37   :  { %6609 = vmatpush.msrb.mxu3 %v8738_v44  ;;  %v8730_v44 = vld [vmem:[%s16151_s5 + $0xc58] sm:$0xff] }
 0xe39   :  { %6610 = vmatpush.msrb.mxu3 %v8736_v43  ;;  %v8728_v43 = vld [vmem:[%s16151_s5 + $0xc48] sm:$0xff] }
 0xe3a   :  { %8772 = vmatmul.msk.f32.gmra.mxu1 %vm341_vm3, %v6377_v37  ;;  %8786 = vmatmul.msk.f32.gmra.mxu0 %vm341_vm3, %v6377_v37  ;;  %v8733_v37 = vld [vmem:[%s16151_s5 + $0xc70] sm:$0xff] }
 0xe3b   :  { %6493 = vmatpush.msra.mxu2 %v8733_v37  ;;  %6611 = vmatpush.msrb.mxu3 %v8734_v21  ;;  %v5921_v37 = vpop.f32.mrf.mxu3  ;;  %v8725_v21 = vld [vmem:[%s16151_s5 + $0xc30] sm:$0xff] }
 0xe3d   :  { %6494 = vmatpush.msra.mxu2 %v8731_v29  ;;  %6612 = vmatpush.msrb.mxu3 %v8732_v49  ;;  %v8726_v29 = vld [vmem:[%s16151_s5 + $0xc38] sm:$0xff]  ;;  %v5980_v49 = vpop.f32.mrf.mxu0 }
 0xe3f   :  { %6495 = vmatpush.msra.mxu2 %v8729_v5  ;;  %6613 = vmatpush.msrb.mxu3 %v8730_v44  ;;  %v5991_v5 = vrot.slane %v14774_v39, 1 }
 0xe41   :  { %6496 = vmatpush.msra.mxu2 %v8727_v34  ;;  %6614 = vmatpush.msrb.mxu3 %v8728_v43  ;;  %v8721_v43 = vld [vmem:[%s16151_s5 + $0xc10] sm:$0xff] }
 0xe42   :  { %8773 = vmatmul.msk.f32.gmra.mxu1 %vm341_vm3, %v6379_v1  ;;  %8787 = vmatmul.msk.f32.gmra.mxu0 %vm341_vm3, %v6379_v1  ;;  %v5972_v1 = vadd.f32 %v5971_v19, %v5912_v9  ;;  %v14894_v9 = vadd.f32 %v5974_v3, %v14805_v33  ;;  %v14896_v19 = vadd.f32 %v5980_v49, %v5921_v37  ;;  %v16528_v33 = vrot.slane %v14532_v14, 1  ;;  %v8720_v49 = vld [vmem:[%s16151_s5 + $0xc08] sm:$0xff] }
 0xe43   :  { %6497 = vmatpush.msra.mxu2 %v8725_v21  ;;  %6615 = vmatpush.msrb.mxu3 %v8726_v29 }
 0xe44   :  { %v6091_v44 = vrot.slane %v5972_v1, 7  ;;  %v6001_v3 = vsel %vm441_vm1, %v5991_v5, %v16528_v33  ;;  %v8722_v1 = vld [vmem:[%s16151_s5 + $0xc18] sm:$0xff]  ;;  %v16294_v37 = vrot.slane %v14894_v9, 7  ;;  %v6094_v21 = vrot.slane %v14896_v19, 7 }
 0xe45   :  { %v6257_v45 = vpop.permute.xlu1 %6256  ;;  %6498 = vmatpush.msra.mxu2 %v8723_v18  ;;  %v8719_v18 = vld [vmem:[%s16151_s5 + $0xc00] sm:$0xff] }
 0xe46   :  { %6297 = vst.msk [vmem:[#allocation2 + $0x10] sm:$0xff] %vm412_vm4, %v6257_v45  ;;  %v14891_v45 = vadd.f32 %v14789_v60, %v14787_v12  ;;  %v8724_v12 = vld [vmem:[%s16151_s5 + $0xc28] sm:$0xff] }
 0xe47   :  { %6616 = vmatpush.msrb.mxu3 %v8724_v12  ;;  %6499 = vmatpush.msra.mxu2 %v8721_v43  ;;  %v6097_v43 = vsel %vm277_vm2, %v6091_v44, %v16294_v37 }
 0xe48   :  { %v16293_v60 = vrot.slane %v14891_v45, 7 }
 0xe49   :  { %6617 = vmatpush.msrb.mxu3 %v8722_v1  ;;  %6500 = vmatpush.msra.mxu2 %v8719_v18  ;;  %v6108_v1 = vsel %vm277_vm2, %v6094_v21, %v6081_v58 }
 0xe4a   :  { %v6098_v29 = vsel %vm277_vm2, %v16293_v60, %v6091_v44 }
 0xe4b   :  { %6618 = vmatpush.msrb.mxu3 %v8720_v49  ;;  %v16530_v49 = vld [vmem:[#allocation9_spill] sm:$0xff] }
 0xe4d   :  { %v6044_v34 = vpop.permute.xlu1 %6043 }
 0xe4e   :  { %v6076_v14 = vadd.f32 %v6044_v34, %v6001_v3 }
 0xe4f   :  { %v6046_v33 = vpop.permute.xlu0 %6045  ;;  %v6052_v52 = vpop.permute.xlu2 %6051 }
 0xe50   :  { %v6118_v12 = vadd.f32 %v6098_v29, %v6076_v14  ;;  %v6077_v19 = vadd.f32 %v6046_v33, %v14556_v62  ;;  %v6080_v34 = vadd.f32 %v6052_v52, %v14704_v23  ;;  %v16531_v33 = vld [vmem:[#allocation21_spill] sm:$0xff] }
 0xe52   :  { %v6137_v3 = vadd.f32 %v14482_v55, %v6118_v12  ;;  %v6119_v14 = vadd.f32 %v6097_v43, %v6077_v19  ;;  %v6122_v29 = vadd.f32 %v6108_v1, %v6080_v34 }
 0xe54   :  { %v6151_v62 = vadd.f32 %v6137_v3, %v16529_v61  ;;  %v6138_v23 = vadd.f32 %v14482_v55, %v6119_v14  ;;  %v6141_v52 = vadd.f32 %v14482_v55, %v6122_v29 }
 0xe56   :  { %v6165_v18 = vmax.f32 %v6151_v62, 0.0  ;;  %v6152_v12 = vadd.f32 %v6138_v23, %v16530_v49  ;;  %v6155_v60 = vadd.f32 %v6141_v52, %v16531_v33 }
 0xe58   :  { %v14947_v44 = vmul.f32 %v6165_v18, %v9204_v53  ;;  %v6166_v2 = vmax.f32 %v6152_v12, 0.0  ;;  %v6169_v37 = vmax.f32 %v6155_v60, 0.0  ;;  %v14989_v12 = vadd.f32 %v14848_v46, %v14840_v0 }
 0xe5a   :  { %16532 = vst [vmem:[#allocation15_spill] sm:$0xff] %v14947_v44  ;;  %6272 = vrot.lane.b32.xlu2 %v14947_v44, %s8946_s19  ;;  %v14952_v58 = vmul.f32 %v6169_v37, %v9206_v56  ;;  %v14955_v61 = vmul.f32 %v6166_v2, %v9225_v7  ;;  %v6319_v19 = vrot.slane %v14947_v44, 1  ;;  %v6193_v37 = vrot.slane %v14947_v44, 7 }
 0xe5b   :  { %v6093_v33 = vrot.slane %v14989_v12, 7  ;;  %v16538_v12 = vld [vmem:[#allocation3_spill] sm:$0xff] }
 0xe5c   :  { %16533 = vst [vmem:[#allocation5_spill] sm:$0xff] %v14952_v58  ;;  %v6197_v34 = vrot.slane %v14952_v58, 7  ;;  %v6323_v3 = vrot.slane %v14952_v58, 1  ;;  %6274 = vrot.lane.b32.xlu0 %v14955_v61, %s8946_s19  ;;  %v6194_v60 = vrot.slane %v14955_v61, 7  ;;  %v6320_v1 = vrot.slane %v14955_v61, 1 }
 0xe5d   :  { %16534 = vst [vmem:[#allocation4_spill] sm:$0xff] %v14955_v61  ;;  %v6263_v43 = vpop.permute.xlu1 %6262  ;;  %v6095_v46 = vsel %vm277_vm2, %v6093_v33, %v6094_v21 }
 0xe5e   :  { %6300 = vst.msk [vmem:[#allocation2 + $0x40] sm:$0xff] %vm412_vm4, %v6263_v43  ;;  %v6337_v14 = vsel %vm441_vm1, %v6323_v3, %v6310_v50  ;;  %v6327_v29 = vsel %vm441_vm1, %v6319_v19, %v6320_v1  ;;  %v6255_v62 = vpop.permute.xlu2 %6254  ;;  %v6211_v23 = vsel %vm277_vm2, %v6197_v34, %v6184_v24  ;;  %v6201_v50 = vsel %vm277_vm2, %v6193_v37, %v6194_v60 }
 0xe5f   :  { %v6351_v52 = vmul.f32 %v6337_v14, %v9357_v57  ;;  %v6347_v18 = vmul.f32 %v6327_v29, %v9163_v38  ;;  %v6212_v49 = vmul.f32 %v6211_v23, %v9368_v22  ;;  %v6222_v24 = vmul.f32 %v6201_v50, %v9229_v11 }
 0xe60   :  { %v6002_v14 = vsel %vm441_vm1, %v5990_v17, %v5991_v5 }
 0xe61   :  { %6365 = vst.msk [vmem:[#allocation2 + $0xd8] sm:$0xff] %vm341_vm3, %v6351_v52  ;;  %v16535_v52 = vrot.slane %v14891_v45, 7 }
 0xe62   :  { %6361 = vst.msk [vmem:[#allocation2 + $0x98] sm:$0xff] %vm341_vm3, %v6347_v18  ;;  %v16536_v18 = vrot.slane %v14636_v51, 7 }
 0xe63   :  { %6226 = vst.msk [vmem:[#allocation2] sm:$0xff] %vm341_vm3, %v6212_v49  ;;  %v16537_v49 = vld [vmem:[#allocation20_spill] sm:$0xff] }
 0xe64   :  { %6296 = vst.msk [vmem:[#allocation2] sm:$0xff] %vm412_vm4, %v6255_v62  ;;  %6280 = vrot.lane.b32.xlu0 %v14952_v58, %s8946_s19 }
 0xe65   :  { %v6265_v2 = vpop.permute.xlu0 %6264  ;;  %v6050_v43 = vpop.permute.xlu1 %6049  ;;  %6236 = vst.msk [vmem:[#allocation2 + $0xa0] sm:$0xff] %vm341_vm3, %v6222_v24 }
 0xe66   :  { %6301 = vst.msk [vmem:[#allocation2 + $0x50] sm:$0xff] %vm412_vm4, %v6265_v2  ;;  %v6079_v0 = vadd.f32 %v6050_v43, %v14645_v15  ;;  %v6042_v29 = vpop.permute.xlu2 %6041  ;;  %v6099_v15 = vsel %vm277_vm2, %v16536_v18, %v16535_v52 }
 0xe67   :  { %v6075_v23 = vadd.f32 %v6042_v29, %v6002_v14  ;;  %v6368_v29 = vld [vmem:[#allocation2 + $0x10] sm:$0xff] }
 0xe68   :  { %v6121_v62 = vadd.f32 %v6095_v46, %v6079_v0 }
 0xe69   :  { %v6117_v39 = vadd.f32 %v6099_v15, %v6075_v23 }
 0xe6a   :  { %v6140_v21 = vadd.f32 %v14482_v55, %v6121_v62 }
 0xe6b   :  { %v6136_v50 = vadd.f32 %v14482_v55, %v6117_v39  ;;  %v6366_v17 = vld [vmem:[#allocation2] sm:$0xff]  ;;  %v16541_v39 = vrot.slane %v14731_v20, 1 }
 0xe6c   :  { %v6154_v30 = vadd.f32 %v6140_v21, %v16537_v49  ;;  %6501 = vmatmul.f32.vlgmr.msra.gmra.mxu2 %v6366_v17  ;;  %6619 = vmatmul.f32.vlgmr.msrb.gmra.mxu3 %v6366_v17 }
 0xe6d   :  { %v6150_v24 = vadd.f32 %v6136_v50, %v16538_v12 }
 0xe6e   :  { %v6168_v5 = vmax.f32 %v6154_v30, 0.0  ;;  %v6261_v2 = vpop.permute.xlu2 %6260  ;;  %v16542_v30 = vrot.slane %v14731_v20, 7 }
 0xe6f   :  { %v6164_v45 = vmax.f32 %v6150_v24, 0.0  ;;  %6299 = vst.msk [vmem:[#allocation2 + $0x30] sm:$0xff] %vm412_vm4, %v6261_v2  ;;  %v16543_v2 = vrot.slane %v14894_v9, 7 }
 0xe70   :  { %v15022_v51 = vmul.f32 %v6168_v5, %v9227_v8 }
 0xe71   :  { %v15029_v46 = vmul.f32 %v6164_v45, %v9186_v47  ;;  %v6096_v45 = vsel %vm277_vm2, %v16543_v2, %v6093_v33 }
 0xe72   :  { %16539 = vst [vmem:[#allocation7_spill] sm:$0xff] %v15022_v51  ;;  %v6196_v43 = vrot.slane %v15022_v51, 7  ;;  %v6322_v0 = vrot.slane %v15022_v51, 1  ;;  %6278 = vrot.lane.b32.xlu2 %v15022_v51, %s8946_s19 }
 0xe73   :  { %16540 = vst [vmem:[#allocation17_spill] sm:$0xff] %v15029_v46  ;;  %6270 = vrot.lane.b32.xlu1 %v15029_v46, %s8946_s19  ;;  %v6192_v62 = vrot.slane %v15029_v46, 7  ;;  %v6318_v23 = vrot.slane %v15029_v46, 1 }
 0xe74   :  { %v6324_v14 = vsel %vm441_vm1, %v6322_v0, %v6323_v3  ;;  %v6198_v52 = vsel %vm277_vm2, %v6196_v43, %v6197_v34  ;;  %6504 = vmatmul.f32.gmra.mxu2 %v6368_v29  ;;  %6622 = vmatmul.f32.gmra.mxu3 %v6368_v29 }
 0xe75   :  { %v6350_v18 = vmul.f32 %v6324_v14, %v9307_v4  ;;  %v6269_v15 = vpop.permute.xlu0 %6268  ;;  %v6225_v21 = vmul.f32 %v6198_v52, %v9373_v26  ;;  %v6328_v3 = vsel %vm441_vm1, %v6318_v23, %v6319_v19  ;;  %v6329_v49 = vsel %vm441_vm1, %v16541_v39, %v6318_v23 }
 0xe76   :  { %6303 = vst.msk [vmem:[#allocation2 + $0x70] sm:$0xff] %vm412_vm4, %v6269_v15  ;;  %v6202_v34 = vsel %vm277_vm2, %v6192_v62, %v6193_v37  ;;  %v6203_v50 = vsel %vm277_vm2, %v16542_v30, %v6192_v62  ;;  %v6345_v17 = vmul.f32 %v6329_v49, %v9617_v31  ;;  %v6346_v19 = vmul.f32 %v6328_v3, %v9633_v28  ;;  %v6048_v5 = vpop.permute.xlu2 %6047  ;;  %v6370_v62 = vld [vmem:[#allocation2 + $0x20] sm:$0xff] }
 0xe77   :  { %6364 = vst.msk [vmem:[#allocation2 + $0xc8] sm:$0xff] %vm341_vm3, %v6350_v18  ;;  %v6221_v12 = vmul.f32 %v6202_v34, %v9210_v59  ;;  %v6078_v24 = vadd.f32 %v6048_v5, %v14589_v13  ;;  %v6220_v37 = vmul.f32 %v6203_v50, %v9188_v48  ;;  %v16544_v13 = vld [vmem:[#allocation8_spill] sm:$0xff] }
 0xe78   :  { %6239 = vst.msk [vmem:[#allocation2 + $0xd0] sm:$0xff] %vm341_vm3, %v6225_v21 }
 0xe79   :  { %6359 = vst.msk [vmem:[#allocation2 + $0x78] sm:$0xff] %vm341_vm3, %v6345_v17  ;;  %v6120_v14 = vadd.f32 %v6096_v45, %v6078_v24  ;;  %v6393_v45 = vld [vmem:[#allocation2 + $0xd8] sm:$0xff] }
 0xe7a   :  { %6360 = vst.msk [vmem:[#allocation2 + $0x88] sm:$0xff] %vm341_vm3, %v6346_v19 }
 0xe7b   :  { %6235 = vst.msk [vmem:[#allocation2 + $0x90] sm:$0xff] %vm341_vm3, %v6221_v12  ;;  %v6139_v29 = vadd.f32 %v14482_v55, %v6120_v14  ;;  %v6372_v55 = vld [vmem:[#allocation2 + $0x30] sm:$0xff] }
 0xe7c   :  { %6234 = vst.msk [vmem:[#allocation2 + $0x80] sm:$0xff] %vm341_vm3, %v6220_v37  ;;  %6507 = vmatmul.f32.gmra.mxu2 %v6370_v62  ;;  %6625 = vmatmul.f32.gmra.mxu3 %v6370_v62 }
 0xe7d   :  { %v6153_v23 = vadd.f32 %v6139_v29, %v16544_v13  ;;  %v6380_v37 = vld [vmem:[#allocation2 + $0x70] sm:$0xff] }
 0xe7e   :  { %v6267_v52 = vpop.permute.xlu2 %6266  ;;  %v6391_v2 = vld [vmem:[#allocation2 + $0xc8] sm:$0xff] }
 0xe7f   :  { %v6167_v18 = vmax.f32 %v6153_v23, 0.0  ;;  %6302 = vst.msk [vmem:[#allocation2 + $0x60] sm:$0xff] %vm412_vm4, %v6267_v52 }
 0xe80   :  { %v6381_v9 = vld [vmem:[#allocation2 + $0x78] sm:$0xff] }
 0xe81   :  { %8774 = vmatmul.msk.f32.gmra.mxu1 %vm341_vm3, %v6381_v9  ;;  %8788 = vmatmul.msk.f32.gmra.mxu0 %vm341_vm3, %v6381_v9  ;;  %v15077_v33 = vmul.f32 %v6167_v18, %v16384_v10 }
 0xe83   :  { %16545 = vst [vmem:[#allocation11_spill] sm:$0xff] %v15077_v33  ;;  %6276 = vrot.lane.b32.xlu1 %v15077_v33, %s8946_s19  ;;  %v6195_v15 = vrot.slane %v15077_v33, 7  ;;  %v6321_v21 = vrot.slane %v15077_v33, 1 }
 0xe84   :  { %6510 = vmatmul.f32.gmra.mxu2 %v6372_v55  ;;  %6628 = vmatmul.f32.gmra.mxu3 %v6372_v55 }
 0xe85   :  { %v6325_v3 = vsel %vm441_vm1, %v6321_v21, %v6322_v0  ;;  %v6326_v39 = vsel %vm441_vm1, %v6320_v1, %v6321_v21  ;;  %v6199_v49 = vsel %vm277_vm2, %v6195_v15, %v6196_v43  ;;  %v6200_v34 = vsel %vm277_vm2, %v6194_v60, %v6195_v15  ;;  %v6383_v0 = vld [vmem:[#allocation2 + $0x88] sm:$0xff]  ;;  %v6374_v60 = vld [vmem:[#allocation2 + $0x40] sm:$0xff]  ;;  %v6385_v1 = vld [vmem:[#allocation2 + $0x98] sm:$0xff] }
 0xe86   :  { %v6348_v30 = vmul.f32 %v6326_v39, %v9167_v40  ;;  %v6349_v50 = vmul.f32 %v6325_v3, %v9265_v32  ;;  %v6224_v17 = vmul.f32 %v6199_v49, %v9313_v16  ;;  %v6223_v19 = vmul.f32 %v6200_v34, %v9273_v35  ;;  %v6376_v43 = vld [vmem:[#allocation2 + $0x50] sm:$0xff]  ;;  %v6378_v12 = vld [vmem:[#allocation2 + $0x60] sm:$0xff] }
 0xe88   :  { %6362 = vst.msk [vmem:[#allocation2 + $0xa8] sm:$0xff] %vm341_vm3, %v6348_v30 }
 0xe89   :  { %8775 = vmatmul.msk.f32.gmra.mxu1 %vm341_vm3, %v6383_v0  ;;  %8789 = vmatmul.msk.f32.gmra.mxu0 %vm341_vm3, %v6383_v0  ;;  %6363 = vst.msk [vmem:[#allocation2 + $0xb8] sm:$0xff] %vm341_vm3, %v6349_v50 }
 0xe8a   :  { %6238 = vst.msk [vmem:[#allocation2 + $0xc0] sm:$0xff] %vm341_vm3, %v6224_v17 }
 0xe8b   :  { %6237 = vst.msk [vmem:[#allocation2 + $0xb0] sm:$0xff] %vm341_vm3, %v6223_v19 }
 0xe8c   :  { %6513 = vmatmul.f32.gmra.mxu2 %v6374_v60  ;;  %6631 = vmatmul.f32.gmra.mxu3 %v6374_v60 }
 0xe8f   :  { %v6387_v5 = vld [vmem:[#allocation2 + $0xa8] sm:$0xff]  ;;  %v6561_v23 = vpop.f32.mrf.mxu1 }
 0xe90   :  { %v6389_v24 = vld [vmem:[#allocation2 + $0xb8] sm:$0xff] }
 0xe91   :  { %8776 = vmatmul.msk.f32.gmra.mxu1 %vm341_vm3, %v6385_v1  ;;  %8790 = vmatmul.msk.f32.gmra.mxu0 %vm341_vm3, %v6385_v1 }
 0xe94   :  { %6516 = vmatmul.f32.gmra.mxu2 %v6376_v43  ;;  %6634 = vmatmul.f32.gmra.mxu3 %v6376_v43 }
 0xe97   :  { %v6564_v18 = vpop.f32.mrf.mxu1 }
 0xe99   :  { %8777 = vmatmul.msk.f32.gmra.mxu1 %vm341_vm3, %v6387_v5  ;;  %8791 = vmatmul.msk.f32.gmra.mxu0 %vm341_vm3, %v6387_v5 }
 0xe9c   :  { %6519 = vmatmul.f32.gmra.mxu2 %v6378_v12  ;;  %6637 = vmatmul.f32.gmra.mxu3 %v6378_v12 }
 0xe9f   :  { %v6567_v39 = vpop.f32.mrf.mxu1 }
 0xea1   :  { %8778 = vmatmul.msk.f32.gmra.mxu1 %vm341_vm3, %v6389_v24  ;;  %8792 = vmatmul.msk.f32.gmra.mxu0 %vm341_vm3, %v6389_v24 }
 0xea4   :  { %6522 = vmatmul.f32.gmra.mxu2 %v6380_v37  ;;  %6640 = vmatmul.f32.gmra.mxu3 %v6380_v37 }
 0xea7   :  { %v6570_v0 = vpop.f32.mrf.mxu1 }
 0xea9   :  { %8779 = vmatmul.msk.f32.gmra.mxu1 %vm341_vm3, %v6391_v2  ;;  %8793 = vmatmul.msk.f32.gmra.mxu0 %vm341_vm3, %v6391_v2 }
 0xeaf   :  { %v6573_v37 = vpop.f32.mrf.mxu1 }
 0xeb1   :  { %8780 = vmatmul.msk.f32.gmra.mxu1 %vm341_vm3, %v6393_v45  ;;  %8794 = vmatmul.msk.f32.gmra.mxu0 %vm341_vm3, %v6393_v45 }
 0xeb4   :  { %v6273_v14 = vpop.permute.xlu2 %6272 }
 0xeb5   :  { %6305 = vst.msk [vmem:[#allocation2 + $0x90] sm:$0xff] %vm412_vm4, %v6273_v14 }
 0xebc   :  { %v6384_v3 = vld [vmem:[#allocation2 + $0x90] sm:$0xff] }
 0xecc   :  { %v6279_v29 = vpop.permute.xlu2 %6278 }
 0xecd   :  { %6308 = vst.msk [vmem:[#allocation2 + $0xc0] sm:$0xff] %vm412_vm4, %v6279_v29 }
 0xece   :  { %v6275_v62 = vpop.permute.xlu0 %6274 }
 0xecf   :  { %6306 = vst.msk [vmem:[#allocation2 + $0xa0] sm:$0xff] %vm412_vm4, %v6275_v62 }
 0xed4   :  { %v6390_v45 = vld [vmem:[#allocation2 + $0xc0] sm:$0xff] }
 0xed6   :  { %v6281_v13 = vpop.permute.xlu0 %6280  ;;  %v6386_v30 = vld [vmem:[#allocation2 + $0xa0] sm:$0xff] }
 0xed7   :  { %6309 = vst.msk [vmem:[#allocation2 + $0xd0] sm:$0xff] %vm412_vm4, %v6281_v13 }
 0xee5   :  { %v6271_v52 = vpop.permute.xlu1 %6270 }
 0xee6   :  { %6304 = vst.msk [vmem:[#allocation2 + $0x80] sm:$0xff] %vm412_vm4, %v6271_v52  ;;  %v6392_v52 = vld [vmem:[#allocation2 + $0xd0] sm:$0xff] }
 0xeed   :  { %v6382_v9 = vld [vmem:[#allocation2 + $0x80] sm:$0xff] }
 0xeee   :  { %6525 = vmatmul.f32.gmra.mxu2 %v6382_v9  ;;  %6643 = vmatmul.f32.gmra.mxu3 %v6382_v9 }
 0xeef   :  { %v6502_v55 = vpop.f32.mrf.mxu2 }
 0xef0   :  { %v15120_v15 = vadd.f32 %v6561_v23, %v6502_v55  ;;  %v6576_v23 = vpop.f32.mrf.mxu1 }
 0xef2   :  { %6763 = vrot.lane.b32.xlu1 %v15120_v15, %s8946_s19 }
 0xef5   :  { %v6277_v21 = vpop.permute.xlu1 %6276 }
 0xef6   :  { %6307 = vst.msk [vmem:[#allocation2 + $0xb0] sm:$0xff] %vm412_vm4, %v6277_v21  ;;  %6528 = vmatmul.f32.gmra.mxu2 %v6384_v3  ;;  %6646 = vmatmul.f32.gmra.mxu3 %v6384_v3 }
 0xef7   :  { %v6505_v49 = vpop.f32.mrf.mxu2 }
 0xef8   :  { %v15125_v34 = vadd.f32 %v6564_v18, %v6505_v49  ;;  %v6579_v3 = vpop.f32.mrf.mxu1  ;;  %v15148_v49 = vpop.f32.mrf.mxu0 }
 0xefa   :  { %6765 = vrot.lane.b32.xlu2 %v15125_v34, %s8946_s19  ;;  %v6722_v19 = vrot.slane %v15125_v34, 1 }
 0xefd   :  { %v6388_v43 = vld [vmem:[#allocation2 + $0xb0] sm:$0xff] }
 0xefe   :  { %6531 = vmatmul.f32.gmra.mxu2 %v6386_v30  ;;  %6649 = vmatmul.f32.gmra.mxu3 %v6386_v30 }
 0xeff   :  { %v6508_v50 = vpop.f32.mrf.mxu2 }
 0xf00   :  { %v6568_v17 = vadd.f32 %v6567_v39, %v6508_v50  ;;  %v15155_v50 = vpop.f32.mrf.mxu3 }
 0xf02   :  { %v6723_v60 = vrot.slane %v6568_v17, 1  ;;  %6767 = vrot.lane.b32.xlu0 %v6568_v17, %s8946_s19 }
 0xf04   :  { %v15133_v1 = vsel %vm441_vm1, %v6722_v19, %v6723_v60 }
 0xf06   :  { %6534 = vmatmul.f32.gmra.mxu2 %v6388_v43  ;;  %6652 = vmatmul.f32.gmra.mxu3 %v6388_v43 }
 0xf07   :  { %v6511_v5 = vpop.f32.mrf.mxu2 }
 0xf08   :  { %v6571_v12 = vadd.f32 %v6570_v0, %v6511_v5  ;;  %v6582_v0 = vpop.f32.mrf.mxu1  ;;  %v6682_v5 = vpop.f32.mrf.mxu0 }
 0xf0a   :  { %v6724_v24 = vrot.slane %v6571_v12, 1  ;;  %6769 = vrot.lane.b32.xlu1 %v6571_v12, %s8946_s19  ;;  %v6623_v12 = vpop.f32.mrf.mxu3 }
 0xf0c   :  { %v15138_v2 = vsel %vm441_vm1, %v6723_v60, %v6724_v24 }
 0xf0e   :  { %6537 = vmatmul.f32.gmra.mxu2 %v6390_v45  ;;  %6655 = vmatmul.f32.gmra.mxu3 %v6390_v45 }
 0xf0f   :  { %v6514_v14 = vpop.f32.mrf.mxu2 }
 0xf10   :  { %v6574_v29 = vadd.f32 %v6573_v37, %v6514_v14  ;;  %v15190_v33 = vpop.f32.mrf.mxu1 }
 0xf12   :  { %v6725_v62 = vrot.slane %v6574_v29, 1  ;;  %6771 = vrot.lane.b32.xlu2 %v6574_v29, %s8946_s19  ;;  %v6626_v37 = vpop.f32.mrf.mxu3 }
 0xf14   :  { %v6744_v13 = vsel %vm441_vm1, %v6724_v24, %v6725_v62  ;;  %v6685_v24 = vpop.f32.mrf.mxu0 }
 0xf16   :  { %6540 = vmatmul.f32.gmra.mxu2 %v6392_v52  ;;  %6658 = vmatmul.f32.gmra.mxu3 %v6392_v52  ;;  %v15167_v52 = vadd.f32 %v6682_v5, %v6623_v12 }
 0xf17   :  { %v6517_v18 = vpop.f32.mrf.mxu2 }
 0xf18   :  { %v6577_v9 = vadd.f32 %v6576_v23, %v6517_v18  ;;  %v6686_v23 = vadd.f32 %v6685_v24, %v6626_v37 }
 0xf1a   :  { %v6726_v55 = vrot.slane %v6577_v9, 1  ;;  %6773 = vrot.lane.b32.xlu1 %v6577_v9, %s8946_s19  ;;  %v6629_v14 = vpop.f32.mrf.mxu3  ;;  %v16298_v9 = vrot.slane %v15120_v15, 1 }
 0xf1c   :  { %v15146_v21 = vsel %vm441_vm1, %v6725_v62, %v6726_v55  ;;  %v6688_v45 = vpop.f32.mrf.mxu0 }
 0xf1d   :  { %v6689_v61 = vadd.f32 %v6688_v45, %v6629_v14 }
 0xf1f   :  { %v6520_v39 = vpop.f32.mrf.mxu2  ;;  %v6822_v46 = vrot.slane %v6689_v61, 7 }
 0xf20   :  { %v15150_v34 = vadd.f32 %v6579_v3, %v6520_v39  ;;  %v16301_v3 = vrot.slane %v15167_v52, 7 }
 0xf22   :  { %v16295_v30 = vrot.slane %v15150_v34, 1  ;;  %6775 = vrot.lane.b32.xlu2 %v15150_v34, %s8946_s19  ;;  %v6632_v62 = vpop.f32.mrf.mxu3 }
 0xf24   :  { %v15161_v17 = vsel %vm441_vm1, %v6726_v55, %v16295_v30  ;;  %v6691_v29 = vpop.f32.mrf.mxu0  ;;  %v6821_v55 = vrot.slane %v6686_v23, 7  ;;  %v15178_v30 = vld [vmem:[%s16149_s6 + $0x9] ss:$0 sm:$0xff] }
 0xf26   :  { %v6844_v12 = vsel %vm277_vm2, %v16301_v3, %v6821_v55 }
 0xf27   :  { %v6523_v60 = vpop.f32.mrf.mxu2 }
 0xf28   :  { %v15163_v43 = vadd.f32 %v6582_v0, %v6523_v60  ;;  %v6747_v0 = vsel %vm441_vm1, %v16298_v9, %v6722_v19 }
 0xf2a   :  { %6777 = vrot.lane.b32.xlu1 %v15163_v43, %s8946_s19  ;;  %v6635_v60 = vpop.f32.mrf.mxu3 }
 0xf2c   :  { %v6694_v18 = vpop.f32.mrf.mxu0 }
 0xf32   :  { %v6638_v19 = vpop.f32.mrf.mxu3 }
 0xf34   :  { %v6697_v58 = vpop.f32.mrf.mxu0 }
 0xf3c   :  { %v6700_v9 = vpop.f32.mrf.mxu0 }
 0xf44   :  { %v6703_v3 = vpop.f32.mrf.mxu0 }
 0xf54   :  { %v6766_v39 = vpop.permute.xlu2 %6765 }
 0xf55   :  { %v6806_v5 = vadd.f32 %v6766_v39, %v6747_v0  ;;  %v6641_v39 = vpop.f32.mrf.mxu3  ;;  %v15192_v0 = vadd.f32 %v6694_v18, %v6635_v60  ;;  %v6706_v60 = vpop.f32.mrf.mxu0 }
 0xf57   :  { %v6848_v24 = vadd.f32 %v6844_v12, %v6806_v5  ;;  %v6692_v5 = vadd.f32 %v6691_v29, %v6632_v62  ;;  %v6843_v62 = vsel %vm277_vm2, %v6821_v55, %v6822_v46 }
 0xf59   :  { %v6867_v37 = vadd.f32 %v15178_v30, %v6848_v24  ;;  %v6588_v24 = vpop.f32.mrf.mxu1  ;;  %v6823_v41 = vrot.slane %v6692_v5, 7 }
 0xf5b   :  { %v6881_v23 = vmax.f32 %v6867_v37, 0.0  ;;  %v16311_v37 = vrot.slane %v15192_v0, 7 }
 0xf5d   :  { %v15186_v51 = vmul.f32 %v6881_v23, %v9186_v47  ;;  %v6841_v45 = vsel %vm277_vm2, %v6823_v41, %v16311_v37 }
 0xf5f   :  { %6980 = vrot.lane.b32.xlu2 %v15186_v51, %s8946_s19 }
 0xf61   :  { %v6591_v37 = vpop.f32.mrf.mxu1 }
 0xf64   :  { %v15197_v63 = vpop.permute.xlu1 %6763 }
 0xf6c   :  { %v6772_v12 = vpop.permute.xlu2 %6771 }
 0xf6d   :  { %v6809_v20 = vadd.f32 %v6772_v12, %v6744_v13 }
 0xf6f   :  { %v6851_v29 = vadd.f32 %v6841_v45, %v6809_v20 }
 0xf71   :  { %v15195_v44 = vpop.f32.mrf.mxu2  ;;  %v6644_v23 = vpop.f32.mrf.mxu3  ;;  %v6870_v12 = vadd.f32 %v15178_v30, %v6851_v29  ;;  %v6842_v29 = vsel %vm277_vm2, %v6822_v46, %v6823_v41 }
 0xf72   :  { %v15206_v54 = vadd.f32 %v6703_v3, %v6644_v23  ;;  %v15218_v3 = vadd.f32 %v6700_v9, %v6641_v39  ;;  %v16315_v9 = vrot.slane %v15186_v51, 1 }
 0xf74   :  { %v6768_v36 = vpop.permute.xlu0 %6767  ;;  %v16317_v20 = vrot.slane %v15206_v54, 7 }
 0xf75   :  { %v6807_v14 = vadd.f32 %v6768_v36, %v15133_v1 }
 0xf77   :  { %v6849_v18 = vadd.f32 %v6843_v62, %v6807_v14  ;;  %v6884_v14 = vmax.f32 %v6870_v12, 0.0 }
 0xf79   :  { %v6868_v61 = vadd.f32 %v15178_v30, %v6849_v18  ;;  %v6529_v13 = vpop.f32.mrf.mxu2  ;;  %v6647_v5 = vpop.f32.mrf.mxu3 }
 0xf7a   :  { %v15210_v27 = vadd.f32 %v6588_v24, %v6529_v13  ;;  %v15212_v25 = vadd.f32 %v6706_v60, %v6647_v5  ;;  %v16313_v24 = vrot.slane %v15186_v51, 7  ;;  %v16316_v13 = vrot.slane %v15218_v3, 7 }
 0xf7b   :  { %v6882_v36 = vmax.f32 %v6868_v61, 0.0 }
 0xf7c   :  { %v16312_v1 = vrot.slane %v15212_v25, 7  ;;  %v6770_v55 = vpop.permute.xlu1 %6769  ;;  %6781 = vrot.lane.b32.xlu2 %v15210_v27, %s8946_s19  ;;  %v6776_v61 = vpop.permute.xlu2 %6775 }
 0xf7d   :  { %v6896_v23 = vmul.f32 %v6882_v36, %v9204_v53  ;;  %v6808_v45 = vadd.f32 %v6770_v55, %v15138_v2  ;;  %v6698_v2 = vadd.f32 %v6697_v58, %v6638_v19  ;;  %v15246_v36 = vmul.f32 %v6884_v14, %v16384_v10 }
 0xf7e   :  { %v15231_v62 = vsel %vm277_vm2, %v16317_v20, %v16312_v1 }
 0xf7f   :  { %v6910_v39 = vrot.slane %v6896_v23, 7  ;;  %v7036_v18 = vrot.slane %v6896_v23, 1  ;;  %v6850_v60 = vadd.f32 %v6842_v29, %v6808_v45  ;;  %6982 = vrot.lane.b32.xlu1 %v6896_v23, %s8946_s19  ;;  %v6811_v45 = vadd.f32 %v6776_v61, %v15161_v17 }
 0xf80   :  { %v6825_v29 = vrot.slane %v6698_v2, 7  ;;  %v7038_v61 = vrot.slane %v15246_v36, 1 }
 0xf81   :  { %v7059_v41 = vsel %vm441_vm1, %v16315_v9, %v7036_v18  ;;  %v6869_v46 = vadd.f32 %v15178_v30, %v6850_v60  ;;  %v6532_v5 = vpop.f32.mrf.mxu2  ;;  %v6933_v12 = vsel %vm277_vm2, %v16313_v24, %v6910_v39  ;;  %v16314_v60 = vrot.slane %v15210_v27, 1  ;;  %v6594_v24 = vpop.f32.mrf.mxu1 }
 0xf82   :  { %v7063_v58 = vmul.f32 %v7059_v41, %v9633_v28  ;;  %v6592_v19 = vadd.f32 %v6591_v37, %v6532_v5  ;;  %v6938_v55 = vmul.f32 %v6933_v12, %v9210_v59  ;;  %v6912_v37 = vrot.slane %v15246_v36, 7 }
 0xf83   :  { %v6883_v23 = vmax.f32 %v6869_v46, 0.0  ;;  %v6839_v17 = vsel %vm277_vm2, %v6825_v29, %v16316_v13 }
 0xf84   :  { %7077 = vst.msk [vmem:[#allocation2 + $0x18] sm:$0xff] %vm341_vm3, %v7063_v58  ;;  %v6731_v1 = vrot.slane %v6592_v19, 1  ;;  %6986 = vrot.lane.b32.xlu2 %v15246_v36, %s8946_s19  ;;  %v6853_v5 = vadd.f32 %v6839_v17, %v6811_v45 }
 0xf85   :  { %v15256_v14 = vmul.f32 %v6883_v23, %v9225_v7  ;;  %6952 = vst.msk [vmem:[#allocation2 + $0x20] sm:$0xff] %vm341_vm3, %v6938_v55 }
 0xf86   :  { %v15268_v2 = vsel %vm441_vm1, %v16314_v60, %v6731_v1  ;;  %v6872_v9 = vadd.f32 %v15178_v30, %v6853_v5  ;;  %v8841_v5 = vld [vmem:[%s16151_s5 + $0xee8] sm:$0xff] }
 0xf87   :  { %v6911_v41 = vrot.slane %v15256_v14, 7  ;;  %v7037_v46 = vrot.slane %v15256_v14, 1  ;;  %6783 = vrot.lane.b32.xlu1 %v6592_v19, %s8946_s19 }
 0xf89   :  { %v7057_v12 = vsel %vm441_vm1, %v7037_v46, %v7038_v61  ;;  %v7058_v58 = vsel %vm441_vm1, %v7036_v18, %v7037_v46  ;;  %v6535_v55 = vpop.f32.mrf.mxu2  ;;  %v6931_v23 = vsel %vm277_vm2, %v6911_v41, %v6912_v37  ;;  %v6932_v60 = vsel %vm277_vm2, %v6910_v39, %v6911_v41  ;;  %v8842_v39 = vld [vmem:[%s16151_s5 + $0xef0] sm:$0xff]  ;;  %v8840_v41 = vld [vmem:[%s16151_s5 + $0xee0] sm:$0xff] }
 0xf8a   :  { %v7064_v45 = vmul.f32 %v7058_v58, %v9163_v38  ;;  %v7065_v19 = vmul.f32 %v7057_v12, %v9167_v40  ;;  %v15288_v17 = vadd.f32 %v6594_v24, %v6535_v55  ;;  %v6940_v13 = vmul.f32 %v6931_v23, %v9273_v35  ;;  %v8843_v24 = vld [vmem:[%s16151_s5 + $0xef8] sm:$0xff]  ;;  %7276 = vmatpush.msra.mxu1 %v8842_v39  ;;  %v8838_v55 = vld [vmem:[%s16151_s5 + $0xed0] sm:$0xff] }
 0xf8b   :  { %v6939_v18 = vmul.f32 %v6932_v60, %v9229_v11  ;;  %7394 = vmatpush.msra.mxu0 %v8843_v24  ;;  %v16546_v12 = vrot.slane %v15192_v0, 7  ;;  %v8839_v23 = vld [vmem:[%s16151_s5 + $0xed8] sm:$0xff]  ;;  %v6597_v0 = vpop.f32.mrf.mxu1 }
 0xf8c   :  { %7078 = vst.msk [vmem:[#allocation2 + $0x28] sm:$0xff] %vm341_vm3, %v7064_v45  ;;  %v16318_v46 = vrot.slane %v15288_v17, 1  ;;  %v6774_v20 = vpop.permute.xlu1 %6773  ;;  %7277 = vmatpush.msra.mxu1 %v8840_v41 }
 0xf8d   :  { %7079 = vst.msk [vmem:[#allocation2 + $0x38] sm:$0xff] %vm341_vm3, %v7065_v19  ;;  %v6810_v60 = vadd.f32 %v6774_v20, %v15146_v21  ;;  %v6840_v58 = vsel %vm277_vm2, %v16546_v12, %v6825_v29  ;;  %v6886_v20 = vmax.f32 %v6872_v9, 0.0  ;;  %7395 = vmatpush.msra.mxu0 %v8841_v5  ;;  %v8836_v29 = vld [vmem:[%s16151_s5 + $0xec0] sm:$0xff]  ;;  %v8834_v9 = vld [vmem:[%s16151_s5 + $0xeb0] sm:$0xff]  ;;  %v8833_v12 = vld [vmem:[%s16151_s5 + $0xea8] sm:$0xff] }
 0xf8e   :  { %6954 = vst.msk [vmem:[#allocation2 + $0x40] sm:$0xff] %vm341_vm3, %v6940_v13  ;;  %v15324_v21 = vsel %vm441_vm1, %v6731_v1, %v16318_v46  ;;  %v8837_v13 = vld [vmem:[%s16151_s5 + $0xec8] sm:$0xff]  ;;  %7278 = vmatpush.msra.mxu1 %v8838_v55 }
 0xf8f   :  { %v6852_v45 = vadd.f32 %v6840_v58, %v6810_v60  ;;  %6953 = vst.msk [vmem:[#allocation2 + $0x30] sm:$0xff] %vm341_vm3, %v6939_v18  ;;  %7396 = vmatpush.msra.mxu0 %v8839_v23  ;;  %v8835_v18 = vld [vmem:[%s16151_s5 + $0xeb8] sm:$0xff]  ;;  %v15343_v24 = vmul.f32 %v6886_v20, %v9206_v56  ;;  %v8832_v60 = vld [vmem:[%s16151_s5 + $0xea0] sm:$0xff]  ;;  %v8830_v58 = vld [vmem:[%s16151_s5 + $0xe90] sm:$0xff] }
 0xf90   :  { %7279 = vmatpush.msra.mxu1 %v8836_v29 }
 0xf91   :  { %v6871_v19 = vadd.f32 %v15178_v30, %v6852_v45  ;;  %v6538_v39 = vpop.f32.mrf.mxu2  ;;  %7397 = vmatpush.msra.mxu0 %v8837_v13  ;;  %v6914_v55 = vrot.slane %v15343_v24, 7  ;;  %v7040_v23 = vrot.slane %v15343_v24, 1  ;;  %v8831_v45 = vld [vmem:[%s16151_s5 + $0xe98] sm:$0xff]  ;;  %v8828_v13 = vld [vmem:[%s16151_s5 + $0xe80] sm:$0xff] }
 0xf92   :  { %v15334_v1 = vadd.f32 %v6597_v0, %v6538_v39  ;;  %7280 = vmatpush.msra.mxu1 %v8834_v9 }
 0xf93   :  { %v6885_v41 = vmax.f32 %v6871_v19, 0.0  ;;  %7398 = vmatpush.msra.mxu0 %v8835_v18  ;;  %v6600_v19 = vpop.f32.mrf.mxu1 }
 0xf94   :  { %6787 = vrot.lane.b32.xlu2 %v15334_v1, %s8946_s19  ;;  %7281 = vmatpush.msra.mxu1 %v8832_v60 }
 0xf95   :  { %v6899_v5 = vmul.f32 %v6885_v41, %v9227_v8  ;;  %7399 = vmatpush.msra.mxu0 %v8833_v12  ;;  %v8829_v41 = vld [vmem:[%s16151_s5 + $0xe88] sm:$0xff]  ;;  %v15384_v12 = vadd.f32 %v15148_v49, %v15155_v50  ;;  %v16547_v49 = vrot.slane %v15163_v43, 1  ;;  %v16548_v50 = vrot.slane %v15150_v34, 1 }
 0xf96   :  { %7282 = vmatpush.msra.mxu1 %v8830_v58  ;;  %v16551_v34 = vrot.slane %v15218_v3, 7 }
 0xf97   :  { %v6913_v0 = vrot.slane %v6899_v5, 7  ;;  %v7039_v20 = vrot.slane %v6899_v5, 1  ;;  %6988 = vrot.lane.b32.xlu1 %v6899_v5, %s8946_s19  ;;  %7400 = vmatpush.msra.mxu0 %v8831_v45 }
 0xf98   :  { %7283 = vmatpush.msra.mxu1 %v8828_v13  ;;  %v6819_v13 = vrot.slane %v15384_v12, 7 }
 0xf99   :  { %v7055_v39 = vsel %vm441_vm1, %v7039_v20, %v7040_v23  ;;  %v7056_v9 = vsel %vm441_vm1, %v7038_v61, %v7039_v20  ;;  %v6541_v18 = vpop.f32.mrf.mxu2  ;;  %v6930_v60 = vsel %vm277_vm2, %v6912_v37, %v6913_v0  ;;  %v6929_v5 = vsel %vm277_vm2, %v6913_v0, %v6914_v55  ;;  %7401 = vmatpush.msra.mxu0 %v8829_v41 }
 0xf9a   :  { %v7066_v61 = vmul.f32 %v7056_v9, %v9265_v32  ;;  %v7067_v58 = vmul.f32 %v7055_v39, %v9307_v4  ;;  %v6601_v20 = vadd.f32 %v6600_v19, %v6541_v18  ;;  %v6941_v46 = vmul.f32 %v6930_v60, %v9313_v16 }
 0xf9b   :  { %v6942_v36 = vmul.f32 %v6929_v5, %v9373_v26  ;;  %v6733_v37 = vrot.slane %v15334_v1, 1  ;;  %v6741_v39 = vsel %vm441_vm1, %v16548_v50, %v16547_v49  ;;  %v16549_v19 = vrot.slane %v15120_v15, 1 }
 0xf9c   :  { %7080 = vst.msk [vmem:[#allocation2 + $0x48] sm:$0xff] %vm341_vm3, %v7066_v61  ;;  %v6734_v0 = vrot.slane %v6601_v20, 1  ;;  %v6778_v29 = vpop.permute.xlu1 %6777  ;;  %6789 = vrot.lane.b32.xlu0 %v6601_v20, %s8946_s19  ;;  %v16550_v18 = vrot.slane %v15206_v54, 7  ;;  %v16552_v54 = vrot.slane %v15167_v52, 7 }
 0xf9d   :  { %7081 = vst.msk [vmem:[#allocation2 + $0x58] sm:$0xff] %vm341_vm3, %v7067_v58  ;;  %v6812_v45 = vadd.f32 %v6778_v29, %v6741_v39 }
 0xf9e   :  { %v6748_v9 = vsel %vm441_vm1, %v6734_v0, %v16549_v19  ;;  %v6838_v60 = vsel %vm277_vm2, %v16551_v34, %v16550_v18  ;;  %6955 = vst.msk [vmem:[#allocation2 + $0x50] sm:$0xff] %vm341_vm3, %v6941_v46  ;;  %v15416_v29 = vsel %vm441_vm1, %v6733_v37, %v6734_v0  ;;  %v6845_v3 = vsel %vm277_vm2, %v6819_v13, %v16552_v54 }
 0xf9f   :  { %v6805_v15 = vadd.f32 %v15197_v63, %v6748_v9  ;;  %v6854_v41 = vadd.f32 %v6838_v60, %v6812_v45  ;;  %6956 = vst.msk [vmem:[#allocation2 + $0x60] sm:$0xff] %vm341_vm3, %v6942_v36  ;;  %v16553_v18 = vrot.slane %v15186_v51, 1  ;;  %v16554_v34 = vrot.slane %v15186_v51, 7 }
 0xfa1   :  { %v6847_v5 = vadd.f32 %v6845_v3, %v6805_v15  ;;  %v6873_v46 = vadd.f32 %v15178_v30, %v6854_v41  ;;  %v15471_v41 = vadd.f32 %v15190_v33, %v15195_v44  ;;  %v7093_v3 = vld [vmem:[#allocation2 + $0x18] sm:$0xff]  ;;  %v7095_v44 = vld [vmem:[#allocation2 + $0x28] sm:$0xff]  ;;  %v6650_v33 = vpop.f32.mrf.mxu3 }
 0xfa3   :  { %v6887_v61 = vmax.f32 %v6873_v46, 0.0  ;;  %v6866_v58 = vadd.f32 %v15178_v30, %v6847_v5  ;;  %v6709_v5 = vpop.f32.mrf.mxu0 }
 0xfa4   :  { %v15491_v46 = vadd.f32 %v6709_v5, %v6650_v33 }
 0xfa5   :  { %v15429_v20 = vmul.f32 %v6887_v61, %v9172_v42  ;;  %v6880_v63 = vmax.f32 %v6866_v58, 0.0 }
 0xfa7   :  { %v6915_v0 = vrot.slane %v15429_v20, 7  ;;  %v7041_v36 = vrot.slane %v15429_v20, 1  ;;  %6992 = vrot.lane.b32.xlu1 %v15429_v20, %s8946_s19  ;;  %v15436_v52 = vmul.f32 %v6880_v63, %v9172_v42  ;;  %v6729_v63 = vrot.slane %v15471_v41, 1 }
 0xfa9   :  { %v7054_v49 = vsel %vm441_vm1, %v7040_v23, %v7041_v36  ;;  %6978 = vrot.lane.b32.xlu0 %v15436_v52, %s8946_s19  ;;  %v6908_v50 = vrot.slane %v15436_v52, 7  ;;  %v7034_v39 = vrot.slane %v15436_v52, 1  ;;  %v6928_v45 = vsel %vm277_vm2, %v6914_v55, %v6915_v0  ;;  %v6653_v61 = vpop.f32.mrf.mxu3 }
 0xfaa   :  { %v7068_v19 = vmul.f32 %v7054_v49, %v9357_v57  ;;  %v6943_v9 = vmul.f32 %v6928_v45, %v9368_v22  ;;  %v6829_v49 = vrot.slane %v15491_v46, 7  ;;  %v7099_v45 = vld [vmem:[#allocation2 + $0x48] sm:$0xff]  ;;  %v8811_v46 = vld [vmem:[%s16151_s5 + $0xdf8] sm:$0xff] }
 0xfab   :  { %v7060_v23 = vsel %vm441_vm1, %v7034_v39, %v16553_v18  ;;  %v6934_v60 = vsel %vm277_vm2, %v6908_v50, %v16554_v34  ;;  %v6712_v58 = vpop.f32.mrf.mxu0 }
 0xfac   :  { %7082 = vst.msk [vmem:[#allocation2 + $0x68] sm:$0xff] %vm341_vm3, %v7068_v19  ;;  %v7062_v55 = vmul.f32 %v7060_v23, %v9617_v31  ;;  %v6937_v15 = vmul.f32 %v6934_v60, %v9188_v48  ;;  %v16556_v23 = vrot.slane %v15212_v25, 7 }
 0xfad   :  { %6957 = vst.msk [vmem:[#allocation2 + $0x70] sm:$0xff] %vm341_vm3, %v6943_v9  ;;  %v16555_v9 = vrot.slane %v15210_v27, 1 }
 0xfae   :  { %7076 = vst.msk [vmem:[#allocation2 + $0x8] sm:$0xff] %vm341_vm3, %v7062_v55  ;;  %v6836_v34 = vsel %vm277_vm2, %v16556_v23, %v6829_v49 }
 0xfaf   :  { %6951 = vst.msk [vmem:[#allocation2 + $0x10] sm:$0xff] %vm341_vm3, %v6937_v15 }
 0xfb1   :  { %6779 = vrot.lane.b32.xlu0 %v15471_v41, %s8946_s19  ;;  %v6656_v55 = vpop.f32.mrf.mxu3 }
 0xfb3   :  { %v6715_v15 = vpop.f32.mrf.mxu0  ;;  %v7103_v33 = vld [vmem:[#allocation2 + $0x68] sm:$0xff] }
 0xfb5   :  { %v7091_v51 = vld [vmem:[#allocation2 + $0x8] sm:$0xff] }
 0xfb6   :  { %8844 = vmatmul.msk.f32.vlgmr.msra.gmra.mxu1 %vm341_vm3, %v7091_v51  ;;  %8858 = vmatmul.msk.f32.vlgmr.msra.gmra.mxu0 %vm341_vm3, %v7091_v51 }
 0xfb9   :  { %v6981_v54 = vpop.permute.xlu2 %6980  ;;  %6984 = vrot.lane.b32.xlu0 %v15256_v14, %s8946_s19  ;;  %v7097_v14 = vld [vmem:[#allocation2 + $0x38] sm:$0xff]  ;;  %v6659_v25 = vpop.f32.mrf.mxu3 }
 0xfba   :  { %7021 = vst.msk [vmem:[#allocation2 + $0x10] sm:$0xff] %vm412_vm4, %v6981_v54  ;;  %v7101_v54 = vld [vmem:[#allocation2 + $0x58] sm:$0xff] }
 0xfbb   :  { %v6718_v5 = vpop.f32.mrf.mxu0 }
 0xfbe   :  { %8845 = vmatmul.msk.f32.gmra.mxu1 %vm341_vm3, %v7093_v3  ;;  %8859 = vmatmul.msk.f32.gmra.mxu0 %vm341_vm3, %v7093_v3 }
 0xfc1   :  { %6785 = vrot.lane.b32.xlu0 %v15288_v17, %s8946_s19 }
 0xfc6   :  { %8846 = vmatmul.msk.f32.gmra.mxu1 %vm341_vm3, %v7095_v44  ;;  %8860 = vmatmul.msk.f32.gmra.mxu0 %vm341_vm3, %v7095_v44 }
 0xfc9   :  { %6990 = vrot.lane.b32.xlu0 %v15343_v24, %s8946_s19  ;;  %v6739_v24 = vsel %vm441_vm1, %v6729_v63, %v16555_v9  ;;  %v8827_v9 = vld [vmem:[%s16151_s5 + $0xe78] sm:$0xff] }
 0xfca   :  { %7327 = vmatpush.msra.mxu3 %v8827_v9  ;;  %v8818_v9 = vld [vmem:[%s16151_s5 + $0xe30] sm:$0xff] }
 0xfce   :  { %8847 = vmatmul.msk.f32.gmra.mxu1 %vm341_vm3, %v7097_v14  ;;  %8861 = vmatmul.msk.f32.gmra.mxu0 %vm341_vm3, %v7097_v14  ;;  %v15520_v14 = vadd.f32 %v6718_v5, %v6659_v25 }
 0xfd0   :  { %v6832_v23 = vrot.slane %v15520_v14, 7 }
 0xfd6   :  { %v6782_v19 = vpop.permute.xlu2 %6781  ;;  %8848 = vmatmul.msk.f32.gmra.mxu1 %vm341_vm3, %v7099_v45  ;;  %8862 = vmatmul.msk.f32.gmra.mxu0 %vm341_vm3, %v7099_v45  ;;  %v15522_v45 = vadd.f32 %v6715_v15, %v6656_v55  ;;  %v16557_v15 = vrot.slane %v15288_v17, 1 }
 0xfd7   :  { %v6814_v18 = vadd.f32 %v6782_v19, %v6739_v24  ;;  %v8826_v19 = vld [vmem:[%s16151_s5 + $0xe70] sm:$0xff]  ;;  %v8824_v24 = vld [vmem:[%s16151_s5 + $0xe60] sm:$0xff] }
 0xfd8   :  { %7209 = vmatpush.msrb.mxu2 %v8826_v19  ;;  %v6831_v55 = vrot.slane %v15522_v45, 7 }
 0xfd9   :  { %v6856_v60 = vadd.f32 %v6836_v34, %v6814_v18  ;;  %v8825_v18 = vld [vmem:[%s16151_s5 + $0xe68] sm:$0xff]  ;;  %v8822_v34 = vld [vmem:[%s16151_s5 + $0xe50] sm:$0xff] }
 0xfda   :  { %7210 = vmatpush.msrb.mxu2 %v8824_v24  ;;  %7328 = vmatpush.msra.mxu3 %v8825_v18  ;;  %v6833_v17 = vsel %vm277_vm2, %v6831_v55, %v6832_v23  ;;  %v8819_v24 = vld [vmem:[%s16151_s5 + $0xe38] sm:$0xff] }
 0xfdb   :  { %v6875_v27 = vadd.f32 %v15178_v30, %v6856_v60  ;;  %v8823_v60 = vld [vmem:[%s16151_s5 + $0xe58] sm:$0xff] }
 0xfdc   :  { %7211 = vmatpush.msrb.mxu2 %v8822_v34  ;;  %7329 = vmatpush.msra.mxu3 %v8823_v60 }
 0xfdd   :  { %v6889_v51 = vmax.f32 %v6875_v27, 0.0 }
 0xfde   :  { %v6987_v3 = vpop.permute.xlu2 %6986  ;;  %8849 = vmatmul.msk.f32.gmra.mxu1 %vm341_vm3, %v7101_v54  ;;  %8863 = vmatmul.msk.f32.gmra.mxu0 %vm341_vm3, %v7101_v54  ;;  %v8820_v54 = vld [vmem:[%s16151_s5 + $0xe40] sm:$0xff] }
 0xfdf   :  { %v15513_v44 = vmul.f32 %v6889_v51, %v9204_v53  ;;  %7024 = vst.msk [vmem:[#allocation2 + $0x40] sm:$0xff] %vm412_vm4, %v6987_v3  ;;  %v6736_v51 = vsel %vm441_vm1, %v16557_v15, %v6733_v37  ;;  %v8821_v3 = vld [vmem:[%s16151_s5 + $0xe48] sm:$0xff]  ;;  %7212 = vmatpush.msrb.mxu2 %v8820_v54  ;;  %v8815_v15 = vld [vmem:[%s16151_s5 + $0xe18] sm:$0xff] }
 0xfe0   :  { %7330 = vmatpush.msra.mxu3 %v8821_v3  ;;  %v8812_v3 = vld [vmem:[%s16151_s5 + $0xe00] sm:$0xff] }
 0xfe1   :  { %6996 = vrot.lane.b32.xlu0 %v15513_v44, %s8946_s19  ;;  %7213 = vmatpush.msrb.mxu2 %v8818_v9  ;;  %v8807_v9 = vld [vmem:[%s16151_s5 + $0xdd8] sm:$0xff] }
 0xfe2   :  { %7331 = vmatpush.msra.mxu3 %v8819_v24  ;;  %v8804_v24 = vld [vmem:[%s16151_s5 + $0xdc0] sm:$0xff] }
 0xfe6   :  { %8850 = vmatmul.msk.f32.gmra.mxu1 %vm341_vm3, %v7103_v33  ;;  %8864 = vmatmul.msk.f32.gmra.mxu0 %vm341_vm3, %v7103_v33  ;;  %v15563_v33 = vadd.f32 %v6712_v58, %v6653_v61  ;;  %v8816_v61 = vld [vmem:[%s16151_s5 + $0xe20] sm:$0xff]  ;;  %v8817_v58 = vld [vmem:[%s16151_s5 + $0xe28] sm:$0xff] }
 0xfe7   :  { %7214 = vmatpush.msrb.mxu2 %v8816_v61  ;;  %7332 = vmatpush.msra.mxu3 %v8817_v58  ;;  %v8805_v58 = vld [vmem:[%s16151_s5 + $0xdc8] sm:$0xff] }
 0xfe8   :  { %v6830_v18 = vrot.slane %v15563_v33, 7 }
 0xfe9   :  { %7333 = vmatpush.msra.mxu3 %v8815_v15  ;;  %v7043_v15 = vrot.slane %v15513_v44, 1 }
 0xfea   :  { %v6835_v54 = vsel %vm277_vm2, %v6829_v49, %v6830_v18 }
 0xfee   :  { %v6788_v27 = vpop.permute.xlu2 %6787 }
 0xfef   :  { %v6817_v25 = vadd.f32 %v6788_v27, %v6736_v51  ;;  %v8814_v27 = vld [vmem:[%s16151_s5 + $0xe10] sm:$0xff] }
 0xff0   :  { %7215 = vmatpush.msrb.mxu2 %v8814_v27  ;;  %v6917_v27 = vrot.slane %v15513_v44, 7 }
 0xff1   :  { %v6859_v1 = vadd.f32 %v6833_v17, %v6817_v25  ;;  %v6983_v37 = vpop.permute.xlu1 %6982  ;;  %v8813_v25 = vld [vmem:[%s16151_s5 + $0xe08] sm:$0xff] }
 0xff2   :  { %7022 = vst.msk [vmem:[#allocation2 + $0x20] sm:$0xff] %vm412_vm4, %v6983_v37  ;;  %7216 = vmatpush.msrb.mxu2 %v8812_v3  ;;  %7334 = vmatpush.msra.mxu3 %v8813_v25  ;;  %v8809_v37 = vld [vmem:[%s16151_s5 + $0xde8] sm:$0xff]  ;;  %v8803_v3 = vld [vmem:[%s16151_s5 + $0xdb8] sm:$0xff]  ;;  %v8800_v25 = vld [vmem:[%s16151_s5 + $0xda0] sm:$0xff] }
 0xff3   :  { %v6878_v5 = vadd.f32 %v15178_v30, %v6859_v1  ;;  %v8808_v1 = vld [vmem:[%s16151_s5 + $0xde0] sm:$0xff] }
 0xff4   :  { %7335 = vmatpush.msra.mxu3 %v8811_v46 }
 0xff5   :  { %v6892_v19 = vmax.f32 %v6878_v5, 0.0 }
 0xff6   :  { %7336 = vmatpush.msra.mxu3 %v8809_v37 }
 0xff7   :  { %v15574_v34 = vmul.f32 %v6892_v19, %v9227_v8  ;;  %v8806_v19 = vld [vmem:[%s16151_s5 + $0xdd0] sm:$0xff] }
 0xff8   :  { %7337 = vmatpush.msra.mxu3 %v8807_v9 }
 0xff9   :  { %v6784_v60 = vpop.permute.xlu1 %6783  ;;  %7002 = vrot.lane.b32.xlu0 %v15574_v34, %s8946_s19 }
 0xffa   :  { %v6815_v51 = vadd.f32 %v6784_v60, %v15268_v2  ;;  %v8810_v2 = vld [vmem:[%s16151_s5 + $0xdf0] sm:$0xff]  ;;  %7338 = vmatpush.msra.mxu3 %v8805_v58  ;;  %v6846_v58 = vsel %vm277_vm2, %v6832_v23, %v6819_v13 }
 0xffb   :  { %7217 = vmatpush.msrb.mxu2 %v8810_v2  ;;  %v8802_v60 = vld [vmem:[%s16151_s5 + $0xdb0] sm:$0xff]  ;;  %v8801_v2 = vld [vmem:[%s16151_s5 + $0xda8] sm:$0xff] }
 0xffc   :  { %v6857_v17 = vadd.f32 %v6835_v54, %v6815_v51  ;;  %7339 = vmatpush.msra.mxu3 %v8803_v3 }
 0xffd   :  { %7218 = vmatpush.msrb.mxu2 %v8808_v1 }
 0xffe   :  { %v6876_v49 = vadd.f32 %v15178_v30, %v6857_v17  ;;  %7340 = vmatpush.msra.mxu3 %v8801_v2  ;;  %v6920_v2 = vrot.slane %v15574_v34, 7 }
 0xfff   :  { %7219 = vmatpush.msrb.mxu2 %v8806_v19  ;;  %v8799_v19 = vld [vmem:[%s16151_s5 + $0xd98] sm:$0xff] }
0x1000   :  { %v6890_v5 = vmax.f32 %v6876_v49, 0.0  ;;  %7341 = vmatpush.msra.mxu3 %v8799_v19 }
0x1001   :  { %7220 = vmatpush.msrb.mxu2 %v8804_v24 }
0x1002   :  { %v15626_v61 = vmul.f32 %v6890_v5, %v9225_v7  ;;  %v8798_v5 = vld [vmem:[%s16151_s5 + $0xd90] sm:$0xff] }
0x1003   :  { %7221 = vmatpush.msrb.mxu2 %v8802_v60 }
0x1004   :  { %v6918_v51 = vrot.slane %v15626_v61, 7  ;;  %v7044_v54 = vrot.slane %v15626_v61, 1  ;;  %6998 = vrot.lane.b32.xlu1 %v15626_v61, %s8946_s19 }
0x1005   :  { %7222 = vmatpush.msrb.mxu2 %v8800_v25 }
0x1006   :  { %v7051_v17 = vsel %vm441_vm1, %v7043_v15, %v7044_v54  ;;  %v6925_v46 = vsel %vm277_vm2, %v6917_v27, %v6918_v51 }
0x1007   :  { %v7071_v49 = vmul.f32 %v7051_v17, %v9163_v38  ;;  %v6946_v1 = vmul.f32 %v6925_v46, %v9229_v11  ;;  %7223 = vmatpush.msrb.mxu2 %v8798_v5  ;;  %v8796_v38 = vld [vmem:[%s16151_s5 + $0xd80] sm:$0xff]  ;;  %v8797_v11 = vld [vmem:[%s16151_s5 + $0xd88] sm:$0xff]  ;;  %v7046_v46 = vrot.slane %v15574_v34, 1 }
0x1008   :  { %7342 = vmatpush.msra.mxu3 %v8797_v11 }
0x1009   :  { %7085 = vst.msk [vmem:[#allocation2 + $0x98] sm:$0xff] %vm341_vm3, %v7071_v49  ;;  %v6989_v37 = vpop.permute.xlu1 %6988  ;;  %7224 = vmatpush.msrb.mxu2 %v8796_v38 }
0x100a   :  { %7025 = vst.msk [vmem:[#allocation2 + $0x50] sm:$0xff] %vm412_vm4, %v6989_v37 }
0x100b   :  { %6960 = vst.msk [vmem:[#allocation2 + $0xa0] sm:$0xff] %vm341_vm3, %v6946_v1 }
0x100e   :  { %v6790_v9 = vpop.permute.xlu0 %6789 }
0x100f   :  { %v6818_v24 = vadd.f32 %v6790_v9, %v15416_v29 }
0x1011   :  { %v6860_v60 = vadd.f32 %v6846_v58, %v6818_v24 }
0x1013   :  { %v6879_v3 = vadd.f32 %v15178_v30, %v6860_v60  ;;  %v7092_v60 = vld [vmem:[#allocation2 + $0x10] sm:$0xff] }
0x1015   :  { %v6893_v25 = vmax.f32 %v6879_v3, 0.0 }
0x1017   :  { %v6907_v17 = vmul.f32 %v6893_v25, %v9206_v56 }
0x1019   :  { %v6921_v49 = vrot.slane %v6907_v17, 7  ;;  %v7047_v1 = vrot.slane %v6907_v17, 1  ;;  %v6993_v29 = vpop.permute.xlu1 %6992  ;;  %7004 = vrot.lane.b32.xlu1 %v6907_v17, %s8946_s19 }
0x101a   :  { %7027 = vst.msk [vmem:[#allocation2 + $0x70] sm:$0xff] %vm412_vm4, %v6993_v29 }
0x101b   :  { %v7048_v12 = vsel %vm441_vm1, %v7046_v46, %v7047_v1  ;;  %v7061_v13 = vsel %vm441_vm1, %v7047_v1, %v7034_v39  ;;  %v6979_v14 = vpop.permute.xlu0 %6978  ;;  %v6935_v23 = vsel %vm277_vm2, %v6921_v49, %v6908_v50  ;;  %v6922_v37 = vsel %vm277_vm2, %v6920_v2, %v6921_v49 }
0x101c   :  { %v7074_v5 = vmul.f32 %v7048_v12, %v9307_v4  ;;  %v7075_v19 = vmul.f32 %v7061_v13, %v9357_v57  ;;  %v6936_v38 = vmul.f32 %v6935_v23, %v9368_v22  ;;  %v6949_v39 = vmul.f32 %v6922_v37, %v9373_v26 }
0x101d   :  { %v16558_v4 = vrot.slane %v15163_v43, 1 }
0x101e   :  { %7088 = vst.msk [vmem:[#allocation2 + $0xc8] sm:$0xff] %vm341_vm3, %v7074_v5 }
0x101f   :  { %7089 = vst.msk [vmem:[#allocation2 + $0xd8] sm:$0xff] %vm341_vm3, %v7075_v19  ;;  %v6740_v57 = vsel %vm441_vm1, %v16558_v4, %v6729_v63 }
0x1020   :  { %6950 = vst.msk [vmem:[#allocation2] sm:$0xff] %vm341_vm3, %v6936_v38 }
0x1021   :  { %7020 = vst.msk [vmem:[#allocation2] sm:$0xff] %vm412_vm4, %v6979_v14 }
0x1022   :  { %6963 = vst.msk [vmem:[#allocation2 + $0xd0] sm:$0xff] %vm341_vm3, %v6949_v39 }
0x1023   :  { %v6780_v22 = vpop.permute.xlu0 %6779 }
0x1024   :  { %v6813_v52 = vadd.f32 %v6780_v22, %v6740_v57 }
0x1025   :  { %v7115_v37 = vld [vmem:[#allocation2 + $0xc8] sm:$0xff] }
0x1026   :  { %v6855_v50 = vadd.f32 %v15231_v62, %v6813_v52  ;;  %v7117_v5 = vld [vmem:[#allocation2 + $0xd8] sm:$0xff] }
0x1028   :  { %v6874_v26 = vadd.f32 %v15178_v30, %v6855_v50  ;;  %v7090_v11 = vld [vmem:[#allocation2] sm:$0xff] }
0x1029   :  { %7225 = vmatmul.f32.vlgmr.msrb.gmra.mxu2 %v7090_v11  ;;  %7343 = vmatmul.f32.vlgmr.msra.gmra.mxu3 %v7090_v11 }
0x102a   :  { %v6888_v9 = vmax.f32 %v6874_v26, 0.0 }
0x102b   :  { %v6985_v24 = vpop.permute.xlu0 %6984 }
0x102c   :  { %v6902_v58 = vmul.f32 %v6888_v9, %v9186_v47  ;;  %7023 = vst.msk [vmem:[#allocation2 + $0x30] sm:$0xff] %vm412_vm4, %v6985_v24 }
0x102e   :  { %v6916_v41 = vrot.slane %v6902_v58, 7  ;;  %v7042_v43 = vrot.slane %v6902_v58, 1  ;;  %6994 = vrot.lane.b32.xlu2 %v6902_v58, %s8946_s19 }
0x1030   :  { %v7052_v62 = vsel %vm441_vm1, %v7042_v43, %v7043_v15  ;;  %v7053_v63 = vsel %vm441_vm1, %v7041_v36, %v7042_v43  ;;  %v6926_v3 = vsel %vm277_vm2, %v6916_v41, %v6917_v27  ;;  %v6927_v25 = vsel %vm277_vm2, %v6915_v0, %v6916_v41 }
0x1031   :  { %v7069_v17 = vmul.f32 %v7053_v63, %v9617_v31  ;;  %v7070_v15 = vmul.f32 %v7052_v62, %v9633_v28  ;;  %7228 = vmatmul.f32.gmra.mxu2 %v7092_v60  ;;  %7346 = vmatmul.f32.gmra.mxu3 %v7092_v60  ;;  %v6945_v49 = vmul.f32 %v6926_v3, %v9210_v59  ;;  %v7094_v59 = vld [vmem:[#allocation2 + $0x20] sm:$0xff] }
0x1032   :  { %v6944_v36 = vmul.f32 %v6927_v25, %v9188_v48  ;;  %v6834_v31 = vsel %vm277_vm2, %v6830_v18, %v6831_v55 }
0x1033   :  { %7083 = vst.msk [vmem:[#allocation2 + $0x78] sm:$0xff] %vm341_vm3, %v7069_v17  ;;  %v6786_v44 = vpop.permute.xlu0 %6785  ;;  %v7096_v1 = vld [vmem:[#allocation2 + $0x30] sm:$0xff]  ;;  %v7285_v50 = vpop.f32.mrf.mxu1 }
0x1034   :  { %7084 = vst.msk [vmem:[#allocation2 + $0x88] sm:$0xff] %vm341_vm3, %v7070_v15  ;;  %v6816_v20 = vadd.f32 %v6786_v44, %v15324_v21 }
0x1035   :  { %6959 = vst.msk [vmem:[#allocation2 + $0x90] sm:$0xff] %vm341_vm3, %v6945_v49 }
0x1036   :  { %v6858_v28 = vadd.f32 %v6834_v31, %v6816_v20  ;;  %6958 = vst.msk [vmem:[#allocation2 + $0x80] sm:$0xff] %vm341_vm3, %v6944_v36 }
0x1038   :  { %v6877_v48 = vadd.f32 %v15178_v30, %v6858_v28 }
0x1039   :  { %7231 = vmatmul.f32.gmra.mxu2 %v7094_v59  ;;  %7349 = vmatmul.f32.gmra.mxu3 %v7094_v59 }
0x103a   :  { %v6891_v0 = vmax.f32 %v6877_v48, 0.0  ;;  %v7105_v27 = vld [vmem:[#allocation2 + $0x78] sm:$0xff] }
0x103b   :  { %v6991_v21 = vpop.permute.xlu0 %6990  ;;  %8851 = vmatmul.msk.f32.gmra.mxu1 %vm341_vm3, %v7105_v27  ;;  %8865 = vmatmul.msk.f32.gmra.mxu0 %vm341_vm3, %v7105_v27  ;;  %v7288_v9 = vpop.f32.mrf.mxu1 }
0x103c   :  { %v6905_v45 = vmul.f32 %v6891_v0, %v16384_v10  ;;  %7026 = vst.msk [vmem:[#allocation2 + $0x60] sm:$0xff] %vm412_vm4, %v6991_v21 }
0x103e   :  { %v6919_v55 = vrot.slane %v6905_v45, 7  ;;  %v7045_v33 = vrot.slane %v6905_v45, 1  ;;  %7000 = vrot.lane.b32.xlu2 %v6905_v45, %s8946_s19 }
0x1040   :  { %v7049_v30 = vsel %vm441_vm1, %v7045_v33, %v7046_v46  ;;  %v7050_v18 = vsel %vm441_vm1, %v7044_v54, %v7045_v33  ;;  %v6923_v29 = vsel %vm277_vm2, %v6919_v55, %v6920_v2  ;;  %v6924_v12 = vsel %vm277_vm2, %v6918_v51, %v6919_v55  ;;  %v7107_v54 = vld [vmem:[#allocation2 + $0x88] sm:$0xff]  ;;  %v7104_v2 = vld [vmem:[#allocation2 + $0x70] sm:$0xff] }
0x1041   :  { %v7072_v13 = vmul.f32 %v7050_v18, %v9167_v40  ;;  %v7073_v46 = vmul.f32 %v7049_v30, %v9265_v32  ;;  %7234 = vmatmul.f32.gmra.mxu2 %v7096_v1  ;;  %7352 = vmatmul.f32.gmra.mxu3 %v7096_v1  ;;  %v6948_v14 = vmul.f32 %v6923_v29, %v9313_v16  ;;  %v7098_v40 = vld [vmem:[#allocation2 + $0x40] sm:$0xff]  ;;  %v7109_v32 = vld [vmem:[#allocation2 + $0x98] sm:$0xff] }
0x1042   :  { %v6947_v23 = vmul.f32 %v6924_v12, %v9273_v35  ;;  %v7100_v35 = vld [vmem:[#allocation2 + $0x50] sm:$0xff] }
0x1043   :  { %7086 = vst.msk [vmem:[#allocation2 + $0xa8] sm:$0xff] %vm341_vm3, %v7072_v13  ;;  %8852 = vmatmul.msk.f32.gmra.mxu1 %vm341_vm3, %v7107_v54  ;;  %8866 = vmatmul.msk.f32.gmra.mxu0 %vm341_vm3, %v7107_v54  ;;  %v7102_v61 = vld [vmem:[#allocation2 + $0x60] sm:$0xff]  ;;  %v7291_v43 = vpop.f32.mrf.mxu1 }
0x1044   :  { %7087 = vst.msk [vmem:[#allocation2 + $0xb8] sm:$0xff] %vm341_vm3, %v7073_v46 }
0x1045   :  { %6962 = vst.msk [vmem:[#allocation2 + $0xc0] sm:$0xff] %vm341_vm3, %v6948_v14 }
0x1046   :  { %6961 = vst.msk [vmem:[#allocation2 + $0xb0] sm:$0xff] %vm341_vm3, %v6947_v23 }
0x1049   :  { %7237 = vmatmul.f32.gmra.mxu2 %v7098_v40  ;;  %7355 = vmatmul.f32.gmra.mxu3 %v7098_v40 }
0x104a   :  { %v7111_v16 = vld [vmem:[#allocation2 + $0xa8] sm:$0xff] }
0x104b   :  { %8853 = vmatmul.msk.f32.gmra.mxu1 %vm341_vm3, %v7109_v32  ;;  %8867 = vmatmul.msk.f32.gmra.mxu0 %vm341_vm3, %v7109_v32  ;;  %v7113_v51 = vld [vmem:[#allocation2 + $0xb8] sm:$0xff]  ;;  %v7294_v36 = vpop.f32.mrf.mxu1 }
0x1051   :  { %7240 = vmatmul.f32.gmra.mxu2 %v7100_v35  ;;  %7358 = vmatmul.f32.gmra.mxu3 %v7100_v35 }
0x1053   :  { %v6997_v34 = vpop.permute.xlu0 %6996  ;;  %8854 = vmatmul.msk.f32.gmra.mxu1 %vm341_vm3, %v7111_v16  ;;  %8868 = vmatmul.msk.f32.gmra.mxu0 %vm341_vm3, %v7111_v16  ;;  %v7297_v59 = vpop.f32.mrf.mxu1 }
0x1054   :  { %7029 = vst.msk [vmem:[#allocation2 + $0x90] sm:$0xff] %vm412_vm4, %v6997_v34 }
0x1059   :  { %7243 = vmatmul.f32.gmra.mxu2 %v7102_v61  ;;  %7361 = vmatmul.f32.gmra.mxu3 %v7102_v61 }
0x105b   :  { %8855 = vmatmul.msk.f32.gmra.mxu1 %vm341_vm3, %v7113_v51  ;;  %8869 = vmatmul.msk.f32.gmra.mxu0 %vm341_vm3, %v7113_v51  ;;  %v7108_v52 = vld [vmem:[#allocation2 + $0x90] sm:$0xff]  ;;  %v7300_v33 = vpop.f32.mrf.mxu1 }
0x1061   :  { %7246 = vmatmul.f32.gmra.mxu2 %v7104_v2  ;;  %7364 = vmatmul.f32.gmra.mxu3 %v7104_v2 }
0x1063   :  { %8856 = vmatmul.msk.f32.gmra.mxu1 %vm341_vm3, %v7115_v37  ;;  %8870 = vmatmul.msk.f32.gmra.mxu0 %vm341_vm3, %v7115_v37  ;;  %v7303_v12 = vpop.f32.mrf.mxu1 }
0x106b   :  { %v7003_v19 = vpop.permute.xlu0 %7002  ;;  %8857 = vmatmul.msk.f32.gmra.mxu1 %vm341_vm3, %v7117_v5  ;;  %8871 = vmatmul.msk.f32.gmra.mxu0 %vm341_vm3, %v7117_v5 }
0x106c   :  { %7032 = vst.msk [vmem:[#allocation2 + $0xc0] sm:$0xff] %vm412_vm4, %v7003_v19 }
0x1073   :  { %v7114_v41 = vld [vmem:[#allocation2 + $0xc0] sm:$0xff] }
0x1076   :  { %v6999_v38 = vpop.permute.xlu1 %6998 }
0x1077   :  { %7030 = vst.msk [vmem:[#allocation2 + $0xa0] sm:$0xff] %vm412_vm4, %v6999_v38  ;;  %v7403_v38 = vpop.f32.mrf.mxu0 }
0x107e   :  { %v7110_v26 = vld [vmem:[#allocation2 + $0xa0] sm:$0xff] }
0x1088   :  { %v6995_v39 = vpop.permute.xlu2 %6994 }
0x1089   :  { %7028 = vst.msk [vmem:[#allocation2 + $0x80] sm:$0xff] %vm412_vm4, %v6995_v39 }
0x108b   :  { %v7005_v4 = vpop.permute.xlu1 %7004 }
0x108c   :  { %7033 = vst.msk [vmem:[#allocation2 + $0xd0] sm:$0xff] %vm412_vm4, %v7005_v4 }
0x1090   :  { %v7106_v57 = vld [vmem:[#allocation2 + $0x80] sm:$0xff] }
0x1091   :  { %7249 = vmatmul.f32.gmra.mxu2 %v7106_v57  ;;  %7367 = vmatmul.f32.gmra.mxu3 %v7106_v57 }
0x1093   :  { %v7116_v25 = vld [vmem:[#allocation2 + $0xd0] sm:$0xff] }
0x1098   :  { %v7001_v22 = vpop.permute.xlu2 %7000 }
0x1099   :  { %7031 = vst.msk [vmem:[#allocation2 + $0xb0] sm:$0xff] %vm412_vm4, %v7001_v22  ;;  %7252 = vmatmul.f32.gmra.mxu2 %v7108_v52  ;;  %7370 = vmatmul.f32.gmra.mxu3 %v7108_v52 }
0x10a0   :  { %v7112_v11 = vld [vmem:[#allocation2 + $0xb0] sm:$0xff] }
0x10a1   :  { %7255 = vmatmul.f32.gmra.mxu2 %v7110_v26  ;;  %7373 = vmatmul.f32.gmra.mxu3 %v7110_v26  ;;  %v7653_v26 = vld [vmem:[%s16152_s7 + $0x38] sm:$0xff] }
0x10a2   :  { %7708 = vmatpush.msra.mxu2 %v7653_v26 }
0x10a9   :  { %7258 = vmatmul.f32.gmra.mxu2 %v7112_v11  ;;  %7376 = vmatmul.f32.gmra.mxu3 %v7112_v11  ;;  %v7406_v11 = vpop.f32.mrf.mxu0 }
0x10ac   :  { %v7226_v24 = vpop.f32.mrf.mxu2  ;;  %v7344_v5 = vpop.f32.mrf.mxu3 }
0x10ad   :  { %v15806_v58 = vadd.f32 %v7285_v50, %v7226_v24 }
0x10af   :  { %7487 = vrot.lane.b32.xlu2 %v15806_v58, %s8946_s19  ;;  %v7445_v60 = vrot.slane %v15806_v58, 1  ;;  %v15919_v58 = vld [vmem:[%s16149_s6 + $0xa] ss:$0 sm:$0xff] }
0x10b1   :  { %7261 = vmatmul.f32.gmra.mxu2 %v7114_v41  ;;  %7379 = vmatmul.f32.gmra.mxu3 %v7114_v41  ;;  %v7652_v41 = vld [vmem:[%s16152_s7 + $0x30] sm:$0xff] }
0x10b2   :  { %7709 = vmatpush.msra.mxu2 %v7652_v41 }
0x10b4   :  { %v7229_v62 = vpop.f32.mrf.mxu2  ;;  %v7347_v50 = vpop.f32.mrf.mxu3 }
0x10b5   :  { %v7289_v63 = vadd.f32 %v7288_v9, %v7229_v62 }
0x10b7   :  { %v7446_v3 = vrot.slane %v7289_v63, 1  ;;  %7489 = vrot.lane.b32.xlu0 %v7289_v63, %s8946_s19  ;;  %v7651_v63 = vld [vmem:[%s16152_s7 + $0x28] sm:$0xff] }
0x10b8   :  { %v7306_v23 = vpop.f32.mrf.mxu1  ;;  %7710 = vmatpush.msra.mxu2 %v7651_v63 }
0x10b9   :  { %7264 = vmatmul.f32.gmra.mxu2 %v7116_v25  ;;  %7382 = vmatmul.f32.gmra.mxu3 %v7116_v25  ;;  %v15816_v17 = vsel %vm441_vm1, %v7445_v60, %v7446_v3  ;;  %v7650_v25 = vld [vmem:[%s16152_s7 + $0x20] sm:$0xff] }
0x10ba   :  { %7711 = vmatpush.msra.mxu2 %v7650_v25  ;;  %v16559_v25 = vld [vmem:[#allocation13_spill] sm:$0xff] }
0x10bc   :  { %v7232_v15 = vpop.f32.mrf.mxu2 }
0x10bd   :  { %v7292_v49 = vadd.f32 %v7291_v43, %v7232_v15  ;;  %v7350_v15 = vpop.f32.mrf.mxu3 }
0x10bf   :  { %v7447_v44 = vrot.slane %v7292_v49, 1  ;;  %7491 = vrot.lane.b32.xlu1 %v7292_v49, %s8946_s19 }
0x10c0   :  { %v7309_v34 = vpop.f32.mrf.mxu1 }
0x10c1   :  { %v15821_v20 = vsel %vm441_vm1, %v7446_v3, %v7447_v44 }
0x10c4   :  { %v7235_v31 = vpop.f32.mrf.mxu2 }
0x10c5   :  { %v7295_v28 = vadd.f32 %v7294_v36, %v7235_v31  ;;  %v7649_v36 = vld [vmem:[%s16152_s7 + $0x18] sm:$0xff]  ;;  %v7409_v31 = vpop.f32.mrf.mxu0 }
0x10c6   :  { %7712 = vmatpush.msra.mxu2 %v7649_v36 }
0x10c7   :  { %v7448_v48 = vrot.slane %v7295_v28, 1  ;;  %7493 = vrot.lane.b32.xlu2 %v7295_v28, %s8946_s19  ;;  %v7648_v28 = vld [vmem:[%s16152_s7 + $0x10] sm:$0xff] }
0x10c8   :  { %v7312_v61 = vpop.f32.mrf.mxu1  ;;  %7713 = vmatpush.msra.mxu2 %v7648_v28 }
0x10c9   :  { %v15826_v0 = vsel %vm441_vm1, %v7447_v44, %v7448_v48 }
0x10cc   :  { %v7238_v27 = vpop.f32.mrf.mxu2 }
0x10cd   :  { %v7298_v21 = vadd.f32 %v7297_v59, %v7238_v27  ;;  %v7647_v59 = vld [vmem:[%s16152_s7 + $0x8] sm:$0xff] }
0x10ce   :  { %7714 = vmatpush.msra.mxu2 %v7647_v59 }
0x10cf   :  { %v7449_v45 = vrot.slane %v7298_v21, 1  ;;  %7495 = vrot.lane.b32.xlu0 %v7298_v21, %s8946_s19 }
0x10d0   :  { %v7315_v57 = vpop.f32.mrf.mxu1 }
0x10d1   :  { %v15831_v55 = vsel %vm441_vm1, %v7448_v48, %v7449_v45 }
0x10d4   :  { %v7241_v30 = vpop.f32.mrf.mxu2 }
0x10d5   :  { %v7301_v18 = vadd.f32 %v7300_v33, %v7241_v30 }
0x10d7   :  { %v7450_v1 = vrot.slane %v7301_v18, 1  ;;  %7497 = vrot.lane.b32.xlu1 %v7301_v18, %s8946_s19  ;;  %v7353_v18 = vpop.f32.mrf.mxu3 }
0x10d8   :  { %v7318_v62 = vpop.f32.mrf.mxu1 }
0x10d9   :  { %v15836_v29 = vsel %vm441_vm1, %v7449_v45, %v7450_v1  ;;  %v7646_v45 = vld [vmem:[%s16152_s7] sm:$0xff] }
0x10da   :  { %7715 = vmatpush.msra.mxu2 %v7646_v45 }
0x10dc   :  { %v7244_v13 = vpop.f32.mrf.mxu2 }
0x10dd   :  { %v7304_v46 = vadd.f32 %v7303_v12, %v7244_v13  ;;  %v7412_v12 = vpop.f32.mrf.mxu0 }
0x10df   :  { %v7451_v14 = vrot.slane %v7304_v46, 1  ;;  %7499 = vrot.lane.b32.xlu2 %v7304_v46, %s8946_s19  ;;  %v7407_v46 = vadd.f32 %v7406_v11, %v7347_v50 }
0x10e0   :  { %v7321_v21 = vpop.f32.mrf.mxu1 }
0x10e1   :  { %v15841_v54 = vsel %vm441_vm1, %v7450_v1, %v7451_v14 }
0x10e4   :  { %v7247_v40 = vpop.f32.mrf.mxu2 }
0x10e5   :  { %v7307_v32 = vadd.f32 %v7306_v23, %v7247_v40 }
0x10e7   :  { %v7452_v35 = vrot.slane %v7307_v32, 1  ;;  %7501 = vrot.lane.b32.xlu0 %v7307_v32, %s8946_s19  ;;  %v15897_v32 = vadd.f32 %v7403_v38, %v7344_v5  ;;  %v7415_v38 = vpop.f32.mrf.mxu0 }
0x10e8   :  { %v7324_v23 = vpop.f32.mrf.mxu1 }
0x10e9   :  { %v15846_v16 = vsel %vm441_vm1, %v7451_v14, %v7452_v35  ;;  %v7410_v14 = vadd.f32 %v7409_v31, %v7350_v15 }
0x10ef   :  { %v7418_v28 = vpop.f32.mrf.mxu0 }
0x1114   :  { %v7250_v51 = vpop.f32.mrf.mxu2 }
0x1115   :  { %v7310_v2 = vadd.f32 %v7309_v34, %v7250_v51  ;;  %v7545_v51 = vrot.slane %v7410_v14, 7 }
0x1117   :  { %v7453_v37 = vrot.slane %v7310_v2, 1  ;;  %7503 = vrot.lane.b32.xlu1 %v7310_v2, %s8946_s19 }
0x1119   :  { %v15851_v19 = vsel %vm441_vm1, %v7452_v35, %v7453_v37 }
0x111c   :  { %v7253_v39 = vpop.f32.mrf.mxu2 }
0x111d   :  { %v7313_v4 = vadd.f32 %v7312_v61, %v7253_v39  ;;  %v7544_v61 = vrot.slane %v7407_v46, 7 }
0x111f   :  { %v7454_v22 = vrot.slane %v7313_v4, 1  ;;  %7505 = vrot.lane.b32.xlu2 %v7313_v4, %s8946_s19  ;;  %v7543_v4 = vrot.slane %v15897_v32, 7  ;;  %v7568_v11 = vsel %vm277_vm2, %v7544_v61, %v7545_v51 }
0x1121   :  { %v15856_v52 = vsel %vm441_vm1, %v7453_v37, %v7454_v22  ;;  %v7356_v37 = vpop.f32.mrf.mxu3  ;;  %v7569_v26 = vsel %vm277_vm2, %v7543_v4, %v7544_v61 }
0x1124   :  { %v7256_v9 = vpop.f32.mrf.mxu2 }
0x1125   :  { %v7316_v24 = vadd.f32 %v7315_v57, %v7256_v9  ;;  %v7488_v57 = vpop.permute.xlu2 %7487 }
0x1127   :  { %v7455_v43 = vrot.slane %v7316_v24, 1  ;;  %7507 = vrot.lane.b32.xlu0 %v7316_v24, %s8946_s19 }
0x1129   :  { %v15870_v3 = vsel %vm441_vm1, %v7454_v22, %v7455_v43  ;;  %v7490_v35 = vpop.permute.xlu0 %7489 }
0x112a   :  { %v7530_v39 = vadd.f32 %v7490_v35, %v15816_v17  ;;  %v7413_v17 = vadd.f32 %v7412_v12, %v7353_v18 }
0x112c   :  { %v7259_v49 = vpop.f32.mrf.mxu2 }
0x112d   :  { %v7319_v44 = vadd.f32 %v7318_v62, %v7259_v49  ;;  %v7359_v49 = vpop.f32.mrf.mxu3 }
0x112e   :  { %v7419_v12 = vadd.f32 %v7418_v28, %v7359_v49 }
0x112f   :  { %v7456_v48 = vrot.slane %v7319_v44, 1  ;;  %7509 = vrot.lane.b32.xlu1 %v7319_v44, %s8946_s19  ;;  %v7416_v44 = vadd.f32 %v7415_v38, %v7356_v37  ;;  %v16562_v38 = vld [vmem:[#allocation10_spill] sm:$0xff] }
0x1131   :  { %v15887_v27 = vsel %vm441_vm1, %v7455_v43, %v7456_v48  ;;  %v7492_v24 = vpop.permute.xlu1 %7491  ;;  %v7546_v43 = vrot.slane %v7413_v17, 7 }
0x1132   :  { %v7531_v63 = vadd.f32 %v7492_v24, %v15821_v20 }
0x1133   :  { %v7567_v31 = vsel %vm277_vm2, %v7545_v51, %v7546_v43  ;;  %v7421_v51 = vpop.f32.mrf.mxu0 }
0x1134   :  { %v7262_v33 = vpop.f32.mrf.mxu2 }
0x1135   :  { %v7322_v30 = vadd.f32 %v7321_v21, %v7262_v33  ;;  %v7573_v21 = vadd.f32 %v7567_v31, %v7531_v63  ;;  %v7494_v33 = vpop.permute.xlu2 %7493  ;;  %v7362_v14 = vpop.f32.mrf.mxu3 }
0x1136   :  { %v7532_v20 = vadd.f32 %v7494_v33, %v15826_v0 }
0x1137   :  { %v7457_v1 = vrot.slane %v7322_v30, 1  ;;  %7511 = vrot.lane.b32.xlu2 %v7322_v30, %s8946_s19  ;;  %v7547_v30 = vrot.slane %v7416_v44, 7 }
0x1139   :  { %v15895_v13 = vsel %vm441_vm1, %v7456_v48, %v7457_v1  ;;  %v16560_v48 = vld [vmem:[#allocation19_spill] sm:$0xff]  ;;  %v7566_v46 = vsel %vm277_vm2, %v7546_v43, %v7547_v30 }
0x113c   :  { %v7265_v40 = vpop.f32.mrf.mxu2 }
0x113d   :  { %v7325_v34 = vadd.f32 %v7324_v23, %v7265_v40  ;;  %v7574_v23 = vadd.f32 %v7566_v46, %v7532_v20  ;;  %v16561_v40 = vld [vmem:[#allocation18_spill] sm:$0xff]  ;;  %v7500_v44 = vpop.permute.xlu2 %7499  ;;  %v16564_v20 = vld [vmem:[#allocation12_spill] sm:$0xff] }
0x113f   :  { %v7458_v2 = vrot.slane %v7325_v34, 1  ;;  %7513 = vrot.lane.b32.xlu0 %v7325_v34, %s8946_s19  ;;  %v7593_v0 = vadd.f32 %v15919_v58, %v7574_v23 }
0x1141   :  { %v7472_v22 = vsel %vm441_vm1, %v7458_v2, %v7445_v60  ;;  %v15908_v5 = vsel %vm441_vm1, %v7457_v1, %v7458_v2  ;;  %v7572_v60 = vadd.f32 %v7568_v11, %v7530_v39  ;;  %v7592_v1 = vadd.f32 %v15919_v58, %v7573_v21  ;;  %v7496_v61 = vpop.permute.xlu0 %7495 }
0x1142   :  { %v7529_v50 = vadd.f32 %v7488_v57, %v7472_v22  ;;  %v7548_v2 = vrot.slane %v7419_v12, 7  ;;  %v7533_v39 = vadd.f32 %v7496_v61, %v15831_v55  ;;  %v7422_v57 = vadd.f32 %v7421_v51, %v7362_v14  ;;  %v16565_v61 = vld [vmem:[#allocation14_spill] sm:$0xff] }
0x1143   :  { %v7591_v62 = vadd.f32 %v15919_v58, %v7572_v60  ;;  %v7606_v35 = vadd.f32 %v7592_v1, %v16561_v40  ;;  %v7424_v60 = vpop.f32.mrf.mxu0 }
0x1144   :  { %v7571_v9 = vadd.f32 %v7569_v26, %v7529_v50  ;;  %v7565_v22 = vsel %vm277_vm2, %v7547_v30, %v7548_v2  ;;  %v7607_v50 = vadd.f32 %v7593_v0, %v16562_v38  ;;  %v7549_v24 = vrot.slane %v7422_v57, 7  ;;  %v16566_v38 = vld [vmem:[#allocation16_spill] sm:$0xff] }
0x1145   :  { %v7605_v59 = vadd.f32 %v7591_v62, %v16560_v48  ;;  %v7620_v37 = vmax.f32 %v7606_v35, 0.0  ;;  %v7575_v26 = vadd.f32 %v7565_v22, %v7533_v39 }
0x1146   :  { %v7590_v41 = vadd.f32 %v15919_v58, %v7571_v9  ;;  %v7365_v9 = vpop.f32.mrf.mxu3  ;;  %v7564_v63 = vsel %vm277_vm2, %v7548_v2, %v7549_v24 }
0x1147   :  { %v7619_v18 = vmax.f32 %v7605_v59, 0.0  ;;  %v7634_v17 = vmul.f32 %v7620_v37, %v9204_v53  ;;  %v7594_v43 = vadd.f32 %v15919_v58, %v7575_v26  ;;  %v7425_v62 = vadd.f32 %v7424_v60, %v7365_v9 }
0x1148   :  { %v7604_v15 = vadd.f32 %v7590_v41, %v16559_v25  ;;  %v7621_v41 = vmax.f32 %v7607_v50, 0.0  ;;  %v16563_v25 = vld [vmem:[#allocation6_spill] sm:$0xff]  ;;  %v7535_v59 = vadd.f32 %v7500_v44, %v15841_v54 }
0x1149   :  { %v7633_v34 = vmul.f32 %v7619_v18, %v9186_v47  ;;  %v7498_v11 = vpop.permute.xlu1 %7497  ;;  %v7550_v28 = vrot.slane %v7425_v62, 7 }
0x114a   :  { %v7618_v36 = vmax.f32 %v7604_v15, 0.0  ;;  %v7534_v55 = vadd.f32 %v7498_v11, %v15836_v29  ;;  %v7608_v15 = vadd.f32 %v7594_v43, %v16563_v25 }
0x114b   :  { %v7427_v48 = vpop.f32.mrf.mxu0  ;;  %v7563_v33 = vsel %vm277_vm2, %v7549_v24, %v7550_v28 }
0x114c   :  { %v7632_v45 = vmul.f32 %v7618_v36, %v9172_v42  ;;  %v7576_v49 = vadd.f32 %v7564_v63, %v7534_v55  ;;  %v7635_v36 = vmul.f32 %v7621_v41, %v9225_v7  ;;  %v7622_v21 = vmax.f32 %v7608_v15, 0.0 }
0x114d   :  { %v7577_v30 = vadd.f32 %v7563_v33, %v7535_v59  ;;  %v16567_v59 = vld [vmem:[#allocation17_spill] sm:$0xff] }
0x114e   :  { %8873 = vmatmul.msk.f32.vlgmr.msra.gmra.mxu2 %vm341_vm3, %v7632_v45  ;;  %v7368_v31 = vpop.f32.mrf.mxu3  ;;  %v7595_v29 = vadd.f32 %v15919_v58, %v7576_v49  ;;  %v7636_v1 = vmul.f32 %v7622_v21, %v16384_v10 }
0x114f   :  { %v7428_v45 = vadd.f32 %v7427_v48, %v7368_v31  ;;  %v7596_v23 = vadd.f32 %v15919_v58, %v7577_v30 }
0x1150   :  { %v7609_v18 = vadd.f32 %v7595_v29, %v16564_v20 }
0x1151   :  { %v7551_v46 = vrot.slane %v7428_v45, 7  ;;  %v7610_v51 = vadd.f32 %v7596_v23, %v16565_v61  ;;  %v16568_v45 = vld [vmem:[#allocation15_spill] sm:$0xff] }
0x1152   :  { %v7623_v54 = vmax.f32 %v7609_v18, 0.0 }
0x1153   :  { %v7430_v35 = vpop.f32.mrf.mxu0  ;;  %v7624_v37 = vmax.f32 %v7610_v51, 0.0 }
0x1154   :  { %v7637_v0 = vmul.f32 %v7623_v54, %v9227_v8 }
0x1156   :  { %8874 = vmatmul.msk.f32.gmra.mxu2 %vm341_vm3, %v7633_v34  ;;  %v7371_v14 = vpop.f32.mrf.mxu3  ;;  %v7562_v34 = vsel %vm277_vm2, %v7550_v28, %v7551_v46 }
0x1159   :  { %v7502_v12 = vpop.permute.xlu0 %7501 }
0x115a   :  { %v7536_v40 = vadd.f32 %v7502_v12, %v15846_v16  ;;  %v7638_v16 = vmul.f32 %v7624_v37, %v9206_v56 }
0x115b   :  { %v7433_v22 = vpop.f32.mrf.mxu0 }
0x115c   :  { %v7578_v2 = vadd.f32 %v7562_v34, %v7536_v40 }
0x115e   :  { %8875 = vmatmul.msk.f32.gmra.mxu2 %vm341_vm3, %v7634_v17  ;;  %v7597_v39 = vadd.f32 %v15919_v58, %v7578_v2  ;;  %v7374_v57 = vpop.f32.mrf.mxu3  ;;  %v7431_v17 = vadd.f32 %v7430_v35, %v7371_v14 }
0x115f   :  { %v7434_v11 = vadd.f32 %v7433_v22, %v7374_v57 }
0x1160   :  { %v7611_v50 = vadd.f32 %v7597_v39, %v16566_v38  ;;  %v7552_v43 = vrot.slane %v7431_v17, 7  ;;  %v16570_v17 = vld [vmem:[#allocation11_spill] sm:$0xff] }
0x1161   :  { %v7553_v55 = vrot.slane %v7434_v11, 7 }
0x1162   :  { %v7625_v26 = vmax.f32 %v7611_v50, 0.0  ;;  %v7561_v49 = vsel %vm277_vm2, %v7551_v46, %v7552_v43 }
0x1163   :  { %v7436_v41 = vpop.f32.mrf.mxu0  ;;  %v7560_v15 = vsel %vm277_vm2, %v7552_v43, %v7553_v55 }
0x1164   :  { %v7639_v9 = vmul.f32 %v7625_v26, %v9172_v42 }
0x1166   :  { %8876 = vmatmul.msk.f32.gmra.mxu2 %vm341_vm3, %v7635_v36  ;;  %v7377_v60 = vpop.f32.mrf.mxu3 }
0x1167   :  { %v7437_v29 = vadd.f32 %v7436_v41, %v7377_v60 }
0x1169   :  { %v7554_v30 = vrot.slane %v7437_v29, 7 }
0x116b   :  { %v7439_v28 = vpop.f32.mrf.mxu0  ;;  %v7559_v54 = vsel %vm277_vm2, %v7553_v55, %v7554_v30 }
0x116e   :  { %8877 = vmatmul.msk.f32.gmra.mxu2 %vm341_vm3, %v7636_v1  ;;  %v7380_v42 = vpop.f32.mrf.mxu3 }
0x116f   :  { %v7440_v14 = vadd.f32 %v7439_v28, %v7380_v42  ;;  %v8947_v28 = vmov 2  }
0x1170   :  { %8911 = vset.pattern.permute.xlu2 %v8947_v28  ;;  %8912 = vset.pattern.permute.xlu1 %v8947_v28 }
0x1171   :  { %v7555_v61 = vrot.slane %v7440_v14, 7  ;;  %8913 = vset.pattern.permute.xlu0 %v8947_v28 }
0x1173   :  { %v7442_v12 = vpop.f32.mrf.mxu0 }
0x1176   :  { %8878 = vmatmul.msk.f32.gmra.mxu2 %vm341_vm3, %v7637_v0  ;;  %v7383_v20 = vpop.f32.mrf.mxu3  ;;  %v16569_v0 = vld [vmem:[#allocation4_spill] sm:$0xff] }
0x1177   :  { %v7443_v23 = vadd.f32 %v7442_v12, %v7383_v20 }
0x1179   :  { %v7506_v24 = vpop.permute.xlu2 %7505  ;;  %v7556_v51 = vrot.slane %v7443_v23, 7 }
0x117a   :  { %v7538_v62 = vadd.f32 %v7506_v24, %v15856_v52 }
0x117b   :  { %v7557_v22 = vsel %vm277_vm2, %v7555_v61, %v7556_v51 }
0x117c   :  { %v7580_v36 = vadd.f32 %v7560_v15, %v7538_v62  ;;  %v16572_v15 = vld [vmem:[#allocation5_spill] sm:$0xff] }
0x117e   :  { %8879 = vmatmul.msk.f32.gmra.mxu2 %vm341_vm3, %v7638_v16  ;;  %v7599_v48 = vadd.f32 %v15919_v58, %v7580_v36 }
0x1186   :  { %8880 = vmatmul.msk.f32.gmra.mxu2 %vm341_vm3, %v7639_v9 }
0x1189   :  { %v7504_v63 = vpop.permute.xlu1 %7503 }
0x118a   :  { %v7537_v25 = vadd.f32 %v7504_v63, %v15851_v19  ;;  %v7613_v19 = vadd.f32 %v7599_v48, %v16568_v45 }
0x118c   :  { %v7579_v44 = vadd.f32 %v7561_v49, %v7537_v25  ;;  %v7627_v18 = vmax.f32 %v7613_v19, 0.0 }
0x118e   :  { %v7598_v31 = vadd.f32 %v15919_v58, %v7579_v44  ;;  %v7641_v35 = vmul.f32 %v7627_v18, %v9204_v53  ;;  %v7558_v53 = vsel %vm277_vm2, %v7554_v30, %v7555_v61 }
0x1190   :  { %v7612_v21 = vadd.f32 %v7598_v31, %v16567_v59 }
0x1191   :  { %v7512_v34 = vpop.permute.xlu2 %7511 }
0x1192   :  { %v7626_v52 = vmax.f32 %v7612_v21, 0.0  ;;  %v7541_v2 = vadd.f32 %v7512_v34, %v15895_v13 }
0x1194   :  { %v7640_v33 = vmul.f32 %v7626_v52, %v9186_v47  ;;  %v7583_v38 = vadd.f32 %v7557_v22, %v7541_v2 }
0x1196   :  { %8881 = vmatmul.msk.f32.gmra.mxu2 %vm341_vm3, %v7640_v33  ;;  %v7602_v13 = vadd.f32 %v15919_v58, %v7583_v38 }
0x1199   :  { %v7508_v1 = vpop.permute.xlu0 %7507 }
0x119a   :  { %v7539_v46 = vadd.f32 %v7508_v1, %v15870_v3 }
0x119c   :  { %v7581_v40 = vadd.f32 %v7559_v54, %v7539_v46 }
0x119e   :  { %v7600_v47 = vadd.f32 %v15919_v58, %v7581_v40  ;;  %8882 = vmatmul.msk.f32.gmra.mxu2 %vm341_vm3, %v7641_v35 }
0x11a0   :  { %v7614_v37 = vadd.f32 %v7600_v47, %v16569_v0 }
0x11a1   :  { %v7510_v3 = vpop.permute.xlu1 %7509 }
0x11a2   :  { %v7628_v39 = vmax.f32 %v7614_v37, 0.0  ;;  %v7540_v57 = vadd.f32 %v7510_v3, %v15887_v27  ;;  %v16571_v27 = vld [vmem:[#allocation7_spill] sm:$0xff] }
0x11a3   :  { %v7616_v9 = vadd.f32 %v7602_v13, %v16571_v27  ;;  %v16573_v13 = vmov 0  }
0x11a4   :  { %v7582_v50 = vadd.f32 %v7558_v53, %v7540_v57  ;;  %v7642_v16 = vmul.f32 %v7628_v39, %v9225_v7  ;;  %v7570_v7 = vsel %vm277_vm2, %v7556_v51, %v7543_v4 }
0x11a5   :  { %v7630_v41 = vmax.f32 %v7616_v9, 0.0 }
0x11a6   :  { %v7601_v26 = vadd.f32 %v15919_v58, %v7582_v50  ;;  %8883 = vmatmul.msk.f32.gmra.mxu2 %vm341_vm3, %v7642_v16  ;;  %v8948_v50 = vmov 1  }
0x11a7   :  { %v7644_v63 = vmul.f32 %v7630_v41, %v9227_v8  ;;  %v7802_v41 = vld [vmem:[%s16154_s12 + $0x28] sm:$0xff] }
0x11a8   :  { %v7615_v11 = vadd.f32 %v7601_v26, %v16570_v17 }
0x11aa   :  { %v7629_v60 = vmax.f32 %v7615_v11, 0.0 }
0x11ac   :  { %v7643_v24 = vmul.f32 %v7629_v60, %v16384_v10 }
0x11ae   :  { %8884 = vmatmul.msk.f32.gmra.mxu2 %vm341_vm3, %v7643_v24 }
0x11b1   :  { %v7514_v43 = vpop.permute.xlu0 %7513 }
0x11b2   :  { %v7542_v55 = vadd.f32 %v7514_v43, %v15908_v5  ;;  %v7803_v43 = vld [vmem:[%s16154_s12 + $0x30] sm:$0xff] }
0x11b4   :  { %v7584_v62 = vadd.f32 %v7570_v7, %v7542_v55 }
0x11b6   :  { %v7603_v25 = vadd.f32 %v15919_v58, %v7584_v62  ;;  %8885 = vmatmul.msk.f32.gmra.mxu2 %vm341_vm3, %v7644_v63  ;;  %v7801_v62 = vld [vmem:[%s16154_s12 + $0x20] sm:$0xff] }
0x11b8   :  { %v7617_v10 = vadd.f32 %v7603_v25, %v16572_v15  ;;  %v7800_v25 = vld [vmem:[%s16154_s12 + $0x18] sm:$0xff] }
0x11ba   :  { %v7631_v49 = vmax.f32 %v7617_v10, 0.0 }
0x11bc   :  { %v7645_v36 = vmul.f32 %v7631_v49, %v9206_v56  ;;  %v8939_v56 = vld [vmem:[%s16153_s8] ss:$0 sm:$0xff]  ;;  %v7799_v49 = vld [vmem:[%s16154_s12 + $0x10] sm:$0xff] }
0x11be   :  { %8886 = vmatmul.msk.f32.gmra.mxu2 %vm341_vm3, %v7645_v36 }
0x11d1   :  { %v7717_v5 = vpop.f32.mrf.mxu2 }
0x11d2   :  { %v7718_v51 = vadd.f32 %v8939_v56, %v7717_v5 }
0x11d4   :  { %v7759_v37 = vmax.f32 %v7718_v51, 0.0 }
0x11d9   :  { %v7720_v44 = vpop.f32.mrf.mxu2 }
0x11da   :  { %v7721_v57 = vadd.f32 %v8939_v56, %v7720_v44 }
0x11dc   :  { %v7760_v53 = vmax.f32 %v7721_v57, 0.0 }
0x11e1   :  { %v7723_v32 = vpop.f32.mrf.mxu2 }
0x11e2   :  { %v7724_v16 = vadd.f32 %v8939_v56, %v7723_v32 }
0x11e4   :  { %v7761_v26 = vmax.f32 %v7724_v16, 0.0  ;;  %v7796_v16 = vld [vmem:[%s16158_s10 + $0x30] sm:$0xff] }
0x11e9   :  { %v7726_v42 = vpop.f32.mrf.mxu2 }
0x11ea   :  { %v7727_v23 = vadd.f32 %v8939_v56, %v7726_v42  ;;  %v7797_v42 = vld [vmem:[%s16154_s12] sm:$0xff] }
0x11ec   :  { %v16021_v34 = vmax.f32 %v7727_v23, 0.0  ;;  %v8949_v23 = vmov 0.0  }
0x11f1   :  { %v7729_v31 = vpop.f32.mrf.mxu2 }
0x11f2   :  { %v7730_v2 = vadd.f32 %v8939_v56, %v7729_v31  ;;  %v7798_v31 = vld [vmem:[%s16154_s12 + $0x8] sm:$0xff] }
0x11f4   :  { %v7763_v3 = vmax.f32 %v7730_v2, 0.0 }
0x11f9   :  { %v7732_v4 = vpop.f32.mrf.mxu2 }
0x11fa   :  { %v7733_v22 = vadd.f32 %v8939_v56, %v7732_v4 }
0x11fc   :  { %v7764_v38 = vmax.f32 %v7733_v22, 0.0 }
0x1201   :  { %v7735_v8 = vpop.f32.mrf.mxu2 }
0x1202   :  { %v7736_v18 = vadd.f32 %v8939_v56, %v7735_v8 }
0x1204   :  { %v7765_v46 = vmax.f32 %v7736_v18, 0.0 }
0x1209   :  { %v7738_v58 = vpop.f32.mrf.mxu2 }
0x120a   :  { %v7739_v54 = vadd.f32 %v8939_v56, %v7738_v58 }
0x120c   :  { %v7766_v47 = vmax.f32 %v7739_v54, 0.0 }
0x1219   :  { %v7741_v48 = vpop.f32.mrf.mxu2 }
0x121a   :  { %v7742_v0 = vadd.f32 %v8939_v56, %v7741_v48  ;;  %v7777_v48 = vadd.s32 1, %v9223_v6 }
0x121c   :  { %v7767_v39 = vmax.f32 %v7742_v0, 0.0 }
0x1221   :  { %v7744_v59 = vpop.f32.mrf.mxu2 }
0x1222   :  { %v7745_v21 = vadd.f32 %v8939_v56, %v7744_v59 }
0x1224   :  { %v7768_v52 = vmax.f32 %v7745_v21, 0.0 }
0x1226   :  { %8037 = vperm.xlu2 %8911, %v7768_v52  }
0x1229   :  { %v7747_v29 = vpop.f32.mrf.mxu2 }
0x122a   :  { %v7748_v45 = vadd.f32 %v8939_v56, %v7747_v29  ;;  %v16574_v29 = vlaneseq }
0x122c   :  { %v7769_v19 = vmax.f32 %v7748_v45, 0.0  ;;  %v7774_v45 = vand.u32 127, %v16574_v29 }
0x122e   :  { %8041 = vperm.xlu1 %8912, %v7769_v19  }
0x1231   :  { %v7750_v33 = vpop.f32.mrf.mxu2 }
0x1232   :  { %v7751_v30 = vadd.f32 %v8939_v56, %v7750_v33  ;;  %v7778_v33 = vmul.u32 56, %v7777_v48 }
0x1234   :  { %v7770_v20 = vmax.f32 %v7751_v30, 0.0  ;;  %vm7779_vm6 = vcmp.lt.s32.totalorder %v7774_v45, %v7778_v33 }
0x1236   :  { %8045 = vperm.xlu0 %8913, %v7770_v20  }
0x1239   :  { %v7753_v1 = vpop.f32.mrf.mxu2 }
0x123a   :  { %v7754_v12 = vadd.f32 %v8939_v56, %v7753_v1 }
0x123c   :  { %v7771_v14 = vmax.f32 %v7754_v12, 0.0 }
0x123e   :  { %8049 = vperm.xlu2 %8911, %v7771_v14   ;;  %8025 = vperm.xlu0 %8913, %v7765_v46  }
0x1241   :  { %v7756_v40 = vpop.f32.mrf.mxu2 }
0x1242   :  { %v7757_v35 = vadd.f32 %v8939_v56, %v7756_v40 }
0x1244   :  { %v7772_v61 = vmax.f32 %v7757_v35, 0.0 }
0x1246   :  { %8029 = vperm.xlu2 %8911, %v7766_v47   ;;  %8013 = vperm.xlu0 %8913, %v16021_v34  }
0x1247   :  { %8053 = vperm.xlu1 %8912, %v7772_v61  }
0x124e   :  { %8017 = vperm.xlu2 %8911, %v7763_v3   ;;  %8001 = vperm.xlu0 %8913, %v7759_v37  }
0x124f   :  { %8033 = vperm.xlu1 %8912, %v7767_v39  }
0x1256   :  { %8005 = vperm.xlu2 %8911, %v7760_v53   ;;  %8916 = vset.pattern.permute.xlu0 %v8948_v50 }
0x1257   :  { %8021 = vperm.xlu1 %8912, %v7764_v38   ;;  %7929 = vperm.xlu0 %8916, %v7769_v19  }
0x125e   :  { %8915 = vset.pattern.permute.xlu2 %v16573_v13 }
0x125f   :  { %8009 = vperm.xlu1 %8912, %v7761_v26   ;;  %7861 = vperm.xlu2 %8915, %v7770_v20  }
0x1260   :  { %7909 = vperm.xlu0 %8916, %v7764_v38  }
0x1267   :  { %8914 = vset.pattern.permute.xlu1 %v8948_v50  ;;  %7856 = vperm.xlu2 %8915, %v7769_v19   ;;  %v7775_v19 = vmul.u32 56, %v9223_v6 }
0x1268   :  { %8921 = vset.pattern.permute.xlu0 %v16573_v13  ;;  %7937 = vperm.xlu1 %8914, %v7771_v14  }
0x1269   :  { %7866 = vperm.xlu0 %8921, %v7771_v14   ;;  %vm7776_vm5 = vcmp.ge.s32.totalorder %v7774_v45, %v7775_v19 }
0x126a   :  { %vm7780_vm7 = vmand %vm7776_vm5, %vm7779_vm6 }
0x126b   :  { %v16059_v54 = vsel %vm7780_vm7, 1.0, %v8949_v23 }
0x126f   :  { %8918 = vset.pattern.permute.xlu2 %v8948_v50 }
0x1270   :  { %7933 = vperm.xlu1 %8914, %v7770_v20   ;;  %7925 = vperm.xlu2 %8918, %v7768_v52  }
0x1271   :  { %7841 = vperm.xlu0 %8921, %v7766_v47  }
0x1278   :  { %8917 = vset.pattern.permute.xlu1 %v16573_v13  ;;  %7921 = vperm.xlu2 %8918, %v7767_v39  }
0x1279   :  { %7816 = vperm.xlu0 %8921, %v7761_v26   ;;  %7851 = vperm.xlu1 %8917, %v7768_v52  }
0x1280   :  { %8920 = vset.pattern.permute.xlu2 %v16573_v13  ;;  %v8038_v17 = vpop.permute.xlu2 %8037 }
0x1281   :  { %8926 = vset.pattern.permute.xlu0 %v8948_v50  ;;  %7846 = vperm.xlu1 %8917, %v7767_v39   ;;  %v8065_v32 = vmul.f32 %v8038_v17, %v7799_v49  ;;  %v7794_v17 = vld [vmem:[%s16158_s10 + $0x20] sm:$0xff] }
0x1282   :  { %7836 = vperm.xlu2 %8920, %v7765_v46   ;;  %7889 = vperm.xlu0 %8926, %v7759_v37  }
0x1289   :  { %8919 = vset.pattern.permute.xlu1 %v8948_v50 }
0x128a   :  { %7831 = vperm.xlu2 %8920, %v7764_v38   ;;  %7917 = vperm.xlu1 %8919, %v7766_v47  }
0x128b   :  { %8927 = vset.pattern.permute.xlu0 %v8947_v28 }
0x1292   :  { %8923 = vset.pattern.permute.xlu2 %v8948_v50  ;;  %7913 = vperm.xlu1 %8919, %v7765_v46  }
0x1293   :  { %7941 = vperm.xlu2 %8923, %v7772_v61  }
0x1298   :  { %v8050_v11 = vpop.permute.xlu2 %8049 }
0x1299   :  { %v8068_v63 = vmul.f32 %v8050_v11, %v7802_v41 }
0x129a   :  { %8922 = vset.pattern.permute.xlu1 %v16573_v13 }
0x129b   :  { %7905 = vperm.xlu2 %8923, %v7763_v3   ;;  %7826 = vperm.xlu1 %8922, %v7763_v3  }
0x12a0   :  { %v8030_v60 = vpop.permute.xlu2 %8029  ;;  %v8042_v27 = vpop.permute.xlu1 %8041 }
0x12a1   :  { %v8066_v5 = vmul.f32 %v8042_v27, %v7800_v25  ;;  %v8063_v28 = vmul.f32 %v8030_v60, %v7797_v42 }
0x12a3   :  { %7901 = vperm.xlu2 %8923, %v16021_v34   ;;  %7871 = vperm.xlu1 %8922, %v7772_v61  }
0x12a8   :  { %v8018_v9 = vpop.permute.xlu2 %8017  ;;  %v8046_v24 = vpop.permute.xlu0 %8045 }
0x12a9   :  { %v8067_v15 = vmul.f32 %v8046_v24, %v7801_v62  ;;  %v8060_v52 = vmul.f32 %v8018_v9, %v7801_v62 }
0x12ab   :  { %8925 = vset.pattern.permute.xlu2 %v16573_v13  ;;  %7821 = vperm.xlu1 %8922, %v16021_v34   ;;  %v7789_v13 = vld [vmem:[%s16157_s9 + $0x30] sm:$0xff] }
0x12ac   :  { %7811 = vperm.xlu2 %8925, %v7760_v53  }
0x12b0   :  { %v8006_v10 = vpop.permute.xlu2 %8005  ;;  %v8026_v36 = vpop.permute.xlu0 %8025 }
0x12b1   :  { %v8062_v8 = vmul.f32 %v8026_v36, %v7803_v43  ;;  %v8057_v46 = vmul.f32 %v8006_v10, %v7798_v31 }
0x12b3   :  { %8924 = vset.pattern.permute.xlu1 %v8948_v50  ;;  %v7788_v50 = vld [vmem:[%s16157_s9 + $0x28] sm:$0xff] }
0x12b4   :  { %7806 = vperm.xlu2 %8925, %v7759_v37   ;;  %7897 = vperm.xlu1 %8924, %v7761_v26   ;;  %v7795_v26 = vld [vmem:[%s16158_s10 + $0x28] sm:$0xff] }
0x12b8   :  { %v8014_v56 = vpop.permute.xlu0 %8013 }
0x12b9   :  { %v8054_v55 = vpop.permute.xlu1 %8053  ;;  %v16054_v58 = vpop.permute.xlu2 %7861  ;;  %v8059_v30 = vmul.f32 %v8014_v56, %v7800_v25  ;;  %v7785_v25 = vld [vmem:[%s16157_s9 + $0x10] sm:$0xff]  ;;  %v7783_v56 = vld [vmem:[%s16157_s9] sm:$0xff] }
0x12ba   :  { %v8069_v7 = vmul.f32 %v8054_v55, %v7803_v43  ;;  %v7793_v43 = vld [vmem:[%s16158_s10 + $0x18] sm:$0xff] }
0x12bc   :  { %7893 = vperm.xlu1 %8924, %v7760_v53   ;;  %8076 = vmatpush.msrb.mxu3 %v8069_v7 }
0x12be   :  { %8077 = vmatpush.msrb.mxu3 %v8068_v63  ;;  %v7786_v63 = vld [vmem:[%s16157_s9 + $0x18] sm:$0xff] }
0x12c0   :  { %8078 = vmatpush.msrb.mxu3 %v8067_v15  ;;  %v8002_v12 = vpop.permute.xlu0 %8001 }
0x12c1   :  { %v8034_v44 = vpop.permute.xlu1 %8033  ;;  %v7857_v18 = vpop.permute.xlu2 %7856  ;;  %v8056_v14 = vmul.f32 %v8002_v12, %v7797_v42 }
0x12c2   :  { %8079 = vmatpush.msrb.mxu3 %v8066_v5  ;;  %v8064_v4 = vmul.f32 %v8034_v44, %v7798_v31  ;;  %v7792_v5 = vld [vmem:[%s16158_s10 + $0x10] sm:$0xff]  ;;  %v7784_v44 = vld [vmem:[%s16157_s9 + $0x8] sm:$0xff] }
0x12c4   :  { %8080 = vmatpush.msrb.mxu3 %v8065_v32  ;;  %v7884_v32 = vmul.f32 %v7857_v18, %v7786_v63 }
0x12c6   :  { %8081 = vmatpush.msrb.mxu3 %v8064_v4  ;;  %v7791_v4 = vld [vmem:[%s16158_s10 + $0x8] sm:$0xff] }
0x12c8   :  { %8082 = vmatpush.msrb.mxu3 %v8063_v28 }
0x12c9   :  { %v8022_v59 = vpop.permute.xlu1 %8021  ;;  %v7930_v0 = vpop.permute.xlu0 %7929 }
0x12ca   :  { %v8061_v21 = vmul.f32 %v8022_v59, %v7802_v41  ;;  %8083 = vmatpush.msrb.mxu3 %v8062_v8  ;;  %v7926_v40 = vpop.permute.xlu2 %7925  ;;  %v7787_v41 = vld [vmem:[%s16157_s9 + $0x20] sm:$0xff]  ;;  %v7954_v10 = vmul.f32 %v7930_v0, %v7793_v43 }
0x12cb   :  { %v7885_v15 = vmul.f32 %v16054_v58, %v7787_v41  ;;  %v7953_v58 = vmul.f32 %v7926_v40, %v7792_v5  ;;  %v7790_v59 = vld [vmem:[%s16158_s10] sm:$0xff] }
0x12cc   :  { %8084 = vmatpush.msrb.mxu3 %v8061_v21  ;;  %v7968_v8 = vadd.f32 %v7954_v10, %v7884_v32  ;;  %v8941_v10 = vld [vmem:[%s16156_s11] ss:$0 sm:$0xff] }
0x12ce   :  { %8085 = vmatpush.msrb.mxu3 %v8060_v52 }
0x12d0   :  { %8086 = vmatpush.msrb.mxu3 %v8059_v30 }
0x12d1   :  { %v8010_v20 = vpop.permute.xlu1 %8009 }
0x12d2   :  { %v8058_v1 = vmul.f32 %v8010_v20, %v7799_v49  ;;  %v7922_v34 = vpop.permute.xlu2 %7921  ;;  %v7910_v57 = vpop.permute.xlu0 %7909 }
0x12d3   :  { %v7952_v21 = vmul.f32 %v7922_v34, %v7791_v4 }
0x12d4   :  { %8087 = vmatpush.msrb.mxu3 %v8058_v1 }
0x12d6   :  { %8088 = vmatpush.msrb.mxu3 %v8057_v46  ;;  %v7949_v46 = vmul.f32 %v7910_v57, %v7795_v26 }
0x12d8   :  { %8089 = vmatpush.msrb.mxu3 %v8056_v14 }
0x12d9   :  { %8889 = vmatmul.msk.f32.vlgmr.msrb.gmra.mxu3 %vm7976_vm8, %v16059_v54 }
0x12da   :  { %v7938_v6 = vpop.permute.xlu1 %7937 }
0x12db   :  { %v7867_v38 = vpop.permute.xlu0 %7866  ;;  %v7956_v60 = vmul.f32 %v7938_v6, %v7795_v26 }
0x12dc   :  { %v7837_v61 = vpop.permute.xlu2 %7836  ;;  %v7886_v27 = vmul.f32 %v7867_v38, %v7788_v50 }
0x12dd   :  { %v7880_v20 = vmul.f32 %v7837_v61, %v7789_v13 }
0x12de   :  { %v7970_v49 = vadd.f32 %v7956_v60, %v7886_v27  ;;  %v8099_v60 = vld [vmem:[%s16159_s14 + $0x20] sm:$0xff]  ;;  %v8098_v27 = vld [vmem:[%s16159_s14 + $0x18] sm:$0xff] }
0x12e2   :  { %v7934_v35 = vpop.permute.xlu1 %7933 }
0x12e3   :  { %v7955_v55 = vmul.f32 %v7934_v35, %v7794_v17  ;;  %v7842_v36 = vpop.permute.xlu0 %7841 }
0x12e4   :  { %v7832_v2 = vpop.permute.xlu2 %7831  ;;  %v7881_v45 = vmul.f32 %v7842_v36, %v7783_v56 }
0x12e5   :  { %v7969_v42 = vadd.f32 %v7955_v55, %v7885_v15  ;;  %v7879_v18 = vmul.f32 %v7832_v2, %v7788_v50 }
0x12e7   :  { %v7963_v40 = vadd.f32 %v7949_v46, %v7879_v18 }
0x12eb   :  { %v7852_v47 = vpop.permute.xlu1 %7851  ;;  %v7817_v1 = vpop.permute.xlu0 %7816 }
0x12ec   :  { %v7883_v31 = vmul.f32 %v7852_v47, %v7785_v25 }
0x12ed   :  { %v7942_v3 = vpop.permute.xlu2 %7941 }
0x12ee   :  { %v7957_v9 = vmul.f32 %v7942_v3, %v7796_v16  ;;  %v7967_v52 = vadd.f32 %v7953_v58, %v7883_v31 }
0x12f3   :  { %v7847_v51 = vpop.permute.xlu1 %7846 }
0x12f4   :  { %v7882_v48 = vmul.f32 %v7847_v51, %v7784_v44  ;;  %v7890_v2 = vpop.permute.xlu0 %7889 }
0x12f5   :  { %v7906_v53 = vpop.permute.xlu2 %7905 }
0x12f6   :  { %v7966_v19 = vadd.f32 %v7952_v21, %v7882_v48  ;;  %v7948_v35 = vmul.f32 %v7906_v53, %v7794_v17  ;;  %v8101_v17 = vld [vmem:[%s16159_s14 + $0x30] sm:$0xff] }
0x12fc   :  { %v7918_v37 = vpop.permute.xlu1 %7917 }
0x12fd   :  { %v7902_v7 = vpop.permute.xlu2 %7901  ;;  %v7951_v29 = vmul.f32 %v7918_v37, %v7790_v59  ;;  %v7876_v37 = vmul.f32 %v7817_v1, %v7785_v25 }
0x12fe   :  { %v7947_v47 = vmul.f32 %v7902_v7, %v7793_v43 }
0x12ff   :  { %v7965_v12 = vadd.f32 %v7951_v29, %v7881_v45 }
0x1304   :  { %v7914_v39 = vpop.permute.xlu1 %7913 }
0x1305   :  { %v7950_v33 = vmul.f32 %v7914_v39, %v7796_v16  ;;  %v7944_v16 = vmul.f32 %v7890_v2, %v7790_v59 }
0x1306   :  { %v7812_v30 = vpop.permute.xlu2 %7811 }
0x1307   :  { %v7964_v14 = vadd.f32 %v7950_v33, %v7880_v20  ;;  %v7875_v38 = vmul.f32 %v7812_v30, %v7784_v44 }
0x130d   :  { %v7827_v22 = vpop.permute.xlu1 %7826 }
0x130e   :  { %v7878_v23 = vmul.f32 %v7827_v22, %v7787_v41  ;;  %v7807_v3 = vpop.permute.xlu2 %7806  ;;  %v8940_v41 = vld [vmem:[%s16155_s13] ss:$0 sm:$0xff] }
0x130f   :  { %v7874_v22 = vmul.f32 %v7807_v3, %v7783_v56 }
0x1310   :  { %v7962_v51 = vadd.f32 %v7948_v35, %v7878_v23 }
0x1311   :  { %v7958_v26 = vadd.f32 %v7944_v16, %v7874_v22 }
0x1315   :  { %v7872_v11 = vpop.permute.xlu1 %7871 }
0x1316   :  { %v7887_v24 = vmul.f32 %v7872_v11, %v7789_v13  ;;  %v8102_v13 = vld [vmem:[%s16159_s14 + $0x38] sm:$0xff]  ;;  %v8100_v11 = vld [vmem:[%s16159_s14 + $0x28] sm:$0xff] }
0x1318   :  { %v7971_v62 = vadd.f32 %v7957_v9, %v7887_v24  ;;  %v8097_v9 = vld [vmem:[%s16159_s14 + $0x10] sm:$0xff]  ;;  %v8095_v24 = vld [vmem:[%s16159_s14] sm:$0xff] }
0x131a   :  { %7982 = vmatpush.msrb.mxu1 %v7971_v62 }
0x131c   :  { %7983 = vmatpush.msrb.mxu1 %v7970_v49 }
0x131d   :  { %v7822_v28 = vpop.permute.xlu1 %7821 }
0x131e   :  { %7984 = vmatpush.msrb.mxu1 %v7969_v42  ;;  %v7877_v34 = vmul.f32 %v7822_v28, %v7786_v63  ;;  %v8942_v63 = vld [vmem:[%s16160_s15] ss:$0 sm:$0xff] }
0x1320   :  { %7985 = vmatpush.msrb.mxu1 %v7968_v8  ;;  %v7961_v61 = vadd.f32 %v7947_v47, %v7877_v34 }
0x1322   :  { %7986 = vmatpush.msrb.mxu1 %v7967_v52 }
0x1324   :  { %7987 = vmatpush.msrb.mxu1 %v7966_v19 }
0x1326   :  { %7988 = vmatpush.msrb.mxu1 %v7965_v12  ;;  %v7898_v6 = vpop.permute.xlu1 %7897 }
0x1327   :  { %v7946_v0 = vmul.f32 %v7898_v6, %v7792_v5 }
0x1328   :  { %7989 = vmatpush.msrb.mxu1 %v7964_v14 }
0x1329   :  { %v7960_v39 = vadd.f32 %v7946_v0, %v7876_v37 }
0x132a   :  { %7990 = vmatpush.msrb.mxu1 %v7963_v40 }
0x132c   :  { %7991 = vmatpush.msrb.mxu1 %v7962_v51 }
0x132e   :  { %7992 = vmatpush.msrb.mxu1 %v7961_v61  ;;  %v7894_v57 = vpop.permute.xlu1 %7893 }
0x132f   :  { %v7945_v50 = vmul.f32 %v7894_v57, %v7791_v4 }
0x1330   :  { %7993 = vmatpush.msrb.mxu1 %v7960_v39 }
0x1331   :  { %v7959_v53 = vadd.f32 %v7945_v50, %v7875_v38 }
0x1333   :  { %7994 = vmatpush.msrb.mxu1 %v7959_v53 }
0x1335   :  { %7995 = vmatpush.msrb.mxu1 %v7958_v26 }
0x1336   :  { %8888 = vmatmul.msk.f32.vlgmr.msrb.gmra.mxu1 %vm7976_vm8, %v16059_v54  ;;  %v8096_v54 = vld [vmem:[%s16159_s14 + $0x8] sm:$0xff] }
0x1337   :  { %8118 = vmatpush.msra.mxu1 %v8102_v13 }
0x1339   :  { %8119 = vmatpush.msra.mxu1 %v8101_v17 }
0x133b   :  { %8120 = vmatpush.msra.mxu1 %v8100_v11 }
0x133d   :  { %8121 = vmatpush.msra.mxu1 %v8099_v60 }
0x133f   :  { %8122 = vmatpush.msra.mxu1 %v8098_v27 }
0x1341   :  { %8123 = vmatpush.msra.mxu1 %v8097_v9 }
0x1343   :  { %8124 = vmatpush.msra.mxu1 %v8096_v54 }
0x1345   :  { %8125 = vmatpush.msra.mxu1 %v8095_v24 }
0x135c   :  { %v8091_v43 = vpop.f32.mrf.mxu3 }
0x135d   :  { %v8092_v55 = vadd.f32 %v8940_v41, %v8091_v43 }
0x135f   :  { %v8094_v7 = vmax.f32 %v8092_v55, 0.0 }
0x1361   :  { %8890 = vmatmul.msk.f32.vlgmr.msra.gmra.mxu1 %vm341_vm3, %v8094_v7 }
0x13b3   :  { %v7997_v62 = vpop.f32.mrf.mxu1 }
0x13b4   :  { %v7998_v49 = vadd.f32 %v8941_v10, %v7997_v62 }
0x13de   :  { %v8127_v25 = vpop.f32.mrf.mxu1 }
0x13df   :  { %v8128_v15 = vadd.f32 %v8942_v63, %v8127_v25 }
0x13e1   :  { %8943 = vtanh.f32 %v8128_v15 }
0x13e7   :  { %v8944_v36 = vpop.eup %8943 }
0x13e8   :  { %v8131_v5 = vadd.f32 %v8944_v36, %v7998_v49 }
0x13ea   :  { %8132 = vst [vmem:[%s16161_s16] sm:$0x3] %v8131_v5 }

</bundles_post_ra>
